<compile_context>
chip_gen: v6e
topology: v6e:2x2x1
jax: 0.10.0
libtpu: 0.0.40
codegen_flags: <defaults>
</compile_context>

<pallas_src>
import functools

import numpy as np

import jax
import jax.numpy as jnp
from jax import lax
from jax.experimental import pallas as pl
from jax.experimental.pallas import tpu as pltpu


def dblock_kernel(x_ref, mask_ref, pool_ref, w1_ref, w2_ref, wsc_ref, o_ref,
                  *, wp, nq, eps):
    """Whole DBlock forward, spatial-on-lanes layout.

    x_ref    : [Cin,  NPp]   zero-padded input, flattened (Cin, N*(H+2)*(W+2)) + lane pad
    mask_ref : [1,    NPp]   1.0 at interior pixels, 0.0 on the padding ring / lane tail
    pool_ref : [NPp,  NQp]   constant 0/0.25 matrix: interior-extract + 2x2 avg-pool
    w1_ref   : [9, Cout, Cin]   per-tap transposed conv1 weights (tap = ky*3+kx)
    w2_ref   : [9, Cout, Cout]  per-tap transposed conv2 weights
    wsc_ref  : [Cout, Cin]      transposed 1x1 shortcut conv
    o_ref    : [Cout, NQp]      output, (Cout, N*H2*W2) lane-dense
    """
    f32 = jnp.float32
    npp = x_ref.shape[1]
    nqp = o_ref.shape[1]

    x = x_ref[...]                       # [Cin, NPp]
    xr = jnp.maximum(x, 0.0)             # pre-activation ReLU (optimized=False); zeros stay zero

    def conv3x3(act, w_ref):
        # Tap (ky,kx) of a 3x3 "same" conv on the flattened zero-padded grid is a pure
        # lane rotation by off = (ky-1)*Wp + (kx-1); padding rows/cols absorb all borders.
        cout = w_ref.shape[1]
        acc = jnp.zeros((cout, npp), f32)
        for ky in range(3):
            for kx in range(3):
                off = (ky - 1) * wp + (kx - 1)
                tap = act if off == 0 else pltpu.roll(act, (-off) % npp, axis=1)
                acc = acc + jnp.dot(w_ref[ky * 3 + kx], tap,
                                    preferred_element_type=f32,
                                    precision=lax.Precision.HIGHEST)
        return acc

    # ---------------- residual path ----------------
    h1 = jnp.maximum(conv3x3(xr, w1_ref), 0.0) * mask_ref[...]   # conv1 + relu, re-zero the halo
    r = conv3x3(h1, w2_ref)                                      # conv2

    pool = pool_ref[...]                                         # [NPp, NQp]
    rp = jnp.dot(r, pool, preferred_element_type=f32,
                 precision=lax.Precision.HIGHEST)                # pooled residual [Cout, NQp]

    # BatchNorm2d(Cout, affine=False): training-mode batch stats (biased variance) over
    # the nq valid pooled positions (lane-padded columns of rp are exactly zero).
    mean = jnp.sum(rp, axis=1, keepdims=True) * (1.0 / nq)
    d = rp - mean
    var = (jnp.sum(d * d, axis=1, keepdims=True)
           - float(nqp - nq) * mean * mean) * (1.0 / nq)
    res = d * lax.rsqrt(var + eps)

    # ---------------- shortcut path ----------------
    # avg_pool(conv1x1(x)) == conv1x1(avg_pool(x)) (both linear); pool first (smaller).
    xp = jnp.dot(x, pool, preferred_element_type=f32,
                 precision=lax.Precision.HIGHEST)                # [Cin, NQp]
    sc = jnp.dot(wsc_ref[...], xp, preferred_element_type=f32,
                 precision=lax.Precision.HIGHEST)                # [Cout, NQp]

    o_ref[...] = sc + res


def dblock_forward(x, w1, w2, wsc, *, eps=1e-5):
    """x: [N, Cin, H, W] (NCHW). Returns [N, Cout, H//2, W//2] (NCHW)."""
    N, Cin, H, W = x.shape
    Cout = w1.shape[-1]
    H2, W2 = H // 2, W // 2
    Hp, Wp = H + 2, W + 2

    NP = N * Hp * Wp                       # flattened zero-padded spatial size
    NPp = ((NP + 127) // 128) * 128        # lane-pad to a multiple of 128
    NQ = N * H2 * W2                       # pooled output positions
    NQp = ((NQ + 127) // 128) * 128

    # ---- wrapper-side layout plumbing (tiny constant-shape ops) ----
    xc = jnp.transpose(x, (1, 0, 2, 3)).astype(jnp.float32)          # [Cin, N, H, W]
    xpad = jnp.pad(xc, ((0, 0), (0, 0), (1, 1), (1, 1)))             # [Cin, N, Hp, Wp]
    xflat = jnp.pad(xpad.reshape(Cin, NP), ((0, 0), (0, NPp - NP)))  # [Cin, NPp]

    mask = jnp.pad(jnp.ones((N, H, W), jnp.float32),
                   ((0, 0), (1, 1), (1, 1))).reshape(1, NP)
    mask = jnp.pad(mask, ((0, 0), (0, NPp - NP)))                    # [1, NPp]

    # Constant pooling matrix: interior-extraction + 2x2 avg-pool + flatten in one matmul.
    pool_np = np.zeros((NPp, NQp), np.float32)
    for n in range(N):
        for yo in range(H2):
            for xo in range(W2):
                q = (n * H2 + yo) * W2 + xo
                for dy in range(2):
                    for dx in range(2):
                        p = n * Hp * Wp + (2 * yo + 1 + dy) * Wp + (2 * xo + 1 + dx)
                        pool_np[p, q] = 0.25
    pool = jnp.asarray(pool_np)

    # Per-tap transposed weights: wt[t] = w[ky, kx].T  -> [Cout, Cin_like]
    w1t = jnp.transpose(w1, (0, 1, 3, 2)).reshape(9, Cout, Cin)
    w2t = jnp.transpose(w2, (0, 1, 3, 2)).reshape(9, Cout, Cout)
    wsct = jnp.transpose(wsc, (1, 0))                                # [Cout, Cin]

    kernel = functools.partial(dblock_kernel, wp=Wp, nq=NQ, eps=eps)

    out_flat = pl.pallas_call(
        kernel,
        out_shape=jax.ShapeDtypeStruct((Cout, NQp), jnp.float32),
        grid_spec=pltpu.PrefetchScalarGridSpec(
            num_scalar_prefetch=0,
            grid=(1,),
            in_specs=[
                pl.BlockSpec((Cin, NPp), lambda i: (0, 0)),
                pl.BlockSpec((1, NPp), lambda i: (0, 0)),
                pl.BlockSpec((NPp, NQp), lambda i: (0, 0)),
                pl.BlockSpec((9, Cout, Cin), lambda i: (0, 0, 0)),
                pl.BlockSpec((9, Cout, Cout), lambda i: (0, 0, 0)),
                pl.BlockSpec((Cout, Cin), lambda i: (0, 0)),
            ],
            out_specs=pl.BlockSpec((Cout, NQp), lambda i: (0, 0)),
            scratch_shapes=[],
        ),
        compiler_params=pltpu.CompilerParams(dimension_semantics=("arbitrary",)),
    )(xflat, mask, pool, w1t, w2t, wsct)

    # Unflatten + NCHW in the wrapper (cheap layout plumbing).
    out = out_flat[:, :NQ].reshape(Cout, N, H2, W2)
    return jnp.transpose(out, (1, 0, 2, 3))


def dblock_reference(x, w1, w2, wsc, *, eps=1e-5):
    """Pure-JAX reference (NCHW), mirrors the PyTorch forward."""
    def conv(inp, w, pad):
        return lax.conv_general_dilated(
            inp, w, (1, 1), pad,
            dimension_numbers=('NCHW', 'HWIO', 'NCHW'),
            precision=lax.Precision.HIGHEST)

    def avgpool(v):
        return lax.reduce_window(v, 0.0, lax.add, (1, 1, 2, 2), (1, 1, 2, 2), 'VALID') / 4.0

    h = jnp.maximum(x, 0.0)
    h = conv(h, w1, ((1, 1), (1, 1)))
    h = jnp.maximum(h, 0.0)
    h = conv(h, w2, ((1, 1), (1, 1)))
    h = avgpool(h)
    mean = jnp.mean(h, axis=(0, 2, 3), keepdims=True)
    var = jnp.mean((h - mean) ** 2, axis=(0, 2, 3), keepdims=True)
    h = (h - mean) * lax.rsqrt(var + eps)

    sc = conv(x, wsc.reshape(1, 1, *wsc.shape), ((0, 0), (0, 0)))
    sc = avgpool(sc)
    return sc + h


if __name__ == "__main__":
    N, Cin, Cout, H, W = 2, 4, 8, 16, 16

    key = jax.random.PRNGKey(0)
    kx, k1, k2, k3 = jax.random.split(key, 4)
    x = jax.random.normal(kx, (N, Cin, H, W), jnp.float32)
    # Deterministic synthetic weights (module uses orthogonal init; any deterministic init is fine).
    w1 = jax.random.normal(k1, (3, 3, Cin, Cout), jnp.float32) * (1.0 / (3.0 * Cin ** 0.5))
    w2 = jax.random.normal(k2, (3, 3, Cout, Cout), jnp.float32) * (1.0 / (3.0 * Cout ** 0.5))
    wsc = jax.random.normal(k3, (Cin, Cout), jnp.float32) * (1.0 / Cin ** 0.5)

    out = dblock_forward(x, w1, w2, wsc)
    out = jax.block_until_ready(out)

    ref = dblock_reference(x, w1, w2, wsc)
    assert out.shape == (N, Cout, H // 2, W // 2), out.shape
    if not bool(jnp.allclose(out, ref, atol=1e-3, rtol=1e-3)):
        max_err = float(jnp.max(jnp.abs(out - ref)))
        raise AssertionError(f"kernel mismatch vs reference, max abs err = {max_err}")

    print("KERNEL_OK")
</pallas_src>

<mosaic_0001>
module attributes {stable_mosaic.version = 11 : i64} {
  func.func @dblock_kernel(%arg0: i32, %arg1: memref<4x768xf32, #tpu.memory_space<vmem>>, %arg2: memref<1x768xf32, #tpu.memory_space<vmem>>, %arg3: memref<768x128xf32, #tpu.memory_space<vmem>>, %arg4: memref<9x8x4xf32, #tpu.memory_space<vmem>>, %arg5: memref<9x8x8xf32, #tpu.memory_space<vmem>>, %arg6: memref<8x4xf32, #tpu.memory_space<vmem>>, %arg7: memref<8x128xf32, #tpu.memory_space<vmem>>) attributes {dimension_semantics = [#tpu.dimension_semantics<arbitrary>], iteration_bounds = array<i64: 1>, scalar_prefetch = 0 : i64, scratch_operands = 0 : i64, tpu.core_type = #tpu.core_type<tc>, window_params = [{pipeline_mode = #tpu.pipeline_mode<synchronous>, transform_indices = @transform_0, window_bounds = array<i64: 4, 768>}, {pipeline_mode = #tpu.pipeline_mode<synchronous>, transform_indices = @transform_1, window_bounds = array<i64: 1, 768>}, {pipeline_mode = #tpu.pipeline_mode<synchronous>, transform_indices = @transform_2, window_bounds = array<i64: 768, 128>}, {pipeline_mode = #tpu.pipeline_mode<synchronous>, transform_indices = @transform_3, window_bounds = array<i64: 9, 8, 4>}, {pipeline_mode = #tpu.pipeline_mode<synchronous>, transform_indices = @transform_4, window_bounds = array<i64: 9, 8, 8>}, {pipeline_mode = #tpu.pipeline_mode<synchronous>, transform_indices = @transform_5, window_bounds = array<i64: 8, 4>}, {pipeline_mode = #tpu.pipeline_mode<synchronous>, transform_indices = @transform_6, window_bounds = array<i64: 8, 128>}]} {
    %c0 = arith.constant 0 : index
    %c0_0 = arith.constant 0 : index
    %0 = vector.load %arg1[%c0, %c0_0] : memref<4x768xf32, #tpu.memory_space<vmem>>, vector<4x768xf32>
    %cst = arith.constant 0.000000e+00 : f32
    %1 = vector.broadcast %cst : f32 to vector<4x768xf32>
    %2 = arith.maximumf %0, %1 : vector<4x768xf32>
    %cst_1 = arith.constant 0.000000e+00 : f32
    %3 = vector.broadcast %cst_1 : f32 to vector<8x768xf32>
    %c19_i32 = arith.constant 19 : i32
    %4 = tpu.dynamic_rotate %2 by %c19_i32 dim 1 : vector<4x768xf32>, i32 -> vector<4x768xf32>
    %c0_2 = arith.constant 0 : index
    %c0_3 = arith.constant 0 : index
    %c0_4 = arith.constant 0 : index
    %5 = vector.load %arg4[%c0_2, %c0_3, %c0_4] : memref<9x8x4xf32, #tpu.memory_space<vmem>>, vector<1x8x4xf32>
    %6 = vector.shape_cast %5 : vector<1x8x4xf32> to vector<8x4xf32>
    %cst_5 = arith.constant dense<0.000000e+00> : vector<8x768xf32>
    %7 = tpu.matmul %6, %4, %cst_5 {dimension_numbers = #tpu.dot_dimension_numbers<[1], [0], [0], [1], [0, 0, 1, 1], [], []>, precision = #tpu.contract_precision<fp32>} : vector<8x4xf32>, vector<4x768xf32>, vector<8x768xf32> -> vector<8x768xf32>
    %8 = arith.addf %3, %7 : vector<8x768xf32>
    %c18_i32 = arith.constant 18 : i32
    %9 = tpu.dynamic_rotate %2 by %c18_i32 dim 1 : vector<4x768xf32>, i32 -> vector<4x768xf32>
    %c1 = arith.constant 1 : index
    %c0_6 = arith.constant 0 : index
    %c0_7 = arith.constant 0 : index
    %10 = vector.load %arg4[%c1, %c0_6, %c0_7] : memref<9x8x4xf32, #tpu.memory_space<vmem>>, vector<1x8x4xf32>
    %11 = vector.shape_cast %10 : vector<1x8x4xf32> to vector<8x4xf32>
    %cst_8 = arith.constant dense<0.000000e+00> : vector<8x768xf32>
    %12 = tpu.matmul %11, %9, %cst_8 {dimension_numbers = #tpu.dot_dimension_numbers<[1], [0], [0], [1], [0, 0, 1, 1], [], []>, precision = #tpu.contract_precision<fp32>} : vector<8x4xf32>, vector<4x768xf32>, vector<8x768xf32> -> vector<8x768xf32>
    %13 = arith.addf %8, %12 : vector<8x768xf32>
    %c17_i32 = arith.constant 17 : i32
    %14 = tpu.dynamic_rotate %2 by %c17_i32 dim 1 : vector<4x768xf32>, i32 -> vector<4x768xf32>
    %c2 = arith.constant 2 : index
    %c0_9 = arith.constant 0 : index
    %c0_10 = arith.constant 0 : index
    %15 = vector.load %arg4[%c2, %c0_9, %c0_10] : memref<9x8x4xf32, #tpu.memory_space<vmem>>, vector<1x8x4xf32>
    %16 = vector.shape_cast %15 : vector<1x8x4xf32> to vector<8x4xf32>
    %cst_11 = arith.constant dense<0.000000e+00> : vector<8x768xf32>
    %17 = tpu.matmul %16, %14, %cst_11 {dimension_numbers = #tpu.dot_dimension_numbers<[1], [0], [0], [1], [0, 0, 1, 1], [], []>, precision = #tpu.contract_precision<fp32>} : vector<8x4xf32>, vector<4x768xf32>, vector<8x768xf32> -> vector<8x768xf32>
    %18 = arith.addf %13, %17 : vector<8x768xf32>
    %c1_i32 = arith.constant 1 : i32
    %19 = tpu.dynamic_rotate %2 by %c1_i32 dim 1 : vector<4x768xf32>, i32 -> vector<4x768xf32>
    %c3 = arith.constant 3 : index
    %c0_12 = arith.constant 0 : index
    %c0_13 = arith.constant 0 : index
    %20 = vector.load %arg4[%c3, %c0_12, %c0_13] : memref<9x8x4xf32, #tpu.memory_space<vmem>>, vector<1x8x4xf32>
    %21 = vector.shape_cast %20 : vector<1x8x4xf32> to vector<8x4xf32>
    %cst_14 = arith.constant dense<0.000000e+00> : vector<8x768xf32>
    %22 = tpu.matmul %21, %19, %cst_14 {dimension_numbers = #tpu.dot_dimension_numbers<[1], [0], [0], [1], [0, 0, 1, 1], [], []>, precision = #tpu.contract_precision<fp32>} : vector<8x4xf32>, vector<4x768xf32>, vector<8x768xf32> -> vector<8x768xf32>
    %23 = arith.addf %18, %22 : vector<8x768xf32>
    %c4 = arith.constant 4 : index
    %c0_15 = arith.constant 0 : index
    %c0_16 = arith.constant 0 : index
    %24 = vector.load %arg4[%c4, %c0_15, %c0_16] : memref<9x8x4xf32, #tpu.memory_space<vmem>>, vector<1x8x4xf32>
    %25 = vector.shape_cast %24 : vector<1x8x4xf32> to vector<8x4xf32>
    %cst_17 = arith.constant dense<0.000000e+00> : vector<8x768xf32>
    %26 = tpu.matmul %25, %2, %cst_17 {dimension_numbers = #tpu.dot_dimension_numbers<[1], [0], [0], [1], [0, 0, 1, 1], [], []>, precision = #tpu.contract_precision<fp32>} : vector<8x4xf32>, vector<4x768xf32>, vector<8x768xf32> -> vector<8x768xf32>
    %27 = arith.addf %23, %26 : vector<8x768xf32>
    %c767_i32 = arith.constant 767 : i32
    %28 = tpu.dynamic_rotate %2 by %c767_i32 dim 1 : vector<4x768xf32>, i32 -> vector<4x768xf32>
    %c5 = arith.constant 5 : index
    %c0_18 = arith.constant 0 : index
    %c0_19 = arith.constant 0 : index
    %29 = vector.load %arg4[%c5, %c0_18, %c0_19] : memref<9x8x4xf32, #tpu.memory_space<vmem>>, vector<1x8x4xf32>
    %30 = vector.shape_cast %29 : vector<1x8x4xf32> to vector<8x4xf32>
    %cst_20 = arith.constant dense<0.000000e+00> : vector<8x768xf32>
    %31 = tpu.matmul %30, %28, %cst_20 {dimension_numbers = #tpu.dot_dimension_numbers<[1], [0], [0], [1], [0, 0, 1, 1], [], []>, precision = #tpu.contract_precision<fp32>} : vector<8x4xf32>, vector<4x768xf32>, vector<8x768xf32> -> vector<8x768xf32>
    %32 = arith.addf %27, %31 : vector<8x768xf32>
    %c751_i32 = arith.constant 751 : i32
    %33 = tpu.dynamic_rotate %2 by %c751_i32 dim 1 : vector<4x768xf32>, i32 -> vector<4x768xf32>
    %c6 = arith.constant 6 : index
    %c0_21 = arith.constant 0 : index
    %c0_22 = arith.constant 0 : index
    %34 = vector.load %arg4[%c6, %c0_21, %c0_22] : memref<9x8x4xf32, #tpu.memory_space<vmem>>, vector<1x8x4xf32>
    %35 = vector.shape_cast %34 : vector<1x8x4xf32> to vector<8x4xf32>
    %cst_23 = arith.constant dense<0.000000e+00> : vector<8x768xf32>
    %36 = tpu.matmul %35, %33, %cst_23 {dimension_numbers = #tpu.dot_dimension_numbers<[1], [0], [0], [1], [0, 0, 1, 1], [], []>, precision = #tpu.contract_precision<fp32>} : vector<8x4xf32>, vector<4x768xf32>, vector<8x768xf32> -> vector<8x768xf32>
    %37 = arith.addf %32, %36 : vector<8x768xf32>
    %c750_i32 = arith.constant 750 : i32
    %38 = tpu.dynamic_rotate %2 by %c750_i32 dim 1 : vector<4x768xf32>, i32 -> vector<4x768xf32>
    %c7 = arith.constant 7 : index
    %c0_24 = arith.constant 0 : index
    %c0_25 = arith.constant 0 : index
    %39 = vector.load %arg4[%c7, %c0_24, %c0_25] : memref<9x8x4xf32, #tpu.memory_space<vmem>>, vector<1x8x4xf32>
    %40 = vector.shape_cast %39 : vector<1x8x4xf32> to vector<8x4xf32>
    %cst_26 = arith.constant dense<0.000000e+00> : vector<8x768xf32>
    %41 = tpu.matmul %40, %38, %cst_26 {dimension_numbers = #tpu.dot_dimension_numbers<[1], [0], [0], [1], [0, 0, 1, 1], [], []>, precision = #tpu.contract_precision<fp32>} : vector<8x4xf32>, vector<4x768xf32>, vector<8x768xf32> -> vector<8x768xf32>
    %42 = arith.addf %37, %41 : vector<8x768xf32>
    %c749_i32 = arith.constant 749 : i32
    %43 = tpu.dynamic_rotate %2 by %c749_i32 dim 1 : vector<4x768xf32>, i32 -> vector<4x768xf32>
    %c8 = arith.constant 8 : index
    %c0_27 = arith.constant 0 : index
    %c0_28 = arith.constant 0 : index
    %44 = vector.load %arg4[%c8, %c0_27, %c0_28] : memref<9x8x4xf32, #tpu.memory_space<vmem>>, vector<1x8x4xf32>
    %45 = vector.shape_cast %44 : vector<1x8x4xf32> to vector<8x4xf32>
    %cst_29 = arith.constant dense<0.000000e+00> : vector<8x768xf32>
    %46 = tpu.matmul %45, %43, %cst_29 {dimension_numbers = #tpu.dot_dimension_numbers<[1], [0], [0], [1], [0, 0, 1, 1], [], []>, precision = #tpu.contract_precision<fp32>} : vector<8x4xf32>, vector<4x768xf32>, vector<8x768xf32> -> vector<8x768xf32>
    %47 = arith.addf %42, %46 : vector<8x768xf32>
    %cst_30 = arith.constant 0.000000e+00 : f32
    %48 = vector.broadcast %cst_30 : f32 to vector<8x768xf32>
    %49 = arith.maximumf %47, %48 : vector<8x768xf32>
    %c0_31 = arith.constant 0 : index
    %c0_32 = arith.constant 0 : index
    %50 = vector.load %arg2[%c0_31, %c0_32] : memref<1x768xf32, #tpu.memory_space<vmem>>, vector<1x768xf32>
    %51 = vector.broadcast %50 : vector<1x768xf32> to vector<8x768xf32>
    %52 = arith.mulf %49, %51 : vector<8x768xf32>
    %cst_33 = arith.constant 0.000000e+00 : f32
    %53 = vector.broadcast %cst_33 : f32 to vector<8x768xf32>
    %c19_i32_34 = arith.constant 19 : i32
    %54 = tpu.dynamic_rotate %52 by %c19_i32_34 dim 1 : vector<8x768xf32>, i32 -> vector<8x768xf32>
    %c0_35 = arith.constant 0 : index
    %c0_36 = arith.constant 0 : index
    %c0_37 = arith.constant 0 : index
    %55 = vector.load %arg5[%c0_35, %c0_36, %c0_37] : memref<9x8x8xf32, #tpu.memory_space<vmem>>, vector<1x8x8xf32>
    %56 = vector.shape_cast %55 : vector<1x8x8xf32> to vector<8x8xf32>
    %cst_38 = arith.constant dense<0.000000e+00> : vector<8x768xf32>
    %57 = tpu.matmul %56, %54, %cst_38 {dimension_numbers = #tpu.dot_dimension_numbers<[1], [0], [0], [1], [0, 0, 1, 1], [], []>, precision = #tpu.contract_precision<fp32>} : vector<8x8xf32>, vector<8x768xf32>, vector<8x768xf32> -> vector<8x768xf32>
    %58 = arith.addf %53, %57 : vector<8x768xf32>
    %c18_i32_39 = arith.constant 18 : i32
    %59 = tpu.dynamic_rotate %52 by %c18_i32_39 dim 1 : vector<8x768xf32>, i32 -> vector<8x768xf32>
    %c1_40 = arith.constant 1 : index
    %c0_41 = arith.constant 0 : index
    %c0_42 = arith.constant 0 : index
    %60 = vector.load %arg5[%c1_40, %c0_41, %c0_42] : memref<9x8x8xf32, #tpu.memory_space<vmem>>, vector<1x8x8xf32>
    %61 = vector.shape_cast %60 : vector<1x8x8xf32> to vector<8x8xf32>
    %cst_43 = arith.constant dense<0.000000e+00> : vector<8x768xf32>
    %62 = tpu.matmul %61, %59, %cst_43 {dimension_numbers = #tpu.dot_dimension_numbers<[1], [0], [0], [1], [0, 0, 1, 1], [], []>, precision = #tpu.contract_precision<fp32>} : vector<8x8xf32>, vector<8x768xf32>, vector<8x768xf32> -> vector<8x768xf32>
    %63 = arith.addf %58, %62 : vector<8x768xf32>
    %c17_i32_44 = arith.constant 17 : i32
    %64 = tpu.dynamic_rotate %52 by %c17_i32_44 dim 1 : vector<8x768xf32>, i32 -> vector<8x768xf32>
    %c2_45 = arith.constant 2 : index
    %c0_46 = arith.constant 0 : index
    %c0_47 = arith.constant 0 : index
    %65 = vector.load %arg5[%c2_45, %c0_46, %c0_47] : memref<9x8x8xf32, #tpu.memory_space<vmem>>, vector<1x8x8xf32>
    %66 = vector.shape_cast %65 : vector<1x8x8xf32> to vector<8x8xf32>
    %cst_48 = arith.constant dense<0.000000e+00> : vector<8x768xf32>
    %67 = tpu.matmul %66, %64, %cst_48 {dimension_numbers = #tpu.dot_dimension_numbers<[1], [0], [0], [1], [0, 0, 1, 1], [], []>, precision = #tpu.contract_precision<fp32>} : vector<8x8xf32>, vector<8x768xf32>, vector<8x768xf32> -> vector<8x768xf32>
    %68 = arith.addf %63, %67 : vector<8x768xf32>
    %c1_i32_49 = arith.constant 1 : i32
    %69 = tpu.dynamic_rotate %52 by %c1_i32_49 dim 1 : vector<8x768xf32>, i32 -> vector<8x768xf32>
    %c3_50 = arith.constant 3 : index
    %c0_51 = arith.constant 0 : index
    %c0_52 = arith.constant 0 : index
    %70 = vector.load %arg5[%c3_50, %c0_51, %c0_52] : memref<9x8x8xf32, #tpu.memory_space<vmem>>, vector<1x8x8xf32>
    %71 = vector.shape_cast %70 : vector<1x8x8xf32> to vector<8x8xf32>
    %cst_53 = arith.constant dense<0.000000e+00> : vector<8x768xf32>
    %72 = tpu.matmul %71, %69, %cst_53 {dimension_numbers = #tpu.dot_dimension_numbers<[1], [0], [0], [1], [0, 0, 1, 1], [], []>, precision = #tpu.contract_precision<fp32>} : vector<8x8xf32>, vector<8x768xf32>, vector<8x768xf32> -> vector<8x768xf32>
    %73 = arith.addf %68, %72 : vector<8x768xf32>
    %c4_54 = arith.constant 4 : index
    %c0_55 = arith.constant 0 : index
    %c0_56 = arith.constant 0 : index
    %74 = vector.load %arg5[%c4_54, %c0_55, %c0_56] : memref<9x8x8xf32, #tpu.memory_space<vmem>>, vector<1x8x8xf32>
    %75 = vector.shape_cast %74 : vector<1x8x8xf32> to vector<8x8xf32>
    %cst_57 = arith.constant dense<0.000000e+00> : vector<8x768xf32>
    %76 = tpu.matmul %75, %52, %cst_57 {dimension_numbers = #tpu.dot_dimension_numbers<[1], [0], [0], [1], [0, 0, 1, 1], [], []>, precision = #tpu.contract_precision<fp32>} : vector<8x8xf32>, vector<8x768xf32>, vector<8x768xf32> -> vector<8x768xf32>
    %77 = arith.addf %73, %76 : vector<8x768xf32>
    %c767_i32_58 = arith.constant 767 : i32
    %78 = tpu.dynamic_rotate %52 by %c767_i32_58 dim 1 : vector<8x768xf32>, i32 -> vector<8x768xf32>
    %c5_59 = arith.constant 5 : index
    %c0_60 = arith.constant 0 : index
    %c0_61 = arith.constant 0 : index
    %79 = vector.load %arg5[%c5_59, %c0_60, %c0_61] : memref<9x8x8xf32, #tpu.memory_space<vmem>>, vector<1x8x8xf32>
    %80 = vector.shape_cast %79 : vector<1x8x8xf32> to vector<8x8xf32>
    %cst_62 = arith.constant dense<0.000000e+00> : vector<8x768xf32>
    %81 = tpu.matmul %80, %78, %cst_62 {dimension_numbers = #tpu.dot_dimension_numbers<[1], [0], [0], [1], [0, 0, 1, 1], [], []>, precision = #tpu.contract_precision<fp32>} : vector<8x8xf32>, vector<8x768xf32>, vector<8x768xf32> -> vector<8x768xf32>
    %82 = arith.addf %77, %81 : vector<8x768xf32>
    %c751_i32_63 = arith.constant 751 : i32
    %83 = tpu.dynamic_rotate %52 by %c751_i32_63 dim 1 : vector<8x768xf32>, i32 -> vector<8x768xf32>
    %c6_64 = arith.constant 6 : index
    %c0_65 = arith.constant 0 : index
    %c0_66 = arith.constant 0 : index
    %84 = vector.load %arg5[%c6_64, %c0_65, %c0_66] : memref<9x8x8xf32, #tpu.memory_space<vmem>>, vector<1x8x8xf32>
    %85 = vector.shape_cast %84 : vector<1x8x8xf32> to vector<8x8xf32>
    %cst_67 = arith.constant dense<0.000000e+00> : vector<8x768xf32>
    %86 = tpu.matmul %85, %83, %cst_67 {dimension_numbers = #tpu.dot_dimension_numbers<[1], [0], [0], [1], [0, 0, 1, 1], [], []>, precision = #tpu.contract_precision<fp32>} : vector<8x8xf32>, vector<8x768xf32>, vector<8x768xf32> -> vector<8x768xf32>
    %87 = arith.addf %82, %86 : vector<8x768xf32>
    %c750_i32_68 = arith.constant 750 : i32
    %88 = tpu.dynamic_rotate %52 by %c750_i32_68 dim 1 : vector<8x768xf32>, i32 -> vector<8x768xf32>
    %c7_69 = arith.constant 7 : index
    %c0_70 = arith.constant 0 : index
    %c0_71 = arith.constant 0 : index
    %89 = vector.load %arg5[%c7_69, %c0_70, %c0_71] : memref<9x8x8xf32, #tpu.memory_space<vmem>>, vector<1x8x8xf32>
    %90 = vector.shape_cast %89 : vector<1x8x8xf32> to vector<8x8xf32>
    %cst_72 = arith.constant dense<0.000000e+00> : vector<8x768xf32>
    %91 = tpu.matmul %90, %88, %cst_72 {dimension_numbers = #tpu.dot_dimension_numbers<[1], [0], [0], [1], [0, 0, 1, 1], [], []>, precision = #tpu.contract_precision<fp32>} : vector<8x8xf32>, vector<8x768xf32>, vector<8x768xf32> -> vector<8x768xf32>
    %92 = arith.addf %87, %91 : vector<8x768xf32>
    %c749_i32_73 = arith.constant 749 : i32
    %93 = tpu.dynamic_rotate %52 by %c749_i32_73 dim 1 : vector<8x768xf32>, i32 -> vector<8x768xf32>
    %c8_74 = arith.constant 8 : index
    %c0_75 = arith.constant 0 : index
    %c0_76 = arith.constant 0 : index
    %94 = vector.load %arg5[%c8_74, %c0_75, %c0_76] : memref<9x8x8xf32, #tpu.memory_space<vmem>>, vector<1x8x8xf32>
    %95 = vector.shape_cast %94 : vector<1x8x8xf32> to vector<8x8xf32>
    %cst_77 = arith.constant dense<0.000000e+00> : vector<8x768xf32>
    %96 = tpu.matmul %95, %93, %cst_77 {dimension_numbers = #tpu.dot_dimension_numbers<[1], [0], [0], [1], [0, 0, 1, 1], [], []>, precision = #tpu.contract_precision<fp32>} : vector<8x8xf32>, vector<8x768xf32>, vector<8x768xf32> -> vector<8x768xf32>
    %97 = arith.addf %92, %96 : vector<8x768xf32>
    %c0_78 = arith.constant 0 : index
    %c0_79 = arith.constant 0 : index
    %98 = vector.load %arg3[%c0_78, %c0_79] : memref<768x128xf32, #tpu.memory_space<vmem>>, vector<768x128xf32>
    %cst_80 = arith.constant dense<0.000000e+00> : vector<8x128xf32>
    %99 = tpu.matmul %97, %98, %cst_80 {dimension_numbers = #tpu.dot_dimension_numbers<[1], [0], [0], [1], [0, 0, 1, 1], [], []>, precision = #tpu.contract_precision<fp32>} : vector<8x768xf32>, vector<768x128xf32>, vector<8x128xf32> -> vector<8x128xf32>
    %cst_81 = arith.constant dense<0.000000e+00> : vector<8xf32>
    %100 = vector.multi_reduction <add>, %99, %cst_81 [1] : vector<8x128xf32> to vector<8xf32>
    %101 = vector.shape_cast %100 : vector<8xf32> to vector<8x1xf32>
    %cst_82 = arith.constant 7.812500e-03 : f32
    %102 = vector.broadcast %cst_82 : f32 to vector<8x1xf32>
    %103 = arith.mulf %101, %102 : vector<8x1xf32>
    %104 = vector.broadcast %103 : vector<8x1xf32> to vector<8x128xf32>
    %105 = arith.subf %99, %104 : vector<8x128xf32>
    %106 = arith.mulf %105, %105 : vector<8x128xf32>
    %cst_83 = arith.constant dense<0.000000e+00> : vector<8xf32>
    %107 = vector.multi_reduction <add>, %106, %cst_83 [1] : vector<8x128xf32> to vector<8xf32>
    %108 = vector.shape_cast %107 : vector<8xf32> to vector<8x1xf32>
    %cst_84 = arith.constant 0.000000e+00 : f32
    %109 = vector.broadcast %cst_84 : f32 to vector<8x1xf32>
    %110 = arith.mulf %109, %103 : vector<8x1xf32>
    %111 = arith.mulf %110, %103 : vector<8x1xf32>
    %112 = arith.subf %108, %111 : vector<8x1xf32>
    %cst_85 = arith.constant 7.812500e-03 : f32
    %113 = vector.broadcast %cst_85 : f32 to vector<8x1xf32>
    %114 = arith.mulf %112, %113 : vector<8x1xf32>
    %cst_86 = arith.constant 9.99999974E-6 : f32
    %115 = vector.broadcast %cst_86 : f32 to vector<8x1xf32>
    %116 = arith.addf %114, %115 : vector<8x1xf32>
    %117 = math.rsqrt %116 : vector<8x1xf32>
    %118 = vector.broadcast %117 : vector<8x1xf32> to vector<8x128xf32>
    %119 = arith.mulf %105, %118 : vector<8x128xf32>
    %cst_87 = arith.constant dense<0.000000e+00> : vector<4x128xf32>
    %120 = tpu.matmul %0, %98, %cst_87 {dimension_numbers = #tpu.dot_dimension_numbers<[1], [0], [0], [1], [0, 0, 1, 1], [], []>, precision = #tpu.contract_precision<fp32>} : vector<4x768xf32>, vector<768x128xf32>, vector<4x128xf32> -> vector<4x128xf32>
    %c0_88 = arith.constant 0 : index
    %c0_89 = arith.constant 0 : index
    %121 = vector.load %arg6[%c0_88, %c0_89] : memref<8x4xf32, #tpu.memory_space<vmem>>, vector<8x4xf32>
    %cst_90 = arith.constant dense<0.000000e+00> : vector<8x128xf32>
    %122 = tpu.matmul %121, %120, %cst_90 {dimension_numbers = #tpu.dot_dimension_numbers<[1], [0], [0], [1], [0, 0, 1, 1], [], []>, precision = #tpu.contract_precision<fp32>} : vector<8x4xf32>, vector<4x128xf32>, vector<8x128xf32> -> vector<8x128xf32>
    %123 = arith.addf %122, %119 : vector<8x128xf32>
    %c0_91 = arith.constant 0 : index
    %c0_92 = arith.constant 0 : index
    %124 = vector.load %arg7[%c0_91, %c0_92] : memref<8x128xf32, #tpu.memory_space<vmem>>, vector<8x128xf32>
    tpu.vector_store %arg7[%c0_91, %c0_92], %123 {strides = array<i32>} : memref<8x128xf32, #tpu.memory_space<vmem>>, vector<8x128xf32>,
    return
  }
  func.func @transform_0(%arg0: i32) -> (i32, i32) {
    %c0_i32 = arith.constant 0 : i32
    %c0_i32_0 = arith.constant 0 : i32
    %c0_i32_1 = arith.constant 0 : i32
    return %c0_i32, %c0_i32_0 : i32, i32
  }
  func.func @transform_1(%arg0: i32) -> (i32, i32) {
    %c0_i32 = arith.constant 0 : i32
    %c0_i32_0 = arith.constant 0 : i32
    %c0_i32_1 = arith.constant 0 : i32
    return %c0_i32, %c0_i32_0 : i32, i32
  }
  func.func @transform_2(%arg0: i32) -> (i32, i32) {
    %c0_i32 = arith.constant 0 : i32
    %c0_i32_0 = arith.constant 0 : i32
    %c0_i32_1 = arith.constant 0 : i32
    return %c0_i32, %c0_i32_0 : i32, i32
  }
  func.func @transform_3(%arg0: i32) -> (i32, i32, i32) {
    %c0_i32 = arith.constant 0 : i32
    %c0_i32_0 = arith.constant 0 : i32
    %c0_i32_1 = arith.constant 0 : i32
    %c0_i32_2 = arith.constant 0 : i32
    return %c0_i32, %c0_i32_0, %c0_i32_1 : i32, i32, i32
  }
  func.func @transform_4(%arg0: i32) -> (i32, i32, i32) {
    %c0_i32 = arith.constant 0 : i32
    %c0_i32_0 = arith.constant 0 : i32
    %c0_i32_1 = arith.constant 0 : i32
    %c0_i32_2 = arith.constant 0 : i32
    return %c0_i32, %c0_i32_0, %c0_i32_1 : i32, i32, i32
  }
  func.func @transform_5(%arg0: i32) -> (i32, i32) {
    %c0_i32 = arith.constant 0 : i32
    %c0_i32_0 = arith.constant 0 : i32
    %c0_i32_1 = arith.constant 0 : i32
    return %c0_i32, %c0_i32_0 : i32, i32
  }
  func.func @transform_6(%arg0: i32) -> (i32, i32) {
    %c0_i32 = arith.constant 0 : i32
    %c0_i32_0 = arith.constant 0 : i32
    %c0_i32_1 = arith.constant 0 : i32
    return %c0_i32, %c0_i32_0 : i32, i32
  }
}

</mosaic_0001>

<bundles_post_ra>
// kernel: tpu_custom_call.1
= control target key start
LH: loop header
LB: loop body
LE: loop exit
PB: predicated region body
PF: predicated region fallthrough
CT: control target
= control target key end

     0   :  { %11 = vsyncpa [#allocation3], 0  ;;  %s38607_s0 = inlined_call_operand.vmem [shape: f32[4,768], index: 0, kind: input, shape index: {}]   ;;  %s38608_s1 = inlined_call_operand.vmem [shape: f32[1,768], index: 1, kind: input, shape index: {}]   ;;  %s38609_s2 = inlined_call_operand.hbm [shape: f32[768,128], index: 2, kind: input, shape index: {}]   ;;  %s38610_s3 = inlined_call_operand.vmem [shape: f32[9,8,4], index: 3, kind: input, shape index: {}]   ;;  %s38611_s4 = inlined_call_operand.vmem [shape: f32[9,8,8], index: 4, kind: input, shape index: {}]   ;;  %s38612_s5 = inlined_call_operand.vmem [shape: f32[8,4], index: 5, kind: input, shape index: {}]   ;;  %s38613_s6 = inlined_call_operand.hbm [shape: f32[8,128], index: 6, kind: output, shape index: {}]  }
   0x1   :  { %12 = vsyncpa [#allocation4], 0  ;;  %s32980_s21 = smov [#allocation2]  }
   0x2   :  { %s22_s22 = sshll.u32 %s32980_s21, 4  ;;  %s23_s22 = int_to_ptr.vmem [resolvable:$true] %s22_s22 }
   0x3   :  { %s32944_s23 = scalar_lea.vmem %s23_s22, 12288  ;;  %p32949_p1 = scmp.lt.s32.totalorder %s23_s22, %s23_s22 }
   0x4   :  { %p32945_p0 = scmp.ne.s32.totalorder %s23_s22, %s32944_s23  ;;  %p32950_p2 = scmp.lt.s32.totalorder %s32944_s23, %s32944_s23 }
   0x6   :  { %p32951_p3 = por %p32950_p2, %p32949_p1 }
   0x8   :  { %p32952_p4 = pnand %p32951_p3, %p32945_p0 }
   0xa   :  { %32955 = shalt.err (!%p32952_p4)
}
   0xb   :  { %s32981_s24 = smov 128   ;;  %s32982_s25 = smov 8  }
   0xc   :  { %28 = dma.hbm_to_vmem [thread:$0]  %s38609_s2, 12288, %s23_s22, [#allocation3], %s32981_s24, %s32981_s24, %s32982_s25  }
   0xd   :  { %32976 = dma.done.wait [#allocation3], 12288  }
   0xe   :  { %32977 = vsyncadd [#allocation3], 4294955008  ;;  %v38614_v0 = vmov 0.0   ;;  %v38_v1 = vld [vmem:[%s38607_s0] sm:$0xff]  ;;  %v40_v2 = vld [vmem:[%s38607_s0 + $0x10] sm:$0xff]  ;;  %s32984_s9 = smov 18   ;;  %v38616_v13 = vlaneseq }
   0xf   :  { %185 = vmatprep.mubr.f32.mxu0 %v38614_v0  ;;  %271 = vmatprep.mubr.f32.mxu1 %v38614_v0  ;;  %v33040_v3 = vmax.f32 %v38_v1, 0.0  ;;  %v33042_v4 = vmax.f32 %v40_v2, 0.0  ;;  %v39_v5 = vld [vmem:[%s38607_s0 + $0x8] sm:$0xff]  ;;  %s32985_s10 = smov 19   ;;  %s32986_s11 = smov 17   ;;  %vm96_vm0 = vcmask 31744  }
  0x10   :  { %v33059_v8 = vmax.f32 %v39_v5, 0.0  ;;  %s32987_s12 = smov 1   ;;  %s32988_s13 = smov 127   ;;  %v31596_v10 = vld [vmem:[%s38610_s3 + $0x8] sm:$0xff]  ;;  %v33143_v15 = vand.u32 127, %v38616_v13  ;;  %vm100_vm2 = vcmask 1043456  }
  0x11   :  { %75 = vrot.lane.b32.xlu0 %v33040_v3, %s32984_s9  ;;  %v33051_v6 = vcombine.high %v33042_v4, %v33042_v4  ;;  %v33055_v7 = vcombine.high %v33040_v3, %v33040_v3  ;;  %s32989_s14 = smov 111   ;;  %v98_v11 = vsel %vm96_vm0, %v31596_v10, 0  ;;  %s32990_s17 = smov 110   ;;  %v74_v57 = vld [vmem:[%s38610_s3] sm:$0xff]  ;;  %vm13089_vm10 = vcmask 64512  }
  0x12   :  { %v33065_v9 = vcombine.high %v33059_v8, %v33059_v8  ;;  %v33137_v12 = vand.u32 4294901760, %v98_v11  ;;  %39260 = vst [vmem:[#allocation8_spill] sm:$0xff] %v33143_v15  ;;  %vm87_vm1 = vcmp.lt.s32.totalorder %v33143_v15, 18  ;;  %vm67_vm3 = vcmp.lt.s32.totalorder %v33143_v15, 19  ;;  %s32991_s26 = smov 109  }
  0x13   :  { %85 = vrot.lane.b32.xlu1 %v33051_v6, %s32984_s9  ;;  %v1515_v62 = vsel %vm96_vm0, %v74_v57, 0  ;;  %v31597_v57 = vld [vmem:[%s38610_s3 + $0x10] sm:$0xff]  ;;  %vm2942_vm4 = vcmp.lt.s32.totalorder %v33143_v15, 17  ;;  %vm4385_vm5 = vcmp.lt.s32.totalorder %v33143_v15, 1  ;;  %vm7246_vm6 = vcmp.lt.s32.totalorder %v33143_v15, 127 }
  0x14   :  { %v33140_v14 = vsub.f32 %v98_v11, %v33137_v12  ;;  %v33226_v11 = vand.u32 4294901760, %v1515_v62  ;;  %vm8689_vm7 = vcmp.lt.s32.totalorder %v33143_v15, 111  ;;  %vm10132_vm8 = vcmp.lt.s32.totalorder %v33143_v15, 110 }
  0x15   :  { %77 = vrot.lane.b32.xlu0 %v33055_v7, %s32984_s9  ;;  %vm11575_vm9 = vcmp.lt.s32.totalorder %v33143_v15, 109  ;;  %vm32992_vm11 = vmmov 0  }
  0x16   :  { %v33146_v16 = vand.u32 4294901760, %v33140_v14 }
  0x17   :  { %79 = vrot.lane.b32.xlu1 %v33059_v8, %s32984_s9 }
  0x18   :  { %v189_v20 = vsub.f32 %v33140_v14, %v33146_v16 }
  0x19   :  { %81 = vrot.lane.b32.xlu0 %v33065_v9, %s32984_s9 }
  0x1a   :  { %v33166_v30 = vand.u32 4294901760, %v189_v20 }
  0x1b   :  { %83 = vrot.lane.b32.xlu1 %v33042_v4, %s32984_s9 }
  0x1d   :  { %53 = vrot.lane.b32.xlu0 %v33040_v3, %s32985_s10 }
  0x1f   :  { %55 = vrot.lane.b32.xlu1 %v33055_v7, %s32985_s10 }
  0x21   :  { %63 = vrot.lane.b32.xlu0 %v33051_v6, %s32985_s10 }
  0x23   :  { %57 = vrot.lane.b32.xlu1 %v33059_v8, %s32985_s10 }
  0x25   :  { %59 = vrot.lane.b32.xlu0 %v33065_v9, %s32985_s10 }
  0x27   :  { %61 = vrot.lane.b32.xlu1 %v33042_v4, %s32985_s10 }
  0x29   :  { %2930 = vrot.lane.b32.xlu0 %v33040_v3, %s32986_s11 }
  0x2b   :  { %2932 = vrot.lane.b32.xlu1 %v33055_v7, %s32986_s11 }
  0x2d   :  { %2940 = vrot.lane.b32.xlu0 %v33051_v6, %s32986_s11 }
  0x2f   :  { %2934 = vrot.lane.b32.xlu1 %v33059_v8, %s32986_s11 }
  0x31   :  { %2936 = vrot.lane.b32.xlu0 %v33065_v9, %s32986_s11 }
  0x33   :  { %2938 = vrot.lane.b32.xlu1 %v33042_v4, %s32986_s11 }
  0x35   :  { %4373 = vrot.lane.b32.xlu0 %v33040_v3, %s32987_s12 }
  0x37   :  { %4375 = vrot.lane.b32.xlu1 %v33055_v7, %s32987_s12 }
  0x39   :  { %4383 = vrot.lane.b32.xlu0 %v33051_v6, %s32987_s12 }
  0x3b   :  { %4377 = vrot.lane.b32.xlu1 %v33059_v8, %s32987_s12 }
  0x3d   :  { %4379 = vrot.lane.b32.xlu0 %v33065_v9, %s32987_s12 }
  0x3f   :  { %4381 = vrot.lane.b32.xlu1 %v33042_v4, %s32987_s12 }
  0x41   :  { %7236 = vrot.lane.b32.xlu0 %v33055_v7, %s32988_s13 }
  0x43   :  { %7238 = vrot.lane.b32.xlu1 %v33059_v8, %s32988_s13 }
  0x45   :  { %7234 = vrot.lane.b32.xlu0 %v33040_v3, %s32988_s13 }
  0x47   :  { %7240 = vrot.lane.b32.xlu1 %v33065_v9, %s32988_s13 }
  0x49   :  { %7242 = vrot.lane.b32.xlu0 %v33042_v4, %s32988_s13 }
  0x4b   :  { %7244 = vrot.lane.b32.xlu1 %v33051_v6, %s32988_s13 }
  0x4d   :  { %8679 = vrot.lane.b32.xlu0 %v33055_v7, %s32989_s14 }
  0x4f   :  { %8681 = vrot.lane.b32.xlu1 %v33059_v8, %s32989_s14 }
  0x51   :  { %8677 = vrot.lane.b32.xlu0 %v33040_v3, %s32989_s14 }
  0x53   :  { %8683 = vrot.lane.b32.xlu1 %v33065_v9, %s32989_s14 }
  0x55   :  { %8685 = vrot.lane.b32.xlu0 %v33042_v4, %s32989_s14 }
  0x57   :  { %8687 = vrot.lane.b32.xlu1 %v33051_v6, %s32989_s14 }
  0x59   :  { %10122 = vrot.lane.b32.xlu0 %v33055_v7, %s32990_s17 }
  0x5b   :  { %10124 = vrot.lane.b32.xlu1 %v33059_v8, %s32990_s17 }
  0x5d   :  { %10120 = vrot.lane.b32.xlu0 %v33040_v3, %s32990_s17 }
  0x5f   :  { %10126 = vrot.lane.b32.xlu1 %v33065_v9, %s32990_s17 }
  0x61   :  { %10128 = vrot.lane.b32.xlu0 %v33042_v4, %s32990_s17 }
  0x63   :  { %10130 = vrot.lane.b32.xlu1 %v33051_v6, %s32990_s17 }
  0x65   :  { %11565 = vrot.lane.b32.xlu0 %v33055_v7, %s32991_s26 }
  0x67   :  { %11567 = vrot.lane.b32.xlu1 %v33059_v8, %s32991_s26 }
  0x69   :  { %11563 = vrot.lane.b32.xlu0 %v33040_v3, %s32991_s26 }
  0x6b   :  { %11569 = vrot.lane.b32.xlu1 %v33065_v9, %s32991_s26 }
  0x6d   :  { %11571 = vrot.lane.b32.xlu0 %v33042_v4, %s32991_s26 }
  0x6f   :  { %11573 = vrot.lane.b32.xlu1 %v33051_v6, %s32991_s26 }
  0x83   :  { %v76_v17 = vpop.permute.xlu0 %75 }
  0x85   :  { %v86_v18 = vpop.permute.xlu1 %85 }
  0x86   :  { %v93_v19 = vsel %vm87_vm1, %v86_v18, %v76_v17 }
  0x87   :  { %v102_v21 = vsel %vm100_vm2, %v93_v19, 0  ;;  %v78_v22 = vpop.permute.xlu0 %77 }
  0x88   :  { %v33158_v23 = vand.u32 4294901760, %v102_v21  ;;  %v92_v24 = vsel %vm87_vm1, %v76_v17, %v78_v22 }
  0x89   :  { %v105_v25 = vsel %vm100_vm2, %v92_v24, 0  ;;  %v80_v26 = vpop.permute.xlu1 %79 }
  0x8a   :  { %v234_v27 = vsub.f32 %v102_v21, %v33158_v23  ;;  %v149_v28 = vand.u32 4294901760, %v105_v25  ;;  %v91_v29 = vsel %vm87_vm1, %v78_v22, %v80_v26 }
  0x8b   :  { %v108_v31 = vsel %vm100_vm2, %v91_v29, 0  ;;  %v82_v32 = vpop.permute.xlu0 %81 }
  0x8c   :  { %v228_v33 = vsub.f32 %v105_v25, %v149_v28  ;;  %150 = vmatprep.subr.mxu0 %v149_v28  ;;  %v90_v34 = vsel %vm87_vm1, %v80_v26, %v82_v32  ;;  %v235_v35 = vand.u32 4294901760, %v234_v27  ;;  %v33177_v37 = vand.u32 4294901760, %v108_v31 }
  0x8d   :  { %152 = vmatpush1.msra.mxu0 %v33158_v23  ;;  %v111_v36 = vsel %vm100_vm2, %v90_v34, 0  ;;  %v84_v38 = vpop.permute.xlu1 %83 }
  0x8e   :  { %191 = vmatmul.mubr.f32.vlgmr.msra.gmra.mxu0 %v33166_v30  ;;  %311 = vmatprep.subr.mxu0 %v228_v33  ;;  %v33180_v39 = vand.u32 4294901760, %v111_v36  ;;  %v229_v40 = vand.u32 4294901760, %v228_v33  ;;  %v236_v42 = vsub.f32 %v234_v27, %v235_v35  ;;  %v88_v43 = vsel %vm87_vm1, %v84_v38, %v86_v18 }
  0x8f   :  { %314 = vmatpush1.msra.mxu0 %v234_v27  ;;  %347 = vmatprep.mubr.f32.mxu0 %v38614_v0  ;;  %v699_v45 = vsub.f32 %v108_v31, %v33177_v37  ;;  %v117_v48 = vsel %vm100_vm2, %v88_v43, 0  ;;  %v89_v49 = vsel %vm87_vm1, %v82_v32, %v84_v38  ;;  %v54_v55 = vpop.permute.xlu0 %53 }
  0x90   :  { %v693_v41 = vsub.f32 %v111_v36, %v33180_v39  ;;  %465 = vmatprep.subr.mxu0 %v229_v40  ;;  %v230_v44 = vsub.f32 %v228_v33, %v229_v40  ;;  %v237_v50 = vand.u32 4294901760, %v236_v42  ;;  %v33198_v53 = vand.u32 4294901760, %v117_v48 }
  0x91   :  { %v700_v52 = vand.u32 4294901760, %v699_v45  ;;  %v114_v54 = vsel %vm100_vm2, %v89_v49, 0  ;;  %v56_v61 = vpop.permute.xlu1 %55 }
  0x92   :  { %350 = vmatmul.mubr.f32.vlgmr.msra.gmra.mxu0 %v33140_v14  ;;  %v694_v46 = vand.u32 4294901760, %v693_v41  ;;  %v231_v47 = vand.u32 4294901760, %v230_v44  ;;  %v33207_v58 = vand.u32 4294901760, %v114_v54  ;;  %v1158_v60 = vsub.f32 %v117_v48, %v33198_v53 }
  0x93   :  { %469 = vmatpush1.msra.mxu0 %v235_v35  ;;  %502 = vmatprep.mubr.f32.mxu0 %v38614_v0  ;;  %v701_v59 = vsub.f32 %v699_v45, %v700_v52  ;;  %v72_v63 = vsel %vm67_vm3, %v54_v55, %v56_v61  ;;  %v33219_v1 = vpop.permute.xlu0 %63 }
  0x94   :  { %615 = vmatprep.subr.mxu0 %v33180_v39  ;;  %232 = vmatprep.subr.mxu1 %v231_v47  ;;  %v695_v51 = vsub.f32 %v693_v41, %v694_v46  ;;  %v1164_v2 = vsub.f32 %v114_v54, %v33207_v58  ;;  %v1159_v10 = vand.u32 4294901760, %v1158_v60  ;;  %v1521_v17 = vsel %vm100_vm2, %v72_v63, 0 }
  0x95   :  { %238 = vmatpush1.msra.mxu1 %v237_v50  ;;  %v702_v5 = vand.u32 4294901760, %v701_v59  ;;  %v73_v18 = vsel %vm67_vm3, %v33219_v1, %v54_v55  ;;  %v33236_v20 = vand.u32 4294901760, %v1521_v17  ;;  %v58_v25 = vpop.permute.xlu1 %57 }
  0x96   :  { %504 = vmatmul.mubr.f32.vlgmr.msra.gmra.mxu0 %v33137_v12  ;;  %273 = vmatmul.mubr.f32.vlgmr.msra.gmra.mxu1 %v33137_v12  ;;  %v696_v56 = vand.u32 4294901760, %v695_v51  ;;  %v1165_v19 = vand.u32 4294901760, %v1164_v2  ;;  %v1518_v21 = vsel %vm100_vm2, %v73_v18, 0  ;;  %v1160_v22 = vsub.f32 %v1158_v60, %v1159_v10 }
  0x97   :  { %387 = vmatprep.subr.mxu1 %v149_v28  ;;  %617 = vmatpush1.msra.mxu0 %v33177_v37  ;;  %v33246_v24 = vpop.permute.xlu0 %59  ;;  %v33249_v26 = vand.u32 4294901760, %v1518_v21 }
  0x98   :  { %389 = vmatpush1.msra.mxu1 %v33158_v23  ;;  %776 = vmatprep.subr.mxu0 %v693_v41  ;;  %v1166_v27 = vsub.f32 %v1164_v2, %v1165_v19  ;;  %v1161_v29 = vand.u32 4294901760, %v1160_v22  ;;  %v70_v32 = vsel %vm67_vm3, %v58_v25, %v33246_v24 }
  0x99   :  { %541 = vmatprep.subr.mxu1 %v149_v28  ;;  %422 = vmatprep.mubr.f32.mxu1 %v38614_v0  ;;  %v1644_v28 = vsub.f32 %v1521_v17, %v33236_v20  ;;  %v1650_v33 = vsub.f32 %v1518_v21, %v33249_v26  ;;  %v1527_v34 = vsel %vm100_vm2, %v70_v32, 0  ;;  %v62_v44 = vpop.permute.xlu1 %61 }
  0x9a   :  { %650 = vmatprep.mubr.f32.mxu0 %v38614_v0  ;;  %426 = vmatmul.mubr.f32.vlgmr.msra.gmra.mxu1 %v33146_v16  ;;  %v33275_v38 = vand.u32 4294901760, %v1527_v34  ;;  %v68_v47 = vsel %vm67_vm3, %v62_v44, %v33219_v1  ;;  %v69_v51 = vsel %vm67_vm3, %v33246_v24, %v62_v44 }
  0x9b   :  { %656 = vmatmul.mubr.f32.vlgmr.msra.gmra.mxu0 %v33166_v30  ;;  %543 = vmatpush1.msra.mxu1 %v33158_v23  ;;  %v33242_v23 = vsub.f32 %v1515_v62, %v33226_v11  ;;  %v1645_v36 = vand.u32 4294901760, %v1644_v28  ;;  %v1533_v50 = vsel %vm100_vm2, %v68_v47, 0  ;;  %v1530_v54 = vsel %vm100_vm2, %v69_v51, 0  ;;  %v2931_v55 = vpop.permute.xlu0 %2930 }
  0x9c   :  { %779 = vmatpush1.msra.mxu0 %v699_v45  ;;  %697 = vmatprep.subr.mxu1 %v696_v56  ;;  %v2109_v42 = vsub.f32 %v1527_v34, %v33275_v38  ;;  %v2952_v62 = vsel %vm96_vm0, %v31597_v57, 0  ;;  %v31598_v57 = vld [vmem:[%s38610_s3 + $0x18] sm:$0xff] }
  0x9d   :  { %930 = vmatprep.subr.mxu0 %v694_v46  ;;  %576 = vmatprep.mubr.f32.mxu1 %v38614_v0  ;;  %v33257_v31 = vand.u32 4294901760, %v33242_v23  ;;  %v1646_v41 = vsub.f32 %v1644_v28, %v1645_v36  ;;  %v33341_v17 = vand.u32 4294901760, %v2952_v62 }
  0x9e   :  { %812 = vmatprep.mubr.f32.mxu0 %v38614_v0  ;;  %578 = vmatmul.mubr.f32.vlgmr.msra.gmra.mxu1 %v33137_v12  ;;  %v2110_v48 = vand.u32 4294901760, %v2109_v42 }
  0x9f   :  { %815 = vmatmul.mubr.f32.vlgmr.msra.gmra.mxu0 %v33140_v14  ;;  %703 = vmatpush1.msra.mxu1 %v702_v5  ;;  %v1605_v35 = vsub.f32 %v33242_v23, %v33257_v31  ;;  %v1647_v46 = vand.u32 4294901760, %v1646_v41  ;;  %v33334_v1 = vpop.permute.xlu0 %2940 }
  0xa0   :  { %934 = vmatpush1.msra.mxu0 %v700_v52  ;;  %852 = vmatprep.subr.mxu1 %v33180_v39  ;;  %v2111_v52 = vsub.f32 %v2109_v42, %v2110_v48 }
  0xa1   :  { %1080 = vmatprep.subr.mxu0 %v33198_v53  ;;  %736 = vmatprep.mubr.f32.mxu1 %v38614_v0  ;;  %v33282_v40 = vand.u32 4294901760, %v1605_v35 }
  0xa2   :  { %967 = vmatprep.mubr.f32.mxu0 %v38614_v0  ;;  %738 = vmatmul.mubr.f32.vlgmr.msra.gmra.mxu1 %v33137_v12  ;;  %v2112_v56 = vand.u32 4294901760, %v2111_v52 }
  0xa3   :  { %969 = vmatmul.mubr.f32.vlgmr.msra.gmra.mxu0 %v33137_v12  ;;  %854 = vmatpush1.msra.mxu1 %v33177_v37 }
  0xa4   :  { %1082 = vmatpush1.msra.mxu0 %v33207_v58  ;;  %1006 = vmatprep.subr.mxu1 %v33180_v39  ;;  %v1651_v39 = vand.u32 4294901760, %v1650_v33 }
  0xa5   :  { %1241 = vmatprep.subr.mxu0 %v1158_v60  ;;  %887 = vmatprep.mubr.f32.mxu1 %v38614_v0 }
  0xa6   :  { %1115 = vmatprep.mubr.f32.mxu0 %v38614_v0  ;;  %891 = vmatmul.mubr.f32.vlgmr.msra.gmra.mxu1 %v33146_v16  ;;  %v1652_v45 = vsub.f32 %v1650_v33, %v1651_v39 }
  0xa7   :  { %1121 = vmatmul.mubr.f32.vlgmr.msra.gmra.mxu0 %v33166_v30  ;;  %1008 = vmatpush1.msra.mxu1 %v33177_v37  ;;  %v1167_v30 = vand.u32 4294901760, %v1166_v27  ;;  %v71_v37 = vsel %vm67_vm3, %v56_v61, %v58_v25  ;;  %v2933_v61 = vpop.permute.xlu1 %2932  ;;  %v33357_v25 = vsub.f32 %v2952_v62, %v33341_v17  ;;  %v4395_v62 = vsel %vm96_vm0, %v31598_v57, 0 }
  0xa8   :  { %1244 = vmatpush1.msra.mxu0 %v1164_v2  ;;  %1162 = vmatprep.subr.mxu1 %v1161_v29  ;;  %v2947_v63 = vsel %vm2942_vm4, %v2931_v55, %v2933_v61 }
  0xa9   :  { %1395 = vmatprep.subr.mxu0 %v1159_v10  ;;  %1041 = vmatprep.mubr.f32.mxu1 %v38614_v0  ;;  %v2958_v18 = vsel %vm100_vm2, %v2947_v63, 0 }
  0xaa   :  { %1277 = vmatprep.mubr.f32.mxu0 %v38614_v0  ;;  %1043 = vmatmul.mubr.f32.vlgmr.msra.gmra.mxu1 %v33137_v12  ;;  %v33351_v21 = vand.u32 4294901760, %v2958_v18 }
  0xab   :  { %1280 = vmatmul.mubr.f32.vlgmr.msra.gmra.mxu0 %v33140_v14  ;;  %1168 = vmatpush1.msra.mxu1 %v1167_v30  ;;  %v1524_v14 = vsel %vm100_vm2, %v71_v37, 0  ;;  %v2935_v27 = vpop.permute.xlu1 %2934  ;;  %v33372_v30 = vand.u32 4294901760, %v33357_v25 }
  0xac   :  { %1399 = vmatpush1.msra.mxu0 %v1165_v19  ;;  %1317 = vmatprep.subr.mxu1 %v33198_v53  ;;  %v33288_v43 = vand.u32 4294901760, %v1524_v14  ;;  %v2948_v19 = vsel %vm2942_vm4, %v33334_v1, %v2931_v55  ;;  %v3081_v32 = vsub.f32 %v2958_v18, %v33351_v21  ;;  %v33456_v18 = vand.u32 4294901760, %v4395_v62 }
  0xad   :  { %1201 = vmatprep.mubr.f32.mxu1 %v38614_v0  ;;  %1432 = vmatprep.mubr.f32.mxu0 %v38614_v0  ;;  %v2955_v22 = vsel %vm100_vm2, %v2948_v19, 0 }
  0xae   :  { %1566 = vmatprep.subr.mxu0 %v33236_v20  ;;  %1203 = vmatmul.mubr.f32.vlgmr.msra.gmra.mxu1 %v33137_v12  ;;  %v2115_v49 = vsub.f32 %v1524_v14, %v33288_v43  ;;  %v2946_v14 = vsel %vm2942_vm4, %v2933_v61, %v2935_v27 }
  0xaf   :  { %1434 = vmatmul.mubr.f32.vlgmr.msra.gmra.mxu0 %v33137_v12  ;;  %1319 = vmatpush1.msra.mxu1 %v33207_v58 }
  0xb0   :  { %1568 = vmatpush1.msra.mxu0 %v33249_v26  ;;  %1471 = vmatprep.subr.mxu1 %v33198_v53  ;;  %v2116_v53 = vand.u32 4294901760, %v2115_v49 }
  0xb1   :  { %1727 = vmatprep.subr.mxu0 %v1644_v28  ;;  %1352 = vmatprep.mubr.f32.mxu1 %v38614_v0  ;;  %v33364_v28 = vand.u32 4294901760, %v2955_v22 }
  0xb2   :  { %1601 = vmatprep.mubr.f32.mxu0 %v38614_v0  ;;  %1356 = vmatmul.mubr.f32.vlgmr.msra.gmra.mxu1 %v33146_v16  ;;  %v1653_v16 = vand.u32 4294901760, %v1652_v45  ;;  %v2117_v59 = vsub.f32 %v2115_v49, %v2116_v53 }
  0xb3   :  { %1607 = vmatmul.mubr.f32.vlgmr.msra.gmra.mxu0 %v33282_v40  ;;  %1473 = vmatpush1.msra.mxu1 %v33207_v58  ;;  %v33322_v58 = vand.u32 4294901760, %v1530_v54  ;;  %v3087_v35 = vsub.f32 %v2955_v22, %v33364_v28 }
  0xb4   :  { %1730 = vmatpush1.msra.mxu0 %v1650_v33  ;;  %1648 = vmatprep.subr.mxu1 %v1647_v46  ;;  %v2118_v5 = vand.u32 4294901760, %v2117_v59  ;;  %v2939_v46 = vpop.permute.xlu1 %2938 }
  0xb5   :  { %1881 = vmatprep.subr.mxu0 %v1645_v36  ;;  %1506 = vmatprep.mubr.f32.mxu1 %v38614_v0  ;;  %v2580_v2 = vsub.f32 %v1530_v54, %v33322_v58  ;;  %v3088_v41 = vand.u32 4294901760, %v3087_v35 }
  0xb6   :  { %1763 = vmatprep.mubr.f32.mxu0 %v38614_v0  ;;  %1508 = vmatmul.mubr.f32.vlgmr.msra.gmra.mxu1 %v33137_v12  ;;  %v33311_v12 = vand.u32 4294901760, %v1533_v50 }
  0xb7   :  { %1766 = vmatmul.mubr.f32.vlgmr.msra.gmra.mxu0 %v33242_v23  ;;  %1654 = vmatpush1.msra.mxu1 %v1653_v16  ;;  %v3089_v47 = vsub.f32 %v3087_v35, %v3088_v41 }
  0xb8   :  { %1885 = vmatpush1.msra.mxu0 %v1651_v39  ;;  %1803 = vmatprep.subr.mxu1 %v33236_v20  ;;  %v2574_v60 = vsub.f32 %v1533_v50, %v33311_v12  ;;  %v3082_v39 = vand.u32 4294901760, %v3081_v32  ;;  %v4376_v61 = vpop.permute.xlu1 %4375 }
  0xb9   :  { %1687 = vmatprep.mubr.f32.mxu1 %v38614_v0  ;;  %1918 = vmatprep.mubr.f32.mxu0 %v38614_v0 }
  0xba   :  { %2031 = vmatprep.subr.mxu0 %v33275_v38  ;;  %1689 = vmatmul.mubr.f32.vlgmr.msra.gmra.mxu1 %v33226_v11  ;;  %v2575_v10 = vand.u32 4294901760, %v2574_v60 }
  0xbb   :  { %1920 = vmatmul.mubr.f32.vlgmr.msra.gmra.mxu0 %v33226_v11  ;;  %1805 = vmatpush1.msra.mxu1 %v33249_v26 }
  0xbc   :  { %2033 = vmatpush1.msra.mxu0 %v33288_v43  ;;  %1957 = vmatprep.subr.mxu1 %v33236_v20  ;;  %v2581_v20 = vand.u32 4294901760, %v2580_v2  ;;  %v2576_v24 = vsub.f32 %v2574_v60, %v2575_v10 }
  0xbd   :  { %2192 = vmatprep.subr.mxu0 %v2109_v42  ;;  %1838 = vmatprep.mubr.f32.mxu1 %v38614_v0 }
  0xbe   :  { %2066 = vmatprep.mubr.f32.mxu0 %v38614_v0  ;;  %1842 = vmatmul.mubr.f32.vlgmr.msra.gmra.mxu1 %v33257_v31  ;;  %v2582_v29 = vsub.f32 %v2580_v2, %v2581_v20  ;;  %v2577_v33 = vand.u32 4294901760, %v2576_v24 }
  0xbf   :  { %2072 = vmatmul.mubr.f32.vlgmr.msra.gmra.mxu0 %v33282_v40  ;;  %1959 = vmatpush1.msra.mxu1 %v33249_v26  ;;  %v33361_v26 = vpop.permute.xlu0 %2936 }
  0xc0   :  { %2195 = vmatpush1.msra.mxu0 %v2115_v49  ;;  %2113 = vmatprep.subr.mxu1 %v2112_v56  ;;  %v2945_v34 = vsel %vm2942_vm4, %v2935_v27, %v33361_v26  ;;  %v2583_v36 = vand.u32 4294901760, %v2582_v29  ;;  %v2943_v49 = vsel %vm2942_vm4, %v2939_v46, %v33334_v1  ;;  %v2944_v52 = vsel %vm2942_vm4, %v33361_v26, %v2939_v46  ;;  %v4378_v29 = vpop.permute.xlu1 %4377 }
  0xc1   :  { %2346 = vmatprep.subr.mxu0 %v2110_v48  ;;  %1992 = vmatprep.mubr.f32.mxu1 %v38614_v0  ;;  %v2964_v37 = vsel %vm100_vm2, %v2945_v34, 0  ;;  %v2970_v51 = vsel %vm100_vm2, %v2943_v49, 0  ;;  %v2967_v54 = vsel %vm100_vm2, %v2944_v52, 0  ;;  %v33472_v27 = vsub.f32 %v4395_v62, %v33456_v18 }
  0xc2   :  { %2228 = vmatprep.mubr.f32.mxu0 %v38614_v0  ;;  %1994 = vmatmul.mubr.f32.vlgmr.msra.gmra.mxu1 %v33226_v11 }
  0xc3   :  { %2231 = vmatmul.mubr.f32.vlgmr.msra.gmra.mxu0 %v33242_v23  ;;  %2119 = vmatpush1.msra.mxu1 %v2118_v5  ;;  %v4374_v55 = vpop.permute.xlu0 %4373 }
  0xc4   :  { %2350 = vmatpush1.msra.mxu0 %v2116_v53  ;;  %2268 = vmatprep.subr.mxu1 %v33275_v38  ;;  %v4390_v63 = vsel %vm4385_vm5, %v4374_v55, %v4376_v61 }
  0xc5   :  { %2496 = vmatprep.subr.mxu0 %v33311_v12  ;;  %2152 = vmatprep.mubr.f32.mxu1 %v38614_v0  ;;  %v4401_v19 = vsel %vm100_vm2, %v4390_v63, 0 }
  0xc6   :  { %2383 = vmatprep.mubr.f32.mxu0 %v38614_v0  ;;  %2154 = vmatmul.mubr.f32.vlgmr.msra.gmra.mxu1 %v33226_v11  ;;  %v33466_v22 = vand.u32 4294901760, %v4401_v19 }
  0xc7   :  { %2385 = vmatmul.mubr.f32.vlgmr.msra.gmra.mxu0 %v33226_v11  ;;  %2270 = vmatpush1.msra.mxu1 %v33288_v43  ;;  %v33449_v1 = vpop.permute.xlu0 %4383 }
  0xc8   :  { %2498 = vmatpush1.msra.mxu0 %v33322_v58  ;;  %2422 = vmatprep.subr.mxu1 %v33275_v38  ;;  %v3042_v38 = vsub.f32 %v33357_v25, %v33372_v30  ;;  %v4524_v34 = vsub.f32 %v4401_v19, %v33466_v22 }
  0xc9   :  { %2657 = vmatprep.subr.mxu0 %v2574_v60  ;;  %2303 = vmatprep.mubr.f32.mxu1 %v38614_v0 }
  0xca   :  { %2531 = vmatprep.mubr.f32.mxu0 %v38614_v0  ;;  %2307 = vmatmul.mubr.f32.vlgmr.msra.gmra.mxu1 %v33257_v31  ;;  %v33397_v42 = vand.u32 4294901760, %v3042_v38 }
  0xcb   :  { %2537 = vmatmul.mubr.f32.vlgmr.msra.gmra.mxu0 %v33282_v40  ;;  %2424 = vmatpush1.msra.mxu1 %v33288_v43  ;;  %v33390_v40 = vand.u32 4294901760, %v2964_v37  ;;  %v3083_v43 = vsub.f32 %v3081_v32, %v3082_v39 }
  0xcc   :  { %2660 = vmatpush1.msra.mxu0 %v2580_v2  ;;  %2578 = vmatprep.subr.mxu1 %v2577_v33 }
  0xcd   :  { %2811 = vmatprep.subr.mxu0 %v2575_v10  ;;  %2457 = vmatprep.mubr.f32.mxu1 %v38614_v0  ;;  %v3546_v44 = vsub.f32 %v2964_v37, %v33390_v40  ;;  %v3084_v48 = vand.u32 4294901760, %v3083_v43 }
  0xce   :  { %2693 = vmatprep.mubr.f32.mxu0 %v38614_v0  ;;  %2459 = vmatmul.mubr.f32.vlgmr.msra.gmra.mxu1 %v33226_v11 }
  0xcf   :  { %2696 = vmatmul.mubr.f32.vlgmr.msra.gmra.mxu0 %v33242_v23  ;;  %2584 = vmatpush1.msra.mxu1 %v2583_v36  ;;  %v2961_v23 = vsel %vm100_vm2, %v2946_v14, 0  ;;  %v3547_v16 = vand.u32 4294901760, %v3546_v44  ;;  %v33487_v36 = vand.u32 4294901760, %v33472_v27 }
  0xd0   :  { %2815 = vmatpush1.msra.mxu0 %v2581_v20  ;;  %2733 = vmatprep.subr.mxu1 %v33311_v12  ;;  %v33403_v45 = vand.u32 4294901760, %v2961_v23  ;;  %v4391_v20 = vsel %vm4385_vm5, %v33449_v1, %v4374_v55 }
  0xd1   :  { %2617 = vmatprep.mubr.f32.mxu1 %v38614_v0  ;;  %2848 = vmatprep.mubr.f32.mxu0 %v38614_v0  ;;  %v3548_v53 = vsub.f32 %v3546_v44, %v3547_v16  ;;  %v4398_v24 = vsel %vm100_vm2, %v4391_v20, 0 }
  0xd2   :  { %3003 = vmatprep.subr.mxu0 %v33351_v21  ;;  %2619 = vmatmul.mubr.f32.vlgmr.msra.gmra.mxu1 %v33226_v11  ;;  %v3552_v50 = vsub.f32 %v2961_v23, %v33403_v45  ;;  %v4389_v23 = vsel %vm4385_vm5, %v4376_v61, %v4378_v29 }
  0xd3   :  { %2850 = vmatmul.mubr.f32.vlgmr.msra.gmra.mxu0 %v33226_v11  ;;  %2735 = vmatpush1.msra.mxu1 %v33322_v58  ;;  %v3549_v56 = vand.u32 4294901760, %v3548_v53 }
  0xd4   :  { %3005 = vmatpush1.msra.mxu0 %v33364_v28  ;;  %2887 = vmatprep.subr.mxu1 %v33311_v12  ;;  %v3553_v12 = vand.u32 4294901760, %v3552_v50 }
  0xd5   :  { %3164 = vmatprep.subr.mxu0 %v3081_v32  ;;  %2768 = vmatprep.mubr.f32.mxu1 %v38614_v0  ;;  %v33479_v32 = vand.u32 4294901760, %v4398_v24 }
  0xd6   :  { %3038 = vmatprep.mubr.f32.mxu0 %v38614_v0  ;;  %2772 = vmatmul.mubr.f32.vlgmr.msra.gmra.mxu1 %v33257_v31  ;;  %v3090_v31 = vand.u32 4294901760, %v3089_v47  ;;  %v3554_v59 = vsub.f32 %v3552_v50, %v3553_v12 }
  0xd7   :  { %3044 = vmatmul.mubr.f32.vlgmr.msra.gmra.mxu0 %v33397_v42  ;;  %2889 = vmatpush1.msra.mxu1 %v33322_v58  ;;  %v33437_v58 = vand.u32 4294901760, %v2967_v54  ;;  %v4530_v38 = vsub.f32 %v4398_v24, %v33479_v32 }
  0xd8   :  { %3167 = vmatpush1.msra.mxu0 %v3087_v35  ;;  %3085 = vmatprep.subr.mxu1 %v3084_v48  ;;  %v3555_v5 = vand.u32 4294901760, %v3554_v59  ;;  %v4382_v48 = vpop.permute.xlu1 %4381 }
  0xd9   :  { %3318 = vmatprep.subr.mxu0 %v3082_v39  ;;  %2922 = vmatprep.mubr.f32.mxu1 %v38614_v0  ;;  %v4017_v2 = vsub.f32 %v2967_v54, %v33437_v58  ;;  %v4531_v43 = vand.u32 4294901760, %v4530_v38 }
  0xda   :  { %3200 = vmatprep.mubr.f32.mxu0 %v38614_v0  ;;  %2924 = vmatmul.mubr.f32.vlgmr.msra.gmra.mxu1 %v33226_v11  ;;  %v33426_v11 = vand.u32 4294901760, %v2970_v51 }
  0xdb   :  { %3203 = vmatmul.mubr.f32.vlgmr.msra.gmra.mxu0 %v33357_v25  ;;  %3091 = vmatpush1.msra.mxu1 %v3090_v31  ;;  %v4532_v49 = vsub.f32 %v4530_v38, %v4531_v43 }
  0xdc   :  { %3322 = vmatpush1.msra.mxu0 %v3088_v41  ;;  %3240 = vmatprep.subr.mxu1 %v33351_v21  ;;  %v4011_v60 = vsub.f32 %v2970_v51, %v33426_v11  ;;  %v4525_v41 = vand.u32 4294901760, %v4524_v34 }
  0xdd   :  { %3124 = vmatprep.mubr.f32.mxu1 %v38614_v0  ;;  %3355 = vmatprep.mubr.f32.mxu0 %v38614_v0 }
  0xde   :  { %3468 = vmatprep.subr.mxu0 %v33390_v40  ;;  %3126 = vmatmul.mubr.f32.vlgmr.msra.gmra.mxu1 %v33341_v17  ;;  %v4012_v10 = vand.u32 4294901760, %v4011_v60 }
  0xdf   :  { %3357 = vmatmul.mubr.f32.vlgmr.msra.gmra.mxu0 %v33341_v17  ;;  %3242 = vmatpush1.msra.mxu1 %v33364_v28 }
  0xe0   :  { %3470 = vmatpush1.msra.mxu0 %v33403_v45  ;;  %3394 = vmatprep.subr.mxu1 %v33351_v21  ;;  %v4018_v21 = vand.u32 4294901760, %v4017_v2  ;;  %v4013_v26 = vsub.f32 %v4011_v60, %v4012_v10 }
  0xe1   :  { %3629 = vmatprep.subr.mxu0 %v3546_v44  ;;  %3275 = vmatprep.mubr.f32.mxu1 %v38614_v0 }
  0xe2   :  { %3503 = vmatprep.mubr.f32.mxu0 %v38614_v0  ;;  %3279 = vmatmul.mubr.f32.vlgmr.msra.gmra.mxu1 %v33372_v30  ;;  %v4019_v33 = vsub.f32 %v4017_v2, %v4018_v21  ;;  %v4014_v35 = vand.u32 4294901760, %v4013_v26 }
  0xe3   :  { %3509 = vmatmul.mubr.f32.vlgmr.msra.gmra.mxu0 %v33397_v42  ;;  %3396 = vmatpush1.msra.mxu1 %v33364_v28  ;;  %v33476_v28 = vpop.permute.xlu0 %4379 }
  0xe4   :  { %3632 = vmatpush1.msra.mxu0 %v3552_v50  ;;  %3550 = vmatprep.subr.mxu1 %v3549_v56  ;;  %v4388_v37 = vsel %vm4385_vm5, %v4378_v29, %v33476_v28  ;;  %v4020_v39 = vand.u32 4294901760, %v4019_v33  ;;  %v4386_v50 = vsel %vm4385_vm5, %v4382_v48, %v33449_v1  ;;  %v4387_v53 = vsel %vm4385_vm5, %v33476_v28, %v4382_v48  ;;  %v31599_v56 = vld [vmem:[%s38610_s3 + $0x20] sm:$0xff] }
  0xe5   :  { %3783 = vmatprep.subr.mxu0 %v3547_v16  ;;  %3429 = vmatprep.mubr.f32.mxu1 %v38614_v0  ;;  %v4407_v14 = vsel %vm100_vm2, %v4388_v37, 0  ;;  %v4413_v52 = vsel %vm100_vm2, %v4386_v50, 0  ;;  %v4410_v54 = vsel %vm100_vm2, %v4387_v53, 0  ;;  %v5823_v1 = vsel %vm100_vm2, %v33055_v7, 0 }
  0xe6   :  { %3665 = vmatprep.mubr.f32.mxu0 %v38614_v0  ;;  %3431 = vmatmul.mubr.f32.vlgmr.msra.gmra.mxu1 %v33341_v17  ;;  %v33552_v57 = vand.u32 4294901760, %v4410_v54  ;;  %v33576_v19 = vand.u32 4294901760, %v5823_v1 }
  0xe7   :  { %3668 = vmatmul.mubr.f32.vlgmr.msra.gmra.mxu0 %v33357_v25  ;;  %3556 = vmatpush1.msra.mxu1 %v3555_v5  ;;  %v5821_v5 = vsel %vm100_vm2, %v33040_v3, 0  ;;  %v7237_v48 = vpop.permute.xlu0 %7236 }
  0xe8   :  { %3787 = vmatpush1.msra.mxu0 %v3553_v12  ;;  %3705 = vmatprep.subr.mxu1 %v33390_v40  ;;  %v5460_v61 = vsub.f32 %v4410_v54, %v33552_v57  ;;  %v5942_v26 = vsub.f32 %v5823_v1, %v33576_v19 }
  0xe9   :  { %3933 = vmatprep.subr.mxu0 %v33426_v11  ;;  %3589 = vmatprep.mubr.f32.mxu1 %v38614_v0 }
  0xea   :  { %3820 = vmatprep.mubr.f32.mxu0 %v38614_v0  ;;  %3591 = vmatmul.mubr.f32.vlgmr.msra.gmra.mxu1 %v33341_v17 }
  0xeb   :  { %3822 = vmatmul.mubr.f32.vlgmr.msra.gmra.mxu0 %v33341_v17  ;;  %3707 = vmatpush1.msra.mxu1 %v33403_v45 }
  0xec   :  { %3935 = vmatpush1.msra.mxu0 %v33437_v58  ;;  %3859 = vmatprep.subr.mxu1 %v33390_v40  ;;  %v4485_v40 = vsub.f32 %v33472_v27, %v33487_v36 }
  0xed   :  { %4094 = vmatprep.subr.mxu0 %v4011_v60  ;;  %3740 = vmatprep.mubr.f32.mxu1 %v38614_v0  ;;  %v5819_v60 = vsel %vm96_vm0, %v31599_v56, 0 }
  0xee   :  { %3968 = vmatprep.mubr.f32.mxu0 %v38614_v0  ;;  %3744 = vmatmul.mubr.f32.vlgmr.msra.gmra.mxu1 %v33372_v30  ;;  %v33512_v44 = vand.u32 4294901760, %v4485_v40 }
  0xef   :  { %3974 = vmatmul.mubr.f32.vlgmr.msra.gmra.mxu0 %v33397_v42  ;;  %3861 = vmatpush1.msra.mxu1 %v33403_v45  ;;  %v33505_v42 = vand.u32 4294901760, %v4407_v14  ;;  %v4526_v45 = vsub.f32 %v4524_v34, %v4525_v41 }
  0xf0   :  { %4097 = vmatpush1.msra.mxu0 %v4017_v2  ;;  %4015 = vmatprep.subr.mxu1 %v4014_v35  ;;  %v33568_v2 = vand.u32 4294901760, %v5819_v60 }
  0xf1   :  { %4248 = vmatprep.subr.mxu0 %v4012_v10  ;;  %3894 = vmatprep.mubr.f32.mxu1 %v38614_v0  ;;  %v4989_v46 = vsub.f32 %v4407_v14, %v33505_v42  ;;  %v4527_v16 = vand.u32 4294901760, %v4526_v45  ;;  %v5461_v10 = vand.u32 4294901760, %v5460_v61  ;;  %v5825_v14 = vsel %vm100_vm2, %v33059_v8, 0  ;;  %v31600_v8 = vld [vmem:[%s38610_s3 + $0x28] sm:$0xff] }
  0xf2   :  { %4130 = vmatprep.mubr.f32.mxu0 %v38614_v0  ;;  %3896 = vmatmul.mubr.f32.vlgmr.msra.gmra.mxu1 %v33341_v17  ;;  %v7256_v53 = vsel %vm96_vm0, %v31600_v8, 0 }
  0xf3   :  { %4133 = vmatmul.mubr.f32.vlgmr.msra.gmra.mxu0 %v33357_v25  ;;  %4021 = vmatpush1.msra.mxu1 %v4020_v39  ;;  %v4404_v25 = vsel %vm100_vm2, %v4389_v23, 0  ;;  %v4990_v31 = vand.u32 4294901760, %v4989_v46  ;;  %v5462_v24 = vsub.f32 %v5460_v61, %v5461_v10  ;;  %v5827_v39 = vsel %vm100_vm2, %v33065_v9, 0 }
  0xf4   :  { %4252 = vmatpush1.msra.mxu0 %v4018_v21  ;;  %4170 = vmatprep.subr.mxu1 %v33426_v11  ;;  %v33518_v47 = vand.u32 4294901760, %v4404_v25  ;;  %v33581_v21 = vsub.f32 %v5819_v60, %v33568_v2  ;;  %v33680_v9 = vand.u32 4294901760, %v7256_v53 }
  0xf5   :  { %4054 = vmatprep.mubr.f32.mxu1 %v38614_v0  ;;  %4285 = vmatprep.mubr.f32.mxu0 %v38614_v0  ;;  %v4991_v12 = vsub.f32 %v4989_v46, %v4990_v31  ;;  %v5463_v33 = vand.u32 4294901760, %v5462_v24 }
  0xf6   :  { %4446 = vmatprep.subr.mxu0 %v33466_v22  ;;  %4056 = vmatmul.mubr.f32.vlgmr.msra.gmra.mxu1 %v33341_v17  ;;  %v4995_v51 = vsub.f32 %v4404_v25, %v33518_v47  ;;  %v33594_v29 = vand.u32 4294901760, %v33581_v21 }
  0xf7   :  { %4287 = vmatmul.mubr.f32.vlgmr.msra.gmra.mxu0 %v33341_v17  ;;  %4172 = vmatpush1.msra.mxu1 %v33437_v58  ;;  %v4992_v55 = vand.u32 4294901760, %v4991_v12 }
  0xf8   :  { %4448 = vmatpush1.msra.mxu0 %v33479_v32  ;;  %4324 = vmatprep.subr.mxu1 %v33426_v11  ;;  %v4996_v11 = vand.u32 4294901760, %v4995_v51  ;;  %v5903_v35 = vsub.f32 %v33581_v21, %v33594_v29 }
  0xf9   :  { %4607 = vmatprep.subr.mxu0 %v4524_v34  ;;  %4205 = vmatprep.mubr.f32.mxu1 %v38614_v0  ;;  %v5943_v34 = vand.u32 4294901760, %v5942_v26 }
  0xfa   :  { %4481 = vmatprep.mubr.f32.mxu0 %v38614_v0  ;;  %4209 = vmatmul.mubr.f32.vlgmr.msra.gmra.mxu1 %v33372_v30  ;;  %v4533_v30 = vand.u32 4294901760, %v4532_v49 }
  0xfb   :  { %4487 = vmatmul.mubr.f32.vlgmr.msra.gmra.mxu0 %v33512_v44  ;;  %4326 = vmatpush1.msra.mxu1 %v33437_v58  ;;  %v4997_v58 = vsub.f32 %v4995_v51, %v4996_v11 }
  0xfc   :  { %4610 = vmatpush1.msra.mxu0 %v4530_v38  ;;  %4528 = vmatprep.subr.mxu1 %v4527_v16  ;;  %v5944_v38 = vsub.f32 %v5942_v26, %v5943_v34 }
  0xfd   :  { %4761 = vmatprep.subr.mxu0 %v4525_v41  ;;  %4359 = vmatprep.mubr.f32.mxu1 %v38614_v0  ;;  %v4998_v62 = vand.u32 4294901760, %v4997_v58  ;;  %v33620_v41 = vand.u32 4294901760, %v5827_v39 }
  0xfe   :  { %4643 = vmatprep.mubr.f32.mxu0 %v38614_v0  ;;  %4361 = vmatmul.mubr.f32.vlgmr.msra.gmra.mxu1 %v33341_v17  ;;  %v33541_v17 = vand.u32 4294901760, %v4413_v52  ;;  %v5945_v23 = vand.u32 4294901760, %v5944_v38 }
  0xff   :  { %4646 = vmatmul.mubr.f32.vlgmr.msra.gmra.mxu0 %v33472_v27  ;;  %4534 = vmatpush1.msra.mxu1 %v4533_v30  ;;  %v6407_v25 = vsub.f32 %v5827_v39, %v33620_v41  ;;  %v7239_v30 = vpop.permute.xlu1 %7238 }
 0x100   :  { %4765 = vmatpush1.msra.mxu0 %v4531_v43  ;;  %4683 = vmatprep.subr.mxu1 %v33466_v22  ;;  %v5454_v59 = vsub.f32 %v4413_v52, %v33541_v17  ;;  %v7250_v12 = vsel %vm7246_vm6, %v7237_v48, %v7239_v30 }
 0x101   :  { %4567 = vmatprep.mubr.f32.mxu1 %v38614_v0  ;;  %4798 = vmatprep.mubr.f32.mxu0 %v38614_v0 }
 0x102   :  { %4911 = vmatprep.subr.mxu0 %v33505_v42  ;;  %4569 = vmatmul.mubr.f32.vlgmr.msra.gmra.mxu1 %v33456_v18  ;;  %v5455_v63 = vand.u32 4294901760, %v5454_v59 }
 0x103   :  { %4800 = vmatmul.mubr.f32.vlgmr.msra.gmra.mxu0 %v33456_v18  ;;  %4685 = vmatpush1.msra.mxu1 %v33479_v32 }
 0x104   :  { %4913 = vmatpush1.msra.mxu0 %v33518_v47  ;;  %4837 = vmatprep.subr.mxu1 %v33466_v22  ;;  %v5456_v20 = vsub.f32 %v5454_v59, %v5455_v63  ;;  %v33585_v22 = vand.u32 4294901760, %v5821_v5 }
 0x105   :  { %5072 = vmatprep.subr.mxu0 %v4989_v46  ;;  %4718 = vmatprep.mubr.f32.mxu1 %v38614_v0  ;;  %v5829_v46 = vsel %vm100_vm2, %v33042_v4, 0 }
 0x106   :  { %4946 = vmatprep.mubr.f32.mxu0 %v38614_v0  ;;  %4722 = vmatmul.mubr.f32.vlgmr.msra.gmra.mxu1 %v33487_v36  ;;  %v5457_v28 = vand.u32 4294901760, %v5456_v20  ;;  %v33656_v50 = vand.u32 4294901760, %v5829_v46 }
 0x107   :  { %4952 = vmatmul.mubr.f32.vlgmr.msra.gmra.mxu0 %v33512_v44  ;;  %4839 = vmatpush1.msra.mxu1 %v33479_v32  ;;  %v5948_v32 = vsub.f32 %v5821_v5, %v33585_v22 }
 0x108   :  { %5075 = vmatpush1.msra.mxu0 %v4995_v51  ;;  %4993 = vmatprep.subr.mxu1 %v4992_v55  ;;  %v6878_v52 = vsub.f32 %v5829_v46, %v33656_v50 }
 0x109   :  { %5226 = vmatprep.subr.mxu0 %v4990_v31  ;;  %4872 = vmatprep.mubr.f32.mxu1 %v38614_v0  ;;  %v5949_v37 = vand.u32 4294901760, %v5948_v32 }
 0x10a   :  { %5108 = vmatprep.mubr.f32.mxu0 %v38614_v0  ;;  %4874 = vmatmul.mubr.f32.vlgmr.msra.gmra.mxu1 %v33456_v18  ;;  %v6879_v55 = vand.u32 4294901760, %v6878_v52 }
 0x10b   :  { %5111 = vmatmul.mubr.f32.vlgmr.msra.gmra.mxu0 %v33472_v27  ;;  %4999 = vmatpush1.msra.mxu1 %v4998_v62  ;;  %v5950_v40 = vsub.f32 %v5948_v32, %v5949_v37 }
 0x10c   :  { %5230 = vmatpush1.msra.mxu0 %v4996_v11  ;;  %5148 = vmatprep.subr.mxu1 %v33505_v42  ;;  %v33677_v11 = vpop.permute.xlu0 %7234 }
 0x10d   :  { %5376 = vmatprep.subr.mxu0 %v33541_v17  ;;  %5032 = vmatprep.mubr.f32.mxu1 %v38614_v0  ;;  %v5951_v43 = vand.u32 4294901760, %v5950_v40  ;;  %v7251_v54 = vsel %vm7246_vm6, %v33677_v11, %v7237_v48 }
 0x10e   :  { %5263 = vmatprep.mubr.f32.mxu0 %v38614_v0  ;;  %5034 = vmatmul.mubr.f32.vlgmr.msra.gmra.mxu1 %v33456_v18 }
 0x10f   :  { %5265 = vmatmul.mubr.f32.vlgmr.msra.gmra.mxu0 %v33456_v18  ;;  %5150 = vmatpush1.msra.mxu1 %v33518_v47 }
 0x110   :  { %5378 = vmatpush1.msra.mxu0 %v33552_v57  ;;  %5302 = vmatprep.subr.mxu1 %v33505_v42  ;;  %v33623_v42 = vand.u32 4294901760, %v5825_v14  ;;  %v33702_v60 = vpop.permute.xlu0 %7242 }
 0x111   :  { %5537 = vmatprep.subr.mxu0 %v5454_v59  ;;  %5183 = vmatprep.mubr.f32.mxu1 %v38614_v0  ;;  %v33698_v59 = vsub.f32 %v7256_v53, %v33680_v9 }
 0x112   :  { %5411 = vmatprep.mubr.f32.mxu0 %v38614_v0  ;;  %5187 = vmatmul.mubr.f32.vlgmr.msra.gmra.mxu1 %v33487_v36 }
 0x113   :  { %5417 = vmatmul.mubr.f32.vlgmr.msra.gmra.mxu0 %v33512_v44  ;;  %5304 = vmatpush1.msra.mxu1 %v33518_v47  ;;  %v6413_v44 = vsub.f32 %v5825_v14, %v33623_v42  ;;  %v33713_v5 = vand.u32 4294901760, %v33698_v59 }
 0x114   :  { %5540 = vmatpush1.msra.mxu0 %v5460_v61  ;;  %5458 = vmatprep.subr.mxu1 %v5457_v28  ;;  %v7241_v61 = vpop.permute.xlu1 %7240 }
 0x115   :  { %5691 = vmatprep.subr.mxu0 %v5455_v63  ;;  %5337 = vmatprep.mubr.f32.mxu1 %v38614_v0  ;;  %v6414_v45 = vand.u32 4294901760, %v6413_v44  ;;  %v7346_v24 = vsub.f32 %v33698_v59, %v33713_v5  ;;  %v7249_v28 = vsel %vm7246_vm6, %v7239_v30, %v7241_v61 }
 0x116   :  { %5573 = vmatprep.mubr.f32.mxu0 %v38614_v0  ;;  %5339 = vmatmul.mubr.f32.vlgmr.msra.gmra.mxu1 %v33456_v18 }
 0x117   :  { %5576 = vmatmul.mubr.f32.vlgmr.msra.gmra.mxu0 %v33472_v27  ;;  %5464 = vmatpush1.msra.mxu1 %v5463_v33  ;;  %v33612_v27 = vand.u32 4294901760, %v5903_v35  ;;  %v6415_v49 = vsub.f32 %v6413_v44, %v6414_v45  ;;  %v7265_v33 = vsel %vm100_vm2, %v7249_v28, 0 }
 0x118   :  { %5695 = vmatpush1.msra.mxu0 %v5461_v10  ;;  %5613 = vmatprep.subr.mxu1 %v33541_v17  ;;  %v7248_v10 = vsel %vm7246_vm6, %v7241_v61, %v33702_v60  ;;  %v7245_v35 = vpop.permute.xlu1 %7244  ;;  %v33745_v38 = vand.u32 4294901760, %v7265_v33 }
 0x119   :  { %5497 = vmatprep.mubr.f32.mxu1 %v38614_v0  ;;  %5728 = vmatprep.mubr.f32.mxu0 %v38614_v0  ;;  %v6416_v31 = vand.u32 4294901760, %v6415_v49  ;;  %v7252_v14 = vsel %vm7246_vm6, %v7245_v35, %v33677_v11 }
 0x11a   :  { %5864 = vmatprep.subr.mxu0 %v33576_v19  ;;  %5499 = vmatmul.mubr.f32.vlgmr.msra.gmra.mxu1 %v33456_v18 }
 0x11b   :  { %5730 = vmatmul.mubr.f32.vlgmr.msra.gmra.mxu0 %v33456_v18  ;;  %5615 = vmatpush1.msra.mxu1 %v33552_v57 }
 0x11c   :  { %5648 = vmatprep.mubr.f32.mxu1 %v38614_v0  ;;  %5767 = vmatprep.subr.mxu1 %v33541_v17  ;;  %v7262_v17 = vsel %vm100_vm2, %v7250_v12, 0  ;;  %v33789_v8 = vpop.permute.xlu1 %8681 }
 0x11d   :  { %5866 = vmatpush1.msra.mxu0 %v33585_v22  ;;  %5899 = vmatprep.mubr.f32.mxu0 %v38614_v0  ;;  %v33692_v56 = vand.u32 4294901760, %v7262_v17 }
 0x11e   :  { %6025 = vmatprep.subr.mxu0 %v5942_v26  ;;  %5652 = vmatmul.mubr.f32.vlgmr.msra.gmra.mxu1 %v33487_v36  ;;  %v6408_v36 = vand.u32 4294901760, %v6407_v25 }
 0x11f   :  { %5905 = vmatmul.mubr.f32.vlgmr.msra.gmra.mxu0 %v33612_v27  ;;  %5769 = vmatpush1.msra.mxu1 %v33552_v57  ;;  %v7259_v57 = vsel %vm100_vm2, %v7251_v54, 0  ;;  %v7385_v63 = vsub.f32 %v7262_v17, %v33692_v56 }
 0x120   :  { %5802 = vmatprep.mubr.f32.mxu1 %v38614_v0  ;;  %6028 = vmatpush1.msra.mxu0 %v5948_v32  ;;  %v6409_v47 = vsub.f32 %v6407_v25, %v6408_v36  ;;  %v33706_v62 = vand.u32 4294901760, %v7259_v57 }
 0x121   :  { %6061 = vmatprep.mubr.f32.mxu0 %v38614_v0  ;;  %5946 = vmatprep.subr.mxu1 %v5945_v23  ;;  %v7386_v26 = vand.u32 4294901760, %v7385_v63  ;;  %v7274_v23 = vsel %vm100_vm2, %v7252_v14, 0 }
 0x122   :  { %6179 = vmatprep.subr.mxu0 %v5943_v34  ;;  %5804 = vmatmul.mubr.f32.vlgmr.msra.gmra.mxu1 %v33456_v18  ;;  %v5831_v18 = vsel %vm100_vm2, %v33051_v6, 0  ;;  %v6410_v7 = vand.u32 4294901760, %v6409_v47  ;;  %v6880_v6 = vsub.f32 %v6878_v52, %v6879_v55  ;;  %v7391_v20 = vsub.f32 %v7259_v57, %v33706_v62  ;;  %v31601_v47 = vld [vmem:[%s38610_s3 + $0x30] sm:$0xff] }
 0x123   :  { %6064 = vmatmul.mubr.f32.vlgmr.msra.gmra.mxu0 %v33581_v21  ;;  %5952 = vmatpush1.msra.mxu1 %v5951_v43  ;;  %v33652_v16 = vand.u32 4294901760, %v5831_v18  ;;  %v33739_v34 = vand.u32 4294901760, %v7346_v24  ;;  %v7387_v4 = vsub.f32 %v7385_v63, %v7386_v26  ;;  %v8684_v24 = vpop.permute.xlu1 %8683 }
 0x124   :  { %5985 = vmatprep.mubr.f32.mxu1 %v38614_v0  ;;  %6183 = vmatpush1.msra.mxu0 %v5949_v37  ;;  %v7392_v32 = vand.u32 4294901760, %v7391_v20 }
 0x125   :  { %6216 = vmatprep.mubr.f32.mxu0 %v38614_v0  ;;  %6101 = vmatprep.subr.mxu1 %v33576_v19  ;;  %v6872_v51 = vsub.f32 %v5831_v18, %v33652_v16 }
 0x126   :  { %6329 = vmatprep.subr.mxu0 %v33620_v41  ;;  %5987 = vmatmul.mubr.f32.vlgmr.msra.gmra.mxu1 %v33568_v2  ;;  %v7393_v39 = vsub.f32 %v7391_v20, %v7392_v32 }
 0x127   :  { %6218 = vmatmul.mubr.f32.vlgmr.msra.gmra.mxu0 %v33568_v2  ;;  %6103 = vmatpush1.msra.mxu1 %v33585_v22  ;;  %v6873_v3 = vand.u32 4294901760, %v6872_v51 }
 0x128   :  { %6136 = vmatprep.mubr.f32.mxu1 %v38614_v0  ;;  %6331 = vmatpush1.msra.mxu0 %v33623_v42 }
 0x129   :  { %6364 = vmatprep.mubr.f32.mxu0 %v38614_v0  ;;  %6255 = vmatprep.subr.mxu1 %v33576_v19  ;;  %v6874_v58 = vsub.f32 %v6872_v51, %v6873_v3  ;;  %v6881_v19 = vand.u32 4294901760, %v6880_v6 }
 0x12a   :  { %6140 = vmatmul.mubr.f32.vlgmr.msra.gmra.mxu1 %v33594_v29  ;;  %6490 = vmatprep.subr.mxu0 %v6407_v25 }
 0x12b   :  { %6370 = vmatmul.mubr.f32.vlgmr.msra.gmra.mxu0 %v33612_v27  ;;  %6257 = vmatpush1.msra.mxu1 %v33585_v22  ;;  %v6875_v1 = vand.u32 4294901760, %v6874_v58  ;;  %v7268_v22 = vsel %vm100_vm2, %v7248_v10, 0 }
 0x12c   :  { %6290 = vmatprep.mubr.f32.mxu1 %v38614_v0  ;;  %6493 = vmatpush1.msra.mxu0 %v6413_v44  ;;  %v33766_v44 = vand.u32 4294901760, %v7274_v23 }
 0x12d   :  { %6526 = vmatprep.mubr.f32.mxu0 %v38614_v0  ;;  %6411 = vmatprep.subr.mxu1 %v6410_v7 }
 0x12e   :  { %6292 = vmatmul.mubr.f32.vlgmr.msra.gmra.mxu1 %v33568_v2  ;;  %6644 = vmatprep.subr.mxu0 %v6408_v36  ;;  %v33781_v48 = vsub.f32 %v7274_v23, %v33766_v44 }
 0x12f   :  { %6529 = vmatmul.mubr.f32.vlgmr.msra.gmra.mxu0 %v33581_v21  ;;  %6417 = vmatpush1.msra.mxu1 %v6416_v31  ;;  %v8699_v31 = vsel %vm96_vm0, %v31601_v47, 0 }
 0x130   :  { %6450 = vmatprep.mubr.f32.mxu1 %v38614_v0  ;;  %6648 = vmatpush1.msra.mxu0 %v6414_v45  ;;  %v8680_v45 = vpop.permute.xlu0 %8679  ;;  %v8316_v12 = vand.u32 4294901760, %v33781_v48  ;;  %v33807_v17 = vand.u32 4294901760, %v8699_v31 }
 0x131   :  { %6681 = vmatprep.mubr.f32.mxu0 %v38614_v0  ;;  %6566 = vmatprep.subr.mxu1 %v33620_v41  ;;  %v8693_v7 = vsel %vm8689_vm7, %v8680_v45, %v33789_v8 }
 0x132   :  { %6452 = vmatmul.mubr.f32.vlgmr.msra.gmra.mxu1 %v33568_v2  ;;  %6794 = vmatprep.subr.mxu0 %v33652_v16  ;;  %v8705_v11 = vsel %vm100_vm2, %v8693_v7, 0  ;;  %v8317_v61 = vsub.f32 %v33781_v48, %v8316_v12  ;;  %v33824_v10 = vsub.f32 %v8699_v31, %v33807_v17 }
 0x133   :  { %6683 = vmatmul.mubr.f32.vlgmr.msra.gmra.mxu0 %v33568_v2  ;;  %6568 = vmatpush1.msra.mxu1 %v33623_v42  ;;  %v33815_v6 = vand.u32 4294901760, %v8705_v11 }
 0x134   :  { %6601 = vmatprep.mubr.f32.mxu1 %v38614_v0  ;;  %6796 = vmatpush1.msra.mxu0 %v33656_v50  ;;  %v33796_v30 = vpop.permute.xlu0 %8677 }
 0x135   :  { %6829 = vmatprep.mubr.f32.mxu0 %v38614_v0  ;;  %6720 = vmatprep.subr.mxu1 %v33620_v41  ;;  %v7856_v41 = vsub.f32 %v7265_v33, %v33745_v38  ;;  %v8318_v33 = vand.u32 4294901760, %v8317_v61 }
 0x136   :  { %6605 = vmatmul.mubr.f32.vlgmr.msra.gmra.mxu1 %v33594_v29  ;;  %6955 = vmatprep.subr.mxu0 %v6872_v51 }
 0x137   :  { %6835 = vmatmul.mubr.f32.vlgmr.msra.gmra.mxu0 %v33612_v27  ;;  %6722 = vmatpush1.msra.mxu1 %v33623_v42  ;;  %v7388_v27 = vand.u32 4294901760, %v7387_v4  ;;  %v7247_v42 = vsel %vm7246_vm6, %v33702_v60, %v7245_v35  ;;  %v7857_v25 = vand.u32 4294901760, %v7856_v41 }
 0x138   :  { %6755 = vmatprep.mubr.f32.mxu1 %v38614_v0  ;;  %6958 = vmatpush1.msra.mxu0 %v6878_v52 }
 0x139   :  { %6991 = vmatprep.mubr.f32.mxu0 %v38614_v0  ;;  %7109 = vmatprep.subr.mxu0 %v6873_v3 }
 0x13a   :  { %6757 = vmatmul.mubr.f32.vlgmr.msra.gmra.mxu1 %v33568_v2  ;;  %6876 = vmatprep.subr.mxu1 %v6875_v1 }
 0x13b   :  { %6994 = vmatmul.mubr.f32.vlgmr.msra.gmra.mxu0 %v33581_v21  ;;  %6882 = vmatpush1.msra.mxu1 %v6881_v19  ;;  %v33732_v21 = vand.u32 4294901760, %v7268_v22  ;;  %v33826_v19 = vpop.permute.xlu0 %8685 }
 0x13c   :  { %7113 = vmatpush1.msra.mxu0 %v6879_v55  ;;  %6915 = vmatprep.mubr.f32.mxu1 %v38614_v0  ;;  %v8694_v55 = vsel %vm8689_vm7, %v33796_v30, %v8680_v45 }
 0x13d   :  { %7146 = vmatprep.mubr.f32.mxu0 %v38614_v0  ;;  %7307 = vmatprep.subr.mxu0 %v33692_v56  ;;  %v7850_v37 = vsub.f32 %v7268_v22, %v33732_v21 }
 0x13e   :  { %6917 = vmatmul.mubr.f32.vlgmr.msra.gmra.mxu1 %v33568_v2  ;;  %7031 = vmatprep.subr.mxu1 %v33652_v16 }
 0x13f   :  { %7148 = vmatmul.mubr.f32.vlgmr.msra.gmra.mxu0 %v33568_v2  ;;  %7033 = vmatpush1.msra.mxu1 %v33656_v50  ;;  %v7851_v40 = vand.u32 4294901760, %v7850_v37 }
 0x140   :  { %7309 = vmatpush1.msra.mxu0 %v33706_v62  ;;  %7066 = vmatprep.mubr.f32.mxu1 %v38614_v0 }
 0x141   :  { %7468 = vmatprep.subr.mxu0 %v7385_v63  ;;  %7185 = vmatprep.subr.mxu1 %v33652_v16  ;;  %v7852_v43 = vsub.f32 %v7850_v37, %v7851_v40  ;;  %v7858_v16 = vsub.f32 %v7856_v41, %v7857_v25  ;;  %v8702_v63 = vsel %vm100_vm2, %v8694_v55, 0 }
 0x142   :  { %7342 = vmatprep.mubr.f32.mxu0 %v38614_v0  ;;  %7070 = vmatmul.mubr.f32.vlgmr.msra.gmra.mxu1 %v33594_v29  ;;  %v7394_v29 = vand.u32 4294901760, %v7393_v39  ;;  %v33841_v39 = vsub.f32 %v8705_v11, %v33815_v6 }
 0x143   :  { %7348 = vmatmul.mubr.f32.vlgmr.msra.gmra.mxu0 %v33739_v34  ;;  %7187 = vmatpush1.msra.mxu1 %v33656_v50  ;;  %v7853_v46 = vand.u32 4294901760, %v7852_v43  ;;  %v7859_v53 = vand.u32 4294901760, %v7858_v16 }
 0x144   :  { %7471 = vmatpush1.msra.mxu0 %v7391_v20  ;;  %7389 = vmatprep.subr.mxu1 %v7388_v27 }
 0x145   :  { %7622 = vmatprep.subr.mxu0 %v7386_v26  ;;  %7220 = vmatprep.mubr.f32.mxu1 %v38614_v0 }
 0x146   :  { %7504 = vmatprep.mubr.f32.mxu0 %v38614_v0  ;;  %7222 = vmatmul.mubr.f32.vlgmr.msra.gmra.mxu1 %v33568_v2  ;;  %v7271_v2 = vsel %vm100_vm2, %v7247_v42, 0 }
 0x147   :  { %7507 = vmatmul.mubr.f32.vlgmr.msra.gmra.mxu0 %v33698_v59  ;;  %7395 = vmatpush1.msra.mxu1 %v7394_v29  ;;  %v33783_v49 = vand.u32 4294901760, %v7271_v2 }
 0x148   :  { %7626 = vmatpush1.msra.mxu0 %v7392_v32  ;;  %7544 = vmatprep.subr.mxu1 %v33692_v56  ;;  %v33832_v32 = vand.u32 4294901760, %v8702_v63 }
 0x149   :  { %7428 = vmatprep.mubr.f32.mxu1 %v38614_v0  ;;  %7659 = vmatprep.mubr.f32.mxu0 %v38614_v0  ;;  %v33799_v52 = vsub.f32 %v7271_v2, %v33783_v49 }
 0x14a   :  { %7772 = vmatprep.subr.mxu0 %v33732_v21  ;;  %7430 = vmatmul.mubr.f32.vlgmr.msra.gmra.mxu1 %v33680_v9 }
 0x14b   :  { %7661 = vmatmul.mubr.f32.vlgmr.msra.gmra.mxu0 %v33680_v9  ;;  %7546 = vmatpush1.msra.mxu1 %v33706_v62  ;;  %v8322_v58 = vand.u32 4294901760, %v33799_v52 }
 0x14c   :  { %7774 = vmatpush1.msra.mxu0 %v33745_v38  ;;  %7698 = vmatprep.subr.mxu1 %v33692_v56 }
 0x14d   :  { %7933 = vmatprep.subr.mxu0 %v7850_v37  ;;  %7579 = vmatprep.mubr.f32.mxu1 %v38614_v0  ;;  %v8323_v37 = vsub.f32 %v33799_v52, %v8322_v58 }
 0x14e   :  { %v192_v36 = vpop.f32.mrf.mxu0  ;;  %7807 = vmatprep.mubr.f32.mxu0 %v38614_v0  ;;  %7583 = vmatmul.mubr.f32.vlgmr.msra.gmra.mxu1 %v33713_v5 }
 0x14f   :  { %7813 = vmatmul.mubr.f32.vlgmr.msra.gmra.mxu0 %v33739_v34  ;;  %7700 = vmatpush1.msra.mxu1 %v33706_v62 }
 0x150   :  { %v194_v18 = vpop.f32.mrf.mxu0  ;;  %7936 = vmatpush1.msra.mxu0 %v7856_v41  ;;  %7854 = vmatprep.subr.mxu1 %v7853_v46  ;;  %v8829_v46 = vand.u32 4294901760, %v33841_v39 }
 0x151   :  { %8087 = vmatprep.subr.mxu0 %v7851_v40  ;;  %7733 = vmatprep.mubr.f32.mxu1 %v38614_v0  ;;  %v33846_v40 = vand.u32 4294901760, %v33824_v10 }
 0x152   :  { %v351_v50 = vpop.f32.mrf.mxu0  ;;  %7969 = vmatprep.mubr.f32.mxu0 %v38614_v0  ;;  %7735 = vmatmul.mubr.f32.vlgmr.msra.gmra.mxu1 %v33680_v9  ;;  %v8830_v11 = vsub.f32 %v33841_v39, %v8829_v46 }
 0x153   :  { %7972 = vmatmul.mubr.f32.vlgmr.msra.gmra.mxu0 %v33698_v59  ;;  %7860 = vmatpush1.msra.mxu1 %v7859_v53 }
 0x154   :  { %v353_v51 = vpop.f32.mrf.mxu0  ;;  %8091 = vmatpush1.msra.mxu0 %v7857_v25  ;;  %8009 = vmatprep.subr.mxu1 %v33732_v21  ;;  %v8324_v25 = vand.u32 4294901760, %v8323_v37 }
 0x155   :  { %8237 = vmatprep.subr.mxu0 %v33766_v44  ;;  %7893 = vmatprep.mubr.f32.mxu1 %v38614_v0 }
 0x156   :  { %v505_v3 = vpop.f32.mrf.mxu0  ;;  %v274_v54 = vpop.f32.mrf.mxu1  ;;  %8124 = vmatprep.mubr.f32.mxu0 %v38614_v0  ;;  %7895 = vmatmul.mubr.f32.vlgmr.msra.gmra.mxu1 %v33680_v9 }
 0x157   :  { %v275_v56 = vadd.f32 %v274_v54, %v192_v36  ;;  %8126 = vmatmul.mubr.f32.vlgmr.msra.gmra.mxu0 %v33680_v9  ;;  %8011 = vmatpush1.msra.mxu1 %v33745_v38  ;;  %v8692_v36 = vsel %vm8689_vm7, %v33789_v8, %v8684_v24 }
 0x158   :  { %v507_v57 = vpop.f32.mrf.mxu0  ;;  %v276_v60 = vpop.f32.mrf.mxu1  ;;  %8239 = vmatpush1.msra.mxu0 %v33783_v49  ;;  %8163 = vmatprep.subr.mxu1 %v33732_v21  ;;  %v8691_v21 = vsel %vm8689_vm7, %v8684_v24, %v33826_v19 }
 0x159   :  { %v277_v62 = vadd.f32 %v276_v60, %v194_v18  ;;  %v352_v1 = vadd.f32 %v351_v50, %v275_v56  ;;  %8398 = vmatprep.subr.mxu0 %v33781_v48  ;;  %8044 = vmatprep.mubr.f32.mxu1 %v38614_v0  ;;  %v8711_v43 = vsel %vm100_vm2, %v8691_v21, 0  ;;  %v8789_v18 = vsub.f32 %v33824_v10, %v33846_v40 }
 0x15a   :  { %v427_v20 = vpop.f32.mrf.mxu1  ;;  %8272 = vmatprep.mubr.f32.mxu0 %v38614_v0  ;;  %8048 = vmatmul.mubr.f32.vlgmr.msra.gmra.mxu1 %v33713_v5  ;;  %v33868_v16 = vand.u32 4294901760, %v8711_v43 }
 0x15b   :  { %v657_v22 = vpop.f32.mrf.mxu0  ;;  %v428_v26 = vadd.f32 %v427_v20, %v352_v1  ;;  %v354_v28 = vadd.f32 %v353_v51, %v277_v62  ;;  %8278 = vmatmul.mubr.f32.vlgmr.msra.gmra.mxu0 %v33739_v34  ;;  %8165 = vmatpush1.msra.mxu1 %v33745_v38  ;;  %v33854_v34 = vsub.f32 %v8702_v63, %v33832_v32  ;;  %v8688_v51 = vpop.permute.xlu1 %8687 }
 0x15c   :  { %v429_v4 = vpop.f32.mrf.mxu1  ;;  %8401 = vmatpush1.msra.mxu0 %v33799_v52  ;;  %8319 = vmatprep.subr.mxu1 %v8318_v33  ;;  %v33884_v55 = vsub.f32 %v8711_v43, %v33868_v16  ;;  %v8695_v60 = vsel %vm8689_vm7, %v8688_v51, %v33796_v30 }
 0x15d   :  { %v659_v35 = vpop.f32.mrf.mxu0  ;;  %v430_v27 = vadd.f32 %v429_v4, %v354_v28  ;;  %v506_v14 = vadd.f32 %v505_v3, %v428_v26  ;;  %8552 = vmatprep.subr.mxu0 %v8316_v12  ;;  %8198 = vmatprep.mubr.f32.mxu1 %v38614_v0  ;;  %v8835_v8 = vand.u32 4294901760, %v33854_v34  ;;  %v33878_v12 = vand.u32 4294901760, %v8789_v18 }
 0x15e   :  { %v579_v41 = vpop.f32.mrf.mxu1  ;;  %8434 = vmatprep.mubr.f32.mxu0 %v38614_v0  ;;  %8200 = vmatmul.mubr.f32.vlgmr.msra.gmra.mxu1 %v33680_v9  ;;  %v9294_v24 = vand.u32 4294901760, %v33884_v55  ;;  %v8717_v26 = vsel %vm100_vm2, %v8695_v60, 0 }
 0x15f   :  { %v816_v29 = vpop.f32.mrf.mxu0  ;;  %v33850_v23 = vadd.f32 %v579_v41, %v506_v14  ;;  %v508_v42 = vadd.f32 %v507_v57, %v430_v27  ;;  %8437 = vmatmul.mubr.f32.vlgmr.msra.gmra.mxu0 %v33698_v59  ;;  %8325 = vmatpush1.msra.mxu1 %v8324_v25  ;;  %v8708_v59 = vsel %vm100_vm2, %v8692_v36, 0  ;;  %v8836_v63 = vsub.f32 %v33854_v34, %v8835_v8 }
 0x160   :  { %v581_v38 = vpop.f32.mrf.mxu1  ;;  %8556 = vmatpush1.msra.mxu0 %v8322_v58  ;;  %8474 = vmatprep.subr.mxu1 %v33766_v44  ;;  %v33888_v58 = vand.u32 4294901760, %v8708_v59  ;;  %v33913_v21 = vand.u32 4294901760, %v8717_v26  ;;  %v9295_v41 = vsub.f32 %v33884_v55, %v9294_v24 }
 0x161   :  { %v818_v2 = vpop.f32.mrf.mxu0  ;;  %v33863_v45 = vadd.f32 %v581_v38, %v508_v42  ;;  %8358 = vmatprep.mubr.f32.mxu1 %v38614_v0  ;;  %8589 = vmatprep.mubr.f32.mxu0 %v38614_v0  ;;  %v10123_v38 = vpop.permute.xlu0 %10122 }
 0x162   :  { %v739_v47 = vpop.f32.mrf.mxu1  ;;  %8750 = vmatprep.subr.mxu0 %v33815_v6  ;;  %8360 = vmatmul.mubr.f32.vlgmr.msra.gmra.mxu1 %v33680_v9  ;;  %v33905_v33 = vsub.f32 %v8708_v59, %v33888_v58  ;;  %v31602_v59 = vld [vmem:[%s38610_s3 + $0x38] sm:$0xff] }
 0x163   :  { %v970_v48 = vpop.f32.mrf.mxu0  ;;  %v740_v50 = vadd.f32 %v739_v47, %v657_v22  ;;  %8591 = vmatmul.mubr.f32.vlgmr.msra.gmra.mxu0 %v33680_v9  ;;  %8476 = vmatpush1.msra.mxu1 %v33783_v49 }
 0x164   :  { %v741_v7 = vpop.f32.mrf.mxu1  ;;  %8752 = vmatpush1.msra.mxu0 %v33832_v32  ;;  %8628 = vmatprep.subr.mxu1 %v33766_v44  ;;  %v8831_v44 = vand.u32 4294901760, %v8830_v11 }
 0x165   :  { %v972_v31 = vpop.f32.mrf.mxu0  ;;  %v742_v52 = vadd.f32 %v741_v7, %v659_v35  ;;  %v817_v53 = vadd.f32 %v816_v29, %v740_v50  ;;  %8911 = vmatprep.subr.mxu0 %v33841_v39  ;;  %8509 = vmatprep.mubr.f32.mxu1 %v38614_v0  ;;  %v8690_v39 = vsel %vm8689_vm7, %v33826_v19, %v8688_v51  ;;  %v9300_v29 = vand.u32 4294901760, %v33905_v33  ;;  %v33961_v60 = vpop.permute.xlu0 %10120 }
 0x166   :  { %v892_v3 = vpop.f32.mrf.mxu1  ;;  %8785 = vmatprep.mubr.f32.mxu0 %v38614_v0  ;;  %8513 = vmatmul.mubr.f32.vlgmr.msra.gmra.mxu1 %v33713_v5  ;;  %v8714_v43 = vsel %vm100_vm2, %v8690_v39, 0 }
 0x167   :  { %v1122_v54 = vpop.f32.mrf.mxu0  ;;  %v893_v56 = vadd.f32 %v892_v3, %v817_v53  ;;  %v819_v57 = vadd.f32 %v818_v2, %v742_v52  ;;  %8791 = vmatmul.mubr.f32.vlgmr.msra.gmra.mxu0 %v33878_v12  ;;  %8630 = vmatpush1.msra.mxu1 %v33783_v49  ;;  %v8837_v49 = vand.u32 4294901760, %v8836_v63  ;;  %v33930_v2 = vsub.f32 %v8717_v26, %v33913_v21  ;;  %v33949_v53 = vpop.permute.xlu1 %10124 }
 0x168   :  { %v894_v61 = vpop.f32.mrf.mxu1  ;;  %8914 = vmatpush1.msra.mxu0 %v33854_v34  ;;  %8832 = vmatprep.subr.mxu1 %v8831_v44 }
 0x169   :  { %v1124_v62 = vpop.f32.mrf.mxu0  ;;  %v895_v1 = vadd.f32 %v894_v61, %v819_v57  ;;  %v971_v20 = vadd.f32 %v970_v48, %v893_v56  ;;  %9065 = vmatprep.subr.mxu0 %v8829_v46  ;;  %8663 = vmatprep.mubr.f32.mxu1 %v38614_v0  ;;  %v9296_v46 = vand.u32 4294901760, %v9295_v41  ;;  %v10142_v56 = vsel %vm96_vm0, %v31602_v59, 0 }
 0x16a   :  { %v1044_v30 = vpop.f32.mrf.mxu1  ;;  %8947 = vmatprep.mubr.f32.mxu0 %v38614_v0  ;;  %8665 = vmatmul.mubr.f32.vlgmr.msra.gmra.mxu1 %v33680_v9 }
 0x16b   :  { %v1281_v22 = vpop.f32.mrf.mxu0  ;;  %v33902_v28 = vadd.f32 %v1044_v30, %v971_v20  ;;  %v973_v5 = vadd.f32 %v972_v31, %v895_v1  ;;  %8950 = vmatmul.mubr.f32.vlgmr.msra.gmra.mxu0 %v33824_v10  ;;  %8838 = vmatpush1.msra.mxu1 %v8837_v49  ;;  %v9301_v31 = vsub.f32 %v33905_v33, %v9300_v29  ;;  %v33974_v20 = vand.u32 4294901760, %v10142_v56 }
 0x16c   :  { %v1046_v4 = vpop.f32.mrf.mxu1  ;;  %9069 = vmatpush1.msra.mxu0 %v8835_v8  ;;  %8987 = vmatprep.subr.mxu1 %v33815_v6  ;;  %v33941_v8 = vand.u32 4294901760, %v8714_v43 }
 0x16d   :  { %v1283_v35 = vpop.f32.mrf.mxu0  ;;  %v33911_v37 = vadd.f32 %v1046_v4, %v973_v5  ;;  %8871 = vmatprep.mubr.f32.mxu1 %v38614_v0  ;;  %9102 = vmatprep.mubr.f32.mxu0 %v38614_v0  ;;  %v33993_v41 = vsub.f32 %v10142_v56, %v33974_v20 }
 0x16e   :  { %v1204_v27 = vpop.f32.mrf.mxu1  ;;  %9215 = vmatprep.subr.mxu0 %v33868_v16  ;;  %8873 = vmatmul.mubr.f32.vlgmr.msra.gmra.mxu1 %v33807_v17  ;;  %v33965_v61 = vsub.f32 %v8714_v43, %v33941_v8 }
 0x16f   :  { %v1435_v14 = vpop.f32.mrf.mxu0  ;;  %v1205_v9 = vadd.f32 %v1204_v27, %v1122_v54  ;;  %9104 = vmatmul.mubr.f32.vlgmr.msra.gmra.mxu0 %v33807_v17  ;;  %8989 = vmatpush1.msra.mxu1 %v33832_v32  ;;  %v10136_v54 = vsel %vm10132_vm8, %v10123_v38, %v33949_v53 }
 0x170   :  { %v1206_v19 = vpop.f32.mrf.mxu1  ;;  %9217 = vmatpush1.msra.mxu0 %v33888_v58  ;;  %9141 = vmatprep.subr.mxu1 %v33815_v6  ;;  %v10148_v1 = vsel %vm100_vm2, %v10136_v54, 0 }
 0x171   :  { %v1437_v42 = vpop.f32.mrf.mxu0  ;;  %v1207_v34 = vadd.f32 %v1206_v19, %v1124_v62  ;;  %v1282_v25 = vadd.f32 %v1281_v22, %v1205_v9  ;;  %9376 = vmatprep.subr.mxu0 %v33884_v55  ;;  %9022 = vmatprep.mubr.f32.mxu1 %v38614_v0  ;;  %v9302_v62 = vand.u32 4294901760, %v9301_v31  ;;  %v33985_v49 = vand.u32 4294901760, %v10148_v1  ;;  %v33995_v9 = vpop.permute.xlu0 %10128 }
 0x172   :  { %v1357_v36 = vpop.f32.mrf.mxu1  ;;  %9250 = vmatprep.mubr.f32.mxu0 %v38614_v0  ;;  %9026 = vmatmul.mubr.f32.vlgmr.msra.gmra.mxu1 %v33846_v40 }
 0x173   :  { %v1608_v18 = vpop.f32.mrf.mxu0  ;;  %v1358_v47 = vadd.f32 %v1357_v36, %v1282_v25  ;;  %v1284_v50 = vadd.f32 %v1283_v35, %v1207_v34  ;;  %9256 = vmatmul.mubr.f32.vlgmr.msra.gmra.mxu0 %v33878_v12  ;;  %9143 = vmatpush1.msra.mxu1 %v33832_v32  ;;  %v9759_v32 = vand.u32 4294901760, %v33930_v2  ;;  %v34003_v36 = vsub.f32 %v10148_v1, %v33985_v49 }
 0x174   :  { %v1609_v48 = vadd.f32 %v1608_v18, %v33850_v23  ;;  %v1359_v7 = vpop.f32.mrf.mxu1  ;;  %9379 = vmatpush1.msra.mxu0 %v33905_v33  ;;  %9297 = vmatprep.subr.mxu1 %v9296_v46  ;;  %v9765_v33 = vand.u32 4294901760, %v33965_v61 }
 0x175   :  { %v1610_v6 = vpop.f32.mrf.mxu0  ;;  %v1360_v23 = vadd.f32 %v1359_v7, %v1284_v50  ;;  %v1436_v52 = vadd.f32 %v1435_v14, %v1358_v47  ;;  %9530 = vmatprep.subr.mxu0 %v9294_v24  ;;  %9176 = vmatprep.mubr.f32.mxu1 %v38614_v0  ;;  %v10137_v24 = vsel %vm10132_vm8, %v33961_v60, %v10123_v38  ;;  %v34017_v7 = vand.u32 4294901760, %v33993_v41 }
 0x176   :  { %v1611_v51 = vadd.f32 %v1610_v6, %v33863_v45  ;;  %v1509_v11 = vpop.f32.mrf.mxu1  ;;  %9412 = vmatprep.mubr.f32.mxu0 %v38614_v0  ;;  %9178 = vmatmul.mubr.f32.vlgmr.msra.gmra.mxu1 %v33807_v17  ;;  %v9760_v5 = vsub.f32 %v33930_v2, %v9759_v32  ;;  %v10145_v27 = vsel %vm100_vm2, %v10137_v24, 0  ;;  %v10272_v56 = vand.u32 4294901760, %v34003_v36 }
 0x177   :  { %v1767_v3 = vpop.f32.mrf.mxu0  ;;  %v33959_v45 = vadd.f32 %v1509_v11, %v1436_v52  ;;  %v1438_v57 = vadd.f32 %v1437_v42, %v1360_v23  ;;  %9415 = vmatmul.mubr.f32.vlgmr.msra.gmra.mxu0 %v33824_v10  ;;  %9303 = vmatpush1.msra.mxu1 %v9302_v62  ;;  %v10127_v42 = vpop.permute.xlu1 %10126  ;;  %v34005_v18 = vand.u32 4294901760, %v10145_v27  ;;  %v10232_v54 = vsub.f32 %v33993_v41, %v34017_v7 }
 0x178   :  { %v1511_v63 = vpop.f32.mrf.mxu1  ;;  %9534 = vmatpush1.msra.mxu0 %v9300_v29  ;;  %9452 = vmatprep.subr.mxu1 %v33868_v16  ;;  %v9761_v25 = vand.u32 4294901760, %v9760_v5  ;;  %v10273_v24 = vsub.f32 %v34003_v36, %v10272_v56 }
 0x179   :  { %v1769_v44 = vpop.f32.mrf.mxu0  ;;  %v33971_v55 = vadd.f32 %v1511_v63, %v1438_v57  ;;  %9680 = vmatprep.subr.mxu0 %v33913_v21  ;;  %9336 = vmatprep.mubr.f32.mxu1 %v38614_v0 }
 0x17a   :  { %v1690_v30 = vpop.f32.mrf.mxu1  ;;  %9567 = vmatprep.mubr.f32.mxu0 %v38614_v0  ;;  %9338 = vmatmul.mubr.f32.vlgmr.msra.gmra.mxu1 %v33807_v17 }
 0x17b   :  { %v1921_v22 = vpop.f32.mrf.mxu0  ;;  %v1691_v26 = vadd.f32 %v1690_v30, %v1609_v48  ;;  %9569 = vmatmul.mubr.f32.vlgmr.msra.gmra.mxu0 %v33807_v17  ;;  %9454 = vmatpush1.msra.mxu1 %v33888_v58  ;;  %v10134_v48 = vsel %vm10132_vm8, %v10127_v42, %v33995_v9 }
 0x17c   :  { %v1692_v4 = vpop.f32.mrf.mxu1  ;;  %9682 = vmatpush1.msra.mxu0 %v33941_v8  ;;  %9606 = vmatprep.subr.mxu1 %v33868_v16  ;;  %v9766_v16 = vsub.f32 %v33965_v61, %v9765_v33 }
 0x17d   :  { %v1923_v35 = vpop.f32.mrf.mxu0  ;;  %v1693_v39 = vadd.f32 %v1692_v4, %v1611_v51  ;;  %v1768_v14 = vadd.f32 %v1767_v3, %v1691_v26  ;;  %9841 = vmatprep.subr.mxu0 %v33930_v2  ;;  %9487 = vmatprep.mubr.f32.mxu1 %v38614_v0  ;;  %v10154_v51 = vsel %vm100_vm2, %v10134_v48, 0  ;;  %v10135_v2 = vsel %vm10132_vm8, %v33949_v53, %v10127_v42  ;;  %v10131_v4 = vpop.permute.xlu1 %10130 }
 0x17e   :  { %v1843_v29 = vpop.f32.mrf.mxu1  ;;  %9715 = vmatprep.mubr.f32.mxu0 %v38614_v0  ;;  %9491 = vmatmul.mubr.f32.vlgmr.msra.gmra.mxu1 %v33846_v40 }
 0x17f   :  { %v2073_v19 = vpop.f32.mrf.mxu0  ;;  %v1844_v43 = vadd.f32 %v1843_v29, %v1768_v14  ;;  %v1770_v38 = vadd.f32 %v1769_v44, %v1693_v39  ;;  %9721 = vmatmul.mubr.f32.vlgmr.msra.gmra.mxu0 %v33878_v12  ;;  %9608 = vmatpush1.msra.mxu1 %v33888_v58  ;;  %v9767_v58 = vand.u32 4294901760, %v9766_v16 }
 0x180   :  { %v2074_v34 = vadd.f32 %v2073_v19, %v33902_v28  ;;  %v1845_v46 = vpop.f32.mrf.mxu1  ;;  %9844 = vmatpush1.msra.mxu0 %v33965_v61  ;;  %9762 = vmatprep.subr.mxu1 %v9761_v25  ;;  %v34041_v61 = vand.u32 4294901760, %v10154_v51  ;;  %v10138_v25 = vsel %vm10132_vm8, %v10131_v4, %v33961_v60 }
 0x181   :  { %v2075_v47 = vpop.f32.mrf.mxu0  ;;  %v1846_v28 = vadd.f32 %v1845_v46, %v1770_v38  ;;  %v1922_v59 = vadd.f32 %v1921_v22, %v1844_v43  ;;  %9995 = vmatprep.subr.mxu0 %v9759_v32  ;;  %9641 = vmatprep.mubr.f32.mxu1 %v38614_v0  ;;  %v34051_v22 = vand.u32 4294901760, %v10232_v54  ;;  %v10160_v48 = vsel %vm100_vm2, %v10138_v25, 0 }
 0x182   :  { %v2076_v50 = vadd.f32 %v2075_v47, %v33911_v37  ;;  %v1995_v6 = vpop.f32.mrf.mxu1  ;;  %v34027_v37 = vsub.f32 %v10145_v27, %v34005_v18  ;;  %9877 = vmatprep.mubr.f32.mxu0 %v38614_v0  ;;  %9643 = vmatmul.mubr.f32.vlgmr.msra.gmra.mxu1 %v33807_v17 }
 0x183   :  { %v2232_v31 = vpop.f32.mrf.mxu0  ;;  %v34023_v23 = vadd.f32 %v1995_v6, %v1922_v59  ;;  %v1924_v12 = vadd.f32 %v1923_v35, %v1846_v28  ;;  %9880 = vmatmul.mubr.f32.vlgmr.msra.gmra.mxu0 %v33824_v10  ;;  %9768 = vmatpush1.msra.mxu1 %v9767_v58  ;;  %v10151_v10 = vsel %vm100_vm2, %v10135_v2, 0 }
 0x184   :  { %v1997_v52 = vpop.f32.mrf.mxu1  ;;  %9999 = vmatpush1.msra.mxu0 %v9765_v33  ;;  %9917 = vmatprep.subr.mxu1 %v33913_v21  ;;  %v10278_v62 = vand.u32 4294901760, %v34027_v37  ;;  %v34057_v33 = vsub.f32 %v10154_v51, %v34041_v61  ;;  %v34062_v14 = vand.u32 4294901760, %v10151_v10  ;;  %v34095_v51 = vand.u32 4294901760, %v10160_v48 }
 0x185   :  { %v2234_v11 = vpop.f32.mrf.mxu0  ;;  %v34036_v3 = vadd.f32 %v1997_v52, %v1924_v12  ;;  %9801 = vmatprep.mubr.f32.mxu1 %v38614_v0  ;;  %10032 = vmatprep.mubr.f32.mxu0 %v38614_v0 }
 0x186   :  { %v2155_v57 = vpop.f32.mrf.mxu1  ;;  %10193 = vmatprep.subr.mxu0 %v33985_v49  ;;  %9803 = vmatmul.mubr.f32.vlgmr.msra.gmra.mxu1 %v33807_v17  ;;  %v10279_v42 = vsub.f32 %v34027_v37, %v10278_v62  ;;  %v10737_v47 = vand.u32 4294901760, %v34057_v33 }
 0x187   :  { %v2386_v32 = vpop.f32.mrf.mxu0  ;;  %v2156_v53 = vadd.f32 %v2155_v57, %v2074_v34  ;;  %10034 = vmatmul.mubr.f32.vlgmr.msra.gmra.mxu0 %v33807_v17  ;;  %9919 = vmatpush1.msra.mxu1 %v33941_v8 }
 0x188   :  { %v2157_v63 = vpop.f32.mrf.mxu1  ;;  %10195 = vmatpush1.msra.mxu0 %v34005_v18  ;;  %10071 = vmatprep.subr.mxu1 %v33913_v21  ;;  %v10274_v21 = vand.u32 4294901760, %v10273_v24  ;;  %v10280_v60 = vand.u32 4294901760, %v10279_v42  ;;  %v10738_v12 = vsub.f32 %v34057_v33, %v10737_v47 }
 0x189   :  { %v2388_v44 = vpop.f32.mrf.mxu0  ;;  %v2158_v1 = vadd.f32 %v2157_v63, %v2076_v50  ;;  %v2233_v30 = vadd.f32 %v2232_v31, %v2156_v53  ;;  %10354 = vmatprep.subr.mxu0 %v34003_v36  ;;  %9952 = vmatprep.mubr.f32.mxu1 %v38614_v0  ;;  %v10133_v50 = vsel %vm10132_vm8, %v33995_v9, %v10131_v4 }
 0x18a   :  { %v2308_v26 = vpop.f32.mrf.mxu1  ;;  %10228 = vmatprep.mubr.f32.mxu0 %v38614_v0  ;;  %9956 = vmatmul.mubr.f32.vlgmr.msra.gmra.mxu1 %v33846_v40  ;;  %v10157_v58 = vsel %vm100_vm2, %v10133_v50, 0  ;;  %v10739_v53 = vand.u32 4294901760, %v10738_v12 }
 0x18b   :  { %v2538_v5 = vpop.f32.mrf.mxu0  ;;  %v2309_v35 = vadd.f32 %v2308_v26, %v2233_v30  ;;  %v2235_v27 = vadd.f32 %v2234_v11, %v2158_v1  ;;  %10234 = vmatmul.mubr.f32.vlgmr.msra.gmra.mxu0 %v34051_v22  ;;  %10073 = vmatpush1.msra.mxu1 %v33941_v8 }
 0x18c   :  { %v2539_v39 = vadd.f32 %v2538_v5, %v33959_v45  ;;  %v2310_v29 = vpop.f32.mrf.mxu1  ;;  %10357 = vmatpush1.msra.mxu0 %v34027_v37  ;;  %10275 = vmatprep.subr.mxu1 %v10274_v21 }
 0x18d   :  { %v2540_v19 = vpop.f32.mrf.mxu0  ;;  %v2311_v43 = vadd.f32 %v2310_v29, %v2235_v27  ;;  %v2387_v45 = vadd.f32 %v2386_v32, %v2309_v35  ;;  %10508 = vmatprep.subr.mxu0 %v10272_v56  ;;  %10106 = vmatprep.mubr.f32.mxu1 %v38614_v0  ;;  %v31603_v56 = vld [vmem:[%s38610_s3 + $0x40] sm:$0xff]  ;;  %v34125_v35 = vpop.permute.xlu1 %11567 }
 0x18e   :  { %v2541_v34 = vadd.f32 %v2540_v19, %v33971_v55  ;;  %v2460_v38 = vpop.f32.mrf.mxu1  ;;  %v34079_v55 = vsub.f32 %v10151_v10, %v34062_v14  ;;  %10390 = vmatprep.mubr.f32.mxu0 %v38614_v0  ;;  %10108 = vmatmul.mubr.f32.vlgmr.msra.gmra.mxu1 %v33807_v17  ;;  %v34110_v10 = vsub.f32 %v10160_v48, %v34095_v51  ;;  %v11585_v24 = vsel %vm96_vm0, %v31603_v56, 0 }
 0x18f   :  { %v2697_v36 = vpop.f32.mrf.mxu0  ;;  %v34075_v40 = vadd.f32 %v2460_v38, %v2387_v45  ;;  %v2389_v46 = vadd.f32 %v2388_v44, %v2311_v43  ;;  %10393 = vmatmul.mubr.f32.vlgmr.msra.gmra.mxu0 %v33993_v41  ;;  %10281 = vmatpush1.msra.mxu1 %v10280_v60  ;;  %v34135_v21 = vand.u32 4294901760, %v11585_v24 }
 0x190   :  { %v2462_v8 = vpop.f32.mrf.mxu1  ;;  %10512 = vmatpush1.msra.mxu0 %v10278_v62  ;;  %10430 = vmatprep.subr.mxu1 %v33985_v49  ;;  %v10743_v17 = vand.u32 4294901760, %v34079_v55  ;;  %v34112_v62 = vand.u32 4294901760, %v10157_v58 }
 0x191   :  { %v2699_v16 = vpop.f32.mrf.mxu0  ;;  %v34086_v28 = vadd.f32 %v2462_v8, %v2389_v46  ;;  %10314 = vmatprep.mubr.f32.mxu1 %v38614_v0  ;;  %10545 = vmatprep.mubr.f32.mxu0 %v38614_v0 }
 0x192   :  { %v2620_v59 = vpop.f32.mrf.mxu1  ;;  %10658 = vmatprep.subr.mxu0 %v34041_v61  ;;  %10316 = vmatmul.mubr.f32.vlgmr.msra.gmra.mxu1 %v33974_v20  ;;  %v10744_v44 = vsub.f32 %v34079_v55, %v10743_v17  ;;  %v34128_v27 = vsub.f32 %v10157_v58, %v34112_v62 }
 0x193   :  { %v2851_v6 = vpop.f32.mrf.mxu0  ;;  %v2621_v31 = vadd.f32 %v2620_v59, %v2539_v39  ;;  %10547 = vmatmul.mubr.f32.vlgmr.msra.gmra.mxu0 %v33974_v20  ;;  %10432 = vmatpush1.msra.mxu1 %v34005_v18  ;;  %v11566_v39 = vpop.permute.xlu0 %11565 }
 0x194   :  { %v2622_v9 = vpop.f32.mrf.mxu1  ;;  %10660 = vmatpush1.msra.mxu0 %v34062_v14  ;;  %10584 = vmatprep.subr.mxu1 %v33985_v49  ;;  %v11579_v19 = vsel %vm11575_vm9, %v11566_v39, %v34125_v35  ;;  %v11208_v46 = vand.u32 4294901760, %v34128_v27 }
 0x195   :  { %v2853_v37 = vpop.f32.mrf.mxu0  ;;  %v2698_v52 = vadd.f32 %v2697_v36, %v2621_v31  ;;  %v2623_v11 = vadd.f32 %v2622_v9, %v2541_v34  ;;  %10819 = vmatprep.subr.mxu0 %v34057_v33  ;;  %10465 = vmatprep.mubr.f32.mxu1 %v38614_v0  ;;  %v11202_v34 = vand.u32 4294901760, %v34110_v10  ;;  %v11591_v45 = vsel %vm100_vm2, %v11579_v19, 0 }
 0x196   :  { %v2773_v2 = vpop.f32.mrf.mxu1  ;;  %10693 = vmatprep.mubr.f32.mxu0 %v38614_v0  ;;  %10469 = vmatmul.mubr.f32.vlgmr.msra.gmra.mxu1 %v34017_v7  ;;  %v34151_v60 = vand.u32 4294901760, %v11591_v45 }
 0x197   :  { %v3045_v54 = vpop.f32.mrf.mxu0  ;;  %v2700_v57 = vadd.f32 %v2699_v16, %v2623_v11  ;;  %v2774_v32 = vadd.f32 %v2773_v2, %v2698_v52  ;;  %10699 = vmatmul.mubr.f32.vlgmr.msra.gmra.mxu0 %v34051_v22  ;;  %10586 = vmatpush1.msra.mxu1 %v34005_v18  ;;  %v10745_v18 = vand.u32 4294901760, %v10744_v44  ;;  %v34155_v48 = vpop.permute.xlu0 %11563  ;;  %v11203_v50 = vsub.f32 %v34110_v10, %v11202_v34 }
 0x198   :  { %v2775_v63 = vpop.f32.mrf.mxu1  ;;  %10822 = vmatpush1.msra.mxu0 %v34079_v55  ;;  %10740 = vmatprep.subr.mxu1 %v10739_v53  ;;  %v34149_v55 = vsub.f32 %v11585_v24, %v34135_v21  ;;  %v11209_v11 = vsub.f32 %v34128_v27, %v11208_v46 }
 0x199   :  { %v3047_v1 = vpop.f32.mrf.mxu0  ;;  %v2852_v30 = vadd.f32 %v2851_v6, %v2774_v32  ;;  %v2776_v49 = vadd.f32 %v2775_v63, %v2700_v57  ;;  %10973 = vmatprep.subr.mxu0 %v10737_v47  ;;  %10619 = vmatprep.mubr.f32.mxu1 %v38614_v0  ;;  %v11580_v6 = vsel %vm11575_vm9, %v34155_v48, %v11566_v39  ;;  %v11204_v56 = vand.u32 4294901760, %v11203_v50 }
 0x19a   :  { %v2925_v26 = vpop.f32.mrf.mxu1  ;;  %10855 = vmatprep.mubr.f32.mxu0 %v38614_v0  ;;  %10621 = vmatmul.mubr.f32.vlgmr.msra.gmra.mxu1 %v33974_v20  ;;  %v34172_v2 = vand.u32 4294901760, %v34149_v55 }
 0x19b   :  { %v3204_v5 = vpop.f32.mrf.mxu0  ;;  %v2854_v33 = vadd.f32 %v2853_v37, %v2776_v49  ;;  %v34123_v4 = vadd.f32 %v2925_v26, %v2852_v30  ;;  %10858 = vmatmul.mubr.f32.vlgmr.msra.gmra.mxu0 %v33993_v41  ;;  %10746 = vmatpush1.msra.mxu1 %v10745_v18  ;;  %v11570_v49 = vpop.permute.xlu1 %11569 }
 0x19c   :  { %v2927_v29 = vpop.f32.mrf.mxu1  ;;  %10977 = vmatpush1.msra.mxu0 %v10743_v17  ;;  %10895 = vmatprep.subr.mxu1 %v34041_v61  ;;  %v11588_v17 = vsel %vm100_vm2, %v11580_v6, 0  ;;  %v11578_v39 = vsel %vm11575_vm9, %v34125_v35, %v11570_v49  ;;  %v11572_v50 = vpop.permute.xlu0 %11571 }
 0x19d   :  { %v3206_v42 = vpop.f32.mrf.mxu0  ;;  %v34139_v43 = vadd.f32 %v2927_v29, %v2854_v33  ;;  %11123 = vmatprep.subr.mxu0 %v34095_v51  ;;  %10779 = vmatprep.mubr.f32.mxu1 %v38614_v0  ;;  %v34166_v58 = vand.u32 4294901760, %v11588_v17 }
 0x19e   :  { %v3127_v25 = vpop.f32.mrf.mxu1  ;;  %11010 = vmatprep.mubr.f32.mxu0 %v38614_v0  ;;  %10781 = vmatmul.mubr.f32.vlgmr.msra.gmra.mxu1 %v33974_v20 }
 0x19f   :  { %v3358_v38 = vpop.f32.mrf.mxu0  ;;  %v3128_v36 = vadd.f32 %v3127_v25, %v3045_v54  ;;  %11012 = vmatmul.mubr.f32.vlgmr.msra.gmra.mxu0 %v33974_v20  ;;  %10897 = vmatpush1.msra.mxu1 %v34062_v14 }
 0x1a0   :  { %v3129_v47 = vpop.f32.mrf.mxu1  ;;  %11125 = vmatpush1.msra.mxu0 %v34112_v62  ;;  %11049 = vmatprep.subr.mxu1 %v34041_v61  ;;  %v34175_v61 = vsub.f32 %v11591_v45, %v34151_v60 }
 0x1a1   :  { %v3205_v8 = vadd.f32 %v3204_v5, %v3128_v36  ;;  %v3130_v16 = vadd.f32 %v3129_v47, %v3047_v1  ;;  %v3360_v59 = vpop.f32.mrf.mxu0  ;;  %11284 = vmatprep.subr.mxu0 %v34110_v10  ;;  %10930 = vmatprep.mubr.f32.mxu1 %v38614_v0  ;;  %v34182_v1 = vsub.f32 %v11588_v17, %v34166_v58  ;;  %v11574_v36 = vpop.permute.xlu1 %11573 }
 0x1a2   :  { %v3280_v31 = vpop.f32.mrf.mxu1  ;;  %11158 = vmatprep.mubr.f32.mxu0 %v38614_v0  ;;  %10934 = vmatmul.mubr.f32.vlgmr.msra.gmra.mxu1 %v34017_v7  ;;  %v11715_v33 = vand.u32 4294901760, %v34175_v61 }
 0x1a3   :  { %v3207_v12 = vadd.f32 %v3206_v42, %v3130_v16  ;;  %v3281_v9 = vadd.f32 %v3280_v31, %v3205_v8  ;;  %v3510_v37 = vpop.f32.mrf.mxu0  ;;  %11164 = vmatmul.mubr.f32.vlgmr.msra.gmra.mxu0 %v34051_v22  ;;  %11051 = vmatpush1.msra.mxu1 %v34062_v14  ;;  %v11210_v22 = vand.u32 4294901760, %v11209_v11  ;;  %v11675_v14 = vsub.f32 %v34149_v55, %v34172_v2 }
 0x1a4   :  { %v3282_v52 = vpop.f32.mrf.mxu1  ;;  %11287 = vmatpush1.msra.mxu0 %v34128_v27  ;;  %11205 = vmatprep.subr.mxu1 %v11204_v56  ;;  %v11721_v29 = vand.u32 4294901760, %v34182_v1  ;;  %v11594_v42 = vsel %vm100_vm2, %v11578_v39, 0  ;;  %v11716_v45 = vsub.f32 %v34175_v61, %v11715_v33 }
 0x1a5   :  { %v3359_v54 = vadd.f32 %v3358_v38, %v3281_v9  ;;  %v3283_v57 = vadd.f32 %v3282_v52, %v3207_v12  ;;  %v3512_v32 = vpop.f32.mrf.mxu0  ;;  %11438 = vmatprep.subr.mxu0 %v11202_v34  ;;  %11084 = vmatprep.mubr.f32.mxu1 %v38614_v0  ;;  %v34205_v35 = vand.u32 4294901760, %v11675_v14  ;;  %v34215_v16 = vand.u32 4294901760, %v11594_v42 }
 0x1a6   :  { %v3432_v53 = vpop.f32.mrf.mxu1  ;;  %11320 = vmatprep.mubr.f32.mxu0 %v38614_v0  ;;  %11086 = vmatmul.mubr.f32.vlgmr.msra.gmra.mxu1 %v33974_v20  ;;  %v11722_v6 = vsub.f32 %v34182_v1, %v11721_v29  ;;  %v11717_v12 = vand.u32 4294901760, %v11716_v45  ;;  %v11581_v9 = vsel %vm11575_vm9, %v11574_v36, %v34155_v48 }
 0x1a7   :  { %v3361_v10 = vadd.f32 %v3360_v59, %v3283_v57  ;;  %v3433_v63 = vadd.f32 %v3432_v53, %v3359_v54  ;;  %v3669_v44 = vpop.f32.mrf.mxu0  ;;  %11323 = vmatmul.mubr.f32.vlgmr.msra.gmra.mxu0 %v33993_v41  ;;  %11211 = vmatpush1.msra.mxu1 %v11210_v22  ;;  %v34233_v56 = vsub.f32 %v11594_v42, %v34215_v16 }
 0x1a8   :  { %v3434_v30 = vpop.f32.mrf.mxu1  ;;  %11442 = vmatpush1.msra.mxu0 %v11208_v46  ;;  %11360 = vmatprep.subr.mxu1 %v34095_v51 }
 0x1a9   :  { %v34189_v24 = vadd.f32 %v3433_v63, %v34023_v23  ;;  %v3435_v26 = vadd.f32 %v3434_v30, %v3361_v10  ;;  %v3671_v5 = vpop.f32.mrf.mxu0  ;;  %11244 = vmatprep.mubr.f32.mxu1 %v38614_v0  ;;  %11475 = vmatprep.mubr.f32.mxu0 %v38614_v0 }
 0x1aa   :  { %v3592_v27 = vpop.f32.mrf.mxu1  ;;  %11636 = vmatprep.subr.mxu0 %v34151_v60  ;;  %11246 = vmatmul.mubr.f32.vlgmr.msra.gmra.mxu1 %v33974_v20 }
 0x1ab   :  { %v34199_v23 = vadd.f32 %v3435_v26, %v34036_v3  ;;  %v3593_v18 = vadd.f32 %v3592_v27, %v3510_v37  ;;  %v3823_v41 = vpop.f32.mrf.mxu0  ;;  %11477 = vmatmul.mubr.f32.vlgmr.msra.gmra.mxu0 %v33974_v20  ;;  %11362 = vmatpush1.msra.mxu1 %v34112_v62 }
 0x1ac   :  { %v3594_v19 = vpop.f32.mrf.mxu1  ;;  %11638 = vmatpush1.msra.mxu0 %v34166_v58  ;;  %11514 = vmatprep.subr.mxu1 %v34095_v51  ;;  %v11577_v51 = vsel %vm11575_vm9, %v11570_v49, %v11572_v50  ;;  %v12186_v49 = vand.u32 4294901760, %v34233_v56 }
 0x1ad   :  { %v3670_v34 = vadd.f32 %v3669_v44, %v3593_v18  ;;  %v3595_v3 = vadd.f32 %v3594_v19, %v3512_v32  ;;  %v3825_v25 = vpop.f32.mrf.mxu0  ;;  %11797 = vmatprep.subr.mxu0 %v34175_v61  ;;  %11395 = vmatprep.mubr.f32.mxu1 %v38614_v0  ;;  %v11597_v37 = vsel %vm100_vm2, %v11577_v51, 0  ;;  %v11603_v32 = vsel %vm100_vm2, %v11581_v9, 0 }
 0x1ae   :  { %v3745_v38 = vpop.f32.mrf.mxu1  ;;  %11671 = vmatprep.mubr.f32.mxu0 %v38614_v0  ;;  %11399 = vmatmul.mubr.f32.vlgmr.msra.gmra.mxu1 %v34017_v7  ;;  %v34230_v7 = vand.u32 4294901760, %v11597_v37  ;;  %v11576_v44 = vsel %vm11575_vm9, %v11572_v50, %v11574_v36 }
 0x1af   :  { %v3672_v46 = vadd.f32 %v3671_v5, %v3595_v3  ;;  %v3746_v47 = vadd.f32 %v3745_v38, %v3670_v34  ;;  %v3975_v8 = vpop.f32.mrf.mxu0  ;;  %11677 = vmatmul.mubr.f32.vlgmr.msra.gmra.mxu0 %v34205_v35  ;;  %11516 = vmatpush1.msra.mxu1 %v34112_v62  ;;  %v11723_v62 = vand.u32 4294901760, %v11722_v6 }
 0x1b0   :  { %v3747_v59 = vpop.f32.mrf.mxu1  ;;  %11800 = vmatpush1.msra.mxu0 %v34182_v1  ;;  %11718 = vmatprep.subr.mxu1 %v11717_v12  ;;  %v12179_v53 = vsub.f32 %v11597_v37, %v34230_v7 }
 0x1b1   :  { %v3824_v31 = vadd.f32 %v3823_v41, %v3746_v47  ;;  %v3977_v17 = vpop.f32.mrf.mxu0  ;;  %v3748_v52 = vadd.f32 %v3747_v59, %v3672_v46  ;;  %11951 = vmatprep.subr.mxu0 %v11715_v33  ;;  %11549 = vmatprep.mubr.f32.mxu1 %v38614_v0  ;;  %v11600_v33 = vsel %vm100_vm2, %v11576_v44, 0 }
 0x1b2   :  { %v3897_v11 = vpop.f32.mrf.mxu1  ;;  %11833 = vmatprep.mubr.f32.mxu0 %v38614_v0  ;;  %11551 = vmatmul.mubr.f32.vlgmr.msra.gmra.mxu1 %v33974_v20  ;;  %v34249_v20 = vand.u32 4294901760, %v11603_v32  ;;  %v34262_v3 = vand.u32 4294901760, %v11600_v33 }
 0x1b3   :  { %v3898_v61 = vadd.f32 %v3897_v11, %v3824_v31  ;;  %v4134_v54 = vpop.f32.mrf.mxu0  ;;  %v3826_v57 = vadd.f32 %v3825_v25, %v3748_v52  ;;  %11836 = vmatmul.mubr.f32.vlgmr.msra.gmra.mxu0 %v34149_v55  ;;  %11724 = vmatpush1.msra.mxu1 %v11723_v62  ;;  %v12187_v25 = vsub.f32 %v34233_v56, %v12186_v49 }
 0x1b4   :  { %v3899_v48 = vpop.f32.mrf.mxu1  ;;  %11955 = vmatpush1.msra.mxu0 %v11721_v29  ;;  %11873 = vmatprep.subr.mxu1 %v34151_v60  ;;  %v12644_v38 = vsub.f32 %v11603_v32, %v34249_v20  ;;  %v12650_v6 = vsub.f32 %v11600_v33, %v34262_v3 }
 0x1b5   :  { %v34240_v10 = vadd.f32 %v3898_v61, %v34075_v40  ;;  %v4136_v63 = vpop.f32.mrf.mxu0  ;;  %v3900_v1 = vadd.f32 %v3899_v48, %v3826_v57  ;;  %11757 = vmatprep.mubr.f32.mxu1 %v38614_v0  ;;  %v12180_v40 = vand.u32 4294901760, %v12179_v53  ;;  %11988 = vmatprep.mubr.f32.mxu0 %v38614_v0  ;;  %v12188_v31 = vand.u32 4294901760, %v12187_v25 }
 0x1b6   :  { %v4057_v22 = vpop.f32.mrf.mxu1  ;;  %12101 = vmatprep.subr.mxu0 %v34230_v7  ;;  %11759 = vmatmul.mubr.f32.vlgmr.msra.gmra.mxu1 %v34135_v21  ;;  %v12645_v9 = vand.u32 4294901760, %v12644_v38  ;;  %v12651_v61 = vand.u32 4294901760, %v12650_v6 }
 0x1b7   :  { %v4058_v30 = vadd.f32 %v4057_v22, %v3975_v8  ;;  %v4288_v14 = vpop.f32.mrf.mxu0  ;;  %v34252_v26 = vadd.f32 %v3900_v1, %v34086_v28  ;;  %11990 = vmatmul.mubr.f32.vlgmr.msra.gmra.mxu0 %v34135_v21  ;;  %v12181_v41 = vsub.f32 %v12179_v53, %v12180_v40  ;;  %11875 = vmatpush1.msra.mxu1 %v34166_v58 }
 0x1b8   :  { %v4059_v5 = vpop.f32.mrf.mxu1  ;;  %12103 = vmatpush1.msra.mxu0 %v34215_v16  ;;  %12027 = vmatprep.subr.mxu1 %v34151_v60  ;;  %v12646_v57 = vsub.f32 %v12644_v38, %v12645_v9 }
 0x1b9   :  { %39261 = vst [vmem:[#allocation9_spill] sm:$0xff] %v34252_v26  ;;  %v4135_v39 = vadd.f32 %v4134_v54, %v4058_v30  ;;  %v4060_v27 = vadd.f32 %v4059_v5, %v3977_v17  ;;  %v4290_v18 = vpop.f32.mrf.mxu0  ;;  %12262 = vmatprep.subr.mxu0 %v12179_v53  ;;  %v12182_v42 = vand.u32 4294901760, %v12181_v41  ;;  %11908 = vmatprep.mubr.f32.mxu1 %v38614_v0 }
 0x1ba   :  { %v4210_v28 = vpop.f32.mrf.mxu1  ;;  %12136 = vmatprep.mubr.f32.mxu0 %v38614_v0  ;;  %11912 = vmatmul.mubr.f32.vlgmr.msra.gmra.mxu1 %v34172_v2  ;;  %v12647_v1 = vand.u32 4294901760, %v12646_v57 }
 0x1bb   :  { %v4137_v29 = vadd.f32 %v4136_v63, %v4060_v27  ;;  %v4211_v19 = vadd.f32 %v4210_v28, %v4135_v39  ;;  %v4488_v34 = vpop.f32.mrf.mxu0  ;;  %12142 = vmatmul.mubr.f32.vlgmr.msra.gmra.mxu0 %v34205_v35  ;;  %12029 = vmatpush1.msra.mxu1 %v34166_v58  ;;  %v12652_v63 = vsub.f32 %v12650_v6, %v12651_v61 }
 0x1bc   :  { %v4212_v45 = vpop.f32.mrf.mxu1  ;;  %12265 = vmatpush1.msra.mxu0 %v34233_v56  ;;  %12183 = vmatprep.subr.mxu1 %v12182_v42 }
 0x1bd   :  { %v4289_v36 = vadd.f32 %v4288_v14, %v4211_v19  ;;  %v4213_v60 = vadd.f32 %v4212_v45, %v4137_v29  ;;  %v34270_v46 = vpop.f32.mrf.mxu0  ;;  %12416 = vmatprep.subr.mxu0 %v12180_v40  ;;  %12062 = vmatprep.mubr.f32.mxu1 %v38614_v0  ;;  %v12653_v40 = vand.u32 4294901760, %v12652_v63 }
 0x1be   :  { %v4362_v47 = vpop.f32.mrf.mxu1  ;;  %12298 = vmatprep.mubr.f32.mxu0 %v38614_v0  ;;  %12064 = vmatmul.mubr.f32.vlgmr.msra.gmra.mxu1 %v34135_v21 }
 0x1bf   :  { %v4291_v8 = vadd.f32 %v4290_v18, %v4213_v60  ;;  %v4363_v50 = vadd.f32 %v4362_v47, %v4289_v36  ;;  %v4647_v59 = vpop.f32.mrf.mxu0  ;;  %12301 = vmatmul.mubr.f32.vlgmr.msra.gmra.mxu0 %v34149_v55  ;;  %12189 = vmatpush1.msra.mxu1 %v12188_v31 }
 0x1c0   :  { %v4364_v51 = vpop.f32.mrf.mxu1  ;;  %12420 = vmatpush1.msra.mxu0 %v12186_v49  ;;  %12338 = vmatprep.subr.mxu1 %v34230_v7 }
 0x1c1   :  { %v34278_v12 = vadd.f32 %v4363_v50, %v34123_v4  ;;  %v4365_v58 = vadd.f32 %v4364_v51, %v4291_v8  ;;  %v34282_v17 = vpop.f32.mrf.mxu0  ;;  %12566 = vmatprep.subr.mxu0 %v34249_v20  ;;  %12222 = vmatprep.mubr.f32.mxu1 %v38614_v0 }
 0x1c2   :  { %v4570_v37 = vpop.f32.mrf.mxu1  ;;  %12453 = vmatprep.mubr.f32.mxu0 %v38614_v0  ;;  %12224 = vmatmul.mubr.f32.vlgmr.msra.gmra.mxu1 %v34135_v21 }
 0x1c3   :  { %v34287_v52 = vadd.f32 %v4365_v58, %v34139_v43  ;;  %v4571_v4 = vadd.f32 %v4570_v37, %v4488_v34  ;;  %v4801_v11 = vpop.f32.mrf.mxu0  ;;  %12455 = vmatmul.mubr.f32.vlgmr.msra.gmra.mxu0 %v34135_v21  ;;  %12340 = vmatpush1.msra.mxu1 %v34215_v16 }
 0x1c4   :  { %v34291_v54 = vpop.f32.mrf.mxu1  ;;  %12568 = vmatpush1.msra.mxu0 %v34262_v3  ;;  %12492 = vmatprep.subr.mxu1 %v34230_v7 }
 0x1c5   :  { %39262 = vst [vmem:[#allocation10_spill] sm:$0xff] %v34287_v52  ;;  %v4648_v56 = vadd.f32 %v4647_v59, %v4571_v4  ;;  %v34295_v62 = vpop.f32.mrf.mxu0  ;;  %12727 = vmatprep.subr.mxu0 %v12644_v38  ;;  %12373 = vmatprep.mubr.f32.mxu1 %v38614_v0 }
 0x1c6   :  { %v4723_v43 = vpop.f32.mrf.mxu1  ;;  %12601 = vmatprep.mubr.f32.mxu0 %v38614_v0  ;;  %12377 = vmatmul.mubr.f32.vlgmr.msra.gmra.mxu1 %v34172_v2 }
 0x1c7   :  { %v4724_v48 = vadd.f32 %v4723_v43, %v4648_v56  ;;  %v4953_v32 = vpop.f32.mrf.mxu0  ;;  %12607 = vmatmul.mubr.f32.vlgmr.msra.gmra.mxu0 %v34205_v35  ;;  %12494 = vmatpush1.msra.mxu1 %v34215_v16 }
 0x1c8   :  { %v34302_v53 = vpop.f32.mrf.mxu1  ;;  %12730 = vmatpush1.msra.mxu0 %v12650_v6  ;;  %12648 = vmatprep.subr.mxu1 %v12647_v1 }
 0x1c9   :  { %v4802_v44 = vadd.f32 %v4801_v11, %v4724_v48  ;;  %v34306_v22 = vpop.f32.mrf.mxu0  ;;  %12881 = vmatprep.subr.mxu0 %v12645_v9  ;;  %12527 = vmatprep.mubr.f32.mxu1 %v38614_v0 }
 0x1ca   :  { %v4875_v7 = vpop.f32.mrf.mxu1  ;;  %12763 = vmatprep.mubr.f32.mxu0 %v38614_v0  ;;  %12529 = vmatmul.mubr.f32.vlgmr.msra.gmra.mxu1 %v34135_v21 }
 0x1cb   :  { %v4876_v30 = vadd.f32 %v4875_v7, %v4802_v44  ;;  %v5112_v14 = vpop.f32.mrf.mxu0  ;;  %12766 = vmatmul.mubr.f32.vlgmr.msra.gmra.mxu0 %v34149_v55  ;;  %12654 = vmatpush1.msra.mxu1 %v12653_v40 }
 0x1cc   :  { %v34311_v49 = vpop.f32.mrf.mxu1  ;;  %12885 = vmatpush1.msra.mxu0 %v12651_v61  ;;  %12803 = vmatprep.subr.mxu1 %v34249_v20 }
 0x1cd   :  { %v34314_v35 = vadd.f32 %v4876_v30, %v34189_v24  ;;  %v34318_v16 = vpop.f32.mrf.mxu0  ;;  %12687 = vmatprep.mubr.f32.mxu1 %v38614_v0  ;;  %12918 = vmatprep.mubr.f32.mxu0 %v38614_v0 }
 0x1ce   :  { %v5035_v5 = vpop.f32.mrf.mxu1  ;;  %12689 = vmatmul.mubr.f32.vlgmr.msra.gmra.mxu1 %v34135_v21 }
 0x1cf   :  { %v5036_v33 = vadd.f32 %v5035_v5, %v4953_v32  ;;  %v5266_v39 = vpop.f32.mrf.mxu0  ;;  %12920 = vmatmul.mubr.f32.vlgmr.msra.gmra.mxu0 %v34135_v21  ;;  %12805 = vmatpush1.msra.mxu1 %v34262_v3 }
 0x1d0   :  { %v34322_v27 = vpop.f32.mrf.mxu1  ;;  %12838 = vmatprep.mubr.f32.mxu1 %v38614_v0  ;;  %12957 = vmatprep.subr.mxu1 %v34249_v20 }
 0x1d1   :  { %v5113_v24 = vadd.f32 %v5112_v14, %v5036_v33  ;;  %v34327_v55 = vpop.f32.mrf.mxu0  ;;  %13159 = vmatprep.mubr.f32.mxu0 %v38614_v0 }
 0x1d2   :  { %v5188_v18 = vpop.f32.mrf.mxu1  ;;  %12842 = vmatmul.mubr.f32.vlgmr.msra.gmra.mxu1 %v34172_v2 }
 0x1d3   :  { %v5189_v41 = vadd.f32 %v5188_v18, %v5113_v24  ;;  %v5418_v28 = vpop.f32.mrf.mxu0  ;;  %12959 = vmatpush1.msra.mxu1 %v34262_v3  ;;  %12992 = vmatprep.mubr.f32.mxu1 %v38614_v0 }
 0x1d4   :  { %v34333_v29 = vpop.f32.mrf.mxu1 }
 0x1d5   :  { %v5267_v19 = vadd.f32 %v5266_v39, %v5189_v41  ;;  %v34336_v42 = vpop.f32.mrf.mxu0 }
 0x1d6   :  { %v5340_v34 = vpop.f32.mrf.mxu1  ;;  %12994 = vmatmul.mubr.f32.vlgmr.msra.gmra.mxu1 %v34135_v21 }
 0x1d7   :  { %v5341_v45 = vadd.f32 %v5340_v34, %v5267_v19  ;;  %v5577_v25 = vpop.f32.mrf.mxu0  ;;  %13245 = vmatprep.mubr.f32.mxu1 %v38614_v0 }
 0x1d8   :  { %v34340_v38 = vpop.f32.mrf.mxu1 }
 0x1d9   :  { %39263 = vst [vmem:[#allocation11_spill] sm:$0xff] %v34340_v38  ;;  %v5812_v20 = vadd.f32 %v5341_v45, %v34240_v10  ;;  %v34344_v36 = vpop.f32.mrf.mxu0 }
 0x1da   :  { %v5500_v60 = vpop.f32.mrf.mxu1 }
 0x1db   :  { %v5501_v2 = vadd.f32 %v5500_v60, %v5418_v28  ;;  %v5731_v47 = vpop.f32.mrf.mxu0 }
 0x1dc   :  { %v34347_v8 = vpop.f32.mrf.mxu1 }
 0x1dd   :  { %v5578_v3 = vadd.f32 %v5577_v25, %v5501_v2  ;;  %v34349_v50 = vpop.f32.mrf.mxu0 }
 0x1de   :  { %39264 = vst [vmem:[#allocation12_spill] sm:$0xff] %v34349_v50  ;;  %v5653_v59 = vpop.f32.mrf.mxu1 }
 0x1df   :  { %v5654_v6 = vadd.f32 %v5653_v59, %v5578_v3  ;;  %v5906_v31 = vpop.f32.mrf.mxu0 }
 0x1e0   :  { %v34351_v51 = vpop.f32.mrf.mxu1 }
 0x1e1   :  { %v5732_v10 = vadd.f32 %v5731_v47, %v5654_v6  ;;  %v34353_v58 = vpop.f32.mrf.mxu0 }
 0x1e2   :  { %v5805_v21 = vpop.f32.mrf.mxu1 }
 0x1e3   :  { %v5806_v9 = vadd.f32 %v5805_v21, %v5732_v10  ;;  %v6065_v37 = vpop.f32.mrf.mxu0 }
 0x1e4   :  { %v34355_v4 = vpop.f32.mrf.mxu1 }
 0x1e5   :  { %39265 = vst [vmem:[#allocation13_spill] sm:$0xff] %v34355_v4  ;;  %v5814_v11 = vadd.f32 %v5806_v9, %v34278_v12  ;;  %v34358_v61 = vpop.f32.mrf.mxu0 }
 0x1e6   :  { %v5988_v56 = vpop.f32.mrf.mxu1 }
 0x1e7   :  { %v5989_v57 = vadd.f32 %v5988_v56, %v5906_v31  ;;  %v6219_v43 = vpop.f32.mrf.mxu0 }
 0x1e8   :  { %v34360_v48 = vpop.f32.mrf.mxu1 }
 0x1e9   :  { %v6066_v32 = vadd.f32 %v6065_v37, %v5989_v57  ;;  %v34362_v63 = vpop.f32.mrf.mxu0 }
 0x1ea   :  { %v6141_v44 = vpop.f32.mrf.mxu1 }
 0x1eb   :  { %v6142_v1 = vadd.f32 %v6141_v44, %v6066_v32  ;;  %v6371_v7 = vpop.f32.mrf.mxu0 }
 0x1ec   :  { %v34364_v30 = vpop.f32.mrf.mxu1 }
 0x1ed   :  { %v6220_v14 = vadd.f32 %v6219_v43, %v6142_v1  ;;  %v34366_v40 = vpop.f32.mrf.mxu0 }
 0x1ee   :  { %v6293_v5 = vpop.f32.mrf.mxu1 }
 0x1ef   :  { %v6530_v12 = vpop.f32.mrf.mxu0  ;;  %v6294_v33 = vadd.f32 %v6293_v5, %v6220_v14 }
 0x1f0   :  { %v34368_v39 = vpop.f32.mrf.mxu1 }
 0x1f1   :  { %v34370_v24 = vpop.f32.mrf.mxu0  ;;  %v7228_v18 = vadd.f32 %v6294_v33, %v34314_v35 }
 0x1f2   :  { %39266 = vst [vmem:[#allocation14_spill] sm:$0xff] %v34370_v24  ;;  %v6453_v41 = vpop.f32.mrf.mxu1 }
 0x1f3   :  { %v6454_v28 = vadd.f32 %v6453_v41, %v6371_v7  ;;  %v6684_v19 = vpop.f32.mrf.mxu0 }
 0x1f4   :  { %v34373_v34 = vpop.f32.mrf.mxu1 }
 0x1f5   :  { %v6531_v45 = vadd.f32 %v6530_v12, %v6454_v28  ;;  %v34375_v25 = vpop.f32.mrf.mxu0 }
 0x1f6   :  { %39267 = vst [vmem:[#allocation15_spill] sm:$0xff] %v34375_v25  ;;  %v6606_v60 = vpop.f32.mrf.mxu1 }
 0x1f7   :  { %v6607_v2 = vadd.f32 %v6606_v60, %v6531_v45  ;;  %v6836_v47 = vpop.f32.mrf.mxu0 }
 0x1f8   :  { %v34377_v3 = vpop.f32.mrf.mxu1 }
 0x1f9   :  { %39268 = vst [vmem:[#allocation16_spill] sm:$0xff] %v34377_v3  ;;  %v6685_v59 = vadd.f32 %v6684_v19, %v6607_v2  ;;  %v34379_v6 = vpop.f32.mrf.mxu0 }
 0x1fa   :  { %v6758_v31 = vpop.f32.mrf.mxu1 }
 0x1fb   :  { %v6759_v10 = vadd.f32 %v6758_v31, %v6685_v59  ;;  %v6995_v21 = vpop.f32.mrf.mxu0 }
 0x1fc   :  { %v34381_v35 = vpop.f32.mrf.mxu1 }
 0x1fd   :  { %39269 = vst [vmem:[#allocation17_spill] sm:$0xff] %v34381_v35  ;;  %v7230_v9 = vadd.f32 %v6759_v10, %v5812_v20  ;;  %v34383_v37 = vpop.f32.mrf.mxu0 }
 0x1fe   :  { %39270 = vst [vmem:[#allocation18_spill] sm:$0xff] %v34383_v37  ;;  %v6918_v56 = vpop.f32.mrf.mxu1 }
 0x1ff   :  { %v6919_v57 = vadd.f32 %v6918_v56, %v6836_v47  ;;  %v7149_v43 = vpop.f32.mrf.mxu0 }
 0x200   :  { %v34385_v32 = vpop.f32.mrf.mxu1 }
 0x201   :  { %v6996_v44 = vadd.f32 %v6995_v21, %v6919_v57  ;;  %v34387_v1 = vpop.f32.mrf.mxu0 }
 0x202   :  { %39271 = vst [vmem:[#allocation19_spill] sm:$0xff] %v34387_v1  ;;  %v7071_v7 = vpop.f32.mrf.mxu1 }
 0x203   :  { %v7349_v14 = vpop.f32.mrf.mxu0  ;;  %v7072_v5 = vadd.f32 %v7071_v7, %v6996_v44 }
 0x204   :  { %v34389_v12 = vpop.f32.mrf.mxu1 }
 0x205   :  { %39272 = vst [vmem:[#allocation20_spill] sm:$0xff] %v34389_v12  ;;  %v34391_v33 = vpop.f32.mrf.mxu0  ;;  %v7150_v41 = vadd.f32 %v7149_v43, %v7072_v5 }
 0x206   :  { %v7223_v28 = vpop.f32.mrf.mxu1 }
 0x207   :  { %v7508_v20 = vpop.f32.mrf.mxu0  ;;  %v7224_v19 = vadd.f32 %v7223_v28, %v7150_v41 }
 0x208   :  { %v34393_v45 = vpop.f32.mrf.mxu1 }
 0x209   :  { %39273 = vst [vmem:[#allocation21_spill] sm:$0xff] %v34393_v45  ;;  %v34395_v60 = vpop.f32.mrf.mxu0  ;;  %v7232_v2 = vadd.f32 %v7224_v19, %v5814_v11 }
 0x20a   :  { %v7431_v47 = vpop.f32.mrf.mxu1 }
 0x20b   :  { %v7662_v59 = vpop.f32.mrf.mxu0  ;;  %v7432_v31 = vadd.f32 %v7431_v47, %v7349_v14 }
 0x20c   :  { %v34397_v10 = vpop.f32.mrf.mxu1 }
 0x20d   :  { %v34399_v21 = vpop.f32.mrf.mxu0  ;;  %v7509_v56 = vadd.f32 %v7508_v20, %v7432_v31 }
 0x20e   :  { %v7584_v57 = vpop.f32.mrf.mxu1 }
 0x20f   :  { %v7814_v44 = vpop.f32.mrf.mxu0  ;;  %v7585_v7 = vadd.f32 %v7584_v57, %v7509_v56 }
 0x210   :  { %v34401_v43 = vpop.f32.mrf.mxu1 }
 0x211   :  { %v34403_v5 = vpop.f32.mrf.mxu0  ;;  %v7663_v41 = vadd.f32 %v7662_v59, %v7585_v7 }
 0x212   :  { %39274 = vst [vmem:[#allocation22_spill] sm:$0xff] %v34403_v5  ;;  %v7736_v28 = vpop.f32.mrf.mxu1 }
 0x213   :  { %v7973_v0 = vpop.f32.mrf.mxu0  ;;  %v7737_v13 = vadd.f32 %v7736_v28, %v7663_v41 }
 0x214   :  { %v34405_v11 = vpop.f32.mrf.mxu1 }
 0x215   :  { %v34407_v19 = vpop.f32.mrf.mxu0  ;;  %v8671_v14 = vadd.f32 %v7737_v13, %v7228_v18 }
 0x216   :  { %39275 = vst [vmem:[#allocation23_spill] sm:$0xff] %v34407_v19  ;;  %v7896_v47 = vpop.f32.mrf.mxu1 }
 0x217   :  { %v8127_v15 = vpop.f32.mrf.mxu0  ;;  %v7897_v52 = vadd.f32 %v7896_v47, %v7814_v44 }
 0x218   :  { %v34409_v20 = vpop.f32.mrf.mxu1 }
 0x219   :  { %39276 = vst [vmem:[#allocation24_spill] sm:$0xff] %v34409_v20  ;;  %v34411_v31 = vpop.f32.mrf.mxu0  ;;  %v7974_v56 = vadd.f32 %v7973_v0, %v7897_v52 }
 0x21a   :  { %39277 = vst [vmem:[#allocation25_spill] sm:$0xff] %v34411_v31  ;;  %v8049_v57 = vpop.f32.mrf.mxu1 }
 0x21b   :  { %v8279_v45 = vpop.f32.mrf.mxu0  ;;  %v8050_v35 = vadd.f32 %v8049_v57, %v7974_v56 }
 0x21c   :  { %v34413_v59 = vpop.f32.mrf.mxu1 }
 0x21d   :  { %39278 = vst [vmem:[#allocation26_spill] sm:$0xff] %v34413_v59  ;;  %v34415_v7 = vpop.f32.mrf.mxu0  ;;  %v8128_v41 = vadd.f32 %v8127_v15, %v8050_v35 }
 0x21e   :  { %39279 = vst [vmem:[#allocation27_spill] sm:$0xff] %v34415_v7  ;;  %v8201_v28 = vpop.f32.mrf.mxu1 }
 0x21f   :  { %v8438_v26 = vpop.f32.mrf.mxu0  ;;  %v8202_v4 = vadd.f32 %v8201_v28, %v8128_v41 }
 0x220   :  { %v34417_v13 = vpop.f32.mrf.mxu1 }
 0x221   :  { %39280 = vst [vmem:[#allocation28_spill] sm:$0xff] %v34417_v13  ;;  %v34419_v18 = vpop.f32.mrf.mxu0  ;;  %v8673_v44 = vadd.f32 %v8202_v4, %v7230_v9 }
 0x222   :  { %39281 = vst [vmem:[#allocation29_spill] sm:$0xff] %v34419_v18  ;;  %v8361_v47 = vpop.f32.mrf.mxu1 }
 0x223   :  { %v8592_v1 = vpop.f32.mrf.mxu0  ;;  %v8362_v31 = vadd.f32 %v8361_v47, %v8279_v45 }
 0x224   :  { %v34421_v0 = vpop.f32.mrf.mxu1 }
 0x225   :  { %39282 = vst [vmem:[#allocation30_spill] sm:$0xff] %v34421_v0  ;;  %v34423_v52 = vpop.f32.mrf.mxu0  ;;  %v8439_v56 = vadd.f32 %v8438_v26, %v8362_v31 }
 0x226   :  { %39283 = vst [vmem:[#allocation31_spill] sm:$0xff] %v34423_v52  ;;  %v8514_v57 = vpop.f32.mrf.mxu1 }
 0x227   :  { %v8792_v25 = vpop.f32.mrf.mxu0  ;;  %v8515_v38 = vadd.f32 %v8514_v57, %v8439_v56 }
 0x228   :  { %v34425_v15 = vpop.f32.mrf.mxu1 }
 0x229   :  { %39284 = vst [vmem:[#allocation32_spill] sm:$0xff] %v34425_v15  ;;  %v34427_v35 = vpop.f32.mrf.mxu0  ;;  %v8593_v41 = vadd.f32 %v8592_v1, %v8515_v38 }
 0x22a   :  { %v8666_v28 = vpop.f32.mrf.mxu1 }
 0x22b   :  { %v8951_v13 = vpop.f32.mrf.mxu0  ;;  %v8667_v59 = vadd.f32 %v8666_v28, %v8593_v41 }
 0x22c   :  { %v34429_v4 = vpop.f32.mrf.mxu1 }
 0x22d   :  { %39285 = vst [vmem:[#allocation33_spill] sm:$0xff] %v34429_v4  ;;  %v34431_v9 = vpop.f32.mrf.mxu0  ;;  %v8675_v45 = vadd.f32 %v8667_v59, %v7232_v2 }
 0x22e   :  { %v8874_v47 = vpop.f32.mrf.mxu1 }
 0x22f   :  { %v9105_v50 = vpop.f32.mrf.mxu0  ;;  %v8875_v52 = vadd.f32 %v8874_v47, %v8792_v25 }
 0x230   :  { %v34433_v26 = vpop.f32.mrf.mxu1 }
 0x231   :  { %v34435_v31 = vpop.f32.mrf.mxu0  ;;  %v8952_v56 = vadd.f32 %v8951_v13, %v8875_v52 }
 0x232   :  { %v9027_v57 = vpop.f32.mrf.mxu1 }
 0x233   :  { %v9257_v15 = vpop.f32.mrf.mxu0  ;;  %v9028_v12 = vadd.f32 %v9027_v57, %v8952_v56 }
 0x234   :  { %v34437_v38 = vpop.f32.mrf.mxu1 }
 0x235   :  { %v34439_v1 = vpop.f32.mrf.mxu0  ;;  %v9106_v41 = vadd.f32 %v9105_v50, %v9028_v12 }
 0x236   :  { %39286 = vst [vmem:[#allocation34_spill] sm:$0xff] %v34439_v1  ;;  %v9179_v28 = vpop.f32.mrf.mxu1 }
 0x237   :  { %v9416_v4 = vpop.f32.mrf.mxu0  ;;  %v9180_v18 = vadd.f32 %v9179_v28, %v9106_v41 }
 0x238   :  { %v34441_v2 = vpop.f32.mrf.mxu1 }
 0x239   :  { %v34443_v59 = vpop.f32.mrf.mxu0  ;;  %v34445_v25 = vadd.f32 %v9180_v18, %v8671_v14 }
 0x23a   :  { %39287 = vst [vmem:[#allocation35_spill] sm:$0xff] %v34443_v59  ;;  %v9339_v47 = vpop.f32.mrf.mxu1 }
 0x23b   :  { %39288 = vst [vmem:[#allocation36_spill] sm:$0xff] %v34445_v25  ;;  %v9570_v19 = vpop.f32.mrf.mxu0  ;;  %v9340_v13 = vadd.f32 %v9339_v47, %v9257_v15 }
 0x23c   :  { %v34447_v52 = vpop.f32.mrf.mxu1 }
 0x23d   :  { %39289 = vst [vmem:[#allocation37_spill] sm:$0xff] %v34447_v52  ;;  %v34449_v56 = vpop.f32.mrf.mxu0  ;;  %v9417_v57 = vadd.f32 %v9416_v4, %v9340_v13 }
 0x23e   :  { %39290 = vst [vmem:[#allocation38_spill] sm:$0xff] %v34449_v56  ;;  %v9492_v3 = vpop.f32.mrf.mxu1 }
 0x23f   :  { %v9722_v1 = vpop.f32.mrf.mxu0  ;;  %v9493_v50 = vadd.f32 %v9492_v3, %v9417_v57 }
 0x240   :  { %v34451_v12 = vpop.f32.mrf.mxu1 }
 0x241   :  { %39291 = vst [vmem:[#allocation39_spill] sm:$0xff] %v34451_v12  ;;  %v34453_v41 = vpop.f32.mrf.mxu0  ;;  %v9571_v28 = vadd.f32 %v9570_v19, %v9493_v50 }
 0x242   :  { %39292 = vst [vmem:[#allocation40_spill] sm:$0xff] %v34453_v41  ;;  %v9644_v0 = vpop.f32.mrf.mxu1 }
 0x243   :  { %v9881_v59 = vpop.f32.mrf.mxu0  ;;  %v9645_v14 = vadd.f32 %v9644_v0, %v9571_v28 }
 0x244   :  { %v34455_v18 = vpop.f32.mrf.mxu1 }
 0x245   :  { %39293 = vst [vmem:[#allocation41_spill] sm:$0xff] %v34455_v18  ;;  %v34457_v7 = vpop.f32.mrf.mxu0  ;;  %v34459_v15 = vadd.f32 %v9645_v14, %v8673_v44 }
 0x246   :  { %39294 = vst [vmem:[#allocation42_spill] sm:$0xff] %v34457_v7  ;;  %v9804_v47 = vpop.f32.mrf.mxu1 }
 0x247   :  { %39295 = vst [vmem:[#allocation43_spill] sm:$0xff] %v34459_v15  ;;  %v10035_v56 = vpop.f32.mrf.mxu0  ;;  %v9805_v4 = vadd.f32 %v9804_v47, %v9722_v1 }
 0x248   :  { %v34461_v13 = vpop.f32.mrf.mxu1 }
 0x249   :  { %39296 = vst [vmem:[#allocation44_spill] sm:$0xff] %v34461_v13  ;;  %v34463_v3 = vpop.f32.mrf.mxu0  ;;  %v9882_v57 = vadd.f32 %v9881_v59, %v9805_v4 }
 0x24a   :  { %39297 = vst [vmem:[#allocation45_spill] sm:$0xff] %v34463_v3  ;;  %v9957_v12 = vpop.f32.mrf.mxu1 }
 0x24b   :  { %v10235_v41 = vpop.f32.mrf.mxu0  ;;  %v9958_v19 = vadd.f32 %v9957_v12, %v9882_v57 }
 0x24c   :  { %v34465_v50 = vpop.f32.mrf.mxu1 }
 0x24d   :  { %39298 = vst [vmem:[#allocation46_spill] sm:$0xff] %v34465_v50  ;;  %v10237_v0 = vpop.f32.mrf.mxu0  ;;  %v10036_v28 = vadd.f32 %v10035_v56, %v9958_v19 }
 0x24e   :  { %v10109_v18 = vpop.f32.mrf.mxu1 }
 0x24f   :  { %v10394_v52 = vpop.f32.mrf.mxu0  ;;  %v10110_v7 = vadd.f32 %v10109_v18, %v10036_v28 }
 0x250   :  { %v34467_v44 = vpop.f32.mrf.mxu1 }
 0x251   :  { %39299 = vst [vmem:[#allocation47_spill] sm:$0xff] %v34467_v44  ;;  %v10396_v14 = vpop.f32.mrf.mxu0  ;;  %v34469_v15 = vadd.f32 %v10110_v7, %v8675_v45 }
 0x252   :  { %v10317_v1 = vpop.f32.mrf.mxu1 }
 0x253   :  { %39300 = vst [vmem:[#allocation48_spill] sm:$0xff] %v34469_v15  ;;  %v34471_v47 = vpop.f32.mrf.mxu0 }
 0x254   :  { %v10319_v3 = vpop.f32.mrf.mxu1 }
 0x255   :  { %v34473_v59 = vpop.f32.mrf.mxu0 }
 0x256   :  { %v10470_v4 = vpop.f32.mrf.mxu1 }
 0x257   :  { %v10700_v12 = vpop.f32.mrf.mxu0 }
 0x258   :  { %v10472_v57 = vpop.f32.mrf.mxu1 }
 0x259   :  { %v34475_v50 = vpop.f32.mrf.mxu0 }
 0x25a   :  { %39301 = vst [vmem:[#allocation49_spill] sm:$0xff] %v34475_v50  ;;  %v34477_v56 = vpop.f32.mrf.mxu1  ;;  %v4573_v50 = vadd.f32 %v34291_v54, %v34270_v46  ;;  %v7434_v46 = vadd.f32 %v34397_v10, %v34391_v33 }
 0x25b   :  { %v34479_v19 = vpop.f32.mrf.mxu0 }
 0x25c   :  { %v34481_v18 = vpop.f32.mrf.mxu1 }
 0x25d   :  { %v34483_v28 = vpop.f32.mrf.mxu0 }
 0x25e   :  { %39302 = vst [vmem:[#allocation50_spill] sm:$0xff] %v34483_v28  ;;  %v10782_v7 = vpop.f32.mrf.mxu1  ;;  %v5991_v28 = vadd.f32 %v34360_v48, %v34353_v58  ;;  %v8877_v58 = vadd.f32 %v34433_v26, %v34427_v35  ;;  %v10318_v48 = vadd.f32 %v10317_v1, %v10235_v41 }
 0x25f   :  { %v34485_v45 = vpop.f32.mrf.mxu0 }
 0x260   :  { %39303 = vst [vmem:[#allocation51_spill] sm:$0xff] %v34485_v45  ;;  %v34487_v15 = vpop.f32.mrf.mxu1  ;;  %v6068_v54 = vadd.f32 %v34358_v61, %v5991_v28  ;;  %v8954_v28 = vadd.f32 %v34431_v9, %v8877_v58 }
 0x261   :  { %39304 = vst [vmem:[#allocation52_spill] sm:$0xff] %v34487_v15  ;;  %v34489_v44 = vpop.f32.mrf.mxu0 }
 0x262   :  { %39305 = vst [vmem:[#allocation53_spill] sm:$0xff] %v34489_v44  ;;  %v34491_v13 = vpop.f32.mrf.mxu1  ;;  %v4650_v44 = vadd.f32 %v34282_v17, %v4573_v50  ;;  %v6144_v33 = vadd.f32 %v34364_v30, %v6068_v54  ;;  %v9030_v1 = vadd.f32 %v34437_v38, %v8954_v28 }
 0x263   :  { %v34493_v20 = vpop.f32.mrf.mxu0 }
 0x264   :  { %v34497_v5 = vpop.f32.mrf.mxu1 }
 0x265   :  { %39306 = vst [vmem:[#allocation54_spill] sm:$0xff] %v34497_v5  ;;  %v34499_v37 = vpop.f32.mrf.mxu0 }
 0x266   :  { %39307 = vst [vmem:[#allocation55_spill] sm:$0xff] %v34499_v37  ;;  %v34503_v24 = vpop.f32.mrf.mxu1 }
 0x267   :  { %v34505_v45 = vpop.f32.mrf.mxu0 }
 0x268   :  { %39308 = vst [vmem:[#allocation56_spill] sm:$0xff] %v34505_v45  ;;  %v34508_v15 = vpop.f32.mrf.mxu1  ;;  %v4726_v45 = vadd.f32 %v34302_v53, %v4650_v44 }
 0x269   :  { %39309 = vst [vmem:[#allocation57_spill] sm:$0xff] %v34508_v15  ;;  %v34510_v25 = vpop.f32.mrf.mxu0  ;;  %v7511_v15 = vadd.f32 %v34395_v60, %v7434_v46  ;;  %v5038_v60 = vadd.f32 %v34322_v27, %v34306_v22  ;;  %v5503_v22 = vadd.f32 %v34347_v8, %v34336_v42 }
 0x26a   :  { %39310 = vst [vmem:[#allocation58_spill] sm:$0xff] %v34510_v25  ;;  %v34515_v5 = vpop.f32.mrf.mxu1  ;;  %v10320_v25 = vadd.f32 %v10319_v3, %v10237_v0  ;;  %v4804_v35 = vadd.f32 %v34295_v62, %v4726_v45  ;;  %v6222_v3 = vadd.f32 %v34362_v63, %v6144_v33  ;;  %v10783_v63 = vadd.f32 %v10782_v7, %v10700_v12 }
 0x26b   :  { %v34517_v37 = vpop.f32.mrf.mxu0  ;;  %v7587_v41 = vadd.f32 %v34401_v43, %v7511_v15 }
 0x26c   :  { %39311 = vst [vmem:[#allocation59_spill] sm:$0xff] %v34517_v37  ;;  %v34522_v17 = vpop.f32.mrf.mxu1  ;;  %v10395_v37 = vadd.f32 %v10394_v52, %v10318_v48  ;;  %v10397_v44 = vadd.f32 %v10396_v14, %v10320_v25  ;;  %v4878_v52 = vadd.f32 %v34311_v49, %v4804_v35  ;;  %v5115_v25 = vadd.f32 %v34318_v16, %v5038_v60 }
 0x26d   :  { %v34524_v50 = vpop.f32.mrf.mxu0  ;;  %v7665_v46 = vadd.f32 %v34399_v21, %v7587_v41  ;;  %v6296_v27 = vadd.f32 %v34368_v39, %v6222_v3 }
 0x26e   :  { %v34528_v61 = vpop.f32.mrf.mxu1  ;;  %v10471_v9 = vadd.f32 %v10470_v4, %v10395_v37  ;;  %v10473_v43 = vadd.f32 %v10472_v57, %v10397_v44  ;;  %v9108_v37 = vadd.f32 %v34435_v31, %v9030_v1  ;;  %v5811_v4 = vadd.f32 %v4878_v52, %v34199_v23  ;;  %v39313_v1 = vld [vmem:[#allocation36_spill] sm:$0xff] }
 0x26f   :  { %v11678_v10 = vpop.f32.mrf.mxu0  ;;  %v39312_v57 = vlaneseq  ;;  %v7739_v16 = vadd.f32 %v34405_v11, %v7665_v46  ;;  %v5191_v12 = vadd.f32 %v34333_v29, %v5115_v25  ;;  %v5580_v31 = vadd.f32 %v34344_v36, %v5503_v22  ;;  %v39315_v46 = vld [vmem:[#allocation18_spill] sm:$0xff]  ;;  %v39318_v22 = vld [vmem:[#allocation27_spill] sm:$0xff] }
 0x270   :  { %v34532_v26 = vpop.f32.mrf.mxu1  ;;  %v10549_v49 = vadd.f32 %v34471_v47, %v10471_v9  ;;  %v10551_v42 = vadd.f32 %v34473_v59, %v10473_v43  ;;  %v7229_v7 = vadd.f32 %v6296_v27, %v5811_v4  ;;  %v10860_v47 = vadd.f32 %v34479_v19, %v10783_v63  ;;  %v39316_v43 = vld [vmem:[#allocation22_spill] sm:$0xff] }
 0x271   :  { %v11680_v53 = vpop.f32.mrf.mxu0  ;;  %v34553_v58 = vshrl.u32 %v39312_v57, 7  ;;  %v9182_v33 = vadd.f32 %v34441_v2, %v9108_v37  ;;  %v6456_v11 = vadd.f32 %v34373_v34, %v34366_v40  ;;  %v6921_v59 = vadd.f32 %v34385_v32, %v34379_v6  ;;  %v34574_v40 = vld [vmem:[%s38608_s1] sm:$0x3f]  ;;  %v39319_v27 = vld [vmem:[#allocation30_spill] sm:$0xff] }
 0x272   :  { %v34538_v30 = vpop.f32.mrf.mxu1  ;;  %v8672_v41 = vadd.f32 %v7739_v16, %v7229_v7  ;;  %v10625_v19 = vadd.f32 %v34481_v18, %v10551_v42  ;;  %v5269_v2 = vadd.f32 %v34327_v55, %v5191_v12  ;;  %v10936_v3 = vadd.f32 %v34491_v13, %v10860_v47  ;;  %v39317_v13 = vld [vmem:[#allocation24_spill] sm:$0xff] }
 0x273   :  { %v11837_v0 = vpop.f32.mrf.mxu0  ;;  %v13016_v36 = vsub.s32 0, %v34553_v58  ;;  %v13020_v34 = vsub.s32 1, %v34553_v58  ;;  %v7899_v25 = vadd.f32 %v39317_v13, %v39316_v43  ;;  %v8364_v63 = vadd.f32 %v39319_v27, %v39318_v22  ;;  %v39322_v16 = vld [vmem:[#allocation40_spill] sm:$0xff] }
 0x274   :  { %v34542_v62 = vpop.f32.mrf.mxu1  ;;  %v10115_v32 = vadd.f32 %v9182_v33, %v8672_v41  ;;  %v39323_v42 = vld [vmem:[#allocation44_spill] sm:$0xff] }
 0x275   :  { %v11839_v45 = vpop.f32.mrf.mxu0 }
 0x276   :  { %v11760_v15 = vpop.f32.mrf.mxu1  ;;  %v11558_v37 = vadd.f32 %v10625_v19, %v10115_v32  ;;  %v39328_v19 = vld [vmem:[#allocation49_spill] sm:$0xff] }
 0x277   :  { %v11991_v14 = vpop.f32.mrf.mxu0  ;;  %v11761_v38 = vadd.f32 %v11760_v15, %v11678_v10  ;;  %v10623_v10 = vadd.f32 %v34477_v56, %v10549_v49  ;;  %v5656_v56 = vadd.f32 %v34351_v51, %v5580_v31  ;;  %v6998_v51 = vadd.f32 %v39315_v46, %v6921_v59  ;;  %v39326_v59 = vld [vmem:[#allocation23_spill] sm:$0xff] }
 0x278   :  { %v11762_v54 = vpop.f32.mrf.mxu1  ;;  %v13021_v31 = vrot.slane %v34574_v40, %v13020_v34  ;;  %v39330_v34 = vld [vmem:[#allocation55_spill] sm:$0xff] }
 0x279   :  { %v11993_v21 = vpop.f32.mrf.mxu0  ;;  %v11838_v8 = vadd.f32 %v11837_v0, %v11761_v38  ;;  %v11763_v39 = vadd.f32 %v11762_v54, %v11680_v53  ;;  %v11557_v18 = vadd.f32 %v10623_v10, %v39313_v1  ;;  %v13017_v38 = vrot.slane %v34574_v40, %v13016_v36  ;;  %v39320_v54 = vld [vmem:[#allocation34_spill] sm:$0xff]  ;;  %v39327_v36 = vld [vmem:[#allocation29_spill] sm:$0xff] }
 0x27a   :  { %v11913_v48 = vpop.f32.mrf.mxu1  ;;  %v8441_v41 = vadd.f32 %v39327_v36, %v8364_v63  ;;  %v11250_v32 = vadd.f32 %v34522_v17, %v39330_v34  ;;  %v39348_v34 = vld [vmem:[#allocation31_spill] sm:$0xff] }
 0x27b   :  { %v12143_v23 = vpop.f32.mrf.mxu0  ;;  %v11840_v28 = vadd.f32 %v11839_v45, %v11763_v39  ;;  %v11914_v35 = vadd.f32 %v11913_v48, %v11838_v8  ;;  %v39314_v45 = vld [vmem:[#allocation14_spill] sm:$0xff]  ;;  %v9807_v8 = vadd.f32 %v39323_v42, %v39322_v16  ;;  %v39324_v39 = vld [vmem:[#allocation51_spill] sm:$0xff]  ;;  %v11248_v48 = vadd.f32 %v34515_v5, %v34493_v20 }
 0x27c   :  { %v11915_v29 = vpop.f32.mrf.mxu1  ;;  %v6533_v55 = vadd.f32 %v39314_v45, %v6456_v11  ;;  %v11014_v12 = vadd.f32 %v39324_v39, %v10936_v3  ;;  %v39333_v45 = vld [vmem:[#allocation42_spill] sm:$0xff] }
 0x27d   :  { %v12145_v53 = vpop.f32.mrf.mxu0  ;;  %v11992_v44 = vadd.f32 %v11991_v14, %v11914_v35  ;;  %v11916_v60 = vadd.f32 %v11915_v29, %v11840_v28  ;;  %v39325_v35 = vld [vmem:[#allocation16_spill] sm:$0xff]  ;;  %v7976_v29 = vadd.f32 %v39326_v59, %v7899_v25  ;;  %v39340_v42 = vld [vmem:[#allocation58_spill] sm:$0xff] }
 0x27e   :  { %v12065_v0 = vpop.f32.mrf.mxu1  ;;  %v6609_v11 = vadd.f32 %v39325_v35, %v6533_v55  ;;  %v9884_v55 = vadd.f32 %v39333_v45, %v9807_v8  ;;  %v11088_v46 = vadd.f32 %v34503_v24, %v11014_v12  ;;  %v39334_v25 = vld [vmem:[#allocation56_spill] sm:$0xff]  ;;  %v11327_v8 = vadd.f32 %v39340_v42, %v11250_v32  ;;  %v39341_v12 = vld [vmem:[#allocation15_spill] sm:$0xff]  ;;  %v39349_v32 = vld [vmem:[#allocation54_spill] sm:$0xff] }
 0x27f   :  { %v12302_v6 = vpop.f32.mrf.mxu0  ;;  %v11994_v9 = vadd.f32 %v11993_v21, %v11916_v60  ;;  %v12066_v52 = vadd.f32 %v12065_v0, %v11992_v44  ;;  %v39321_v21 = vld [vmem:[#allocation37_spill] sm:$0xff]  ;;  %v39329_v44 = vld [vmem:[#allocation52_spill] sm:$0xff]  ;;  %v11325_v22 = vadd.f32 %v39334_v25, %v11248_v48  ;;  %v39343_v48 = vld [vmem:[#allocation39_spill] sm:$0xff] }
 0x280   :  { %v12067_v15 = vpop.f32.mrf.mxu1  ;;  %v9342_v57 = vadd.f32 %v39321_v21, %v39320_v54  ;;  %v10785_v60 = vadd.f32 %v39329_v44, %v39328_v19  ;;  %v39346_v19 = vld [vmem:[#allocation13_spill] sm:$0xff] }
 0x281   :  { %v12304_v14 = vpop.f32.mrf.mxu0  ;;  %v13000_v49 = vadd.f32 %v12066_v52, %v11557_v18  ;;  %v12068_v4 = vadd.f32 %v12067_v15, %v11994_v9  ;;  %v39332_v9 = vld [vmem:[#allocation35_spill] sm:$0xff]  ;;  %v11401_v36 = vadd.f32 %v34528_v61, %v11325_v22  ;;  %v39354_v22 = vld [vmem:[#allocation45_spill] sm:$0xff] }
 0x282   :  { %v12225_v7 = vpop.f32.mrf.mxu1  ;;  %v9419_v52 = vadd.f32 %v39332_v9, %v9342_v57  ;;  %v39339_v57 = vld [vmem:[#allocation11_spill] sm:$0xff]  ;;  %v11403_v9 = vadd.f32 %v34532_v26, %v11327_v8  ;;  %v39359_v8 = vld [vmem:[#allocation53_spill] sm:$0xff] }
 0x283   :  { %v12456_v47 = vpop.f32.mrf.mxu0  ;;  %v13006_v33 = vmax.f32 %v13000_v49, 0.0  ;;  %v13001_v10 = vadd.f32 %v12068_v4, %v11558_v37  ;;  %v12226_v28 = vadd.f32 %v12225_v7, %v12143_v23  ;;  %v39331_v23 = vld [vmem:[#allocation20_spill] sm:$0xff]  ;;  %v39338_v4 = vld [vmem:[#allocation50_spill] sm:$0xff]  ;;  %v5343_v16 = vadd.f32 %v39339_v57, %v5269_v2 }
 0x284   :  { %v12227_v3 = vpop.f32.mrf.mxu1  ;;  %v7074_v18 = vadd.f32 %v39331_v23, %v6998_v51  ;;  %v39336_v51 = vld [vmem:[#allocation26_spill] sm:$0xff]  ;;  %v39337_v49 = vld [vmem:[#allocation32_spill] sm:$0xff]  ;;  %v10862_v54 = vadd.f32 %v39338_v4, %v10785_v60  ;;  %v39347_v60 = vld [vmem:[#allocation25_spill] sm:$0xff] }
 0x285   :  { %v34598_v0 = vpop.f32.mrf.mxu0  ;;  %v34602_v1 = vmul.f32 %v13017_v38, %v13006_v33  ;;  %v13007_v5 = vmax.f32 %v13001_v10, 0.0  ;;  %v12303_v20 = vadd.f32 %v12302_v6, %v12226_v28  ;;  %v12228_v63 = vadd.f32 %v12227_v3, %v12145_v53  ;;  %v39335_v6 = vld [vmem:[#allocation12_spill] sm:$0xff]  ;;  %v39344_v10 = vld [vmem:[#allocation46_spill] sm:$0xff]  ;;  %v39350_v23 = vld [vmem:[#allocation9_spill] sm:$0xff] }
 0x286   :  { %v12378_v43 = vpop.f32.mrf.mxu1  ;;  %v5734_v15 = vadd.f32 %v39335_v6, %v5656_v56  ;;  %v8052_v37 = vadd.f32 %v39336_v51, %v7976_v29  ;;  %v8517_v38 = vadd.f32 %v39337_v49, %v8441_v41  ;;  %v13024_v53 = vsub.s32 2, %v34553_v58  ;;  %v39345_v29 = vld [vmem:[#allocation43_spill] sm:$0xff]  ;;  %v39356_v4 = vld [vmem:[#allocation10_spill] sm:$0xff] }
 0x287   :  { %v12608_v13 = vpop.f32.mrf.mxu0  ;;  %v34609_v27 = vmul.f32 %v13021_v31, %v13007_v5  ;;  %v12379_v17 = vadd.f32 %v12378_v43, %v12303_v20  ;;  %13069 = vrot.lane.b32.xlu0 %v34602_v1, %s32984_s9  ;;  %v6687_v56 = vadd.f32 %v39341_v12, %v6609_v11  ;;  %v39342_v31 = vld [vmem:[#allocation19_spill] sm:$0xff]  ;;  %v9495_v33 = vadd.f32 %v39343_v48, %v9419_v52  ;;  %v39353_v43 = vld [vmem:[#allocation38_spill] sm:$0xff] }
 0x288   :  { %v12380_v24 = vpop.f32.mrf.mxu1  ;;  %v7152_v7 = vadd.f32 %v39342_v31, %v7074_v18  ;;  %v9960_v28 = vadd.f32 %v39344_v10, %v9884_v55  ;;  %v11559_v2 = vadd.f32 %v11088_v46, %v39345_v29  ;;  %v5808_v44 = vadd.f32 %v39346_v19, %v5734_v15  ;;  %v39351_v55 = vld [vmem:[#allocation17_spill] sm:$0xff]  ;;  %v39355_v15 = vld [vmem:[#allocation59_spill] sm:$0xff] }
 0x289   :  { %v12610_v21 = vpop.f32.mrf.mxu0  ;;  %v12457_v39 = vadd.f32 %v12456_v47, %v12379_v17  ;;  %13071 = vrot.lane.b32.xlu1 %v34609_v27, %s32984_s9  ;;  %v12305_v47 = vadd.f32 %v12304_v14, %v12228_v63  ;;  %v8130_v3 = vadd.f32 %v39347_v60, %v8052_v37  ;;  %v8595_v11 = vadd.f32 %v39348_v34, %v8517_v38  ;;  %v39352_v14 = vld [vmem:[#allocation21_spill] sm:$0xff] }
 0x28a   :  { %v12530_v35 = vpop.f32.mrf.mxu1  ;;  %v10938_v5 = vadd.f32 %v39349_v32, %v10862_v54  ;;  %v5813_v18 = vadd.f32 %v5343_v16, %v39350_v23  ;;  %v13025_v45 = vrot.slane %v34574_v40, %v13024_v53  ;;  %v6761_v61 = vadd.f32 %v39351_v55, %v6687_v56  ;;  %v39357_v54 = vld [vmem:[#allocation28_spill] sm:$0xff]  ;;  %v39358_v16 = vld [vmem:[#allocation33_spill] sm:$0xff] }
 0x28b   :  { %v12767_v59 = vpop.f32.mrf.mxu0  ;;  %v12531_v41 = vadd.f32 %v12530_v35, %v12457_v39  ;;  %v7226_v46 = vadd.f32 %v39352_v14, %v7152_v7  ;;  %v9573_v25 = vadd.f32 %v39353_v43, %v9495_v33  ;;  %v10038_v63 = vadd.f32 %v39354_v22, %v9960_v28 }
 0x28c   :  { %v12532_v20 = vpop.f32.mrf.mxu1  ;;  %v11479_v51 = vadd.f32 %v39355_v15, %v11401_v36  ;;  %v12381_v37 = vadd.f32 %v12380_v24, %v12305_v47  ;;  %v5815_v26 = vadd.f32 %v5808_v44, %v39356_v4  ;;  %v8204_v57 = vadd.f32 %v39357_v54, %v8130_v3  ;;  %v39360_v24 = vld [vmem:[#allocation41_spill] sm:$0xff] }
 0x28d   :  { %v13002_v52 = vadd.f32 %v12531_v41, %v11559_v2  ;;  %v12769_v6 = vpop.f32.mrf.mxu0  ;;  %v8669_v42 = vadd.f32 %v39358_v16, %v8595_v11  ;;  %v11016_v39 = vadd.f32 %v39359_v8, %v10938_v5  ;;  %v11481_v12 = vadd.f32 %v34524_v50, %v11403_v9  ;;  %v39362_v44 = vld [vmem:[#allocation57_spill] sm:$0xff]  ;;  %v31604_v16 = vld [vmem:[%s38611_s4 + $0x8] sm:$0xff] }
 0x28e   :  { %v12690_v17 = vpop.f32.mrf.mxu1  ;;  %v7231_v48 = vadd.f32 %v6761_v61, %v5813_v18  ;;  %v7233_v33 = vadd.f32 %v7226_v46, %v5815_v26  ;;  %v9647_v10 = vadd.f32 %v39360_v24, %v9573_v25  ;;  %v11553_v2 = vadd.f32 %v34538_v30, %v11479_v51  ;;  %v39363_v18 = vld [vmem:[#allocation48_spill] sm:$0xff] }
 0x28f   :  { %v13008_v49 = vmax.f32 %v13002_v52, 0.0  ;;  %v12691_v38 = vadd.f32 %v12690_v17, %v12608_v13  ;;  %v39361_v13 = vld [vmem:[#allocation47_spill] sm:$0xff]  ;;  %v12921_v29 = vpop.f32.mrf.mxu0  ;;  %v12459_v36 = vadd.f32 %v34598_v0, %v12381_v37  ;;  %v13032_v19 = vsub.s32 4, %v34553_v58 }
 0x290   :  { %v12692_v53 = vpop.f32.mrf.mxu1  ;;  %v10112_v28 = vadd.f32 %v39361_v13, %v10038_v63  ;;  %v8674_v50 = vadd.f32 %v8204_v57, %v7231_v48  ;;  %v11090_v60 = vadd.f32 %v39362_v44, %v11016_v39  ;;  %v11555_v3 = vadd.f32 %v34542_v62, %v11481_v12 }
 0x291   :  { %v34645_v56 = vmul.f32 %v13025_v45, %v13008_v49  ;;  %v12768_v31 = vadd.f32 %v12767_v59, %v12691_v38  ;;  %v12693_v7 = vadd.f32 %v12692_v53, %v12610_v21  ;;  %v8676_v59 = vadd.f32 %v8669_v42, %v7233_v33  ;;  %v12923_v5 = vpop.f32.mrf.mxu0 }
 0x292   :  { %v12843_v35 = vpop.f32.mrf.mxu1  ;;  %v10117_v32 = vadd.f32 %v9647_v10, %v8674_v50  ;;  %v13036_v23 = vsub.s32 5, %v34553_v58  ;;  %v11561_v9 = vadd.f32 %v11553_v2, %v39363_v18  ;;  %v12533_v52 = vadd.f32 %v12532_v20, %v12459_v36 }
 0x293   :  { %v12770_v47 = vadd.f32 %v12769_v6, %v12693_v7  ;;  %v12844_v41 = vadd.f32 %v12843_v35, %v12768_v31  ;;  %13073 = vrot.lane.b32.xlu1 %v34645_v56, %s32984_s9  ;;  %v10119_v30 = vadd.f32 %v10112_v28, %v8676_v59  ;;  %v13033_v61 = vrot.slane %v34574_v40, %v13032_v19 }
 0x294   :  { %v12845_v21 = vpop.f32.mrf.mxu1  ;;  %v11560_v46 = vadd.f32 %v11090_v60, %v10117_v32  ;;  %v13028_v22 = vsub.s32 3, %v34553_v58  ;;  %v13037_v15 = vrot.slane %v34574_v40, %v13036_v23  ;;  %v13091_v39 = vsel %vm13089_vm10, %v31604_v16, 0 }
 0x295   :  { %v12922_v34 = vadd.f32 %v12921_v29, %v12844_v41  ;;  %v12846_v11 = vadd.f32 %v12845_v21, %v12770_v47  ;;  %v11562_v43 = vadd.f32 %v11555_v3, %v10119_v30  ;;  %v34764_v12 = vand.u32 4294901760, %v13091_v39 }
 0x296   :  { %v12995_v0 = vpop.f32.mrf.mxu1  ;;  %v13003_v63 = vadd.f32 %v12533_v52, %v11560_v46  ;;  %v13029_v49 = vrot.slane %v34574_v40, %v13028_v22  ;;  %v39365_v21 = vmov 0.0  }
 0x297   :  { %v12924_v45 = vadd.f32 %v12923_v5, %v12846_v11  ;;  %v12996_v55 = vadd.f32 %v12995_v0, %v12922_v34  ;;  %v34767_v7 = vsub.f32 %v13091_v39, %v34764_v12 }
 0x298   :  { %v12997_v14 = vpop.f32.mrf.mxu1  ;;  %v13009_v20 = vmax.f32 %v13003_v63, 0.0 }
 0x299   :  { %v13004_v25 = vadd.f32 %v12996_v55, %v11561_v9  ;;  %v12998_v62 = vadd.f32 %v12997_v14, %v12924_v45  ;;  %v34770_v48 = vand.u32 4294901760, %v34767_v7  ;;  %v13068_v45 = vld [vmem:[%s38611_s4] sm:$0xff] }
 0x29a   :  { %v34670_v58 = vmul.f32 %v13029_v49, %v13009_v20  ;;  %v14489_v14 = vsel %vm13089_vm10, %v13068_v45, 0 }
 0x29b   :  { %v13010_v17 = vmax.f32 %v13004_v25, 0.0  ;;  %v13005_v6 = vadd.f32 %v12998_v62, %v11562_v43  ;;  %v13163_v33 = vsub.f32 %v34767_v7, %v34770_v48 }
 0x29d   :  { %v34661_v51 = vmul.f32 %v13033_v61, %v13010_v17  ;;  %v13011_v37 = vmax.f32 %v13005_v6, 0.0  ;;  %v34778_v35 = vand.u32 4294901760, %v13163_v33  ;;  %v34822_v17 = vand.u32 4294901760, %v14489_v14 }
 0x29f   :  { %v34664_v38 = vmul.f32 %v13037_v15, %v13011_v37  ;;  %13077 = vrot.lane.b32.xlu1 %v34661_v51, %s32984_s9  ;;  %v34837_v49 = vsub.f32 %v14489_v14, %v34822_v17 }
 0x2a1   :  { %13079 = vrot.lane.b32.xlu0 %v34664_v38, %s32984_s9  ;;  %v34850_v16 = vand.u32 4294901760, %v34837_v49 }
 0x2a3   :  { %13052 = vrot.lane.b32.xlu1 %v34609_v27, %s32985_s10 }
 0x2a5   :  { %13075 = vrot.lane.b32.xlu0 %v34670_v58, %s32984_s9 }
 0x2a7   :  { %13054 = vrot.lane.b32.xlu1 %v34645_v56, %s32985_s10 }
 0x2a9   :  { %13050 = vrot.lane.b32.xlu0 %v34602_v1, %s32985_s10 }
 0x2ab   :  { %13058 = vrot.lane.b32.xlu1 %v34661_v51, %s32985_s10 }
 0x2ad   :  { %13060 = vrot.lane.b32.xlu0 %v34664_v38, %s32985_s10 }
 0x2af   :  { %15888 = vrot.lane.b32.xlu1 %v34609_v27, %s32986_s11 }
 0x2b1   :  { %13056 = vrot.lane.b32.xlu0 %v34670_v58, %s32985_s10 }
 0x2b3   :  { %15890 = vrot.lane.b32.xlu1 %v34645_v56, %s32986_s11 }
 0x2b5   :  { %15886 = vrot.lane.b32.xlu0 %v34602_v1, %s32986_s11 }
 0x2b7   :  { %15894 = vrot.lane.b32.xlu1 %v34661_v51, %s32986_s11 }
 0x2b9   :  { %15896 = vrot.lane.b32.xlu0 %v34664_v38, %s32986_s11 }
 0x2bb   :  { %17312 = vrot.lane.b32.xlu1 %v34609_v27, %s32987_s12 }
 0x2bd   :  { %15892 = vrot.lane.b32.xlu0 %v34670_v58, %s32986_s11 }
 0x2bf   :  { %17314 = vrot.lane.b32.xlu1 %v34645_v56, %s32987_s12 }
 0x2c1   :  { %17310 = vrot.lane.b32.xlu0 %v34602_v1, %s32987_s12 }
 0x2c3   :  { %17318 = vrot.lane.b32.xlu1 %v34661_v51, %s32987_s12 }
 0x2c5   :  { %17320 = vrot.lane.b32.xlu0 %v34664_v38, %s32987_s12 }
 0x2c7   :  { %20144 = vrot.lane.b32.xlu1 %v34645_v56, %s32988_s13 }
 0x2c9   :  { %17316 = vrot.lane.b32.xlu0 %v34670_v58, %s32987_s12 }
 0x2cb   :  { %20146 = vrot.lane.b32.xlu1 %v34670_v58, %s32988_s13 }
 0x2cd   :  { %20142 = vrot.lane.b32.xlu0 %v34609_v27, %s32988_s13 }
 0x2cf   :  { %20150 = vrot.lane.b32.xlu1 %v34664_v38, %s32988_s13 }
 0x2d1   :  { %20140 = vrot.lane.b32.xlu0 %v34602_v1, %s32988_s13 }
 0x2d3   :  { %21568 = vrot.lane.b32.xlu1 %v34645_v56, %s32989_s14 }
 0x2d5   :  { %20148 = vrot.lane.b32.xlu0 %v34661_v51, %s32988_s13 }
 0x2d7   :  { %21570 = vrot.lane.b32.xlu1 %v34670_v58, %s32989_s14 }
 0x2d9   :  { %21566 = vrot.lane.b32.xlu0 %v34609_v27, %s32989_s14 }
 0x2db   :  { %21574 = vrot.lane.b32.xlu1 %v34664_v38, %s32989_s14 }
 0x2dd   :  { %21564 = vrot.lane.b32.xlu0 %v34602_v1, %s32989_s14 }
 0x2df   :  { %22992 = vrot.lane.b32.xlu1 %v34645_v56, %s32990_s17 }
 0x2e1   :  { %21572 = vrot.lane.b32.xlu0 %v34661_v51, %s32989_s14 }
 0x2e3   :  { %22994 = vrot.lane.b32.xlu1 %v34670_v58, %s32990_s17 }
 0x2e5   :  { %22990 = vrot.lane.b32.xlu0 %v34609_v27, %s32990_s17 }
 0x2e7   :  { %22998 = vrot.lane.b32.xlu1 %v34664_v38, %s32990_s17 }
 0x2e9   :  { %22988 = vrot.lane.b32.xlu0 %v34602_v1, %s32990_s17 }
 0x2eb   :  { %24416 = vrot.lane.b32.xlu1 %v34645_v56, %s32991_s26 }
 0x2ed   :  { %22996 = vrot.lane.b32.xlu0 %v34661_v51, %s32990_s17 }
 0x2ef   :  { %24418 = vrot.lane.b32.xlu1 %v34670_v58, %s32991_s26 }
 0x2f1   :  { %24414 = vrot.lane.b32.xlu0 %v34609_v27, %s32991_s26 }
 0x2f3   :  { %24422 = vrot.lane.b32.xlu1 %v34664_v38, %s32991_s26 }
 0x2f5   :  { %24412 = vrot.lane.b32.xlu0 %v34602_v1, %s32991_s26 }
 0x2f9   :  { %24420 = vrot.lane.b32.xlu0 %v34661_v51, %s32991_s26  ;;  %v13070_v40 = vpop.permute.xlu0 %13069 }
 0x2fb   :  { %v13072_v4 = vpop.permute.xlu1 %13071 }
 0x2fc   :  { %v13085_v54 = vsel %vm87_vm1, %v13070_v40, %v13072_v4 }
 0x2fd   :  { %v13123_v57 = vand.u32 4294901760, %v13085_v54 }
 0x2ff   :  { %v13202_v42 = vsub.f32 %v13085_v54, %v13123_v57  ;;  %13124 = vmatprep.subr.mxu0 %v13123_v57 }
 0x301   :  { %v13203_v8 = vand.u32 4294901760, %v13202_v42 }
 0x303   :  { %v13204_v53 = vsub.f32 %v13202_v42, %v13203_v8 }
 0x305   :  { %v13205_v31 = vand.u32 4294901760, %v13204_v53  ;;  %v13074_v24 = vpop.permute.xlu1 %13073 }
 0x306   :  { %v13084_v13 = vsel %vm87_vm1, %v13072_v4, %v13074_v24 }
 0x307   :  { %13206 = vmatprep.subr.mxu1 %v13205_v31  ;;  %v34780_v2 = vand.u32 4294901760, %v13084_v13 }
 0x309   :  { %v13673_v19 = vsub.f32 %v13084_v13, %v34780_v2 }
 0x30b   :  { %v13674_v30 = vand.u32 4294901760, %v13673_v19 }
 0x30d   :  { %v13675_v18 = vsub.f32 %v13673_v19, %v13674_v30 }
 0x30f   :  { %v13676_v43 = vand.u32 4294901760, %v13675_v18 }
 0x311   :  { %v13078_v3 = vpop.permute.xlu1 %13077 }
 0x313   :  { %v13080_v10 = vpop.permute.xlu0 %13079 }
 0x314   :  { %v13086_v28 = vsel %vm87_vm1, %v13080_v10, %v13070_v40  ;;  %v13081_v34 = vsel %vm87_vm1, %v13078_v3, %v13080_v10 }
 0x315   :  { %v13125_v29 = vand.u32 4294901760, %v13086_v28  ;;  %v34795_v5 = vand.u32 4294901760, %v13081_v34  ;;  %v13053_v25 = vpop.permute.xlu1 %13052 }
 0x317   :  { %v13208_v36 = vsub.f32 %v13086_v28, %v13125_v29  ;;  %v13076_v47 = vpop.permute.xlu0 %13075  ;;  %13126 = vmatpush1.msra.mxu0 %v13125_v29  ;;  %v14132_v55 = vsub.f32 %v13081_v34, %v34795_v5 }
 0x318   :  { %v13083_v41 = vsel %vm87_vm1, %v13074_v24, %v13076_v47  ;;  %13165 = vmatmul.mubr.f32.vlgmr.msra.gmra.mxu0 %v34778_v35  ;;  %13285 = vmatprep.subr.mxu0 %v13202_v42  ;;  %v13082_v0 = vsel %vm87_vm1, %v13076_v47, %v13078_v3  ;;  %v14561_v24 = vsub.f32 %v34837_v49, %v34850_v16 }
 0x319   :  { %v13209_v50 = vand.u32 4294901760, %v13208_v36  ;;  %v34785_v59 = vand.u32 4294901760, %v13083_v41  ;;  %13288 = vmatpush1.msra.mxu0 %v13208_v36  ;;  %13321 = vmatprep.mubr.f32.mxu0 %v39365_v21  ;;  %v34802_v9 = vand.u32 4294901760, %v13082_v0  ;;  %v14133_v62 = vand.u32 4294901760, %v14132_v55  ;;  %v13055_v53 = vpop.permute.xlu1 %13054 }
 0x31a   :  { %13439 = vmatprep.subr.mxu0 %v13203_v8  ;;  %v13065_v13 = vsel %vm67_vm3, %v13053_v25, %v13055_v53 }
 0x31b   :  { %v13210_v44 = vsub.f32 %v13208_v36, %v13209_v50  ;;  %v13667_v60 = vsub.f32 %v13083_v41, %v34785_v59  ;;  %v13051_v52 = vpop.permute.xlu0 %13050  ;;  %v14138_v46 = vsub.f32 %v13082_v0, %v34802_v9  ;;  %v14134_v20 = vsub.f32 %v14132_v55, %v14133_v62 }
 0x31c   :  { %13324 = vmatmul.mubr.f32.vlgmr.msra.gmra.mxu0 %v34767_v7  ;;  %v13066_v22 = vsel %vm67_vm3, %v13051_v52, %v13053_v25 }
 0x31d   :  { %13443 = vmatpush1.msra.mxu0 %v13209_v50  ;;  %v13211_v11 = vand.u32 4294901760, %v13210_v44  ;;  %13476 = vmatprep.mubr.f32.mxu0 %v39365_v21  ;;  %v13668_v32 = vand.u32 4294901760, %v13667_v60  ;;  %v14139_v6 = vand.u32 4294901760, %v14138_v46  ;;  %v34827_v15 = vand.u32 4294901760, %v13066_v22 }
 0x31e   :  { %13589 = vmatprep.subr.mxu0 %v34785_v59 }
 0x31f   :  { %13212 = vmatpush1.msra.mxu1 %v13211_v11  ;;  %v13669_v23 = vsub.f32 %v13667_v60, %v13668_v32  ;;  %v34819_v63 = vpop.permute.xlu0 %13060  ;;  %v14140_v40 = vsub.f32 %v14138_v46, %v14139_v6  ;;  %v14600_v54 = vsub.f32 %v13066_v22, %v34827_v15 }
 0x320   :  { %13247 = vmatmul.mubr.f32.vlgmr.msra.gmra.mxu1 %v34764_v12  ;;  %13361 = vmatprep.subr.mxu1 %v13123_v57  ;;  %v13067_v37 = vsel %vm67_vm3, %v34819_v63, %v13051_v52 }
 0x321   :  { %13478 = vmatmul.mubr.f32.vlgmr.msra.gmra.mxu0 %v34764_v12  ;;  %13363 = vmatpush1.msra.mxu1 %v13125_v29  ;;  %v13670_v61 = vand.u32 4294901760, %v13669_v23  ;;  %v34841_v4 = vand.u32 4294901760, %v13067_v37  ;;  %v14141_v39 = vand.u32 4294901760, %v14140_v40  ;;  %v14601_v31 = vand.u32 4294901760, %v14600_v54 }
 0x322   :  { %13591 = vmatpush1.msra.mxu0 %v34780_v2  ;;  %13515 = vmatprep.subr.mxu1 %v13123_v57  ;;  %v14135_v57 = vand.u32 4294901760, %v14134_v20 }
 0x323   :  { %13750 = vmatprep.subr.mxu0 %v13667_v60  ;;  %13396 = vmatprep.mubr.f32.mxu1 %v39365_v21  ;;  %v13057_v42 = vpop.permute.xlu0 %13056  ;;  %v14606_v8 = vsub.f32 %v13067_v37, %v34841_v4 }
 0x324   :  { %13624 = vmatprep.mubr.f32.mxu0 %v39365_v21  ;;  %13400 = vmatmul.mubr.f32.vlgmr.msra.gmra.mxu1 %v34770_v48  ;;  %v13064_v33 = vsel %vm67_vm3, %v13055_v53, %v13057_v42 }
 0x325   :  { %13517 = vmatpush1.msra.mxu1 %v13125_v29  ;;  %13630 = vmatmul.mubr.f32.vlgmr.msra.gmra.mxu0 %v34778_v35  ;;  %v14607_v10 = vand.u32 4294901760, %v14606_v8  ;;  %v34866_v28 = vand.u32 4294901760, %v13064_v33  ;;  %v34876_v29 = vand.u32 4294901760, %v13065_v13 }
 0x326   :  { %13753 = vmatpush1.msra.mxu0 %v13673_v19  ;;  %13671 = vmatprep.subr.mxu1 %v13670_v61 }
 0x327   :  { %13904 = vmatprep.subr.mxu0 %v13668_v32  ;;  %13550 = vmatprep.mubr.f32.mxu1 %v39365_v21  ;;  %v15065_v36 = vsub.f32 %v13064_v33, %v34866_v28  ;;  %v15071_v41 = vsub.f32 %v13065_v13, %v34876_v29  ;;  %v15887_v32 = vpop.permute.xlu0 %15886 }
 0x328   :  { %13786 = vmatprep.mubr.f32.mxu0 %v39365_v21  ;;  %13552 = vmatmul.mubr.f32.vlgmr.msra.gmra.mxu1 %v34764_v12 }
 0x329   :  { %13677 = vmatpush1.msra.mxu1 %v13676_v43  ;;  %13789 = vmatmul.mubr.f32.vlgmr.msra.gmra.mxu0 %v34767_v7  ;;  %v15066_v19 = vand.u32 4294901760, %v15065_v36  ;;  %v15072_v44 = vand.u32 4294901760, %v15071_v41 }
 0x32a   :  { %13908 = vmatpush1.msra.mxu0 %v13674_v30  ;;  %13826 = vmatprep.subr.mxu1 %v34785_v59  ;;  %v31605_v30 = vld [vmem:[%s38611_s4 + $0x10] sm:$0xff] }
 0x32b   :  { %14054 = vmatprep.subr.mxu0 %v34795_v5  ;;  %13710 = vmatprep.mubr.f32.mxu1 %v39365_v21  ;;  %v15067_v3 = vsub.f32 %v15065_v36, %v15066_v19  ;;  %v15073_v34 = vsub.f32 %v15071_v41, %v15072_v44  ;;  %v15907_v23 = vsel %vm13089_vm10, %v31605_v30, 0  ;;  %v34923_v61 = vpop.permute.xlu0 %15896 }
 0x32c   :  { %13941 = vmatprep.mubr.f32.mxu0 %v39365_v21  ;;  %13712 = vmatmul.mubr.f32.vlgmr.msra.gmra.mxu1 %v34764_v12  ;;  %v34926_v14 = vand.u32 4294901760, %v15907_v23  ;;  %v15903_v25 = vsel %vm2942_vm4, %v34923_v61, %v15887_v32 }
 0x32d   :  { %13828 = vmatpush1.msra.mxu1 %v34780_v2  ;;  %13943 = vmatmul.mubr.f32.vlgmr.msra.gmra.mxu0 %v34764_v12  ;;  %v15068_v0 = vand.u32 4294901760, %v15067_v3 }
 0x32e   :  { %14056 = vmatpush1.msra.mxu0 %v34802_v9  ;;  %13980 = vmatprep.subr.mxu1 %v34785_v59  ;;  %v13059_v59 = vpop.permute.xlu1 %13058  ;;  %v34941_v22 = vsub.f32 %v15907_v23, %v34926_v14 }
 0x32f   :  { %14215 = vmatprep.subr.mxu0 %v14132_v55  ;;  %13861 = vmatprep.mubr.f32.mxu1 %v39365_v21  ;;  %v15893_v40 = vpop.permute.xlu0 %15892 }
 0x330   :  { %14089 = vmatprep.mubr.f32.mxu0 %v39365_v21  ;;  %13865 = vmatmul.mubr.f32.vlgmr.msra.gmra.mxu1 %v34770_v48  ;;  %v34954_v20 = vand.u32 4294901760, %v34941_v22 }
 0x331   :  { %13982 = vmatpush1.msra.mxu1 %v34780_v2  ;;  %14095 = vmatmul.mubr.f32.vlgmr.msra.gmra.mxu0 %v34778_v35  ;;  %v34872_v35 = vand.u32 4294901760, %v14561_v24  ;;  %v14608_v2 = vsub.f32 %v14606_v8, %v14607_v10 }
 0x332   :  { %14218 = vmatpush1.msra.mxu0 %v14138_v46  ;;  %14136 = vmatprep.subr.mxu1 %v14135_v57  ;;  %v15889_v52 = vpop.permute.xlu1 %15888 }
 0x333   :  { %14369 = vmatprep.subr.mxu0 %v14133_v62  ;;  %14015 = vmatprep.mubr.f32.mxu1 %v39365_v21  ;;  %v14609_v50 = vand.u32 4294901760, %v14608_v2  ;;  %v15902_v55 = vsel %vm2942_vm4, %v15887_v32, %v15889_v52 }
 0x334   :  { %14251 = vmatprep.mubr.f32.mxu0 %v39365_v21  ;;  %14017 = vmatmul.mubr.f32.vlgmr.msra.gmra.mxu1 %v34764_v12  ;;  %v34931_v43 = vand.u32 4294901760, %v15902_v55 }
 0x335   :  { %14142 = vmatpush1.msra.mxu1 %v14141_v39  ;;  %14254 = vmatmul.mubr.f32.vlgmr.msra.gmra.mxu0 %v34767_v7  ;;  %v14602_v7 = vsub.f32 %v14600_v54, %v14601_v31  ;;  %v15979_v39 = vsub.f32 %v34941_v22, %v34954_v20 }
 0x336   :  { %14373 = vmatpush1.msra.mxu0 %v14139_v6  ;;  %14291 = vmatprep.subr.mxu1 %v34795_v5  ;;  %v34945_v6 = vand.u32 4294901760, %v15903_v25  ;;  %v15891_v57 = vpop.permute.xlu1 %15890 }
 0x337   :  { %14522 = vmatprep.subr.mxu0 %v34827_v15  ;;  %14175 = vmatprep.mubr.f32.mxu1 %v39365_v21  ;;  %v14603_v47 = vand.u32 4294901760, %v14602_v7  ;;  %v34976_v24 = vand.u32 4294901760, %v15979_v39 }
 0x338   :  { %14406 = vmatprep.mubr.f32.mxu0 %v39365_v21  ;;  %14177 = vmatmul.mubr.f32.vlgmr.msra.gmra.mxu1 %v34764_v12 }
 0x339   :  { %14293 = vmatpush1.msra.mxu1 %v34802_v9  ;;  %14408 = vmatmul.mubr.f32.vlgmr.msra.gmra.mxu0 %v34764_v12 }
 0x33a   :  { %14524 = vmatpush1.msra.mxu0 %v34841_v4  ;;  %14445 = vmatprep.subr.mxu1 %v34795_v5  ;;  %v15895_v2 = vpop.permute.xlu1 %15894 }
 0x33b   :  { %14683 = vmatprep.subr.mxu0 %v14600_v54  ;;  %14326 = vmatprep.mubr.f32.mxu1 %v39365_v21 }
 0x33c   :  { %14557 = vmatprep.mubr.f32.mxu0 %v39365_v21  ;;  %14330 = vmatmul.mubr.f32.vlgmr.msra.gmra.mxu1 %v34770_v48  ;;  %v13062_v48 = vsel %vm67_vm3, %v13059_v59, %v34819_v63 }
 0x33d   :  { %14447 = vmatpush1.msra.mxu1 %v34802_v9  ;;  %14563 = vmatmul.mubr.f32.vlgmr.msra.gmra.mxu0 %v34872_v35  ;;  %v34895_v60 = vand.u32 4294901760, %v13062_v48  ;;  %v15074_v9 = vand.u32 4294901760, %v15073_v34 }
 0x33e   :  { %14686 = vmatpush1.msra.mxu0 %v14606_v8  ;;  %14604 = vmatprep.subr.mxu1 %v14603_v47  ;;  %v15900_v8 = vsel %vm2942_vm4, %v15891_v57, %v15893_v40  ;;  %v17313_v32 = vpop.permute.xlu1 %17312 }
 0x33f   :  { %14837 = vmatprep.subr.mxu0 %v14601_v31  ;;  %14480 = vmatprep.mubr.f32.mxu1 %v39365_v21  ;;  %v15530_v5 = vsub.f32 %v13062_v48, %v34895_v60  ;;  %v15901_v31 = vsel %vm2942_vm4, %v15889_v52, %v15891_v57  ;;  %v34970_v33 = vand.u32 4294901760, %v15900_v8  ;;  %v17311_v48 = vpop.permute.xlu0 %17310 }
 0x340   :  { %14719 = vmatprep.mubr.f32.mxu0 %v39365_v21  ;;  %14482 = vmatmul.mubr.f32.vlgmr.msra.gmra.mxu1 %v34764_v12  ;;  %v13063_v12 = vsel %vm67_vm3, %v13057_v42, %v13059_v59 }
 0x341   :  { %14610 = vmatpush1.msra.mxu1 %v14609_v50  ;;  %14722 = vmatmul.mubr.f32.vlgmr.msra.gmra.mxu0 %v34837_v49  ;;  %v34905_v11 = vand.u32 4294901760, %v13063_v12  ;;  %v15531_v45 = vand.u32 4294901760, %v15530_v5 }
 0x342   :  { %14841 = vmatpush1.msra.mxu0 %v14607_v10  ;;  %14759 = vmatprep.subr.mxu1 %v34827_v15  ;;  %v34980_v10 = vand.u32 4294901760, %v15901_v31 }
 0x343   :  { %14987 = vmatprep.subr.mxu0 %v34866_v28  ;;  %14643 = vmatprep.mubr.f32.mxu1 %v39365_v21  ;;  %v15536_v18 = vsub.f32 %v13063_v12, %v34905_v11  ;;  %v15532_v62 = vsub.f32 %v15530_v5, %v15531_v45 }
 0x344   :  { %14874 = vmatprep.mubr.f32.mxu0 %v39365_v21  ;;  %14645 = vmatmul.mubr.f32.vlgmr.msra.gmra.mxu1 %v34822_v17 }
 0x345   :  { %14761 = vmatpush1.msra.mxu1 %v34841_v4  ;;  %14876 = vmatmul.mubr.f32.vlgmr.msra.gmra.mxu0 %v34822_v17  ;;  %v15537_v46 = vand.u32 4294901760, %v15536_v18  ;;  %v15533_v37 = vand.u32 4294901760, %v15532_v62 }
 0x346   :  { %14989 = vmatpush1.msra.mxu0 %v34876_v29  ;;  %14913 = vmatprep.subr.mxu1 %v34827_v15  ;;  %v16018_v15 = vsub.f32 %v15902_v55, %v34931_v43 }
 0x347   :  { %15148 = vmatprep.subr.mxu0 %v15065_v36  ;;  %14794 = vmatprep.mubr.f32.mxu1 %v39365_v21  ;;  %v15538_v63 = vsub.f32 %v15536_v18, %v15537_v46 }
 0x348   :  { %15022 = vmatprep.mubr.f32.mxu0 %v39365_v21  ;;  %14798 = vmatmul.mubr.f32.vlgmr.msra.gmra.mxu1 %v34850_v16  ;;  %v16019_v42 = vand.u32 4294901760, %v16018_v15 }
 0x349   :  { %14915 = vmatpush1.msra.mxu1 %v34841_v4  ;;  %15028 = vmatmul.mubr.f32.vlgmr.msra.gmra.mxu0 %v34872_v35  ;;  %v16024_v4 = vsub.f32 %v15903_v25, %v34945_v6  ;;  %v15539_v54 = vand.u32 4294901760, %v15538_v63 }
 0x34a   :  { %15151 = vmatpush1.msra.mxu0 %v15071_v41  ;;  %15069 = vmatprep.subr.mxu1 %v15068_v0  ;;  %v35027_v0 = vpop.permute.xlu0 %17320 }
 0x34b   :  { %15302 = vmatprep.subr.mxu0 %v15066_v19  ;;  %14948 = vmatprep.mubr.f32.mxu1 %v39365_v21  ;;  %v16025_v53 = vand.u32 4294901760, %v16024_v4  ;;  %v17327_v52 = vsel %vm4385_vm5, %v35027_v0, %v17311_v48 }
 0x34c   :  { %15184 = vmatprep.mubr.f32.mxu0 %v39365_v21  ;;  %14950 = vmatmul.mubr.f32.vlgmr.msra.gmra.mxu1 %v34822_v17 }
 0x34d   :  { %15075 = vmatpush1.msra.mxu1 %v15074_v9  ;;  %15187 = vmatmul.mubr.f32.vlgmr.msra.gmra.mxu0 %v34837_v49  ;;  %v16026_v13 = vsub.f32 %v16024_v4, %v16025_v53 }
 0x34e   :  { %15306 = vmatpush1.msra.mxu0 %v15072_v44  ;;  %15224 = vmatprep.subr.mxu1 %v34866_v28  ;;  %v31606_v44 = vld [vmem:[%s38611_s4 + $0x18] sm:$0xff]  ;;  %v17317_v63 = vpop.permute.xlu0 %17316 }
 0x34f   :  { %15452 = vmatprep.subr.mxu0 %v34895_v60  ;;  %15108 = vmatprep.mubr.f32.mxu1 %v39365_v21  ;;  %v17331_v3 = vsel %vm13089_vm10, %v31606_v44, 0 }
 0x350   :  { %15339 = vmatprep.mubr.f32.mxu0 %v39365_v21  ;;  %15110 = vmatmul.mubr.f32.vlgmr.msra.gmra.mxu1 %v34822_v17  ;;  %v35030_v23 = vand.u32 4294901760, %v17331_v3 }
 0x351   :  { %15226 = vmatpush1.msra.mxu1 %v34876_v29  ;;  %15341 = vmatmul.mubr.f32.vlgmr.msra.gmra.mxu0 %v34822_v17 }
 0x352   :  { %15454 = vmatpush1.msra.mxu0 %v34905_v11  ;;  %15378 = vmatprep.subr.mxu1 %v34866_v28  ;;  %v16483_v28 = vsub.f32 %v15900_v8, %v34970_v33  ;;  %v35045_v55 = vsub.f32 %v17331_v3, %v35030_v23 }
 0x353   :  { %15613 = vmatprep.subr.mxu0 %v15530_v5  ;;  %15259 = vmatprep.mubr.f32.mxu1 %v39365_v21  ;;  %v17326_v5 = vsel %vm4385_vm5, %v17311_v48, %v17313_v32 }
 0x354   :  { %15487 = vmatprep.mubr.f32.mxu0 %v39365_v21  ;;  %15263 = vmatmul.mubr.f32.vlgmr.msra.gmra.mxu1 %v34850_v16  ;;  %v16484_v36 = vand.u32 4294901760, %v16483_v28  ;;  %v35035_v9 = vand.u32 4294901760, %v17326_v5  ;;  %v35058_v62 = vand.u32 4294901760, %v35045_v55 }
 0x355   :  { %15380 = vmatpush1.msra.mxu1 %v34876_v29  ;;  %15493 = vmatmul.mubr.f32.vlgmr.msra.gmra.mxu0 %v34872_v35  ;;  %v16489_v35 = vsub.f32 %v15901_v31, %v34980_v10  ;;  %v16027_v29 = vand.u32 4294901760, %v16026_v13 }
 0x356   :  { %15616 = vmatpush1.msra.mxu0 %v15536_v18  ;;  %15534 = vmatprep.subr.mxu1 %v15533_v37  ;;  %v16485_v50 = vsub.f32 %v16483_v28, %v16484_v36  ;;  %v17315_v37 = vpop.permute.xlu1 %17314 }
 0x357   :  { %15767 = vmatprep.subr.mxu0 %v15531_v45  ;;  %15413 = vmatprep.mubr.f32.mxu1 %v39365_v21  ;;  %v16490_v47 = vand.u32 4294901760, %v16489_v35 }
 0x358   :  { %15649 = vmatprep.mubr.f32.mxu0 %v39365_v21  ;;  %15415 = vmatmul.mubr.f32.vlgmr.msra.gmra.mxu1 %v34822_v17  ;;  %v16486_v12 = vand.u32 4294901760, %v16485_v50 }
 0x359   :  { %15540 = vmatpush1.msra.mxu1 %v15539_v54  ;;  %15652 = vmatmul.mubr.f32.vlgmr.msra.gmra.mxu0 %v34837_v49  ;;  %v16020_v49 = vsub.f32 %v16018_v15, %v16019_v42  ;;  %v16491_v59 = vsub.f32 %v16489_v35, %v16490_v47  ;;  %v17403_v54 = vsub.f32 %v35045_v55, %v35058_v62 }
 0x35a   :  { %15771 = vmatpush1.msra.mxu0 %v15537_v46  ;;  %15689 = vmatprep.subr.mxu1 %v34895_v60  ;;  %v35049_v46 = vand.u32 4294901760, %v17327_v52  ;;  %v17319_v13 = vpop.permute.xlu1 %17318 }
 0x35b   :  { %15940 = vmatprep.subr.mxu0 %v34931_v43  ;;  %15573 = vmatprep.mubr.f32.mxu1 %v39365_v21  ;;  %v16021_v7 = vand.u32 4294901760, %v16020_v49  ;;  %v35080_v39 = vand.u32 4294901760, %v17403_v54 }
 0x35c   :  { %15804 = vmatprep.mubr.f32.mxu0 %v39365_v21  ;;  %15575 = vmatmul.mubr.f32.vlgmr.msra.gmra.mxu1 %v34822_v17 }
 0x35d   :  { %15691 = vmatpush1.msra.mxu1 %v34905_v11  ;;  %15806 = vmatmul.mubr.f32.vlgmr.msra.gmra.mxu0 %v34822_v17 }
 0x35e   :  { %15942 = vmatpush1.msra.mxu0 %v34945_v6  ;;  %15843 = vmatprep.subr.mxu1 %v34895_v60 }
 0x35f   :  { %16101 = vmatprep.subr.mxu0 %v16018_v15  ;;  %15724 = vmatprep.mubr.f32.mxu1 %v39365_v21 }
 0x360   :  { %15975 = vmatprep.mubr.f32.mxu0 %v39365_v21  ;;  %15728 = vmatmul.mubr.f32.vlgmr.msra.gmra.mxu1 %v34850_v16  ;;  %v15898_v16 = vsel %vm2942_vm4, %v15895_v2, %v34923_v61 }
 0x361   :  { %15845 = vmatpush1.msra.mxu1 %v34905_v11  ;;  %15981 = vmatmul.mubr.f32.vlgmr.msra.gmra.mxu0 %v34976_v24  ;;  %v34999_v41 = vand.u32 4294901760, %v15898_v16  ;;  %v16492_v11 = vand.u32 4294901760, %v16491_v59 }
 0x362   :  { %16104 = vmatpush1.msra.mxu0 %v16024_v4  ;;  %16022 = vmatprep.subr.mxu1 %v16021_v7  ;;  %v17324_v4 = vsel %vm4385_vm5, %v17315_v37, %v17317_v63 }
 0x363   :  { %16255 = vmatprep.subr.mxu0 %v16019_v42  ;;  %15878 = vmatprep.mubr.f32.mxu1 %v39365_v21  ;;  %v16948_v60 = vsub.f32 %v15898_v16, %v34999_v41  ;;  %v17325_v42 = vsel %vm4385_vm5, %v17313_v32, %v17315_v37  ;;  %v35074_v8 = vand.u32 4294901760, %v17324_v4  ;;  %v31607_v16 = vld [vmem:[%s38611_s4 + $0x20] sm:$0xff] }
 0x364   :  { %16137 = vmatprep.mubr.f32.mxu0 %v39365_v21  ;;  %15880 = vmatmul.mubr.f32.vlgmr.msra.gmra.mxu1 %v34822_v17  ;;  %v15899_v17 = vsel %vm2942_vm4, %v15893_v40, %v15895_v2 }
 0x365   :  { %16028 = vmatpush1.msra.mxu1 %v16027_v29  ;;  %16140 = vmatmul.mubr.f32.vlgmr.msra.gmra.mxu0 %v34941_v22  ;;  %v35009_v19 = vand.u32 4294901760, %v15899_v17  ;;  %v16949_v30 = vand.u32 4294901760, %v16948_v60 }
 0x366   :  { %16259 = vmatpush1.msra.mxu0 %v16025_v53  ;;  %16177 = vmatprep.subr.mxu1 %v34931_v43  ;;  %v35084_v53 = vand.u32 4294901760, %v17325_v42 }
 0x367   :  { %16405 = vmatprep.subr.mxu0 %v34970_v33  ;;  %16061 = vmatprep.mubr.f32.mxu1 %v39365_v21  ;;  %v16954_v34 = vsub.f32 %v15899_v17, %v35009_v19  ;;  %v16950_v45 = vsub.f32 %v16948_v60, %v16949_v30  ;;  %v18737_v17 = vsel %vm13089_vm10, %v31607_v16, 0 }
 0x368   :  { %16292 = vmatprep.mubr.f32.mxu0 %v39365_v21  ;;  %16063 = vmatmul.mubr.f32.vlgmr.msra.gmra.mxu1 %v34926_v14  ;;  %v35130_v48 = vand.u32 4294901760, %v18737_v17 }
 0x369   :  { %16179 = vmatpush1.msra.mxu1 %v34945_v6  ;;  %16294 = vmatmul.mubr.f32.vlgmr.msra.gmra.mxu0 %v34926_v14  ;;  %v16955_v18 = vand.u32 4294901760, %v16954_v34  ;;  %v16951_v25 = vand.u32 4294901760, %v16950_v45  ;;  %v35174_v45 = vand.u32 4294901760, %v34670_v58 }
 0x36a   :  { %16407 = vmatpush1.msra.mxu0 %v34980_v10  ;;  %16331 = vmatprep.subr.mxu1 %v34931_v43  ;;  %v17442_v43 = vsub.f32 %v17326_v5, %v35035_v9  ;;  %v35143_v3 = vsub.f32 %v18737_v17, %v35130_v48 }
 0x36b   :  { %16566 = vmatprep.subr.mxu0 %v16483_v28  ;;  %16212 = vmatprep.mubr.f32.mxu1 %v39365_v21  ;;  %v16956_v61 = vsub.f32 %v16954_v34, %v16955_v18 }
 0x36c   :  { %16440 = vmatprep.mubr.f32.mxu0 %v39365_v21  ;;  %16216 = vmatmul.mubr.f32.vlgmr.msra.gmra.mxu1 %v34954_v20  ;;  %v17443_v40 = vand.u32 4294901760, %v17442_v43  ;;  %v35158_v5 = vand.u32 4294901760, %v35143_v3 }
 0x36d   :  { %16333 = vmatpush1.msra.mxu1 %v34945_v6  ;;  %16446 = vmatmul.mubr.f32.vlgmr.msra.gmra.mxu0 %v34976_v24  ;;  %v17448_v6 = vsub.f32 %v17327_v52, %v35049_v46  ;;  %v16957_v15 = vand.u32 4294901760, %v16956_v61 }
 0x36e   :  { %16569 = vmatpush1.msra.mxu0 %v16489_v35  ;;  %16487 = vmatprep.subr.mxu1 %v16486_v12  ;;  %v35138_v12 = vand.u32 4294901760, %v34609_v27 }
 0x36f   :  { %16720 = vmatprep.subr.mxu0 %v16484_v36  ;;  %16366 = vmatprep.mubr.f32.mxu1 %v39365_v21  ;;  %v17449_v57 = vand.u32 4294901760, %v17448_v6 }
 0x370   :  { %16602 = vmatprep.mubr.f32.mxu0 %v39365_v21  ;;  %16368 = vmatmul.mubr.f32.vlgmr.msra.gmra.mxu1 %v34926_v14 }
 0x371   :  { %16493 = vmatpush1.msra.mxu1 %v16492_v11  ;;  %16605 = vmatmul.mubr.f32.vlgmr.msra.gmra.mxu0 %v34941_v22  ;;  %v17450_v31 = vsub.f32 %v17448_v6, %v17449_v57  ;;  %v35149_v11 = vand.u32 4294901760, %v34602_v1 }
 0x372   :  { %16724 = vmatpush1.msra.mxu0 %v16490_v47  ;;  %16642 = vmatprep.subr.mxu1 %v34970_v33 }
 0x373   :  { %16870 = vmatprep.subr.mxu0 %v34999_v41  ;;  %16526 = vmatprep.mubr.f32.mxu1 %v39365_v21 }
 0x374   :  { %16757 = vmatprep.mubr.f32.mxu0 %v39365_v21  ;;  %16528 = vmatmul.mubr.f32.vlgmr.msra.gmra.mxu1 %v34926_v14 }
 0x375   :  { %16644 = vmatpush1.msra.mxu1 %v34980_v10  ;;  %16759 = vmatmul.mubr.f32.vlgmr.msra.gmra.mxu0 %v34926_v14 }
 0x376   :  { %16872 = vmatpush1.msra.mxu0 %v35009_v19  ;;  %16796 = vmatprep.subr.mxu1 %v34970_v33  ;;  %v17907_v33 = vsub.f32 %v17324_v4, %v35074_v8  ;;  %v31608_v4 = vld [vmem:[%s38611_s4 + $0x28] sm:$0xff] }
 0x377   :  { %17031 = vmatprep.subr.mxu0 %v16948_v60  ;;  %16677 = vmatprep.mubr.f32.mxu1 %v39365_v21 }
 0x378   :  { %16905 = vmatprep.mubr.f32.mxu0 %v39365_v21  ;;  %16681 = vmatmul.mubr.f32.vlgmr.msra.gmra.mxu1 %v34954_v20  ;;  %v17908_v28 = vand.u32 4294901760, %v17907_v33 }
 0x379   :  { %16798 = vmatpush1.msra.mxu1 %v34980_v10  ;;  %16911 = vmatmul.mubr.f32.vlgmr.msra.gmra.mxu0 %v34976_v24  ;;  %v17913_v24 = vsub.f32 %v17325_v42, %v35084_v53  ;;  %v17451_v10 = vand.u32 4294901760, %v17450_v31  ;;  %v20161_v42 = vsel %vm13089_vm10, %v31608_v4, 0 }
 0x37a   :  { %17034 = vmatpush1.msra.mxu0 %v16954_v34  ;;  %16952 = vmatprep.subr.mxu1 %v16951_v25  ;;  %v17909_v29 = vsub.f32 %v17907_v33, %v17908_v28  ;;  %v19313_v25 = vsub.f32 %v34670_v58, %v35174_v45 }
 0x37b   :  { %17185 = vmatprep.subr.mxu0 %v16949_v30  ;;  %16831 = vmatprep.mubr.f32.mxu1 %v39365_v21  ;;  %v17914_v7 = vand.u32 4294901760, %v17913_v24  ;;  %v18848_v30 = vsub.f32 %v34609_v27, %v35138_v12 }
 0x37c   :  { %17067 = vmatprep.mubr.f32.mxu0 %v39365_v21  ;;  %16833 = vmatmul.mubr.f32.vlgmr.msra.gmra.mxu1 %v34926_v14 }
 0x37d   :  { %16958 = vmatpush1.msra.mxu1 %v16957_v15  ;;  %17070 = vmatmul.mubr.f32.vlgmr.msra.gmra.mxu0 %v34941_v22  ;;  %v17444_v22 = vsub.f32 %v17442_v43, %v17443_v40  ;;  %v17915_v2 = vsub.f32 %v17913_v24, %v17914_v7  ;;  %v18849_v27 = vand.u32 4294901760, %v18848_v30  ;;  %v35204_v15 = vand.u32 4294901760, %v34664_v38 }
 0x37e   :  { %17189 = vmatpush1.msra.mxu0 %v16955_v18  ;;  %17107 = vmatprep.subr.mxu1 %v34999_v41  ;;  %v18854_v18 = vsub.f32 %v34602_v1, %v35149_v11 }
 0x37f   :  { %17364 = vmatprep.subr.mxu0 %v35035_v9  ;;  %16991 = vmatprep.mubr.f32.mxu1 %v39365_v21  ;;  %v17445_v49 = vand.u32 4294901760, %v17444_v22  ;;  %v17916_v59 = vand.u32 4294901760, %v17915_v2  ;;  %v18850_v1 = vsub.f32 %v18848_v30, %v18849_v27 }
 0x380   :  { %17222 = vmatprep.mubr.f32.mxu0 %v39365_v21  ;;  %16993 = vmatmul.mubr.f32.vlgmr.msra.gmra.mxu1 %v34926_v14  ;;  %v18855_v52 = vand.u32 4294901760, %v18854_v18 }
 0x381   :  { %17109 = vmatpush1.msra.mxu1 %v35009_v19  ;;  %17224 = vmatmul.mubr.f32.vlgmr.msra.gmra.mxu0 %v34926_v14 }
 0x382   :  { %17366 = vmatpush1.msra.mxu0 %v35049_v46  ;;  %17261 = vmatprep.subr.mxu1 %v34999_v41  ;;  %v17910_v41 = vand.u32 4294901760, %v17909_v29  ;;  %v18856_v61 = vsub.f32 %v18854_v18, %v18855_v52 }
 0x383   :  { %17525 = vmatprep.subr.mxu0 %v17442_v43  ;;  %17142 = vmatprep.mubr.f32.mxu1 %v39365_v21  ;;  %v18851_v43 = vand.u32 4294901760, %v18850_v1 }
 0x384   :  { %17399 = vmatprep.mubr.f32.mxu0 %v39365_v21  ;;  %17146 = vmatmul.mubr.f32.vlgmr.msra.gmra.mxu1 %v34954_v20  ;;  %v17322_v20 = vsel %vm4385_vm5, %v17319_v13, %v35027_v0 }
 0x385   :  { %17263 = vmatpush1.msra.mxu1 %v35009_v19  ;;  %17405 = vmatmul.mubr.f32.vlgmr.msra.gmra.mxu0 %v35080_v39  ;;  %v35103_v35 = vand.u32 4294901760, %v17322_v20 }
 0x386   :  { %17528 = vmatpush1.msra.mxu0 %v17448_v6  ;;  %17446 = vmatprep.subr.mxu1 %v17445_v49 }
 0x387   :  { %17679 = vmatprep.subr.mxu0 %v17443_v40  ;;  %17296 = vmatprep.mubr.f32.mxu1 %v39365_v21  ;;  %v18372_v47 = vsub.f32 %v17322_v20, %v35103_v35  ;;  %v35212_v40 = vand.u32 4294901760, %v34661_v51 }
 0x388   :  { %17561 = vmatprep.mubr.f32.mxu0 %v39365_v21  ;;  %17298 = vmatmul.mubr.f32.vlgmr.msra.gmra.mxu1 %v34926_v14  ;;  %v17323_v14 = vsel %vm4385_vm5, %v17317_v63, %v17319_v13  ;;  %v18857_v63 = vand.u32 4294901760, %v18856_v61  ;;  %v31609_v61 = vld [vmem:[%s38611_s4 + $0x30] sm:$0xff] }
 0x389   :  { %17452 = vmatpush1.msra.mxu1 %v17451_v10  ;;  %17564 = vmatmul.mubr.f32.vlgmr.msra.gmra.mxu0 %v35045_v55  ;;  %v35113_v36 = vand.u32 4294901760, %v17323_v14  ;;  %v18373_v19 = vand.u32 4294901760, %v18372_v47  ;;  %v19784_v22 = vsub.f32 %v34661_v51, %v35212_v40 }
 0x38a   :  { %17683 = vmatpush1.msra.mxu0 %v17449_v57  ;;  %17601 = vmatprep.subr.mxu1 %v35035_v9  ;;  %v19778_v57 = vsub.f32 %v34664_v38, %v35204_v15 }
 0x38b   :  { %17829 = vmatprep.subr.mxu0 %v35074_v8  ;;  %17485 = vmatprep.mubr.f32.mxu1 %v39365_v21  ;;  %v18378_v50 = vsub.f32 %v17323_v14, %v35113_v36  ;;  %v18374_v60 = vsub.f32 %v18372_v47, %v18373_v19  ;;  %v19785_v51 = vand.u32 4294901760, %v19784_v22 }
 0x38c   :  { %17716 = vmatprep.mubr.f32.mxu0 %v39365_v21  ;;  %17487 = vmatmul.mubr.f32.vlgmr.msra.gmra.mxu1 %v35030_v23  ;;  %v19779_v38 = vand.u32 4294901760, %v19778_v57 }
 0x38d   :  { %17603 = vmatpush1.msra.mxu1 %v35049_v46  ;;  %17718 = vmatmul.mubr.f32.vlgmr.msra.gmra.mxu0 %v35030_v23  ;;  %v18379_v44 = vand.u32 4294901760, %v18378_v50  ;;  %v18375_v32 = vand.u32 4294901760, %v18374_v60  ;;  %v19786_v20 = vsub.f32 %v19784_v22, %v19785_v51 }
 0x38e   :  { %17831 = vmatpush1.msra.mxu0 %v35084_v53  ;;  %17755 = vmatprep.subr.mxu1 %v35035_v9  ;;  %v18809_v9 = vsub.f32 %v35143_v3, %v35158_v5  ;;  %v19780_v10 = vsub.f32 %v19778_v57, %v19779_v38 }
 0x38f   :  { %17990 = vmatprep.subr.mxu0 %v17907_v33  ;;  %17636 = vmatprep.mubr.f32.mxu1 %v39365_v21  ;;  %v18380_v34 = vsub.f32 %v18378_v50, %v18379_v44  ;;  %v35234_v33 = vand.u32 4294901760, %v20161_v42 }
 0x390   :  { %17864 = vmatprep.mubr.f32.mxu0 %v39365_v21  ;;  %17640 = vmatmul.mubr.f32.vlgmr.msra.gmra.mxu1 %v35058_v62 }
 0x391   :  { %17757 = vmatpush1.msra.mxu1 %v35049_v46  ;;  %17870 = vmatmul.mubr.f32.vlgmr.msra.gmra.mxu0 %v35080_v39  ;;  %v18381_v0 = vand.u32 4294901760, %v18380_v34  ;;  %v35184_v46 = vand.u32 4294901760, %v34645_v56  ;;  %v35249_v13 = vsub.f32 %v20161_v42, %v35234_v33 }
 0x392   :  { %17993 = vmatpush1.msra.mxu0 %v17913_v24  ;;  %17911 = vmatprep.subr.mxu1 %v17910_v41 }
 0x393   :  { %18144 = vmatprep.subr.mxu0 %v17908_v28  ;;  %17790 = vmatprep.mubr.f32.mxu1 %v39365_v21  ;;  %v19319_v6 = vsub.f32 %v34645_v56, %v35184_v46  ;;  %v35262_v14 = vand.u32 4294901760, %v35249_v13 }
 0x394   :  { %18026 = vmatprep.mubr.f32.mxu0 %v39365_v21  ;;  %17792 = vmatmul.mubr.f32.vlgmr.msra.gmra.mxu1 %v35030_v23 }
 0x395   :  { %17917 = vmatpush1.msra.mxu1 %v17916_v59  ;;  %18029 = vmatmul.mubr.f32.vlgmr.msra.gmra.mxu0 %v35045_v55  ;;  %v19320_v58 = vand.u32 4294901760, %v19319_v6  ;;  %v20233_v17 = vsub.f32 %v35249_v13, %v35262_v14 }
 0x396   :  { %18148 = vmatpush1.msra.mxu0 %v17914_v7  ;;  %18066 = vmatprep.subr.mxu1 %v35074_v8 }
 0x397   :  { %18294 = vmatprep.subr.mxu0 %v35103_v35  ;;  %17950 = vmatprep.mubr.f32.mxu1 %v39365_v21  ;;  %v19321_v37 = vsub.f32 %v19319_v6, %v19320_v58  ;;  %v35284_v60 = vand.u32 4294901760, %v20233_v17 }
 0x398   :  { %18181 = vmatprep.mubr.f32.mxu0 %v39365_v21  ;;  %17952 = vmatmul.mubr.f32.vlgmr.msra.gmra.mxu1 %v35030_v23 }
 0x399   :  { %18068 = vmatpush1.msra.mxu1 %v35084_v53  ;;  %18183 = vmatmul.mubr.f32.vlgmr.msra.gmra.mxu0 %v35030_v23 }
 0x39a   :  { %18296 = vmatpush1.msra.mxu0 %v35113_v36  ;;  %18220 = vmatprep.subr.mxu1 %v35074_v8  ;;  %v19322_v8 = vand.u32 4294901760, %v19321_v37 }
 0x39b   :  { %18455 = vmatprep.subr.mxu0 %v18372_v47  ;;  %18101 = vmatprep.mubr.f32.mxu1 %v39365_v21 }
 0x39c   :  { %18329 = vmatprep.mubr.f32.mxu0 %v39365_v21  ;;  %18105 = vmatmul.mubr.f32.vlgmr.msra.gmra.mxu1 %v35058_v62 }
 0x39d   :  { %18222 = vmatpush1.msra.mxu1 %v35084_v53  ;;  %18335 = vmatmul.mubr.f32.vlgmr.msra.gmra.mxu0 %v35080_v39  ;;  %v20145_v39 = vpop.permute.xlu1 %20144 }
 0x39e   :  { %18458 = vmatpush1.msra.mxu0 %v18378_v50  ;;  %18376 = vmatprep.subr.mxu1 %v18375_v32 }
 0x39f   :  { %18609 = vmatprep.subr.mxu0 %v18373_v19  ;;  %18255 = vmatprep.mubr.f32.mxu1 %v39365_v21 }
 0x3a0   :  { %18491 = vmatprep.mubr.f32.mxu0 %v39365_v21  ;;  %18257 = vmatmul.mubr.f32.vlgmr.msra.gmra.mxu1 %v35030_v23 }
 0x3a1   :  { %18382 = vmatpush1.msra.mxu1 %v18381_v0  ;;  %18494 = vmatmul.mubr.f32.vlgmr.msra.gmra.mxu0 %v35045_v55  ;;  %v35178_v55 = vand.u32 4294901760, %v18809_v9  ;;  %v20147_v16 = vpop.permute.xlu1 %20146 }
 0x3a2   :  { %18613 = vmatpush1.msra.mxu0 %v18379_v44  ;;  %18531 = vmatprep.subr.mxu1 %v35103_v35  ;;  %v20154_v59 = vsel %vm7246_vm6, %v20145_v39, %v20147_v16 }
 0x3a3   :  { %18770 = vmatprep.subr.mxu0 %v35138_v12  ;;  %18415 = vmatprep.mubr.f32.mxu1 %v39365_v21 }
 0x3a4   :  { %18646 = vmatprep.mubr.f32.mxu0 %v39365_v21  ;;  %18417 = vmatmul.mubr.f32.vlgmr.msra.gmra.mxu1 %v35030_v23 }
 0x3a5   :  { %18533 = vmatpush1.msra.mxu1 %v35113_v36  ;;  %18648 = vmatmul.mubr.f32.vlgmr.msra.gmra.mxu0 %v35030_v23  ;;  %v20151_v0 = vpop.permute.xlu1 %20150 }
 0x3a6   :  { %18772 = vmatpush1.msra.mxu0 %v35149_v11  ;;  %18685 = vmatprep.subr.mxu1 %v35103_v35  ;;  %v19781_v35 = vand.u32 4294901760, %v19780_v10 }
 0x3a7   :  { %18931 = vmatprep.subr.mxu0 %v18848_v30  ;;  %18566 = vmatprep.mubr.f32.mxu1 %v39365_v21 }
 0x3a8   :  { %18805 = vmatprep.mubr.f32.mxu0 %v39365_v21  ;;  %18570 = vmatmul.mubr.f32.vlgmr.msra.gmra.mxu1 %v35058_v62  ;;  %v19314_v62 = vand.u32 4294901760, %v19313_v25 }
 0x3a9   :  { %18687 = vmatpush1.msra.mxu1 %v35113_v36  ;;  %18811 = vmatmul.mubr.f32.vlgmr.msra.gmra.mxu0 %v35178_v55  ;;  %v19787_v36 = vand.u32 4294901760, %v19786_v20 }
 0x3aa   :  { %18934 = vmatpush1.msra.mxu0 %v18854_v18  ;;  %18852 = vmatprep.subr.mxu1 %v18851_v43  ;;  %v19315_v56 = vsub.f32 %v19313_v25, %v19314_v62 }
 0x3ab   :  { %19085 = vmatprep.subr.mxu0 %v18849_v27  ;;  %18720 = vmatprep.mubr.f32.mxu1 %v39365_v21 }
 0x3ac   :  { %18967 = vmatprep.mubr.f32.mxu0 %v39365_v21  ;;  %18722 = vmatmul.mubr.f32.vlgmr.msra.gmra.mxu1 %v35030_v23  ;;  %v20143_v23 = vpop.permute.xlu0 %20142  ;;  %v19316_v54 = vand.u32 4294901760, %v19315_v56  ;;  %v35335_v56 = vpop.permute.xlu1 %21568 }
 0x3ad   :  { %18858 = vmatpush1.msra.mxu1 %v18857_v63  ;;  %18970 = vmatmul.mubr.f32.vlgmr.msra.gmra.mxu0 %v35143_v3  ;;  %v20155_v53 = vsel %vm7246_vm6, %v20143_v23, %v20145_v39 }
 0x3ae   :  { %19089 = vmatpush1.msra.mxu0 %v18855_v52  ;;  %19007 = vmatprep.subr.mxu1 %v35138_v12  ;;  %v35239_v49 = vand.u32 4294901760, %v20155_v53 }
 0x3af   :  { %19235 = vmatprep.subr.mxu0 %v35174_v45  ;;  %18891 = vmatprep.mubr.f32.mxu1 %v39365_v21 }
 0x3b0   :  { %19122 = vmatprep.mubr.f32.mxu0 %v39365_v21  ;;  %18893 = vmatmul.mubr.f32.vlgmr.msra.gmra.mxu1 %v35130_v48  ;;  %v35231_v31 = vpop.permute.xlu0 %20140  ;;  %v20272_v7 = vsub.f32 %v20155_v53, %v35239_v49 }
 0x3b1   :  { %19009 = vmatpush1.msra.mxu1 %v35149_v11  ;;  %19124 = vmatmul.mubr.f32.vlgmr.msra.gmra.mxu0 %v35130_v48  ;;  %v20156_v24 = vsel %vm7246_vm6, %v35231_v31, %v20143_v23 }
 0x3b2   :  { %19237 = vmatpush1.msra.mxu0 %v35184_v46  ;;  %19161 = vmatprep.subr.mxu1 %v35138_v12  ;;  %v35253_v28 = vand.u32 4294901760, %v20156_v24  ;;  %v20273_v47 = vand.u32 4294901760, %v20272_v7  ;;  %v35288_v12 = vand.u32 4294901760, %v20154_v59 }
 0x3b3   :  { %19396 = vmatprep.subr.mxu0 %v19313_v25  ;;  %19042 = vmatprep.mubr.f32.mxu1 %v39365_v21 }
 0x3b4   :  { %19270 = vmatprep.mubr.f32.mxu0 %v39365_v21  ;;  %19046 = vmatmul.mubr.f32.vlgmr.msra.gmra.mxu1 %v35158_v5  ;;  %v20149_v29 = vpop.permute.xlu0 %20148  ;;  %v20278_v2 = vsub.f32 %v20156_v24, %v35253_v28  ;;  %v20274_v44 = vsub.f32 %v20272_v7, %v20273_v47  ;;  %v20743_v32 = vsub.f32 %v20154_v59, %v35288_v12 }
 0x3b5   :  { %19163 = vmatpush1.msra.mxu1 %v35149_v11  ;;  %19276 = vmatmul.mubr.f32.vlgmr.msra.gmra.mxu0 %v35178_v55  ;;  %v20153_v41 = vsel %vm7246_vm6, %v20147_v16, %v20149_v29 }
 0x3b6   :  { %19399 = vmatpush1.msra.mxu0 %v19319_v6  ;;  %19317 = vmatprep.subr.mxu1 %v19316_v54  ;;  %v20279_v50 = vand.u32 4294901760, %v20278_v2  ;;  %v35278_v19 = vand.u32 4294901760, %v20153_v41  ;;  %v20275_v11 = vand.u32 4294901760, %v20274_v44  ;;  %v20744_v27 = vand.u32 4294901760, %v20743_v32 }
 0x3b7   :  { %19550 = vmatprep.subr.mxu0 %v19314_v62  ;;  %19196 = vmatprep.mubr.f32.mxu1 %v39365_v21  ;;  %v21585_v6 = vsel %vm13089_vm10, %v31609_v61, 0 }
 0x3b8   :  { %19432 = vmatprep.mubr.f32.mxu0 %v39365_v21  ;;  %19198 = vmatmul.mubr.f32.vlgmr.msra.gmra.mxu1 %v35130_v48  ;;  %v20737_v34 = vsub.f32 %v20153_v41, %v35278_v19  ;;  %v20745_v1 = vsub.f32 %v20743_v32, %v20744_v27  ;;  %v35346_v4 = vand.u32 4294901760, %v21585_v6 }
 0x3b9   :  { %19323 = vmatpush1.msra.mxu1 %v19322_v8  ;;  %19435 = vmatmul.mubr.f32.vlgmr.msra.gmra.mxu0 %v35143_v3 }
 0x3ba   :  { %19554 = vmatpush1.msra.mxu0 %v19320_v58  ;;  %19472 = vmatprep.subr.mxu1 %v35174_v45  ;;  %v20738_v18 = vand.u32 4294901760, %v20737_v34  ;;  %v20746_v58 = vand.u32 4294901760, %v20745_v1 }
 0x3bb   :  { %19700 = vmatprep.subr.mxu0 %v35204_v15  ;;  %19356 = vmatprep.mubr.f32.mxu1 %v39365_v21 }
 0x3bc   :  { %19587 = vmatprep.mubr.f32.mxu0 %v39365_v21  ;;  %19358 = vmatmul.mubr.f32.vlgmr.msra.gmra.mxu1 %v35130_v48  ;;  %v20739_v52 = vsub.f32 %v20737_v34, %v20738_v18 }
 0x3bd   :  { %19474 = vmatpush1.msra.mxu1 %v35184_v46  ;;  %19589 = vmatmul.mubr.f32.vlgmr.msra.gmra.mxu0 %v35130_v48 }
 0x3be   :  { %19702 = vmatpush1.msra.mxu0 %v35212_v40  ;;  %19626 = vmatprep.subr.mxu1 %v35174_v45  ;;  %v20740_v25 = vand.u32 4294901760, %v20739_v52 }
 0x3bf   :  { %19861 = vmatprep.subr.mxu0 %v19778_v57  ;;  %19507 = vmatprep.mubr.f32.mxu1 %v39365_v21 }
 0x3c0   :  { %19735 = vmatprep.mubr.f32.mxu0 %v39365_v21  ;;  %19511 = vmatmul.mubr.f32.vlgmr.msra.gmra.mxu1 %v35158_v5 }
 0x3c1   :  { %19628 = vmatpush1.msra.mxu1 %v35184_v46  ;;  %19741 = vmatmul.mubr.f32.vlgmr.msra.gmra.mxu0 %v35178_v55  ;;  %v21567_v55 = vpop.permute.xlu0 %21566 }
 0x3c2   :  { %19864 = vmatpush1.msra.mxu0 %v19784_v22  ;;  %19782 = vmatprep.subr.mxu1 %v19781_v35  ;;  %v21579_v37 = vsel %vm8689_vm7, %v21567_v55, %v35335_v56 }
 0x3c3   :  { %20015 = vmatprep.subr.mxu0 %v19779_v38  ;;  %19661 = vmatprep.mubr.f32.mxu1 %v39365_v21  ;;  %v35352_v42 = vand.u32 4294901760, %v21579_v37 }
 0x3c4   :  { %19897 = vmatprep.mubr.f32.mxu0 %v39365_v21  ;;  %19663 = vmatmul.mubr.f32.vlgmr.msra.gmra.mxu1 %v35130_v48 }
 0x3c5   :  { %19788 = vmatpush1.msra.mxu1 %v19787_v36  ;;  %19900 = vmatmul.mubr.f32.vlgmr.msra.gmra.mxu0 %v35143_v3  ;;  %v20280_v3 = vsub.f32 %v20278_v2, %v20279_v50 }
 0x3c6   :  { %20019 = vmatpush1.msra.mxu0 %v19785_v51  ;;  %19937 = vmatprep.subr.mxu1 %v35204_v15 }
 0x3c7   :  { %20194 = vmatprep.subr.mxu0 %v35239_v49  ;;  %19821 = vmatprep.mubr.f32.mxu1 %v39365_v21  ;;  %v20281_v30 = vand.u32 4294901760, %v20280_v3 }
 0x3c8   :  { %20052 = vmatprep.mubr.f32.mxu0 %v39365_v21  ;;  %19823 = vmatmul.mubr.f32.vlgmr.msra.gmra.mxu1 %v35130_v48 }
 0x3c9   :  { %19939 = vmatpush1.msra.mxu1 %v35212_v40  ;;  %20054 = vmatmul.mubr.f32.vlgmr.msra.gmra.mxu0 %v35130_v48 }
 0x3ca   :  { %20196 = vmatpush1.msra.mxu0 %v35253_v28  ;;  %20091 = vmatprep.subr.mxu1 %v35204_v15 }
 0x3cb   :  { %20355 = vmatprep.subr.mxu0 %v20272_v7  ;;  %19972 = vmatprep.mubr.f32.mxu1 %v39365_v21  ;;  %v35373_v7 = vsub.f32 %v21579_v37, %v35352_v42 }
 0x3cc   :  { %20229 = vmatprep.mubr.f32.mxu0 %v39365_v21  ;;  %19976 = vmatmul.mubr.f32.vlgmr.msra.gmra.mxu1 %v35158_v5  ;;  %v20157_v5 = vsel %vm7246_vm6, %v20151_v0, %v35231_v31  ;;  %v35363_v31 = vsub.f32 %v21585_v6, %v35346_v4 }
 0x3cd   :  { %20093 = vmatpush1.msra.mxu1 %v35212_v40  ;;  %20235 = vmatmul.mubr.f32.vlgmr.msra.gmra.mxu0 %v35284_v60  ;;  %v35307_v9 = vand.u32 4294901760, %v20157_v5  ;;  %v35343_v40 = vpop.permute.xlu0 %21564 }
 0x3ce   :  { %20358 = vmatpush1.msra.mxu0 %v20278_v2  ;;  %20276 = vmatprep.subr.mxu1 %v20275_v11  ;;  %v21580_v8 = vsel %vm8689_vm7, %v35343_v40, %v21567_v55  ;;  %v35382_v41 = vand.u32 4294901760, %v35363_v31  ;;  %v21697_v11 = vand.u32 4294901760, %v35373_v7 }
 0x3cf   :  { %20509 = vmatprep.subr.mxu0 %v20273_v47  ;;  %20126 = vmatprep.mubr.f32.mxu1 %v39365_v21  ;;  %v35324_v46 = vsub.f32 %v20157_v5, %v35307_v9  ;;  %v35368_v24 = vand.u32 4294901760, %v21580_v8 }
 0x3d0   :  { %20391 = vmatprep.mubr.f32.mxu0 %v39365_v21  ;;  %20128 = vmatmul.mubr.f32.vlgmr.msra.gmra.mxu1 %v35130_v48  ;;  %v20152_v48 = vsel %vm7246_vm6, %v20149_v29, %v20151_v0  ;;  %v21698_v61 = vsub.f32 %v35373_v7, %v21697_v11 }
 0x3d1   :  { %20282 = vmatpush1.msra.mxu1 %v20281_v30  ;;  %20394 = vmatmul.mubr.f32.vlgmr.msra.gmra.mxu0 %v35249_v13  ;;  %v35317_v45 = vand.u32 4294901760, %v20152_v48  ;;  %v21203_v23 = vand.u32 4294901760, %v35324_v46  ;;  %v35377_v2 = vpop.permute.xlu0 %21572  ;;  %v35386_v59 = vsub.f32 %v21580_v8, %v35368_v24 }
 0x3d2   :  { %20513 = vmatpush1.msra.mxu0 %v20279_v50  ;;  %20431 = vmatprep.subr.mxu1 %v35239_v49  ;;  %v21571_v50 = vpop.permute.xlu1 %21570 }
 0x3d3   :  { %20659 = vmatprep.subr.mxu0 %v35278_v19  ;;  %20315 = vmatprep.mubr.f32.mxu1 %v39365_v21  ;;  %v35332_v62 = vsub.f32 %v20152_v48, %v35317_v45  ;;  %v21204_v39 = vsub.f32 %v35324_v46, %v21203_v23 }
 0x3d4   :  { %20546 = vmatprep.mubr.f32.mxu0 %v39365_v21  ;;  %20317 = vmatmul.mubr.f32.vlgmr.msra.gmra.mxu1 %v35234_v33 }
 0x3d5   :  { %20433 = vmatpush1.msra.mxu1 %v35253_v28  ;;  %20548 = vmatmul.mubr.f32.vlgmr.msra.gmra.mxu0 %v35234_v33  ;;  %v21209_v57 = vand.u32 4294901760, %v35332_v62  ;;  %v21205_v29 = vand.u32 4294901760, %v21204_v39 }
 0x3d6   :  { %20661 = vmatpush1.msra.mxu0 %v35288_v12  ;;  %20585 = vmatprep.subr.mxu1 %v35239_v49 }
 0x3d7   :  { %20820 = vmatprep.subr.mxu0 %v20737_v34  ;;  %20466 = vmatprep.mubr.f32.mxu1 %v39365_v21  ;;  %v21210_v49 = vsub.f32 %v35332_v62, %v21209_v57 }
 0x3d8   :  { %20694 = vmatprep.mubr.f32.mxu0 %v39365_v21  ;;  %v13166_v43 = vpop.f32.mrf.mxu0  ;;  %20470 = vmatmul.mubr.f32.vlgmr.msra.gmra.mxu1 %v35262_v14 }
 0x3d9   :  { %20587 = vmatpush1.msra.mxu1 %v35253_v28  ;;  %20700 = vmatmul.mubr.f32.vlgmr.msra.gmra.mxu0 %v35284_v60  ;;  %v21211_v3 = vand.u32 4294901760, %v21210_v49  ;;  %v21575_v49 = vpop.permute.xlu1 %21574 }
 0x3da   :  { %20823 = vmatpush1.msra.mxu0 %v20743_v32  ;;  %20741 = vmatprep.subr.mxu1 %v20740_v25  ;;  %v13168_v63 = vpop.f32.mrf.mxu0 }
 0x3db   :  { %20974 = vmatprep.subr.mxu0 %v20738_v18  ;;  %20620 = vmatprep.mubr.f32.mxu1 %v39365_v21  ;;  %v21657_v18 = vsub.f32 %v35363_v31, %v35382_v41 }
 0x3dc   :  { %20856 = vmatprep.mubr.f32.mxu0 %v39365_v21  ;;  %v13325_v15 = vpop.f32.mrf.mxu0  ;;  %20622 = vmatmul.mubr.f32.vlgmr.msra.gmra.mxu1 %v35234_v33 }
 0x3dd   :  { %20747 = vmatpush1.msra.mxu1 %v20746_v58  ;;  %20859 = vmatmul.mubr.f32.vlgmr.msra.gmra.mxu0 %v35249_v13  ;;  %v35416_v25 = vand.u32 4294901760, %v21657_v18 }
 0x3de   :  { %20978 = vmatpush1.msra.mxu0 %v20744_v27  ;;  %20896 = vmatprep.subr.mxu1 %v35278_v19  ;;  %v13327_v54 = vpop.f32.mrf.mxu0  ;;  %v21703_v27 = vand.u32 4294901760, %v35386_v59 }
 0x3df   :  { %21124 = vmatprep.subr.mxu0 %v35307_v9  ;;  %20780 = vmatprep.mubr.f32.mxu1 %v39365_v21 }
 0x3e0   :  { %21011 = vmatprep.mubr.f32.mxu0 %v39365_v21  ;;  %v13248_v22 = vpop.f32.mrf.mxu1  ;;  %20782 = vmatmul.mubr.f32.vlgmr.msra.gmra.mxu1 %v35234_v33 }
 0x3e1   :  { %v13249_v38 = vadd.f32 %v13248_v22, %v13166_v43  ;;  %v13479_v53 = vpop.f32.mrf.mxu0  ;;  %20898 = vmatpush1.msra.mxu1 %v35288_v12  ;;  %21013 = vmatmul.mubr.f32.vlgmr.msra.gmra.mxu0 %v35234_v33 }
 0x3e2   :  { %21126 = vmatpush1.msra.mxu0 %v35317_v45  ;;  %21050 = vmatprep.subr.mxu1 %v35278_v19  ;;  %v13250_v51 = vpop.f32.mrf.mxu1 }
 0x3e3   :  { %21285 = vmatprep.subr.mxu0 %v35324_v46  ;;  %v13251_v10 = vadd.f32 %v13250_v51, %v13168_v63  ;;  %v13481_v28 = vpop.f32.mrf.mxu0  ;;  %20931 = vmatprep.mubr.f32.mxu1 %v39365_v21  ;;  %v13326_v20 = vadd.f32 %v13325_v15, %v13249_v38 }
 0x3e4   :  { %21159 = vmatprep.mubr.f32.mxu0 %v39365_v21  ;;  %v13401_v35 = vpop.f32.mrf.mxu1  ;;  %20935 = vmatmul.mubr.f32.vlgmr.msra.gmra.mxu1 %v35262_v14 }
 0x3e5   :  { %v13402_v36 = vadd.f32 %v13401_v35, %v13326_v20  ;;  %v13631_v16 = vpop.f32.mrf.mxu0  ;;  %21052 = vmatpush1.msra.mxu1 %v35288_v12  ;;  %21165 = vmatmul.mubr.f32.vlgmr.msra.gmra.mxu0 %v35284_v60  ;;  %v13328_v47 = vadd.f32 %v13327_v54, %v13251_v10  ;;  %v21577_v60 = vsel %vm8689_vm7, %v21571_v50, %v35377_v2 }
 0x3e6   :  { %21288 = vmatpush1.msra.mxu0 %v35332_v62  ;;  %21206 = vmatprep.subr.mxu1 %v21205_v29  ;;  %v13403_v17 = vpop.f32.mrf.mxu1  ;;  %v35409_v1 = vand.u32 4294901760, %v21577_v60  ;;  %v21704_v62 = vsub.f32 %v35386_v59, %v21703_v27 }
 0x3e7   :  { %21439 = vmatprep.subr.mxu0 %v21203_v23  ;;  %v13404_v19 = vadd.f32 %v13403_v17, %v13328_v47  ;;  %v13633_v44 = vpop.f32.mrf.mxu0  ;;  %21085 = vmatprep.mubr.f32.mxu1 %v39365_v21  ;;  %v13480_v12 = vadd.f32 %v13479_v53, %v13402_v36  ;;  %v21576_v47 = vsel %vm8689_vm7, %v35377_v2, %v21575_v49 }
 0x3e8   :  { %21321 = vmatprep.mubr.f32.mxu0 %v39365_v21  ;;  %v13553_v34 = vpop.f32.mrf.mxu1  ;;  %21087 = vmatmul.mubr.f32.vlgmr.msra.gmra.mxu1 %v35234_v33  ;;  %v35426_v23 = vsub.f32 %v21577_v60, %v35409_v1  ;;  %v21705_v51 = vand.u32 4294901760, %v21704_v62 }
 0x3e9   :  { %v35395_v32 = vadd.f32 %v13553_v34, %v13480_v12  ;;  %v13790_v30 = vpop.f32.mrf.mxu0  ;;  %21212 = vmatpush1.msra.mxu1 %v21211_v3  ;;  %21324 = vmatmul.mubr.f32.vlgmr.msra.gmra.mxu0 %v35249_v13  ;;  %v13482_v0 = vadd.f32 %v13481_v28, %v13404_v19  ;;  %v21578_v13 = vsel %vm8689_vm7, %v35335_v56, %v21571_v50  ;;  %v35465_v12 = vand.u32 4294901760, %v21576_v47  ;;  %v22991_v3 = vpop.permute.xlu0 %22990 }
 0x3ea   :  { %21443 = vmatpush1.msra.mxu0 %v21209_v57  ;;  %21361 = vmatprep.subr.mxu1 %v35307_v9  ;;  %v13555_v5 = vpop.f32.mrf.mxu1  ;;  %v35420_v6 = vand.u32 4294901760, %v21578_v13  ;;  %v22162_v10 = vand.u32 4294901760, %v35426_v23  ;;  %v21581_v28 = vsel %vm8689_vm7, %v21575_v49, %v35343_v40 }
 0x3eb   :  { %21618 = vmatprep.subr.mxu0 %v35352_v42  ;;  %v35403_v48 = vadd.f32 %v13555_v5, %v13482_v0  ;;  %v13792_v52 = vpop.f32.mrf.mxu0  ;;  %21245 = vmatprep.mubr.f32.mxu1 %v39365_v21  ;;  %v35452_v40 = vand.u32 4294901760, %v21581_v28 }
 0x3ec   :  { %21476 = vmatprep.mubr.f32.mxu0 %v39365_v21  ;;  %v13713_v55 = vpop.f32.mrf.mxu1  ;;  %21247 = vmatmul.mubr.f32.vlgmr.msra.gmra.mxu1 %v35234_v33  ;;  %v35434_v39 = vsub.f32 %v21578_v13, %v35420_v6  ;;  %v22163_v50 = vsub.f32 %v35426_v23, %v22162_v10 }
 0x3ed   :  { %v13714_v46 = vadd.f32 %v13713_v55, %v13631_v16  ;;  %v13944_v43 = vpop.f32.mrf.mxu0  ;;  %21363 = vmatpush1.msra.mxu1 %v35317_v45  ;;  %21478 = vmatmul.mubr.f32.vlgmr.msra.gmra.mxu0 %v35234_v33  ;;  %v35473_v0 = vsub.f32 %v21581_v28, %v35452_v40 }
 0x3ee   :  { %21620 = vmatpush1.msra.mxu0 %v35368_v24  ;;  %21515 = vmatprep.subr.mxu1 %v35307_v9  ;;  %v13715_v63 = vpop.f32.mrf.mxu1  ;;  %v21699_v9 = vand.u32 4294901760, %v21698_v61  ;;  %v22168_v36 = vand.u32 4294901760, %v35434_v39  ;;  %v22164_v18 = vand.u32 4294901760, %v22163_v50 }
 0x3ef   :  { %21779 = vmatprep.subr.mxu0 %v35373_v7  ;;  %v13716_v58 = vadd.f32 %v13715_v63, %v13633_v44  ;;  %v13946_v56 = vpop.f32.mrf.mxu0  ;;  %21396 = vmatprep.mubr.f32.mxu1 %v39365_v21  ;;  %v13791_v15 = vadd.f32 %v13790_v30, %v13714_v46  ;;  %v31610_v30 = vld [vmem:[%s38611_s4 + $0x38] sm:$0xff]  ;;  %v35483_v46 = vsub.f32 %v21576_v47, %v35465_v12 }
 0x3f0   :  { %21653 = vmatprep.mubr.f32.mxu0 %v39365_v21  ;;  %v13866_v37 = vpop.f32.mrf.mxu1  ;;  %21400 = vmatmul.mubr.f32.vlgmr.msra.gmra.mxu1 %v35262_v14  ;;  %v22169_v2 = vsub.f32 %v35434_v39, %v22168_v36  ;;  %v23009_v61 = vsel %vm13089_vm10, %v31610_v30, 0 }
 0x3f1   :  { %v13867_v54 = vadd.f32 %v13866_v37, %v13791_v15  ;;  %v14096_v57 = vpop.f32.mrf.mxu0  ;;  %21517 = vmatpush1.msra.mxu1 %v35317_v45  ;;  %21659 = vmatmul.mubr.f32.vlgmr.msra.gmra.mxu0 %v35416_v25  ;;  %v13793_v8 = vadd.f32 %v13792_v52, %v13716_v58  ;;  %v35486_v58 = vpop.permute.xlu1 %22992  ;;  %v22627_v15 = vand.u32 4294901760, %v35473_v0 }
 0x3f2   :  { %21782 = vmatpush1.msra.mxu0 %v35386_v59  ;;  %21700 = vmatprep.subr.mxu1 %v21699_v9  ;;  %v13868_v22 = vpop.f32.mrf.mxu1  ;;  %v22170_v62 = vand.u32 4294901760, %v22169_v2  ;;  %v35495_v37 = vpop.permute.xlu0 %22988 }
 0x3f3   :  { %21933 = vmatprep.subr.mxu0 %v21697_v11  ;;  %v13869_v38 = vadd.f32 %v13868_v22, %v13793_v8  ;;  %v14098_v53 = vpop.f32.mrf.mxu0  ;;  %21550 = vmatprep.mubr.f32.mxu1 %v39365_v21  ;;  %v13945_v14 = vadd.f32 %v13944_v43, %v13867_v54  ;;  %v22633_v22 = vand.u32 4294901760, %v35483_v46  ;;  %v22628_v49 = vsub.f32 %v35473_v0, %v22627_v15 }
 0x3f4   :  { %21815 = vmatprep.mubr.f32.mxu0 %v39365_v21  ;;  %v14018_v45 = vpop.f32.mrf.mxu1  ;;  %21552 = vmatmul.mubr.f32.vlgmr.msra.gmra.mxu1 %v35234_v33 }
 0x3f5   :  { %v35443_v20 = vadd.f32 %v14018_v45, %v13945_v14  ;;  %v14255_v7 = vpop.f32.mrf.mxu0  ;;  %21706 = vmatpush1.msra.mxu1 %v21705_v51  ;;  %21818 = vmatmul.mubr.f32.vlgmr.msra.gmra.mxu0 %v35363_v31  ;;  %v13947_v35 = vadd.f32 %v13946_v56, %v13869_v38  ;;  %v23004_v14 = vsel %vm10132_vm8, %v35495_v37, %v22991_v3 }
 0x3f6   :  { %21937 = vmatpush1.msra.mxu0 %v21703_v27  ;;  %21855 = vmatprep.subr.mxu1 %v35352_v42  ;;  %v14020_v29 = vpop.f32.mrf.mxu1 }
 0x3f7   :  { %22083 = vmatprep.subr.mxu0 %v35409_v1  ;;  %v35449_v33 = vadd.f32 %v14020_v29, %v13947_v35  ;;  %v14257_v16 = vpop.f32.mrf.mxu0  ;;  %21739 = vmatprep.mubr.f32.mxu1 %v39365_v21  ;;  %v22634_v35 = vsub.f32 %v35483_v46, %v22633_v22  ;;  %v35524_v29 = vand.u32 4294901760, %v23004_v14 }
 0x3f8   :  { %21970 = vmatprep.mubr.f32.mxu0 %v39365_v21  ;;  %v14178_v17 = vpop.f32.mrf.mxu1  ;;  %21741 = vmatmul.mubr.f32.vlgmr.msra.gmra.mxu1 %v35346_v4 }
 0x3f9   :  { %v14179_v59 = vadd.f32 %v14178_v17, %v14096_v57  ;;  %v14409_v19 = vpop.f32.mrf.mxu0  ;;  %21857 = vmatpush1.msra.mxu1 %v35368_v24  ;;  %21972 = vmatmul.mubr.f32.vlgmr.msra.gmra.mxu0 %v35346_v4  ;;  %v35500_v57 = vand.u32 4294901760, %v23009_v61  ;;  %v35543_v30 = vsub.f32 %v23004_v14, %v35524_v29 }
 0x3fa   :  { %22085 = vmatpush1.msra.mxu0 %v35420_v6  ;;  %22009 = vmatprep.subr.mxu1 %v35352_v42  ;;  %v14180_v44 = vpop.f32.mrf.mxu1 }
 0x3fb   :  { %22244 = vmatprep.subr.mxu0 %v35426_v23  ;;  %v14181_v60 = vadd.f32 %v14180_v44, %v14098_v53  ;;  %v14411_v34 = vpop.f32.mrf.mxu0  ;;  %21890 = vmatprep.mubr.f32.mxu1 %v39365_v21  ;;  %v14256_v11 = vadd.f32 %v14255_v7, %v14179_v59  ;;  %v23003_v23 = vsel %vm10132_vm8, %v22991_v3, %v35486_v58  ;;  %v35533_v59 = vpop.permute.xlu0 %22996 }
 0x3fc   :  { %22118 = vmatprep.mubr.f32.mxu0 %v39365_v21  ;;  %v14331_v42 = vpop.f32.mrf.mxu1  ;;  %21894 = vmatmul.mubr.f32.vlgmr.msra.gmra.mxu1 %v35382_v41  ;;  %v35508_v53 = vand.u32 4294901760, %v23003_v23  ;;  %v35519_v28 = vsub.f32 %v23009_v61, %v35500_v57 }
 0x3fd   :  { %v14332_v5 = vadd.f32 %v14331_v42, %v14256_v11  ;;  %v14564_v27 = vpop.f32.mrf.mxu0  ;;  %22011 = vmatpush1.msra.mxu1 %v35368_v24  ;;  %22124 = vmatmul.mubr.f32.vlgmr.msra.gmra.mxu0 %v35416_v25  ;;  %v14258_v52 = vadd.f32 %v14257_v16, %v14181_v60  ;;  %v22995_v11 = vpop.permute.xlu1 %22994 }
 0x3fe   :  { %v14565_v13 = vadd.f32 %v14564_v27, %v35395_v32  ;;  %22247 = vmatpush1.msra.mxu0 %v35434_v39  ;;  %22165 = vmatprep.subr.mxu1 %v22164_v18  ;;  %v14333_v55 = vpop.f32.mrf.mxu1  ;;  %v35529_v17 = vsub.f32 %v23003_v23, %v35508_v53  ;;  %v35538_v3 = vand.u32 4294901760, %v35519_v28  ;;  %v23001_v18 = vsel %vm10132_vm8, %v22995_v11, %v35533_v59 }
 0x3ff   :  { %22398 = vmatprep.subr.mxu0 %v22162_v10  ;;  %v14334_v43 = vadd.f32 %v14333_v55, %v14258_v52  ;;  %v14566_v63 = vpop.f32.mrf.mxu0  ;;  %22044 = vmatprep.mubr.f32.mxu1 %v39365_v21  ;;  %v14410_v24 = vadd.f32 %v14409_v19, %v14332_v5 }
 0x400   :  { %v14567_v32 = vadd.f32 %v14566_v63, %v35403_v48  ;;  %22280 = vmatprep.mubr.f32.mxu0 %v39365_v21  ;;  %v14483_v56 = vpop.f32.mrf.mxu1  ;;  %22046 = vmatmul.mubr.f32.vlgmr.msra.gmra.mxu1 %v35346_v4  ;;  %v23121_v27 = vand.u32 4294901760, %v35529_v17  ;;  %v23081_v61 = vsub.f32 %v35519_v28, %v35538_v3 }
 0x401   :  { %v35497_v9 = vadd.f32 %v14483_v56, %v14410_v24  ;;  %v14723_v54 = vpop.f32.mrf.mxu0  ;;  %22171 = vmatpush1.msra.mxu1 %v22170_v62  ;;  %22283 = vmatmul.mubr.f32.vlgmr.msra.gmra.mxu0 %v35363_v31  ;;  %v14412_v48 = vadd.f32 %v14411_v34, %v14334_v43  ;;  %v35567_v24 = vand.u32 4294901760, %v23001_v18 }
 0x402   :  { %22402 = vmatpush1.msra.mxu0 %v22168_v36  ;;  %22320 = vmatprep.subr.mxu1 %v35409_v1  ;;  %v14485_v8 = vpop.f32.mrf.mxu1  ;;  %v35574_v23 = vand.u32 4294901760, %v23081_v61  ;;  %v31611_v61 = vld [vmem:[%s38611_s4 + $0x40] sm:$0xff] }
 0x403   :  { %22548 = vmatprep.subr.mxu0 %v35452_v40  ;;  %v35505_v39 = vadd.f32 %v14485_v8, %v14412_v48  ;;  %v14725_v38 = vpop.f32.mrf.mxu0  ;;  %22204 = vmatprep.mubr.f32.mxu1 %v39365_v21  ;;  %v35584_v14 = vsub.f32 %v23001_v18, %v35567_v24 }
 0x404   :  { %22435 = vmatprep.mubr.f32.mxu0 %v39365_v21  ;;  %v14646_v51 = vpop.f32.mrf.mxu1  ;;  %22206 = vmatmul.mubr.f32.vlgmr.msra.gmra.mxu1 %v35346_v4 }
 0x405   :  { %v14647_v45 = vadd.f32 %v14646_v51, %v14565_v13  ;;  %v14877_v10 = vpop.f32.mrf.mxu0  ;;  %22322 = vmatpush1.msra.mxu1 %v35420_v6  ;;  %22437 = vmatmul.mubr.f32.vlgmr.msra.gmra.mxu0 %v35346_v4 }
 0x406   :  { %22550 = vmatpush1.msra.mxu0 %v35465_v12  ;;  %22474 = vmatprep.subr.mxu1 %v35409_v1  ;;  %v14648_v7 = vpop.f32.mrf.mxu1  ;;  %v22629_v1 = vand.u32 4294901760, %v22628_v49 }
 0x407   :  { %22709 = vmatprep.subr.mxu0 %v35473_v0  ;;  %v14649_v36 = vadd.f32 %v14648_v7, %v14567_v32  ;;  %v14879_v16 = vpop.f32.mrf.mxu0  ;;  %22355 = vmatprep.mubr.f32.mxu1 %v39365_v21  ;;  %v14724_v47 = vadd.f32 %v14723_v54, %v14647_v45  ;;  %v23122_v32 = vsub.f32 %v35529_v17, %v23121_v27 }
 0x408   :  { %22583 = vmatprep.mubr.f32.mxu0 %v39365_v21  ;;  %v14799_v50 = vpop.f32.mrf.mxu1  ;;  %22359 = vmatmul.mubr.f32.vlgmr.msra.gmra.mxu1 %v35382_v41 }
 0x409   :  { %v14800_v19 = vadd.f32 %v14799_v50, %v14724_v47  ;;  %v15029_v44 = vpop.f32.mrf.mxu0  ;;  %22476 = vmatpush1.msra.mxu1 %v35420_v6  ;;  %22589 = vmatmul.mubr.f32.vlgmr.msra.gmra.mxu0 %v35416_v25  ;;  %v14726_v2 = vadd.f32 %v14725_v38, %v14649_v36  ;;  %v22635_v6 = vand.u32 4294901760, %v22634_v35 }
 0x40a   :  { %v15030_v60 = vadd.f32 %v15029_v44, %v35443_v20  ;;  %22712 = vmatpush1.msra.mxu0 %v35483_v46  ;;  %22630 = vmatprep.subr.mxu1 %v22629_v1  ;;  %v14801_v34 = vpop.f32.mrf.mxu1  ;;  %v23127_v46 = vand.u32 4294901760, %v35543_v30  ;;  %v23586_v1 = vand.u32 4294901760, %v35584_v14 }
 0x40b   :  { %22863 = vmatprep.subr.mxu0 %v22627_v15  ;;  %v14802_v0 = vadd.f32 %v14801_v34, %v14726_v2  ;;  %v15031_v42 = vpop.f32.mrf.mxu0  ;;  %22509 = vmatprep.mubr.f32.mxu1 %v39365_v21  ;;  %v14878_v25 = vadd.f32 %v14877_v10, %v14800_v19 }
 0x40c   :  { %v15032_v20 = vadd.f32 %v15031_v42, %v35449_v33  ;;  %22745 = vmatprep.mubr.f32.mxu0 %v39365_v21  ;;  %v14951_v5 = vpop.f32.mrf.mxu1  ;;  %22511 = vmatmul.mubr.f32.vlgmr.msra.gmra.mxu1 %v35346_v4  ;;  %v23128_v48 = vsub.f32 %v35543_v30, %v23127_v46  ;;  %v23587_v42 = vsub.f32 %v35584_v14, %v23586_v1 }
 0x40d   :  { %v35553_v52 = vadd.f32 %v14951_v5, %v14878_v25  ;;  %v15188_v13 = vpop.f32.mrf.mxu0  ;;  %22636 = vmatpush1.msra.mxu1 %v22635_v6  ;;  %22748 = vmatmul.mubr.f32.vlgmr.msra.gmra.mxu0 %v35363_v31  ;;  %v14880_v55 = vadd.f32 %v14879_v16, %v14802_v0  ;;  %v23002_v31 = vsel %vm10132_vm8, %v35486_v58, %v22995_v11  ;;  %v24415_v5 = vpop.permute.xlu0 %24414 }
 0x40e   :  { %22867 = vmatpush1.msra.mxu0 %v22633_v22  ;;  %22785 = vmatprep.subr.mxu1 %v35452_v40  ;;  %v14953_v33 = vpop.f32.mrf.mxu1  ;;  %v35578_v54 = vand.u32 4294901760, %v23002_v31 }
 0x40f   :  { %23042 = vmatprep.subr.mxu0 %v35508_v53  ;;  %v35561_v43 = vadd.f32 %v14953_v33, %v14880_v55  ;;  %v15190_v63 = vpop.f32.mrf.mxu0  ;;  %22669 = vmatprep.mubr.f32.mxu1 %v39365_v21 }
 0x410   :  { %22900 = vmatprep.mubr.f32.mxu0 %v39365_v21  ;;  %v15111_v62 = vpop.f32.mrf.mxu1  ;;  %22671 = vmatmul.mubr.f32.vlgmr.msra.gmra.mxu1 %v35346_v4  ;;  %v35593_v36 = vsub.f32 %v23002_v31, %v35578_v54 }
 0x411   :  { %v15112_v56 = vadd.f32 %v15111_v62, %v15030_v60  ;;  %v15342_v15 = vpop.f32.mrf.mxu0  ;;  %22787 = vmatpush1.msra.mxu1 %v35465_v12  ;;  %22902 = vmatmul.mubr.f32.vlgmr.msra.gmra.mxu0 %v35346_v4 }
 0x412   :  { %23044 = vmatpush1.msra.mxu0 %v35524_v29  ;;  %22939 = vmatprep.subr.mxu1 %v35452_v40  ;;  %v15113_v58 = vpop.f32.mrf.mxu1  ;;  %v23123_v40 = vand.u32 4294901760, %v23122_v32  ;;  %v23592_v34 = vand.u32 4294901760, %v35593_v36 }
 0x413   :  { %23203 = vmatprep.subr.mxu0 %v35529_v17  ;;  %v15114_v8 = vadd.f32 %v15113_v58, %v15032_v20  ;;  %v15344_v22 = vpop.f32.mrf.mxu0  ;;  %22820 = vmatprep.mubr.f32.mxu1 %v39365_v21  ;;  %v15189_v38 = vadd.f32 %v15188_v13, %v15112_v56  ;;  %v23129_v17 = vand.u32 4294901760, %v23128_v48  ;;  %v24433_v56 = vsel %vm13089_vm10, %v31611_v61, 0 }
 0x414   :  { %23077 = vmatprep.mubr.f32.mxu0 %v39365_v21  ;;  %v15264_v51 = vpop.f32.mrf.mxu1  ;;  %22824 = vmatmul.mubr.f32.vlgmr.msra.gmra.mxu1 %v35382_v41 }
 0x415   :  { %v15265_v49 = vadd.f32 %v15264_v51, %v15189_v38  ;;  %v15494_v45 = vpop.f32.mrf.mxu0  ;;  %22941 = vmatpush1.msra.mxu1 %v35465_v12  ;;  %23083 = vmatmul.mubr.f32.vlgmr.msra.gmra.mxu0 %v35574_v23  ;;  %v15191_v10 = vadd.f32 %v15190_v63, %v15114_v8  ;;  %v22999_v12 = vpop.permute.xlu1 %22998 }
 0x416   :  { %v15495_v7 = vadd.f32 %v15494_v45, %v35497_v9  ;;  %23206 = vmatpush1.msra.mxu0 %v35543_v30  ;;  %23124 = vmatprep.subr.mxu1 %v23123_v40  ;;  %v15266_v35 = vpop.f32.mrf.mxu1  ;;  %v23005_v19 = vsel %vm10132_vm8, %v22999_v12, %v35495_v37  ;;  %v23000_v30 = vsel %vm10132_vm8, %v35533_v59, %v22999_v12  ;;  %v35653_v40 = vpop.permute.xlu0 %24412 }
 0x417   :  { %23357 = vmatprep.subr.mxu0 %v23121_v27  ;;  %v15267_v16 = vadd.f32 %v15266_v35, %v15191_v10  ;;  %v15496_v41 = vpop.f32.mrf.mxu0  ;;  %22974 = vmatprep.mubr.f32.mxu1 %v39365_v21  ;;  %v15343_v47 = vadd.f32 %v15342_v15, %v15265_v49  ;;  %v35612_v11 = vand.u32 4294901760, %v23005_v19  ;;  %v23593_v59 = vsub.f32 %v35593_v36, %v23592_v34 }
 0x418   :  { %v15497_v50 = vadd.f32 %v15496_v41, %v35505_v39  ;;  %23239 = vmatprep.mubr.f32.mxu0 %v39365_v21  ;;  %v15416_v9 = vpop.f32.mrf.mxu1  ;;  %22976 = vmatmul.mubr.f32.vlgmr.msra.gmra.mxu1 %v35346_v4  ;;  %v35625_v20 = vand.u32 4294901760, %v23000_v30 }
 0x419   :  { %v35603_v44 = vadd.f32 %v15416_v9, %v15343_v47  ;;  %23130 = vmatpush1.msra.mxu1 %v23129_v17  ;;  %23242 = vmatmul.mubr.f32.vlgmr.msra.gmra.mxu0 %v35519_v28  ;;  %v15345_v2 = vadd.f32 %v15344_v22, %v15267_v16  ;;  %v15653_v60 = vpop.f32.mrf.mxu0  ;;  %v35633_v33 = vsub.f32 %v23005_v19, %v35612_v11  ;;  %v23594_v8 = vand.u32 4294901760, %v23593_v59 }
 0x41a   :  { %23361 = vmatpush1.msra.mxu0 %v23127_v46  ;;  %23279 = vmatprep.subr.mxu1 %v35508_v53  ;;  %v15418_v39 = vpop.f32.mrf.mxu1  ;;  %v23588_v46 = vand.u32 4294901760, %v23587_v42  ;;  %v35642_v15 = vsub.f32 %v23000_v30, %v35625_v20  ;;  %v24428_v17 = vsel %vm11575_vm9, %v35653_v40, %v24415_v5 }
 0x41b   :  { %23507 = vmatprep.subr.mxu0 %v35567_v24  ;;  %v35609_v4 = vadd.f32 %v15418_v39, %v15345_v2  ;;  %23163 = vmatprep.mubr.f32.mxu1 %v39365_v21  ;;  %v15655_v37 = vpop.f32.mrf.mxu0  ;;  %v35682_v39 = vand.u32 4294901760, %v24428_v17 }
 0x41c   :  { %23394 = vmatprep.mubr.f32.mxu0 %v39365_v21  ;;  %v15576_v0 = vpop.f32.mrf.mxu1  ;;  %23165 = vmatmul.mubr.f32.vlgmr.msra.gmra.mxu1 %v35500_v57 }
 0x41d   :  { %v15577_v25 = vadd.f32 %v15576_v0, %v15495_v7  ;;  %23281 = vmatpush1.msra.mxu1 %v35524_v29  ;;  %23396 = vmatmul.mubr.f32.vlgmr.msra.gmra.mxu0 %v35500_v57  ;;  %v15807_v6 = vpop.f32.mrf.mxu0  ;;  %v35658_v7 = vand.u32 4294901760, %v24433_v56 }
 0x41e   :  { %23509 = vmatpush1.msra.mxu0 %v35578_v54  ;;  %23433 = vmatprep.subr.mxu1 %v35508_v53  ;;  %v15578_v18 = vpop.f32.mrf.mxu1 }
 0x41f   :  { %v15654_v27 = vadd.f32 %v15653_v60, %v15577_v25  ;;  %23668 = vmatprep.subr.mxu0 %v35584_v14  ;;  %v15579_v13 = vadd.f32 %v15578_v18, %v15497_v50  ;;  %23314 = vmatprep.mubr.f32.mxu1 %v39365_v21  ;;  %v15809_v55 = vpop.f32.mrf.mxu0  ;;  %v24051_v14 = vand.u32 4294901760, %v35633_v33  ;;  %v35677_v19 = vsub.f32 %v24433_v56, %v35658_v7  ;;  %v35691_v25 = vpop.permute.xlu0 %24420 }
 0x420   :  { %23542 = vmatprep.mubr.f32.mxu0 %v39365_v21  ;;  %v15729_v53 = vpop.f32.mrf.mxu1  ;;  %23318 = vmatmul.mubr.f32.vlgmr.msra.gmra.mxu1 %v35538_v3 }
 0x421   :  { %v15656_v63 = vadd.f32 %v15655_v37, %v15579_v13  ;;  %v15730_v31 = vadd.f32 %v15729_v53, %v15654_v27  ;;  %23435 = vmatpush1.msra.mxu1 %v35524_v29  ;;  %23548 = vmatmul.mubr.f32.vlgmr.msra.gmra.mxu0 %v35574_v23  ;;  %v15982_v62 = vpop.f32.mrf.mxu0  ;;  %v35645_v29 = vpop.permute.xlu1 %24416  ;;  %v24052_v50 = vsub.f32 %v35633_v33, %v24051_v14 }
 0x422   :  { %23671 = vmatpush1.msra.mxu0 %v35593_v36  ;;  %23589 = vmatprep.subr.mxu1 %v23588_v46  ;;  %v15731_v32 = vpop.f32.mrf.mxu1  ;;  %v24427_v51 = vsel %vm11575_vm9, %v24415_v5, %v35645_v29  ;;  %v24057_v36 = vand.u32 4294901760, %v35642_v15  ;;  %v35696_v5 = vand.u32 4294901760, %v35677_v19 }
 0x423   :  { %v15808_v58 = vadd.f32 %v15807_v6, %v15730_v31  ;;  %23822 = vmatprep.subr.mxu0 %v23586_v1  ;;  %v15732_v48 = vadd.f32 %v15731_v32, %v15656_v63  ;;  %23468 = vmatprep.mubr.f32.mxu1 %v39365_v21  ;;  %v15984_v22 = vpop.f32.mrf.mxu0  ;;  %v35666_v47 = vand.u32 4294901760, %v24427_v51 }
 0x424   :  { %23704 = vmatprep.mubr.f32.mxu0 %v39365_v21  ;;  %v15881_v38 = vpop.f32.mrf.mxu1  ;;  %23470 = vmatmul.mubr.f32.vlgmr.msra.gmra.mxu1 %v35500_v57  ;;  %v24058_v60 = vsub.f32 %v35642_v15, %v24057_v36  ;;  %v24505_v56 = vsub.f32 %v35677_v19, %v35696_v5 }
 0x425   :  { %v15810_v49 = vadd.f32 %v15809_v55, %v15732_v48  ;;  %v35655_v45 = vadd.f32 %v15881_v38, %v15808_v58  ;;  %23595 = vmatpush1.msra.mxu1 %v23594_v8  ;;  %23707 = vmatmul.mubr.f32.vlgmr.msra.gmra.mxu0 %v35519_v28  ;;  %v16141_v10 = vpop.f32.mrf.mxu0  ;;  %v35687_v0 = vsub.f32 %v24427_v51, %v35666_v47  ;;  %v24419_v13 = vpop.permute.xlu1 %24418 }
 0x426   :  { %23826 = vmatpush1.msra.mxu0 %v23592_v34  ;;  %23744 = vmatprep.subr.mxu1 %v35567_v24  ;;  %v15883_v35 = vpop.f32.mrf.mxu1  ;;  %v35700_v55 = vsub.f32 %v24428_v17, %v35682_v39 }
 0x427   :  { %23972 = vmatprep.subr.mxu0 %v35612_v11  ;;  %v35663_v16 = vadd.f32 %v15883_v35, %v15810_v49  ;;  %23628 = vmatprep.mubr.f32.mxu1 %v39365_v21  ;;  %v16143_v41 = vpop.f32.mrf.mxu0  ;;  %v24545_v63 = vand.u32 4294901760, %v35687_v0  ;;  %v35732_v35 = vand.u32 4294901760, %v24505_v56 }
 0x428   :  { %23859 = vmatprep.mubr.f32.mxu0 %v39365_v21  ;;  %v16064_v12 = vpop.f32.mrf.mxu1  ;;  %23630 = vmatmul.mubr.f32.vlgmr.msra.gmra.mxu1 %v35500_v57  ;;  %v24551_v58 = vand.u32 4294901760, %v35700_v55 }
 0x429   :  { %v16065_v9 = vadd.f32 %v16064_v12, %v15982_v62  ;;  %23746 = vmatpush1.msra.mxu1 %v35578_v54  ;;  %23861 = vmatmul.mubr.f32.vlgmr.msra.gmra.mxu0 %v35500_v57  ;;  %v16295_v1 = vpop.f32.mrf.mxu0 }
 0x42a   :  { %23974 = vmatpush1.msra.mxu0 %v35625_v20  ;;  %23898 = vmatprep.subr.mxu1 %v35567_v24  ;;  %v16066_v2 = vpop.f32.mrf.mxu1  ;;  %v24053_v24 = vand.u32 4294901760, %v24052_v50 }
 0x42b   :  { %v16142_v34 = vadd.f32 %v16141_v10, %v16065_v9  ;;  %24133 = vmatprep.subr.mxu0 %v35633_v33  ;;  %v16067_v37 = vadd.f32 %v16066_v2, %v15984_v22  ;;  %23779 = vmatprep.mubr.f32.mxu1 %v39365_v21  ;;  %v16297_v30 = vpop.f32.mrf.mxu0 }
 0x42c   :  { %24007 = vmatprep.mubr.f32.mxu0 %v39365_v21  ;;  %v16217_v42 = vpop.f32.mrf.mxu1  ;;  %23783 = vmatmul.mubr.f32.vlgmr.msra.gmra.mxu1 %v35538_v3 }
 0x42d   :  { %v16144_v6 = vadd.f32 %v16143_v41, %v16067_v37  ;;  %v16218_v18 = vadd.f32 %v16217_v42, %v16142_v34  ;;  %23900 = vmatpush1.msra.mxu1 %v35578_v54  ;;  %24013 = vmatmul.mubr.f32.vlgmr.msra.gmra.mxu0 %v35574_v23  ;;  %v16447_v59 = vpop.f32.mrf.mxu0  ;;  %v24059_v54 = vand.u32 4294901760, %v24058_v60  ;;  %v24425_v23 = vsel %vm11575_vm9, %v24419_v13, %v35691_v25 }
 0x42e   :  { %24136 = vmatpush1.msra.mxu0 %v35642_v15  ;;  %24054 = vmatprep.subr.mxu1 %v24053_v24  ;;  %v16219_v27 = vpop.f32.mrf.mxu1  ;;  %v35722_v38 = vand.u32 4294901760, %v24425_v23  ;;  %v24552_v41 = vsub.f32 %v35700_v55, %v24551_v58  ;;  %v24423_v24 = vpop.permute.xlu1 %24422 }
 0x42f   :  { %v16296_v61 = vadd.f32 %v16295_v1, %v16218_v18  ;;  %24287 = vmatprep.subr.mxu0 %v24051_v14  ;;  %v16220_v33 = vadd.f32 %v16219_v27, %v16144_v6  ;;  %23933 = vmatprep.mubr.f32.mxu1 %v39365_v21  ;;  %v16449_v53 = vpop.f32.mrf.mxu0  ;;  %v24429_v18 = vsel %vm11575_vm9, %v24423_v24, %v35653_v40 }
 0x430   :  { %24169 = vmatprep.mubr.f32.mxu0 %v39365_v21  ;;  %v16369_v46 = vpop.f32.mrf.mxu1  ;;  %23935 = vmatmul.mubr.f32.vlgmr.msra.gmra.mxu1 %v35500_v57  ;;  %v35742_v50 = vsub.f32 %v24425_v23, %v35722_v38 }
 0x431   :  { %v16298_v31 = vadd.f32 %v16297_v30, %v16220_v33  ;;  %v16370_v62 = vadd.f32 %v16369_v46, %v16296_v61  ;;  %24060 = vmatpush1.msra.mxu1 %v24059_v54  ;;  %24172 = vmatmul.mubr.f32.vlgmr.msra.gmra.mxu0 %v35519_v28  ;;  %v16606_v32 = vpop.f32.mrf.mxu0  ;;  %v24426_v28 = vsel %vm11575_vm9, %v35645_v29, %v24419_v13  ;;  %v35767_v54 = vand.u32 4294901760, %v24429_v18 }
 0x432   :  { %24291 = vmatpush1.msra.mxu0 %v24057_v36  ;;  %24209 = vmatprep.subr.mxu1 %v35612_v11  ;;  %v16371_v15 = vpop.f32.mrf.mxu1  ;;  %v35736_v36 = vand.u32 4294901760, %v24426_v28  ;;  %v25010_v6 = vand.u32 4294901760, %v35742_v50 }
 0x433   :  { %v35715_v48 = vadd.f32 %v16370_v62, %v35553_v52  ;;  %24466 = vmatprep.subr.mxu0 %v35666_v47  ;;  %v16372_v8 = vadd.f32 %v16371_v15, %v16298_v31  ;;  %24093 = vmatprep.mubr.f32.mxu1 %v39365_v21  ;;  %v16608_v22 = vpop.f32.mrf.mxu0  ;;  %v24546_v52 = vsub.f32 %v35687_v0, %v24545_v63 }
 0x434   :  { %24324 = vmatprep.mubr.f32.mxu0 %v39365_v21  ;;  %v16529_v14 = vpop.f32.mrf.mxu1  ;;  %24095 = vmatmul.mubr.f32.vlgmr.msra.gmra.mxu1 %v35500_v57  ;;  %v35750_v37 = vsub.f32 %v24426_v28, %v35736_v36  ;;  %v35788_v15 = vsub.f32 %v24429_v18, %v35767_v54 }
 0x435   :  { %v35728_v51 = vadd.f32 %v16372_v8, %v35561_v43  ;;  %v16530_v49 = vadd.f32 %v16529_v14, %v16447_v59  ;;  %24211 = vmatpush1.msra.mxu1 %v35625_v20  ;;  %24326 = vmatmul.mubr.f32.vlgmr.msra.gmra.mxu0 %v35500_v57  ;;  %v16760_v10 = vpop.f32.mrf.mxu0 }
 0x436   :  { %24468 = vmatpush1.msra.mxu0 %v35682_v39  ;;  %24363 = vmatprep.subr.mxu1 %v35612_v11  ;;  %v16531_v29 = vpop.f32.mrf.mxu1  ;;  %v24547_v11 = vand.u32 4294901760, %v24546_v52  ;;  %v25016_v61 = vand.u32 4294901760, %v35750_v37 }
 0x437   :  { %v16607_v17 = vadd.f32 %v16606_v32, %v16530_v49  ;;  %24627 = vmatprep.subr.mxu0 %v35687_v0  ;;  %v16532_v43 = vadd.f32 %v16531_v29, %v16449_v53  ;;  %24244 = vmatprep.mubr.f32.mxu1 %v39365_v21  ;;  %v16762_v12 = vpop.f32.mrf.mxu0  ;;  %v24424_v53 = vsel %vm11575_vm9, %v35691_v25, %v24423_v24 }
 0x438   :  { %24501 = vmatprep.mubr.f32.mxu0 %v39365_v21  ;;  %v16682_v9 = vpop.f32.mrf.mxu1  ;;  %24248 = vmatmul.mubr.f32.vlgmr.msra.gmra.mxu1 %v35538_v3  ;;  %v24553_v3 = vand.u32 4294901760, %v24552_v41  ;;  %v25017_v25 = vsub.f32 %v35750_v37, %v25016_v61  ;;  %v35783_v62 = vand.u32 4294901760, %v24424_v53 }
 0x439   :  { %v16609_v1 = vadd.f32 %v16608_v22, %v16532_v43  ;;  %v16683_v2 = vadd.f32 %v16682_v9, %v16607_v17  ;;  %24365 = vmatpush1.msra.mxu1 %v35625_v20  ;;  %24507 = vmatmul.mubr.f32.vlgmr.msra.gmra.mxu0 %v35732_v35  ;;  %v16912_v60 = vpop.f32.mrf.mxu0  ;;  %v25475_v17 = vand.u32 4294901760, %v35788_v15 }
 0x43a   :  { %24630 = vmatpush1.msra.mxu0 %v35700_v55  ;;  %24548 = vmatprep.subr.mxu1 %v24547_v11  ;;  %v16684_v34 = vpop.f32.mrf.mxu1  ;;  %v35796_v52 = vsub.f32 %v24424_v53, %v35783_v62  ;;  %v25018_v29 = vand.u32 4294901760, %v25017_v25 }
 0x43b   :  { %v16761_v30 = vadd.f32 %v16760_v10, %v16683_v2  ;;  %24781 = vmatprep.subr.mxu0 %v24545_v63  ;;  %v16685_v0 = vadd.f32 %v16684_v34, %v16609_v1  ;;  %24398 = vmatprep.mubr.f32.mxu1 %v39365_v21  ;;  %v16914_v42 = vpop.f32.mrf.mxu0 }
 0x43c   :  { %24663 = vmatprep.mubr.f32.mxu0 %v39365_v21  ;;  %v16834_v20 = vpop.f32.mrf.mxu1  ;;  %24400 = vmatmul.mubr.f32.vlgmr.msra.gmra.mxu1 %v35500_v57  ;;  %v25481_v11 = vand.u32 4294901760, %v35796_v52 }
 0x43d   :  { %v16763_v59 = vadd.f32 %v16762_v12, %v16685_v0  ;;  %v16835_v27 = vadd.f32 %v16834_v20, %v16761_v30  ;;  %24554 = vmatpush1.msra.mxu1 %v24553_v3  ;;  %24666 = vmatmul.mubr.f32.vlgmr.msra.gmra.mxu0 %v35677_v19  ;;  %v17071_v13 = vpop.f32.mrf.mxu0 }
 0x43e   :  { %24785 = vmatpush1.msra.mxu0 %v24551_v58  ;;  %24703 = vmatprep.subr.mxu1 %v35666_v47  ;;  %v16836_v55 = vpop.f32.mrf.mxu1 }
 0x43f   :  { %v35763_v57 = vadd.f32 %v16835_v27, %v35603_v44  ;;  %24931 = vmatprep.subr.mxu0 %v35722_v38  ;;  %v16837_v33 = vadd.f32 %v16836_v55, %v16763_v59  ;;  %24587 = vmatprep.mubr.f32.mxu1 %v39365_v21  ;;  %v17073_v40 = vpop.f32.mrf.mxu0  ;;  %v25011_v44 = vsub.f32 %v35742_v50, %v25010_v6 }
 0x440   :  { %24818 = vmatprep.mubr.f32.mxu0 %v39365_v21  ;;  %v16994_v23 = vpop.f32.mrf.mxu1  ;;  %24589 = vmatmul.mubr.f32.vlgmr.msra.gmra.mxu1 %v35658_v7 }
 0x441   :  { %v35776_v46 = vadd.f32 %v16837_v33, %v35609_v4  ;;  %v16995_v63 = vadd.f32 %v16994_v23, %v16912_v60  ;;  %24705 = vmatpush1.msra.mxu1 %v35682_v39  ;;  %24820 = vmatmul.mubr.f32.vlgmr.msra.gmra.mxu0 %v35658_v7  ;;  %v17225_v31 = vpop.f32.mrf.mxu0 }
 0x442   :  { %24933 = vmatpush1.msra.mxu0 %v35736_v36  ;;  %24857 = vmatprep.subr.mxu1 %v35666_v47  ;;  %v16996_v26 = vpop.f32.mrf.mxu1  ;;  %v25012_v47 = vand.u32 4294901760, %v25011_v44 }
 0x443   :  { %v17072_v32 = vadd.f32 %v17071_v13, %v16995_v63  ;;  %25092 = vmatprep.subr.mxu0 %v35742_v50  ;;  %v16997_v4 = vadd.f32 %v16996_v26, %v16914_v42  ;;  %24738 = vmatprep.mubr.f32.mxu1 %v39365_v21  ;;  %v17227_v56 = vpop.f32.mrf.mxu0  ;;  %v25482_v42 = vsub.f32 %v35796_v52, %v25481_v11 }
 0x444   :  { %24966 = vmatprep.mubr.f32.mxu0 %v39365_v21  ;;  %v17147_v58 = vpop.f32.mrf.mxu1  ;;  %24742 = vmatmul.mubr.f32.vlgmr.msra.gmra.mxu1 %v35696_v5 }
 0x445   :  { %v17074_v8 = vadd.f32 %v17073_v40, %v16997_v4  ;;  %v17148_v22 = vadd.f32 %v17147_v58, %v17072_v32  ;;  %24859 = vmatpush1.msra.mxu1 %v35682_v39  ;;  %24972 = vmatmul.mubr.f32.vlgmr.msra.gmra.mxu0 %v35732_v35  ;;  %v17406_v28 = vpop.f32.mrf.mxu0  ;;  %v25483_v13 = vand.u32 4294901760, %v25482_v42 }
 0x446   :  { %25095 = vmatpush1.msra.mxu0 %v35750_v37  ;;  %25013 = vmatprep.subr.mxu1 %v25012_v47  ;;  %v17149_v14 = vpop.f32.mrf.mxu1  ;;  %v25476_v37 = vsub.f32 %v35788_v15, %v25475_v17 }
 0x447   :  { %v17226_v49 = vadd.f32 %v17225_v31, %v17148_v22  ;;  %25246 = vmatprep.subr.mxu0 %v25010_v6  ;;  %v17150_v10 = vadd.f32 %v17149_v14, %v17074_v8  ;;  %24892 = vmatprep.mubr.f32.mxu1 %v39365_v21  ;;  %v35799_v41 = vpop.f32.mrf.mxu0 }
 0x448   :  { %25128 = vmatprep.mubr.f32.mxu0 %v39365_v21  ;;  %v17299_v39 = vpop.f32.mrf.mxu1  ;;  %24894 = vmatmul.mubr.f32.vlgmr.msra.gmra.mxu1 %v35658_v7  ;;  %v25477_v6 = vand.u32 4294901760, %v25476_v37 }
 0x449   :  { %v17228_v43 = vadd.f32 %v17227_v56, %v17150_v10  ;;  %v17300_v12 = vadd.f32 %v17299_v39, %v17226_v49  ;;  %25019 = vmatpush1.msra.mxu1 %v25018_v29  ;;  %25131 = vmatmul.mubr.f32.vlgmr.msra.gmra.mxu0 %v35677_v19  ;;  %v17565_v50 = vpop.f32.mrf.mxu0  ;;  %v25867_v39 = vld [vmem:[#allocation2 + $0xf8] sm:$0xff] }
 0x44a   :  { %25250 = vmatpush1.msra.mxu0 %v25016_v61  ;;  %25168 = vmatprep.subr.mxu1 %v35722_v38  ;;  %v17301_v9 = vpop.f32.mrf.mxu1 }
 0x44b   :  { %v35808_v1 = vadd.f32 %v17300_v12, %v35655_v45  ;;  %25396 = vmatprep.subr.mxu0 %v35767_v54  ;;  %v17302_v2 = vadd.f32 %v17301_v9, %v17228_v43  ;;  %25052 = vmatprep.mubr.f32.mxu1 %v39365_v21  ;;  %v35812_v60 = vpop.f32.mrf.mxu0  ;;  %v35882_v43 = vand.u32 4294901760, %v25867_v39  ;;  %v25851_v12 = vld [vmem:[#allocation2 + $0x78] sm:$0xff]  ;;  %v25866_v9 = vld [vmem:[#allocation2 + $0xf0] sm:$0xff] }
 0x44c   :  { %25283 = vmatprep.mubr.f32.mxu0 %v39365_v21  ;;  %v17488_v34 = vpop.f32.mrf.mxu1  ;;  %25054 = vmatmul.mubr.f32.vlgmr.msra.gmra.mxu1 %v35658_v7  ;;  %v35893_v37 = vand.u32 4294901760, %v25866_v9 }
 0x44d   :  { %v35818_v30 = vadd.f32 %v17302_v2, %v35663_v16  ;;  %v17489_v0 = vadd.f32 %v17488_v34, %v17406_v28  ;;  %25170 = vmatpush1.msra.mxu1 %v35736_v36  ;;  %25285 = vmatmul.mubr.f32.vlgmr.msra.gmra.mxu0 %v35658_v7  ;;  %v17719_v45 = vpop.f32.mrf.mxu0  ;;  %39366 = vst [vmem:[#allocation36_spill] sm:$0xff] %v35882_v43 }
 0x44e   :  { %25398 = vmatpush1.msra.mxu0 %v35783_v62  ;;  %25322 = vmatprep.subr.mxu1 %v35722_v38  ;;  %v35824_v3 = vpop.f32.mrf.mxu1  ;;  %v35891_v34 = vsub.f32 %v25867_v39, %v35882_v43  ;;  %39369 = vst [vmem:[#allocation22_spill] sm:$0xff] %v35893_v37 }
 0x44f   :  { %v17566_v24 = vadd.f32 %v17565_v50, %v17489_v0  ;;  %25557 = vmatprep.subr.mxu0 %v35788_v15  ;;  %25203 = vmatprep.mubr.f32.mxu1 %v39365_v21  ;;  %v35829_v16 = vpop.f32.mrf.mxu0  ;;  %v25850_v0 = vld [vmem:[#allocation2 + $0x70] sm:$0xff] }
 0x450   :  { %25431 = vmatprep.mubr.f32.mxu0 %v39365_v21  ;;  %v17641_v20 = vpop.f32.mrf.mxu1  ;;  %25207 = vmatmul.mubr.f32.vlgmr.msra.gmra.mxu1 %v35696_v5  ;;  %39368 = vst [vmem:[#allocation18_spill] sm:$0xff] %v35891_v34 }
 0x451   :  { %v17642_v18 = vadd.f32 %v17641_v20, %v17566_v24  ;;  %25324 = vmatpush1.msra.mxu1 %v35736_v36  ;;  %25437 = vmatmul.mubr.f32.vlgmr.msra.gmra.mxu0 %v35732_v35  ;;  %v17871_v38 = vpop.f32.mrf.mxu0  ;;  %v35899_v24 = vand.u32 4294901760, %v25850_v0  ;;  %v25865_v20 = vld [vmem:[#allocation2 + $0xe8] sm:$0xff] }
 0x452   :  { %25560 = vmatpush1.msra.mxu0 %v35796_v52  ;;  %25478 = vmatprep.subr.mxu1 %v25477_v6  ;;  %v35836_v59 = vpop.f32.mrf.mxu1  ;;  %v17491_v6 = vadd.f32 %v35824_v3, %v35799_v41  ;;  %v35919_v41 = vand.u32 4294901760, %v25865_v20 }
 0x453   :  { %v17720_v27 = vadd.f32 %v17719_v45, %v17642_v18  ;;  %25711 = vmatprep.subr.mxu0 %v25475_v17  ;;  %25357 = vmatprep.mubr.f32.mxu1 %v39365_v21  ;;  %v35839_v55 = vpop.f32.mrf.mxu0  ;;  %39371 = vst [vmem:[#allocation27_spill] sm:$0xff] %v35899_v24 }
 0x454   :  { %25593 = vmatprep.mubr.f32.mxu0 %v39365_v21  ;;  %v17793_v61 = vpop.f32.mrf.mxu1  ;;  %25359 = vmatmul.mubr.f32.vlgmr.msra.gmra.mxu1 %v35658_v7  ;;  %39376 = vst [vmem:[#allocation44_spill] sm:$0xff] %v35919_v41 }
 0x455   :  { %v17794_v36 = vadd.f32 %v17793_v61, %v17720_v27  ;;  %25484 = vmatpush1.msra.mxu1 %v25483_v13  ;;  %25596 = vmatmul.mubr.f32.vlgmr.msra.gmra.mxu0 %v35677_v19  ;;  %v18030_v35 = vpop.f32.mrf.mxu0  ;;  %v35905_v27 = vand.u32 4294901760, %v35891_v34  ;;  %v35908_v13 = vsub.f32 %v25866_v9, %v35893_v37  ;;  %v25849_v61 = vld [vmem:[#allocation2 + $0x68] sm:$0xff] }
 0x456   :  { %25715 = vmatpush1.msra.mxu0 %v25481_v11  ;;  %25633 = vmatprep.subr.mxu1 %v35767_v54  ;;  %v35845_v33 = vpop.f32.mrf.mxu1  ;;  %v35921_v3 = vand.u32 4294901760, %v25849_v61 }
 0x457   :  { %v35848_v40 = vadd.f32 %v17794_v36, %v35715_v48  ;;  %25517 = vmatprep.mubr.f32.mxu1 %v39365_v21  ;;  %v35851_v53 = vpop.f32.mrf.mxu0  ;;  %25748 = vmatprep.mubr.f32.mxu0 %v39365_v21  ;;  %39372 = vst [vmem:[#allocation30_spill] sm:$0xff] %v35905_v27  ;;  %39373 = vst [vmem:[#allocation34_spill] sm:$0xff] %v35908_v13 }
 0x458   :  { %v17953_v23 = vpop.f32.mrf.mxu1  ;;  %25519 = vmatmul.mubr.f32.vlgmr.msra.gmra.mxu1 %v35658_v7  ;;  %31612 = vmatprep.subr.mxu0 %v35882_v43  ;;  %39377 = vst [vmem:[#allocation51_spill] sm:$0xff] %v35921_v3 }
 0x459   :  { %v17954_v44 = vadd.f32 %v17953_v23, %v17871_v38  ;;  %25635 = vmatpush1.msra.mxu1 %v35783_v62  ;;  %25668 = vmatprep.mubr.f32.mxu1 %v39365_v21  ;;  %v18184_v19 = vpop.f32.mrf.mxu0  ;;  %v35917_v23 = vsub.f32 %v25850_v0, %v35899_v24 }
 0x45a   :  { %25787 = vmatprep.subr.mxu1 %v35767_v54  ;;  %v35858_v63 = vpop.f32.mrf.mxu1  ;;  %25750 = vmatmul.mubr.f32.vlgmr.msra.gmra.mxu0 %v35658_v7 }
 0x45b   :  { %v18031_v48 = vadd.f32 %v18030_v35, %v17954_v44  ;;  %v35861_v31 = vpop.f32.mrf.mxu0  ;;  %39375 = vst [vmem:[#allocation40_spill] sm:$0xff] %v35917_v23 }
 0x45c   :  { %v18106_v26 = vpop.f32.mrf.mxu1  ;;  %25672 = vmatmul.mubr.f32.vlgmr.msra.gmra.mxu1 %v35696_v5 }
 0x45d   :  { %v18107_v25 = vadd.f32 %v18106_v26, %v18031_v48  ;;  %25789 = vmatpush1.msra.mxu1 %v35783_v62  ;;  %25822 = vmatprep.mubr.f32.mxu1 %v39365_v21  ;;  %v18336_v32 = vpop.f32.mrf.mxu0  ;;  %v26160_v48 = vsub.f32 %v35891_v34, %v35905_v27  ;;  %v35932_v26 = vand.u32 4294901760, %v35908_v13 }
 0x45e   :  { %v35866_v4 = vpop.f32.mrf.mxu1 }
 0x45f   :  { %v18185_v56 = vadd.f32 %v18184_v19, %v18107_v25  ;;  %v35868_v54 = vpop.f32.mrf.mxu0  ;;  %39378 = vst [vmem:[#allocation16_spill] sm:$0xff] %v35932_v26 }
 0x460   :  { %v18258_v15 = vpop.f32.mrf.mxu1  ;;  %25824 = vmatmul.mubr.f32.vlgmr.msra.gmra.mxu1 %v35658_v7 }
 0x461   :  { %v18259_v58 = vadd.f32 %v18258_v15, %v18185_v56  ;;  %v18495_v47 = vpop.f32.mrf.mxu0  ;;  %v35937_v56 = vand.u32 4294901760, %v35917_v23  ;;  %v35940_v15 = vsub.f32 %v25865_v20, %v35919_v41 }
 0x462   :  { %v35871_v8 = vpop.f32.mrf.mxu1 }
 0x463   :  { %v35874_v5 = vadd.f32 %v18259_v58, %v35763_v57  ;;  %v35876_v22 = vpop.f32.mrf.mxu0  ;;  %v35886_v57 = vand.u32 4294901760, %v25851_v12  ;;  %39379 = vst [vmem:[#allocation23_spill] sm:$0xff] %v35937_v56  ;;  %39380 = vst [vmem:[#allocation29_spill] sm:$0xff] %v35940_v15  ;;  %v25864_v58 = vld [vmem:[#allocation2 + $0xe0] sm:$0xff]  ;;  %v35959_v9 = vand.u32 4294901760, %v35940_v15 }
 0x464   :  { %v18418_v62 = vpop.f32.mrf.mxu1  ;;  %v35969_v20 = vand.u32 4294901760, %v25864_v58 }
 0x465   :  { %v18419_v28 = vadd.f32 %v18418_v62, %v18336_v32  ;;  %v18649_v14 = vpop.f32.mrf.mxu0  ;;  %39367 = vst [vmem:[#allocation14_spill] sm:$0xff] %v35886_v57  ;;  %v35897_v42 = vsub.f32 %v25851_v12, %v35886_v57  ;;  %31613 = vmatpush3.msra.mxu0 %v35886_v57  ;;  %v26055_v12 = vsub.f32 %v35917_v23, %v35937_v56  ;;  %39384 = vst [vmem:[#allocation20_spill] sm:$0xff] %v35959_v9 }
 0x466   :  { %v35878_v52 = vpop.f32.mrf.mxu1  ;;  %31614 = vmatprep.subr.mxu0 %v35893_v37  ;;  %39387 = vst [vmem:[#allocation56_spill] sm:$0xff] %v35969_v20  ;;  %v35983_v21 = vsub.f32 %v25864_v58, %v35969_v20 }
 0x467   :  { %v18496_v49 = vadd.f32 %v18495_v47, %v18419_v28  ;;  %v35880_v10 = vpop.f32.mrf.mxu0  ;;  %39370 = vst [vmem:[#allocation24_spill] sm:$0xff] %v35897_v42  ;;  %v35914_v35 = vand.u32 4294901760, %v35897_v42  ;;  %31615 = vmatpush3.msra.mxu0 %v35899_v24  ;;  %v17568_v47 = vadd.f32 %v35812_v60, %v17491_v6  ;;  %v25847_v6 = vld [vmem:[#allocation2 + $0x58] sm:$0xff] }
 0x468   :  { %v18571_v29 = vpop.f32.mrf.mxu1  ;;  %31616 = vmatprep.subr.mxu0 %v35919_v41  ;;  %39390 = vst [vmem:[#allocation32_spill] sm:$0xff] %v35983_v21 }
 0x469   :  { %v18572_v7 = vadd.f32 %v18571_v29, %v18496_v49  ;;  %v18812_v17 = vpop.f32.mrf.mxu0  ;;  %39374 = vst [vmem:[#allocation37_spill] sm:$0xff] %v35914_v35  ;;  %v26048_v32 = vsub.f32 %v35897_v42, %v35914_v35  ;;  %v26167_v49 = vsub.f32 %v35908_v13, %v35932_v26  ;;  %v25848_v29 = vld [vmem:[#allocation2 + $0x60] sm:$0xff]  ;;  %31617 = vmatpush3.msra.mxu0 %v35921_v3 }
 0x46a   :  { %v35884_v50 = vpop.f32.mrf.mxu1  ;;  %31618 = vmatprep.subr.mxu0 %v35969_v20 }
 0x46b   :  { %v18650_v11 = vadd.f32 %v18649_v14, %v18572_v7  ;;  %v35888_v2 = vpop.f32.mrf.mxu0  ;;  %v35947_v14 = vand.u32 4294901760, %v26160_v48  ;;  %v35954_v7 = vand.u32 4294901760, %v26048_v32  ;;  %v26174_v48 = vsub.f32 %v35940_v15, %v35959_v9 }
 0x46c   :  { %v18723_v45 = vpop.f32.mrf.mxu1  ;;  %v17644_v32 = vadd.f32 %v35836_v59, %v17568_v47 }
 0x46d   :  { %v18724_v18 = vadd.f32 %v18723_v45, %v18650_v11  ;;  %v18971_v38 = vpop.f32.mrf.mxu0  ;;  %39382 = vst [vmem:[#allocation52_spill] sm:$0xff] %v35947_v14  ;;  %39383 = vst [vmem:[#allocation55_spill] sm:$0xff] %v35954_v7  ;;  %31647 = vmatprep.subr.mxu1 %v35947_v14  ;;  %v35967_v45 = vand.u32 4294901760, %v26167_v49  ;;  %v25846_v14 = vld [vmem:[#allocation2 + $0x50] sm:$0xff] }
 0x46e   :  { %v35911_v36 = vpop.f32.mrf.mxu1  ;;  %31648 = vmatpush3.msra.mxu1 %v35954_v7 }
 0x46f   :  { %v35925_v44 = vadd.f32 %v18724_v18, %v35808_v1  ;;  %v35927_v19 = vpop.f32.mrf.mxu0  ;;  %v35943_v1 = vsub.f32 %v25849_v61, %v35921_v3  ;;  %39386 = vst [vmem:[#allocation42_spill] sm:$0xff] %v35967_v45  ;;  %v35972_v61 = vand.u32 4294901760, %v26055_v12  ;;  %31649 = vmatprep.subr.mxu1 %v35967_v45  ;;  %v25862_v12 = vld [vmem:[#allocation2 + $0xd0] sm:$0xff]  ;;  %v36004_v45 = vand.u32 4294901760, %v35983_v21 }
 0x470   :  { %v18894_v25 = vpop.f32.mrf.mxu1 }
 0x471   :  { %39381 = vst [vmem:[#allocation49_spill] sm:$0xff] %v35943_v1  ;;  %v18895_v62 = vadd.f32 %v18894_v25, %v18812_v17  ;;  %v19125_v28 = vpop.f32.mrf.mxu0  ;;  %v35962_v60 = vand.u32 4294901760, %v35943_v1  ;;  %v25863_v17 = vld [vmem:[#allocation2 + $0xd8] sm:$0xff]  ;;  %39388 = vst [vmem:[#allocation12_spill] sm:$0xff] %v35972_v61  ;;  %v35978_v25 = vand.u32 4294901760, %v25848_v29  ;;  %31650 = vmatpush3.msra.mxu1 %v35972_v61 }
 0x472   :  { %v35952_v39 = vpop.f32.mrf.mxu1  ;;  %v35985_v7 = vand.u32 4294901760, %v25863_v17  ;;  %39396 = vst [vmem:[#allocation39_spill] sm:$0xff] %v36004_v45 }
 0x473   :  { %39385 = vst [vmem:[#allocation35_spill] sm:$0xff] %v35962_v60  ;;  %v18972_v11 = vadd.f32 %v18971_v38, %v18895_v62  ;;  %v35964_v0 = vpop.f32.mrf.mxu0  ;;  %v26062_v38 = vsub.f32 %v35943_v1, %v35962_v60  ;;  %39389 = vst [vmem:[#allocation26_spill] sm:$0xff] %v35978_v25  ;;  %v35991_v60 = vand.u32 4294901760, %v26174_v48  ;;  %v35996_v47 = vsub.f32 %v25848_v29, %v35978_v25 }
 0x474   :  { %v19047_v18 = vpop.f32.mrf.mxu1  ;;  %39391 = vst [vmem:[#allocation50_spill] sm:$0xff] %v35985_v7  ;;  %31619 = vmatpush3.msra.mxu0 %v35978_v25  ;;  %v36007_v56 = vsub.f32 %v25863_v17, %v35985_v7  ;;  %v17722_v17 = vadd.f32 %v35829_v16, %v17644_v32 }
 0x475   :  { %v19048_v62 = vadd.f32 %v19047_v18, %v18972_v11  ;;  %v19277_v49 = vpop.f32.mrf.mxu0  ;;  %39392 = vst [vmem:[#allocation11_spill] sm:$0xff] %v35991_v60  ;;  %v35993_v59 = vand.u32 4294901760, %v26062_v38  ;;  %39394 = vst [vmem:[#allocation15_spill] sm:$0xff] %v35996_v47  ;;  %v35998_v11 = vand.u32 4294901760, %v25847_v6  ;;  %31620 = vmatprep.subr.mxu0 %v35985_v7  ;;  %31651 = vmatprep.subr.mxu1 %v35991_v60  ;;  %v36012_v29 = vand.u32 4294901760, %v35996_v47 }
 0x476   :  { %v35988_v9 = vpop.f32.mrf.mxu1  ;;  %39397 = vst [vmem:[#allocation46_spill] sm:$0xff] %v36007_v56  ;;  %v26181_v60 = vsub.f32 %v35983_v21, %v36004_v45  ;;  %v36027_v35 = vand.u32 4294901760, %v36007_v56 }
 0x477   :  { %39393 = vst [vmem:[#allocation58_spill] sm:$0xff] %v35993_v59  ;;  %39395 = vst [vmem:[#allocation19_spill] sm:$0xff] %v35998_v11  ;;  %v19126_v58 = vadd.f32 %v19125_v28, %v19048_v62  ;;  %v36001_v18 = vpop.f32.mrf.mxu0  ;;  %v36015_v38 = vsub.f32 %v25847_v6, %v35998_v11  ;;  %v36017_v28 = vand.u32 4294901760, %v25862_v12  ;;  %v36019_v62 = vand.u32 4294901760, %v25846_v14  ;;  %31621 = vmatpush3.msra.mxu0 %v35998_v11  ;;  %v25840_v11 = vld [vmem:[#allocation2 + $0x20] sm:$0xff] }
 0x478   :  { %v19199_v48 = vpop.f32.mrf.mxu1  ;;  %39398 = vst [vmem:[#allocation43_spill] sm:$0xff] %v36012_v29  ;;  %31652 = vmatpush3.msra.mxu1 %v35993_v59  ;;  %39402 = vst [vmem:[#allocation54_spill] sm:$0xff] %v36027_v35  ;;  %v26069_v27 = vsub.f32 %v35996_v47, %v36012_v29  ;;  %v36048_v45 = vand.u32 4294901760, %v26181_v60  ;;  %v26188_v29 = vsub.f32 %v36007_v56, %v36027_v35  ;;  %v25845_v47 = vld [vmem:[#allocation2 + $0x48] sm:$0xff]  ;;  %v25860_v60 = vld [vmem:[#allocation2 + $0xc0] sm:$0xff] }
 0x479   :  { %39399 = vst [vmem:[#allocation13_spill] sm:$0xff] %v36015_v38  ;;  %39400 = vst [vmem:[#allocation25_spill] sm:$0xff] %v36017_v28  ;;  %v19200_v61 = vadd.f32 %v19199_v48, %v19126_v58  ;;  %v19436_v26 = vpop.f32.mrf.mxu0  ;;  %v36034_v1 = vand.u32 4294901760, %v36015_v38  ;;  %v36037_v16 = vsub.f32 %v25862_v12, %v36017_v28  ;;  %v36040_v32 = vsub.f32 %v25846_v14, %v36019_v62  ;;  %v25861_v58 = vld [vmem:[#allocation2 + $0xc8] sm:$0xff] }
 0x47a   :  { %39401 = vst [vmem:[#allocation31_spill] sm:$0xff] %v36019_v62  ;;  %v36029_v6 = vpop.f32.mrf.mxu1  ;;  %31622 = vmatprep.subr.mxu0 %v36017_v28  ;;  %39406 = vst [vmem:[#allocation38_spill] sm:$0xff] %v36048_v45  ;;  %v36053_v21 = vand.u32 4294901760, %v26069_v27  ;;  %31653 = vmatprep.subr.mxu1 %v36048_v45  ;;  %v36065_v56 = vand.u32 4294901760, %v26188_v29  ;;  %v36067_v27 = vand.u32 4294901760, %v25861_v58  ;;  %v36086_v45 = vand.u32 4294901760, %v25860_v60 }
 0x47b   :  { %39403 = vst [vmem:[#allocation9_spill] sm:$0xff] %v36034_v1  ;;  %39404 = vst [vmem:[#allocation17_spill] sm:$0xff] %v36037_v16  ;;  %v36044_v48 = vadd.f32 %v19200_v61, %v35848_v40  ;;  %v36046_v59 = vpop.f32.mrf.mxu0  ;;  %31623 = vmatpush3.msra.mxu0 %v36019_v62  ;;  %v26076_v14 = vsub.f32 %v36015_v38, %v36034_v1  ;;  %v36058_v15 = vand.u32 4294901760, %v36037_v16  ;;  %v36061_v40 = vand.u32 4294901760, %v36040_v32  ;;  %v25844_v62 = vld [vmem:[#allocation2 + $0x40] sm:$0xff] }
 0x47c   :  { %39405 = vst [vmem:[#allocation21_spill] sm:$0xff] %v36040_v32  ;;  %v19359_v12 = vpop.f32.mrf.mxu1  ;;  %39407 = vst [vmem:[#allocation45_spill] sm:$0xff] %v36053_v21  ;;  %v17796_v61 = vadd.f32 %v35845_v33, %v17722_v17  ;;  %31654 = vmatpush3.msra.mxu1 %v36053_v21  ;;  %v25843_v21 = vld [vmem:[#allocation2 + $0x38] sm:$0xff]  ;;  %31624 = vmatprep.subr.mxu0 %v36067_v27 }
 0x47d   :  { %39408 = vst [vmem:[#allocation59_spill] sm:$0xff] %v36058_v15  ;;  %39409 = vst [vmem:[#allocation10_spill] sm:$0xff] %v36061_v40  ;;  %v19360_v23 = vadd.f32 %v19359_v12, %v19277_v49  ;;  %v19590_v35 = vpop.f32.mrf.mxu0  ;;  %v36072_v1 = vand.u32 4294901760, %v26076_v14  ;;  %v26195_v38 = vsub.f32 %v36037_v16, %v36058_v15  ;;  %v26083_v33 = vsub.f32 %v36040_v32, %v36061_v40  ;;  %v25859_v14 = vld [vmem:[#allocation2 + $0xb8] sm:$0xff] }
 0x47e   :  { %39410 = vst [vmem:[#allocation28_spill] sm:$0xff] %v36065_v56  ;;  %39411 = vst [vmem:[#allocation33_spill] sm:$0xff] %v36067_v27  ;;  %v36069_v28 = vpop.f32.mrf.mxu1  ;;  %v36078_v49 = vand.u32 4294901760, %v25845_v47  ;;  %31655 = vmatprep.subr.mxu1 %v36065_v56  ;;  %v36084_v12 = vsub.f32 %v25861_v58, %v36067_v27  ;;  %v36101_v58 = vadd.f32 %v17796_v61, %v35728_v51  ;;  %v36121_v61 = vand.u32 4294901760, %v25843_v21 }
 0x47f   :  { %39412 = vst [vmem:[#allocation53_spill] sm:$0xff] %v36072_v1  ;;  %v19437_v17 = vadd.f32 %v19436_v26, %v19360_v23  ;;  %v36080_v29 = vpop.f32.mrf.mxu0  ;;  %39415 = vst [vmem:[#allocation57_spill] sm:$0xff] %v36086_v45  ;;  %31656 = vmatpush3.msra.mxu1 %v36072_v1  ;;  %v36090_v40 = vand.u32 4294901760, %v26195_v38  ;;  %v36092_v32 = vand.u32 4294901760, %v26083_v33  ;;  %v36097_v26 = vand.u32 4294901760, %v25844_v62 }
 0x480   :  { %39413 = vst [vmem:[#allocation41_spill] sm:$0xff] %v36078_v49  ;;  %39414 = vst [vmem:[#allocation47_spill] sm:$0xff] %v36084_v12  ;;  %v19512_v15 = vpop.f32.mrf.mxu1  ;;  %v36095_v23 = vsub.f32 %v25845_v47, %v36078_v49  ;;  %31625 = vmatpush3.msra.mxu0 %v36078_v49  ;;  %v36104_v27 = vand.u32 4294901760, %v36084_v12  ;;  %v36107_v38 = vsub.f32 %v25860_v60, %v36086_v45 }
 0x481   :  { %39416 = vst [vmem:[#allocation48_spill] sm:$0xff] %v36090_v40  ;;  %39417 = vst [vmem:[#allocation8_spill] sm:$0xff] %v36092_v32  ;;  %v19513_v56 = vadd.f32 %v19512_v15, %v19437_v17  ;;  %v19742_v16 = vpop.f32.mrf.mxu0  ;;  %31626 = vmatprep.subr.mxu0 %v36086_v45  ;;  %31657 = vmatprep.subr.mxu1 %v36090_v40  ;;  %v36117_v51 = vsub.f32 %v25844_v62, %v36097_v26  ;;  %v36119_v15 = vand.u32 4294901760, %v25859_v14 }
 0x482   :  { %39418 = vst [vmem:[#allocation60_spill] sm:$0xff] %v36095_v23  ;;  %39419 = vst [vmem:[#allocation61_spill] sm:$0xff] %v36097_v26  ;;  %v36110_v33 = vpop.f32.mrf.mxu1  ;;  %v36114_v47 = vand.u32 4294901760, %v36095_v23  ;;  %31627 = vmatpush3.msra.mxu0 %v36097_v26  ;;  %v18897_v60 = vadd.f32 %v35952_v39, %v35888_v2  ;;  %31658 = vmatpush3.msra.mxu1 %v36092_v32  ;;  %v26202_v40 = vsub.f32 %v36084_v12, %v36104_v27 }
 0x483   :  { %39420 = vst [vmem:[#allocation62_spill] sm:$0xff] %v36104_v27  ;;  %39421 = vst [vmem:[#allocation63_spill] sm:$0xff] %v36107_v38  ;;  %v19591_v17 = vadd.f32 %v19590_v35, %v19513_v56  ;;  %v36126_v1 = vpop.f32.mrf.mxu0  ;;  %v36132_v62 = vand.u32 4294901760, %v36107_v38  ;;  %v36137_v26 = vand.u32 4294901760, %v36117_v51  ;;  %v36140_v2 = vsub.f32 %v25859_v14, %v36119_v15  ;;  %v25858_v56 = vld [vmem:[#allocation2 + $0xb0] sm:$0xff]  ;;  %31628 = vmatprep.subr.mxu0 %v36119_v15 }
 0x484   :  { %39422 = vst [vmem:[#allocation64_spill] sm:$0xff] %v36114_v47  ;;  %39423 = vst [vmem:[#allocation65_spill] sm:$0xff] %v36117_v51  ;;  %v19664_v45 = vpop.f32.mrf.mxu1  ;;  %v26090_v49 = vsub.f32 %v36095_v23, %v36114_v47  ;;  %v36143_v35 = vsub.f32 %v25843_v21, %v36121_v61  ;;  %v17956_v39 = vadd.f32 %v35858_v63, %v35839_v55  ;;  %v36148_v12 = vand.u32 4294901760, %v26202_v40  ;;  %v25842_v23 = vld [vmem:[#allocation2 + $0x30] sm:$0xff]  ;;  %v25857_v63 = vld [vmem:[#allocation2 + $0xa8] sm:$0xff] }
 0x485   :  { %39424 = vst [vmem:[#allocation66_spill] sm:$0xff] %v36119_v15  ;;  %39425 = vst [vmem:[#allocation67_spill] sm:$0xff] %v36121_v61  ;;  %v19665_v32 = vadd.f32 %v19664_v45, %v19591_v17  ;;  %v19901_v27 = vpop.f32.mrf.mxu0  ;;  %v26209_v47 = vsub.f32 %v36107_v38, %v36132_v62  ;;  %31629 = vmatpush3.msra.mxu0 %v36121_v61  ;;  %v26097_v15 = vsub.f32 %v36117_v51, %v36137_v26 }
 0x486   :  { %39426 = vst [vmem:[#allocation68_spill] sm:$0xff] %v36132_v62  ;;  %39427 = vst [vmem:[#allocation69_spill] sm:$0xff] %v36137_v26  ;;  %v36153_v14 = vpop.f32.mrf.mxu1  ;;  %v36155_v21 = vand.u32 4294901760, %v26090_v49  ;;  %v36160_v13 = vand.u32 4294901760, %v36140_v2  ;;  %v36163_v55 = vand.u32 4294901760, %v36143_v35  ;;  %v18974_v45 = vadd.f32 %v35927_v19, %v18897_v60  ;;  %31659 = vmatprep.subr.mxu1 %v36148_v12  ;;  %v25841_v26 = vld [vmem:[#allocation2 + $0x28] sm:$0xff] }
 0x487   :  { %39428 = vst [vmem:[#allocation70_spill] sm:$0xff] %v36140_v2  ;;  %39429 = vst [vmem:[#allocation71_spill] sm:$0xff] %v36143_v35  ;;  %v36167_v40 = vadd.f32 %v19665_v32, %v35874_v5  ;;  %v36169_v17 = vpop.f32.mrf.mxu0  ;;  %v36172_v49 = vand.u32 4294901760, %v26209_v47  ;;  %v36174_v62 = vand.u32 4294901760, %v25858_v56  ;;  %v36177_v38 = vand.u32 4294901760, %v26097_v15  ;;  %v25856_v15 = vld [vmem:[#allocation2 + $0xa0] sm:$0xff] }
 0x488   :  { %39430 = vst [vmem:[#allocation72_spill] sm:$0xff] %v36148_v12  ;;  %39431 = vst [vmem:[#allocation73_spill] sm:$0xff] %v36155_v21  ;;  %v19824_v51 = vpop.f32.mrf.mxu1  ;;  %31660 = vmatpush3.msra.mxu1 %v36155_v21  ;;  %v26216_v19 = vsub.f32 %v36140_v2, %v36160_v13  ;;  %v26104_v5 = vsub.f32 %v36143_v35, %v36163_v55  ;;  %v36183_v32 = vand.u32 4294901760, %v25842_v23  ;;  %v36190_v21 = vand.u32 4294901760, %v25857_v63 }
 0x489   :  { %39432 = vst [vmem:[#allocation74_spill] sm:$0xff] %v36160_v13  ;;  %39433 = vst [vmem:[#allocation75_spill] sm:$0xff] %v36163_v55  ;;  %v18033_v60 = vadd.f32 %v35851_v53, %v17956_v39  ;;  %v19825_v47 = vadd.f32 %v19824_v51, %v19742_v16  ;;  %v20055_v12 = vpop.f32.mrf.mxu0  ;;  %31661 = vmatprep.subr.mxu1 %v36172_v49  ;;  %v36188_v61 = vsub.f32 %v25858_v56, %v36174_v62 }
 0x48a   :  { %39434 = vst [vmem:[#allocation76_spill] sm:$0xff] %v36172_v49  ;;  %39435 = vst [vmem:[#allocation77_spill] sm:$0xff] %v36174_v62  ;;  %31630 = vmatprep.subr.mxu0 %v36174_v62  ;;  %v36193_v13 = vpop.f32.mrf.mxu1  ;;  %31662 = vmatpush3.msra.mxu1 %v36177_v38  ;;  %v36196_v55 = vand.u32 4294901760, %v26216_v19  ;;  %v36198_v53 = vand.u32 4294901760, %v26104_v5  ;;  %v36201_v16 = vsub.f32 %v25842_v23, %v36183_v32  ;;  %v36203_v51 = vand.u32 4294901760, %v25841_v26 }
 0x48b   :  { %39436 = vst [vmem:[#allocation78_spill] sm:$0xff] %v36177_v38  ;;  %39437 = vst [vmem:[#allocation79_spill] sm:$0xff] %v36183_v32  ;;  %31631 = vmatpush3.msra.mxu0 %v36183_v32  ;;  %v19050_v56 = vadd.f32 %v35988_v9, %v18974_v45  ;;  %v19902_v39 = vadd.f32 %v19901_v27, %v19825_v47  ;;  %v36207_v49 = vpop.f32.mrf.mxu0  ;;  %v36210_v35 = vand.u32 4294901760, %v36188_v61  ;;  %v36223_v9 = vand.u32 4294901760, %v25856_v15 }
 0x48c   :  { %39438 = vst [vmem:[#allocation80_spill] sm:$0xff] %v36188_v61  ;;  %39439 = vst [vmem:[#allocation81_spill] sm:$0xff] %v36190_v21  ;;  %v36213_v19 = vsub.f32 %v25857_v63, %v36190_v21  ;;  %31632 = vmatprep.subr.mxu0 %v36190_v21  ;;  %v19977_v5 = vpop.f32.mrf.mxu1  ;;  %31663 = vmatprep.subr.mxu1 %v36196_v55  ;;  %v36218_v23 = vand.u32 4294901760, %v36201_v16  ;;  %v36221_v38 = vsub.f32 %v25841_v26, %v36203_v51 }
 0x48d   :  { %39440 = vst [vmem:[#allocation82_spill] sm:$0xff] %v36196_v55  ;;  %39441 = vst [vmem:[#allocation83_spill] sm:$0xff] %v36198_v53  ;;  %v36225_v27 = vand.u32 4294901760, %v25840_v11  ;;  %31633 = vmatpush3.msra.mxu0 %v36203_v51  ;;  %v36229_v63 = vadd.f32 %v35866_v4, %v18033_v60  ;;  %v19978_v45 = vadd.f32 %v19977_v5, %v19902_v39  ;;  %v20236_v47 = vpop.f32.mrf.mxu0  ;;  %31664 = vmatpush3.msra.mxu1 %v36198_v53  ;;  %v25855_v39 = vld [vmem:[#allocation2 + $0x98] sm:$0xff] }
 0x48e   :  { %39442 = vst [vmem:[#allocation84_spill] sm:$0xff] %v36201_v16  ;;  %39443 = vst [vmem:[#allocation85_spill] sm:$0xff] %v36203_v51  ;;  %v26223_v55 = vsub.f32 %v36188_v61, %v36210_v35  ;;  %v36235_v2 = vand.u32 4294901760, %v36213_v19  ;;  %v36237_v26 = vpop.f32.mrf.mxu1  ;;  %v26111_v21 = vsub.f32 %v36201_v16, %v36218_v23  ;;  %v36242_v51 = vand.u32 4294901760, %v36221_v38  ;;  %31634 = vmatprep.subr.mxu0 %v36223_v9  ;;  %v25839_v16 = vld [vmem:[#allocation2 + $0x18] sm:$0xff] }
 0x48f   :  { %39444 = vst [vmem:[#allocation86_spill] sm:$0xff] %v36210_v35  ;;  %39445 = vst [vmem:[#allocation87_spill] sm:$0xff] %v36213_v19  ;;  %v36245_v4 = vsub.f32 %v25856_v15, %v36223_v9  ;;  %v36248_v60 = vsub.f32 %v25840_v11, %v36225_v27  ;;  %v19128_v5 = vadd.f32 %v35964_v0, %v19050_v56  ;;  %v20238_v35 = vpop.f32.mrf.mxu0  ;;  %31635 = vmatpush3.msra.mxu0 %v36225_v27 }
 0x490   :  { %39446 = vst [vmem:[#allocation88_spill] sm:$0xff] %v36218_v23  ;;  %39447 = vst [vmem:[#allocation89_spill] sm:$0xff] %v36221_v38  ;;  %v20056_v53 = vadd.f32 %v20055_v12, %v19978_v45  ;;  %v36252_v61 = vand.u32 4294901760, %v26223_v55  ;;  %v26230_v23 = vsub.f32 %v36213_v19, %v36235_v2  ;;  %v20129_v15 = vpop.f32.mrf.mxu1  ;;  %v36257_v32 = vand.u32 4294901760, %v26111_v21  ;;  %v25854_v12 = vld [vmem:[#allocation2 + $0x90] sm:$0xff] }
 0x491   :  { %39448 = vst [vmem:[#allocation90_spill] sm:$0xff] %v36223_v9  ;;  %39449 = vst [vmem:[#allocation91_spill] sm:$0xff] %v36225_v27  ;;  %v26118_v11 = vsub.f32 %v36221_v38, %v36242_v51  ;;  %v36262_v9 = vand.u32 4294901760, %v36245_v4  ;;  %v36265_v0 = vand.u32 4294901760, %v36248_v60  ;;  %v19362_v55 = vadd.f32 %v36069_v28, %v36001_v18  ;;  %v20395_v45 = vpop.f32.mrf.mxu0  ;;  %v25838_v19 = vld [vmem:[#allocation2 + $0x10] sm:$0xff] }
 0x492   :  { %39450 = vst [vmem:[#allocation92_spill] sm:$0xff] %v36235_v2  ;;  %39451 = vst [vmem:[#allocation93_spill] sm:$0xff] %v36242_v51  ;;  %v20130_v56 = vadd.f32 %v20129_v15, %v20056_v53  ;;  %31665 = vmatprep.subr.mxu1 %v36252_v61  ;;  %v36270_v2 = vand.u32 4294901760, %v26230_v23  ;;  %v36272_v21 = vand.u32 4294901760, %v25855_v39  ;;  %v36274_v51 = vpop.f32.mrf.mxu1  ;;  %v36283_v28 = vand.u32 4294901760, %v25839_v16 }
 0x493   :  { %39452 = vst [vmem:[#allocation94_spill] sm:$0xff] %v36245_v4  ;;  %39453 = vst [vmem:[#allocation95_spill] sm:$0xff] %v36248_v60  ;;  %31666 = vmatpush3.msra.mxu1 %v36257_v32  ;;  %v36277_v38 = vand.u32 4294901760, %v26118_v11  ;;  %v26237_v27 = vsub.f32 %v36245_v4, %v36262_v9  ;;  %v26125_v18 = vsub.f32 %v36248_v60, %v36265_v0  ;;  %v20397_v15 = vpop.f32.mrf.mxu0 }
 0x494   :  { %39454 = vst [vmem:[#allocation96_spill] sm:$0xff] %v36252_v61  ;;  %39455 = vst [vmem:[#allocation97_spill] sm:$0xff] %v36257_v32  ;;  %v36286_v53 = vadd.f32 %v36029_v6, %v19128_v5  ;;  %v36289_v23 = vadd.f32 %v20130_v56, %v35925_v44  ;;  %31667 = vmatprep.subr.mxu1 %v36270_v2  ;;  %v36293_v11 = vsub.f32 %v25855_v39, %v36272_v21  ;;  %v25853_v61 = vld [vmem:[#allocation2 + $0x88] sm:$0xff] }
 0x495   :  { %39456 = vst [vmem:[#allocation98_spill] sm:$0xff] %v36262_v9  ;;  %39457 = vst [vmem:[#allocation99_spill] sm:$0xff] %v36265_v0  ;;  %v36295_v32 = vand.u32 4294901760, %v25854_v12  ;;  %v25837_v9 = vld [vmem:[#allocation2 + $0x8] sm:$0xff]  ;;  %31636 = vmatprep.subr.mxu0 %v36272_v21  ;;  %v20318_v0 = vpop.f32.mrf.mxu1  ;;  %31668 = vmatpush3.msra.mxu1 %v36277_v38  ;;  %v36299_v6 = vand.u32 4294901760, %v26237_v27  ;;  %v36301_v5 = vand.u32 4294901760, %v26125_v18  ;;  %v36304_v44 = vsub.f32 %v25839_v16, %v36283_v28  ;;  %v20549_v60 = vpop.f32.mrf.mxu0 }
 0x496   :  { %39458 = vst [vmem:[#allocation100_spill] sm:$0xff] %v36270_v2  ;;  %39459 = vst [vmem:[#allocation101_spill] sm:$0xff] %v36272_v21  ;;  %v36306_v56 = vand.u32 4294901760, %v25838_v19  ;;  %31637 = vmatpush3.msra.mxu0 %v36283_v28  ;;  %v19439_v39 = vadd.f32 %v36046_v59, %v19362_v55  ;;  %v20319_v2 = vadd.f32 %v20318_v0, %v20236_v47  ;;  %v36311_v4 = vand.u32 4294901760, %v36293_v11 }
 0x497   :  { %39460 = vst [vmem:[#allocation102_spill] sm:$0xff] %v36277_v38  ;;  %39461 = vst [vmem:[#allocation103_spill] sm:$0xff] %v36283_v28  ;;  %v36314_v38 = vsub.f32 %v25854_v12, %v36295_v32  ;;  %31638 = vmatprep.subr.mxu0 %v36295_v32  ;;  %v20320_v27 = vpop.f32.mrf.mxu1  ;;  %31669 = vmatprep.subr.mxu1 %v36299_v6  ;;  %v36319_v16 = vand.u32 4294901760, %v36304_v44  ;;  %v36324_v59 = vand.u32 4294901760, %v25853_v61  ;;  %v36326_v47 = vand.u32 4294901760, %v25837_v9  ;;  %v20551_v55 = vpop.f32.mrf.mxu0 }
 0x498   :  { %39462 = vst [vmem:[#allocation104_spill] sm:$0xff] %v36293_v11  ;;  %39463 = vst [vmem:[#allocation105_spill] sm:$0xff] %v36295_v32  ;;  %v36322_v18 = vsub.f32 %v25838_v19, %v36306_v56  ;;  %31639 = vmatpush3.msra.mxu0 %v36306_v56  ;;  %v20396_v0 = vadd.f32 %v20395_v45, %v20319_v2  ;;  %v20321_v12 = vadd.f32 %v20320_v27, %v20238_v35  ;;  %v25852_v35 = vld [vmem:[#allocation2 + $0x80] sm:$0xff] }
 0x499   :  { %39464 = vst [vmem:[#allocation106_spill] sm:$0xff] %v36299_v6  ;;  %39465 = vst [vmem:[#allocation107_spill] sm:$0xff] %v36301_v5  ;;  %31670 = vmatpush3.msra.mxu1 %v36301_v5  ;;  %v26244_v6 = vsub.f32 %v36293_v11, %v36311_v4  ;;  %v36333_v32 = vand.u32 4294901760, %v36314_v38  ;;  %v20471_v28 = vpop.f32.mrf.mxu1  ;;  %v26132_v19 = vsub.f32 %v36304_v44, %v36319_v16  ;;  %31640 = vmatprep.subr.mxu0 %v36324_v59  ;;  %v20701_v5 = vpop.f32.mrf.mxu0 }
 0x49a   :  { %39466 = vst [vmem:[#allocation108_spill] sm:$0xff] %v36304_v44  ;;  %39467 = vst [vmem:[#allocation109_spill] sm:$0xff] %v36306_v56  ;;  %v36338_v21 = vand.u32 4294901760, %v36322_v18  ;;  %v36341_v56 = vsub.f32 %v25853_v61, %v36324_v59  ;;  %v36344_v2 = vsub.f32 %v25837_v9, %v36326_v47  ;;  %v20398_v45 = vadd.f32 %v20397_v15, %v20321_v12  ;;  %v25836_v44 = vld [vmem:[#allocation2] sm:$0xff] }
 0x49b   :  { %39468 = vst [vmem:[#allocation110_spill] sm:$0xff] %v36311_v4  ;;  %39469 = vst [vmem:[#allocation111_spill] sm:$0xff] %v36314_v38  ;;  %v20472_v27 = vadd.f32 %v20471_v28, %v20396_v0  ;;  %v36347_v4 = vand.u32 4294901760, %v26244_v6  ;;  %31641 = vmatpush3.msra.mxu0 %v36326_v47  ;;  %v20473_v11 = vpop.f32.mrf.mxu1  ;;  %v36352_v61 = vand.u32 4294901760, %v26132_v19  ;;  %v20703_v0 = vpop.f32.mrf.mxu0 }
 0x49c   :  { %39470 = vst [vmem:[#allocation112_spill] sm:$0xff] %v36319_v16  ;;  %39471 = vst [vmem:[#allocation113_spill] sm:$0xff] %v36322_v18  ;;  %v26251_v16 = vsub.f32 %v36314_v38, %v36333_v32  ;;  %v26139_v9 = vsub.f32 %v36322_v18, %v36338_v21  ;;  %v36357_v62 = vand.u32 4294901760, %v36341_v56  ;;  %v36360_v28 = vand.u32 4294901760, %v36344_v2 }
 0x49d   :  { %39472 = vst [vmem:[#allocation114_spill] sm:$0xff] %v36324_v59  ;;  %39473 = vst [vmem:[#allocation115_spill] sm:$0xff] %v36326_v47  ;;  %v20550_v15 = vadd.f32 %v20549_v60, %v20472_v27  ;;  %v20474_v6 = vadd.f32 %v20473_v11, %v20398_v45  ;;  %31671 = vmatprep.subr.mxu1 %v36347_v4  ;;  %v20623_v19 = vpop.f32.mrf.mxu1  ;;  %v36374_v60 = vand.u32 4294901760, %v25836_v44  ;;  %v20860_v27 = vpop.f32.mrf.mxu0 }
 0x49e   :  { %39474 = vst [vmem:[#allocation116_spill] sm:$0xff] %v36333_v32  ;;  %39475 = vst [vmem:[#allocation117_spill] sm:$0xff] %v36338_v21  ;;  %v36363_v12 = vand.u32 4294901760, %v26251_v16  ;;  %v36365_v32 = vand.u32 4294901760, %v25852_v35  ;;  %31672 = vmatpush3.msra.mxu1 %v36352_v61  ;;  %v36368_v38 = vand.u32 4294901760, %v26139_v9  ;;  %v26258_v21 = vsub.f32 %v36341_v56, %v36357_v62 }
 0x49f   :  { %39476 = vst [vmem:[#allocation118_spill] sm:$0xff] %v36341_v56  ;;  %39477 = vst [vmem:[#allocation119_spill] sm:$0xff] %v36344_v2  ;;  %v26146_v18 = vsub.f32 %v36344_v2, %v36360_v28  ;;  %v20552_v11 = vadd.f32 %v20551_v55, %v20474_v6  ;;  %v20624_v45 = vadd.f32 %v20623_v19, %v20550_v15 }
 0x4a0   :  { %39478 = vst [vmem:[#allocation120_spill] sm:$0xff] %v36347_v4  ;;  %39479 = vst [vmem:[#allocation121_spill] sm:$0xff] %v36352_v61  ;;  %31673 = vmatprep.subr.mxu1 %v36363_v12  ;;  %v36378_v16 = vsub.f32 %v25852_v35, %v36365_v32  ;;  %31642 = vmatprep.subr.mxu0 %v36365_v32  ;;  %v19515_v9 = vadd.f32 %v36110_v33, %v19439_v39  ;;  %v20625_v61 = vpop.f32.mrf.mxu1  ;;  %v36383_v4 = vand.u32 4294901760, %v26258_v21  ;;  %v20862_v33 = vpop.f32.mrf.mxu0 }
 0x4a1   :  { %39480 = vst [vmem:[#allocation122_spill] sm:$0xff] %v36357_v62  ;;  %39481 = vst [vmem:[#allocation123_spill] sm:$0xff] %v36360_v28  ;;  %31674 = vmatpush3.msra.mxu1 %v36368_v38  ;;  %v36385_v28 = vand.u32 4294901760, %v26146_v18  ;;  %v36388_v55 = vsub.f32 %v25836_v44, %v36374_v60  ;;  %31643 = vmatpush3.msra.mxu0 %v36374_v60  ;;  %v20135_v35 = vadd.f32 %v36286_v53, %v36101_v58 }
 0x4a2   :  { %39482 = vst [vmem:[#allocation124_spill] sm:$0xff] %v36363_v12  ;;  %39483 = vst [vmem:[#allocation125_spill] sm:$0xff] %v36365_v32  ;;  %v36394_v15 = vadd.f32 %v20624_v45, %v36044_v48  ;;  %v20626_v6 = vadd.f32 %v20625_v61, %v20552_v11  ;;  %v36397_v39 = vand.u32 4294901760, %v36378_v16  ;;  %31682 = vmatprep.subr.mxu0 %v35891_v34  ;;  %v20783_v44 = vpop.f32.mrf.mxu1  ;;  %31675 = vmatprep.subr.mxu1 %v36383_v4  ;;  %v21014_v61 = vpop.f32.mrf.mxu0 }
 0x4a3   :  { %39484 = vst [vmem:[#allocation126_spill] sm:$0xff] %v36368_v38  ;;  %39485 = vst [vmem:[#allocation127_spill] sm:$0xff] %v36374_v60  ;;  %v18187_v21 = vadd.f32 %v35861_v31, %v36229_v63  ;;  %v36404_v18 = vand.u32 4294901760, %v36388_v55  ;;  %v18421_v48 = vadd.f32 %v35878_v52, %v35868_v54  ;;  %v20784_v53 = vadd.f32 %v20783_v44, %v20701_v5 }
 0x4a4   :  { %39486 = vst [vmem:[#allocation128_spill] sm:$0xff] %v36378_v16  ;;  %39487 = vst [vmem:[#allocation129_spill] sm:$0xff] %v36383_v4  ;;  %v36408_v58 = vadd.f32 %v20626_v6, %v20135_v35  ;;  %31676 = vmatpush3.msra.mxu1 %v36385_v28  ;;  %v26265_v19 = vsub.f32 %v36378_v16, %v36397_v39  ;;  %v19593_v31 = vadd.f32 %v36080_v29, %v19515_v9  ;;  %v20785_v63 = vpop.f32.mrf.mxu1  ;;  %v21016_v52 = vpop.f32.mrf.mxu0 }
 0x4a5   :  { %39488 = vst [vmem:[#allocation130_spill] sm:$0xff] %v36385_v28  ;;  %39489 = vst [vmem:[#allocation131_spill] sm:$0xff] %v36388_v55  ;;  %v26153_v11 = vsub.f32 %v36388_v55, %v36404_v18  ;;  %v19827_v45 = vadd.f32 %v36193_v13, %v36126_v1  ;;  %v20861_v34 = vadd.f32 %v20860_v27, %v20784_v53 }
 0x4a6   :  { %39490 = vst [vmem:[#allocation132_spill] sm:$0xff] %v36397_v39  ;;  %39491 = vst [vmem:[#allocation133_spill] sm:$0xff] %v36404_v18  ;;  %v20786_v54 = vadd.f32 %v20785_v63, %v20703_v0  ;;  %v36418_v35 = vand.u32 4294901760, %v26265_v19  ;;  %v20936_v5 = vpop.f32.mrf.mxu1  ;;  %v18261_v44 = vadd.f32 %v35871_v8, %v18187_v21  ;;  %v18498_v28 = vadd.f32 %v35876_v22, %v18421_v48  ;;  %v21166_v4 = vpop.f32.mrf.mxu0 }
 0x4a7   :  { %v36420_v6 = vand.u32 4294901760, %v26153_v11  ;;  %v20937_v9 = vadd.f32 %v20936_v5, %v20861_v34  ;;  %v19667_v13 = vadd.f32 %v36153_v14, %v19593_v31  ;;  %v19904_v1 = vadd.f32 %v36169_v17, %v19827_v45 }
 0x4a8   :  { %39492 = vst [vmem:[#allocation134_spill] sm:$0xff] %v36418_v35  ;;  %v20863_v29 = vadd.f32 %v20862_v33, %v20786_v54  ;;  %31677 = vmatprep.subr.mxu1 %v36418_v35  ;;  %v20938_v38 = vpop.f32.mrf.mxu1  ;;  %v21168_v53 = vpop.f32.mrf.mxu0  ;;  %v18731_v22 = vadd.f32 %v18261_v44, %v35776_v46  ;;  %v18574_v34 = vadd.f32 %v35884_v50, %v18498_v28 }
 0x4a9   :  { %39493 = vst [vmem:[#allocation135_spill] sm:$0xff] %v36420_v6  ;;  %31678 = vmatpush3.msra.mxu1 %v36420_v6  ;;  %v21015_v0 = vadd.f32 %v21014_v61, %v20937_v9  ;;  %v19980_v11 = vadd.f32 %v36237_v26, %v19904_v1 }
 0x4aa   :  { %v20939_v27 = vadd.f32 %v20938_v38, %v20863_v29  ;;  %31717 = vmatprep.subr.mxu1 %v35882_v43  ;;  %v21088_v8 = vpop.f32.mrf.mxu1  ;;  %v21325_v48 = vpop.f32.mrf.mxu0  ;;  %v20137_v63 = vadd.f32 %v19667_v13, %v18731_v22  ;;  %v18652_v31 = vadd.f32 %v35880_v10, %v18574_v34 }
 0x4ab   :  { %v21089_v21 = vadd.f32 %v21088_v8, %v21015_v0  ;;  %v20058_v28 = vadd.f32 %v36207_v49, %v19980_v11 }
 0x4ac   :  { %v21017_v33 = vadd.f32 %v21016_v52, %v20939_v27  ;;  %v21090_v19 = vpop.f32.mrf.mxu1  ;;  %v21327_v38 = vpop.f32.mrf.mxu0  ;;  %v18726_v26 = vadd.f32 %v35911_v36, %v18652_v31 }
 0x4ad   :  { %v36433_v14 = vadd.f32 %v21089_v21, %v36167_v40  ;;  %v20132_v0 = vadd.f32 %v36274_v51, %v20058_v28 }
 0x4ae   :  { %v21091_v17 = vadd.f32 %v21090_v19, %v21017_v33  ;;  %v21248_v61 = vpop.f32.mrf.mxu1  ;;  %v21479_v54 = vpop.f32.mrf.mxu0  ;;  %v18733_v22 = vadd.f32 %v18726_v26, %v35818_v30 }
 0x4af   :  { %v21249_v46 = vadd.f32 %v21248_v61, %v21166_v4 }
 0x4b0   :  { %v36436_v45 = vadd.f32 %v21091_v17, %v20137_v63  ;;  %v21250_v50 = vpop.f32.mrf.mxu1  ;;  %v21481_v44 = vpop.f32.mrf.mxu0  ;;  %v20139_v21 = vadd.f32 %v20132_v0, %v18733_v22 }
 0x4b1   :  { %v21326_v52 = vadd.f32 %v21325_v48, %v21249_v46  ;;  %v21251_v5 = vadd.f32 %v21250_v50, %v21168_v53 }
 0x4b2   :  { %v21401_v29 = vpop.f32.mrf.mxu1  ;;  %v21660_v13 = vpop.f32.mrf.mxu0 }
 0x4b3   :  { %v21328_v40 = vadd.f32 %v21327_v38, %v21251_v5  ;;  %v21402_v9 = vadd.f32 %v21401_v29, %v21326_v52 }
 0x4b4   :  { %v21403_v1 = vpop.f32.mrf.mxu1  ;;  %v21662_v8 = vpop.f32.mrf.mxu0 }
 0x4b5   :  { %v21480_v10 = vadd.f32 %v21479_v54, %v21402_v9  ;;  %v21404_v27 = vadd.f32 %v21403_v1, %v21328_v40 }
 0x4b6   :  { %v21553_v4 = vpop.f32.mrf.mxu1  ;;  %v21819_v33 = vpop.f32.mrf.mxu0 }
 0x4b7   :  { %v21482_v34 = vadd.f32 %v21481_v44, %v21404_v27  ;;  %v21554_v49 = vadd.f32 %v21553_v4, %v21480_v10 }
 0x4b8   :  { %v21555_v53 = vpop.f32.mrf.mxu1  ;;  %v21821_v19 = vpop.f32.mrf.mxu0 }
 0x4b9   :  { %v36443_v48 = vadd.f32 %v21554_v49, %v36289_v23  ;;  %v21556_v36 = vadd.f32 %v21555_v53, %v21482_v34 }
 0x4ba   :  { %v21742_v63 = vpop.f32.mrf.mxu1  ;;  %v21973_v17 = vpop.f32.mrf.mxu0 }
 0x4bb   :  { %v36445_v11 = vadd.f32 %v21556_v36, %v20139_v21  ;;  %v21743_v51 = vadd.f32 %v21742_v63, %v21660_v13 }
 0x4bc   :  { %v21744_v38 = vpop.f32.mrf.mxu1  ;;  %v21975_v46 = vpop.f32.mrf.mxu0 }
 0x4bd   :  { %v21820_v61 = vadd.f32 %v21819_v33, %v21743_v51  ;;  %v21745_v31 = vadd.f32 %v21744_v38, %v21662_v8 }
 0x4be   :  { %v21895_v30 = vpop.f32.mrf.mxu1  ;;  %v22125_v28 = vpop.f32.mrf.mxu0 }
 0x4bf   :  { %v21822_v54 = vadd.f32 %v21821_v19, %v21745_v31  ;;  %v21896_v50 = vadd.f32 %v21895_v30, %v21820_v61 }
 0x4c0   :  { %v21897_v52 = vpop.f32.mrf.mxu1  ;;  %v22127_v23 = vpop.f32.mrf.mxu0 }
 0x4c1   :  { %v21974_v5 = vadd.f32 %v21973_v17, %v21896_v50  ;;  %v21898_v44 = vadd.f32 %v21897_v52, %v21822_v54 }
 0x4c2   :  { %v22047_v29 = vpop.f32.mrf.mxu1  ;;  %v22284_v9 = vpop.f32.mrf.mxu0 }
 0x4c3   :  { %v21976_v26 = vadd.f32 %v21975_v46, %v21898_v44  ;;  %v22048_v40 = vadd.f32 %v22047_v29, %v21974_v5 }
 0x4c4   :  { %v22049_v1 = vpop.f32.mrf.mxu1  ;;  %v22286_v10 = vpop.f32.mrf.mxu0 }
 0x4c5   :  { %v36448_v13 = vadd.f32 %v22048_v40, %v36394_v15  ;;  %v22050_v0 = vadd.f32 %v22049_v1, %v21976_v26 }
 0x4c6   :  { %v22207_v27 = vpop.f32.mrf.mxu1  ;;  %v22438_v22 = vpop.f32.mrf.mxu0 }
 0x4c7   :  { %v36451_v8 = vadd.f32 %v22050_v0, %v36408_v58  ;;  %v22208_v4 = vadd.f32 %v22207_v27, %v22125_v28 }
 0x4c8   :  { %v22209_v34 = vpop.f32.mrf.mxu1  ;;  %v22440_v53 = vpop.f32.mrf.mxu0 }
 0x4c9   :  { %v22285_v49 = vadd.f32 %v22284_v9, %v22208_v4  ;;  %v22210_v33 = vadd.f32 %v22209_v34, %v22127_v23 }
 0x4ca   :  { %v22360_v21 = vpop.f32.mrf.mxu1  ;;  %v22590_v63 = vpop.f32.mrf.mxu0 }
 0x4cb   :  { %v22287_v36 = vadd.f32 %v22286_v10, %v22210_v33  ;;  %v22361_v19 = vadd.f32 %v22360_v21, %v22285_v49 }
 0x4cc   :  { %v22362_v51 = vpop.f32.mrf.mxu1  ;;  %v22592_v38 = vpop.f32.mrf.mxu0 }
 0x4cd   :  { %v22439_v17 = vadd.f32 %v22438_v22, %v22361_v19  ;;  %v22363_v15 = vadd.f32 %v22362_v51, %v22287_v36 }
 0x4ce   :  { %v22512_v61 = vpop.f32.mrf.mxu1  ;;  %v22749_v30 = vpop.f32.mrf.mxu0 }
 0x4cf   :  { %v22441_v31 = vadd.f32 %v22440_v53, %v22363_v15  ;;  %v22513_v46 = vadd.f32 %v22512_v61, %v22439_v17 }
 0x4d0   :  { %v22514_v58 = vpop.f32.mrf.mxu1  ;;  %v22751_v28 = vpop.f32.mrf.mxu0 }
 0x4d1   :  { %v22984_v54 = vadd.f32 %v22513_v46, %v36433_v14  ;;  %v22515_v50 = vadd.f32 %v22514_v58, %v22441_v31 }
 0x4d2   :  { %v22672_v52 = vpop.f32.mrf.mxu1  ;;  %v22903_v23 = vpop.f32.mrf.mxu0 }
 0x4d3   :  { %v22985_v5 = vadd.f32 %v22515_v50, %v36436_v45  ;;  %v22673_v44 = vadd.f32 %v22672_v52, %v22590_v63 }
 0x4d4   :  { %v22674_v29 = vpop.f32.mrf.mxu1  ;;  %v22905_v9 = vpop.f32.mrf.mxu0 }
 0x4d5   :  { %v22750_v26 = vadd.f32 %v22749_v30, %v22673_v44  ;;  %v22675_v40 = vadd.f32 %v22674_v29, %v22592_v38 }
 0x4d6   :  { %v22825_v1 = vpop.f32.mrf.mxu1  ;;  %v23084_v27 = vpop.f32.mrf.mxu0 }
 0x4d7   :  { %v22752_v0 = vadd.f32 %v22751_v28, %v22675_v40  ;;  %v22826_v10 = vadd.f32 %v22825_v1, %v22750_v26 }
 0x4d8   :  { %v22827_v4 = vpop.f32.mrf.mxu1  ;;  %v23086_v49 = vpop.f32.mrf.mxu0 }
 0x4d9   :  { %v22904_v22 = vadd.f32 %v22903_v23, %v22826_v10  ;;  %v22828_v34 = vadd.f32 %v22827_v4, %v22752_v0 }
 0x4da   :  { %v22977_v14 = vpop.f32.mrf.mxu1  ;;  %v23243_v21 = vpop.f32.mrf.mxu0 }
 0x4db   :  { %v22906_v33 = vadd.f32 %v22905_v9, %v22828_v34  ;;  %v22978_v53 = vadd.f32 %v22977_v14, %v22904_v22 }
 0x4dc   :  { %v22979_v36 = vpop.f32.mrf.mxu1  ;;  %v23245_v63 = vpop.f32.mrf.mxu0 }
 0x4dd   :  { %v36456_v45 = vadd.f32 %v22978_v53, %v36443_v48  ;;  %v22980_v19 = vadd.f32 %v22979_v36, %v22906_v33 }
 0x4de   :  { %v23166_v51 = vpop.f32.mrf.mxu1  ;;  %v36461_v15 = vpop.f32.mrf.mxu0 }
 0x4df   :  { %v36459_v17 = vadd.f32 %v22980_v19, %v36445_v11 }
 0x4e0   :  { %v23168_v38 = vpop.f32.mrf.mxu1  ;;  %v36463_v61 = vpop.f32.mrf.mxu0 }
 0x4e2   :  { %v23319_v31 = vpop.f32.mrf.mxu1  ;;  %v23549_v46 = vpop.f32.mrf.mxu0 }
 0x4e4   :  { %v23321_v30 = vpop.f32.mrf.mxu1  ;;  %v23551_v58 = vpop.f32.mrf.mxu0 }
 0x4e6   :  { %v36465_v50 = vpop.f32.mrf.mxu1  ;;  %v23708_v28 = vpop.f32.mrf.mxu0 }
 0x4e8   :  { %v36467_v48 = vpop.f32.mrf.mxu1  ;;  %v23710_v52 = vpop.f32.mrf.mxu0 }
 0x4ea   :  { %v23631_v44 = vpop.f32.mrf.mxu1  ;;  %v23862_v29 = vpop.f32.mrf.mxu0 }
 0x4eb   :  { %v23632_v23 = vadd.f32 %v23631_v44, %v23549_v46 }
 0x4ec   :  { %v23633_v11 = vpop.f32.mrf.mxu1  ;;  %v23864_v9 = vpop.f32.mrf.mxu0 }
 0x4ed   :  { %v23709_v26 = vadd.f32 %v23708_v28, %v23632_v23  ;;  %v23634_v40 = vadd.f32 %v23633_v11, %v23551_v58  ;;  %v23167_v58 = vadd.f32 %v23166_v51, %v23084_v27 }
 0x4ee   :  { %v23784_v1 = vpop.f32.mrf.mxu1  ;;  %v24014_v4 = vpop.f32.mrf.mxu0 }
 0x4ef   :  { %v23711_v0 = vadd.f32 %v23710_v52, %v23634_v40  ;;  %v23785_v10 = vadd.f32 %v23784_v1, %v23709_v26  ;;  %v23169_v40 = vadd.f32 %v23168_v38, %v23086_v49 }
 0x4f0   :  { %v23786_v22 = vpop.f32.mrf.mxu1  ;;  %v24016_v33 = vpop.f32.mrf.mxu0 }
 0x4f1   :  { %v23863_v34 = vadd.f32 %v23862_v29, %v23785_v10  ;;  %v23787_v14 = vadd.f32 %v23786_v22, %v23711_v0 }
 0x4f2   :  { %v23936_v53 = vpop.f32.mrf.mxu1  ;;  %v24173_v6 = vpop.f32.mrf.mxu0 }
 0x4f3   :  { %v23865_v36 = vadd.f32 %v23864_v9, %v23787_v14  ;;  %v23937_v19 = vadd.f32 %v23936_v53, %v23863_v34  ;;  %v23244_v9 = vadd.f32 %v23243_v21, %v23167_v58  ;;  %v23246_v53 = vadd.f32 %v23245_v63, %v23169_v40 }
 0x4f4   :  { %v23938_v35 = vpop.f32.mrf.mxu1  ;;  %v24175_v44 = vpop.f32.mrf.mxu0 }
 0x4f5   :  { %v36469_v12 = vadd.f32 %v23937_v19, %v22984_v54  ;;  %v23939_v46 = vadd.f32 %v23938_v35, %v23865_v36  ;;  %v23322_v49 = vadd.f32 %v23321_v30, %v23246_v53 }
 0x4f6   :  { %v24096_v28 = vpop.f32.mrf.mxu1  ;;  %v24327_v11 = vpop.f32.mrf.mxu0 }
 0x4f7   :  { %v36471_v23 = vadd.f32 %v23939_v46, %v22985_v5  ;;  %v24097_v52 = vadd.f32 %v24096_v28, %v24014_v4  ;;  %v23320_v5 = vadd.f32 %v23319_v31, %v23244_v9  ;;  %v23400_v31 = vadd.f32 %v36463_v61, %v23322_v49  ;;  %v39496_v49 = vld [vmem:[#allocation19_spill] sm:$0xff] }
 0x4f8   :  { %v24098_v26 = vpop.f32.mrf.mxu1  ;;  %v24329_v0 = vpop.f32.mrf.mxu0 }
 0x4f9   :  { %v24174_v29 = vadd.f32 %v24173_v6, %v24097_v52  ;;  %v24099_v1 = vadd.f32 %v24098_v26, %v24016_v33 }
 0x4fa   :  { %v24249_v10 = vpop.f32.mrf.mxu1  ;;  %v24508_v14 = vpop.f32.mrf.mxu0 }
 0x4fb   :  { %v24176_v22 = vadd.f32 %v24175_v44, %v24099_v1  ;;  %v24250_v34 = vadd.f32 %v24249_v10, %v24174_v29  ;;  %v23398_v44 = vadd.f32 %v36461_v15, %v23320_v5  ;;  %v23474_v10 = vadd.f32 %v36467_v48, %v23400_v31  ;;  %v39503_v31 = vld [vmem:[#allocation49_spill] sm:$0xff] }
 0x4fc   :  { %v24251_v54 = vpop.f32.mrf.mxu1  ;;  %v24510_v19 = vpop.f32.mrf.mxu0 }
 0x4fd   :  { %v24328_v35 = vadd.f32 %v24327_v11, %v24250_v34  ;;  %v24252_v36 = vadd.f32 %v24251_v54, %v24176_v22  ;;  %v23472_v30 = vadd.f32 %v36465_v50, %v23398_v44  ;;  %v24407_v53 = vadd.f32 %v23474_v10, %v36451_v8  ;;  %v39500_v44 = vld [vmem:[#allocation31_spill] sm:$0xff] }
 0x4fe   :  { %v24401_v27 = vpop.f32.mrf.mxu1  ;;  %v24667_v46 = vpop.f32.mrf.mxu0  ;;  %v39512_v10 = vld [vmem:[#allocation67_spill] sm:$0xff] }
 0x4ff   :  { %v24330_v51 = vadd.f32 %v24329_v0, %v24252_v36  ;;  %v24402_v4 = vadd.f32 %v24401_v27, %v24328_v35  ;;  %v24406_v34 = vadd.f32 %v23472_v30, %v36448_v13  ;;  %v39508_v30 = vld [vmem:[#allocation61_spill] sm:$0xff] }
 0x500   :  { %v24403_v28 = vpop.f32.mrf.mxu1  ;;  %v24669_v33 = vpop.f32.mrf.mxu0 }
 0x501   :  { %v36474_v6 = vadd.f32 %v24402_v4, %v36456_v45  ;;  %v24404_v38 = vadd.f32 %v24403_v28, %v24330_v51 }
 0x502   :  { %v24590_v21 = vpop.f32.mrf.mxu1  ;;  %v24821_v29 = vpop.f32.mrf.mxu0 }
 0x503   :  { %39494 = vst [vmem:[#allocation136_spill] sm:$0xff] %v36474_v6  ;;  %v36478_v63 = vadd.f32 %v24404_v38, %v36459_v17  ;;  %v24591_v58 = vadd.f32 %v24590_v21, %v24508_v14  ;;  %v39497_v38 = vld [vmem:[#allocation34_spill] sm:$0xff]  ;;  %v39498_v21 = vld [vmem:[#allocation25_spill] sm:$0xff]  ;;  %v25892_v6 = vld [vmem:[#allocation2 + $0x1c0] sm:$0xff] }
 0x504   :  { %v24592_v52 = vpop.f32.mrf.mxu1  ;;  %v24823_v22 = vpop.f32.mrf.mxu0 }
 0x505   :  { %39495 = vst [vmem:[#allocation137_spill] sm:$0xff] %v36478_v63  ;;  %v24668_v11 = vadd.f32 %v24667_v46, %v24591_v58  ;;  %v24593_v26 = vadd.f32 %v24592_v52, %v24510_v19  ;;  %v39501_v58 = vld [vmem:[#allocation29_spill] sm:$0xff] }
 0x506   :  { %v24743_v40 = vpop.f32.mrf.mxu1  ;;  %v39502_v52 = vld [vmem:[#allocation33_spill] sm:$0xff] }
 0x507   :  { %v24670_v45 = vadd.f32 %v24669_v33, %v24593_v26  ;;  %v24744_v1 = vadd.f32 %v24743_v40, %v24668_v11  ;;  %v39499_v33 = vld [vmem:[#allocation40_spill] sm:$0xff]  ;;  %v39504_v11 = vld [vmem:[#allocation41_spill] sm:$0xff] }
 0x508   :  { %v24745_v0 = vpop.f32.mrf.mxu1  ;;  %v39505_v26 = vld [vmem:[#allocation32_spill] sm:$0xff]  ;;  %v39506_v40 = vld [vmem:[#allocation57_spill] sm:$0xff] }
 0x509   :  { %v24822_v9 = vadd.f32 %v24821_v29, %v24744_v1  ;;  %v24746_v15 = vadd.f32 %v24745_v0, %v24670_v45  ;;  %v39507_v29 = vld [vmem:[#allocation15_spill] sm:$0xff]  ;;  %v39509_v45 = vld [vmem:[#allocation46_spill] sm:$0xff]  ;;  %v39511_v0 = vld [vmem:[#allocation13_spill] sm:$0xff] }
 0x50a   :  { %v24895_v17 = vpop.f32.mrf.mxu1  ;;  %v39510_v1 = vld [vmem:[#allocation66_spill] sm:$0xff] }
 0x50b   :  { %v24824_v14 = vadd.f32 %v24823_v22, %v24746_v15  ;;  %v24896_v54 = vadd.f32 %v24895_v17, %v24822_v9  ;;  %v39513_v9 = vld [vmem:[#allocation17_spill] sm:$0xff]  ;;  %v39516_v17 = vld [vmem:[#allocation79_spill] sm:$0xff] }
 0x50c   :  { %v24897_v61 = vpop.f32.mrf.mxu1  ;;  %v39514_v15 = vld [vmem:[#allocation77_spill] sm:$0xff] }
 0x50d   :  { %v25830_v35 = vadd.f32 %v24896_v54, %v24406_v34  ;;  %v24898_v36 = vadd.f32 %v24897_v61, %v24824_v14  ;;  %v39515_v22 = vld [vmem:[#allocation21_spill] sm:$0xff]  ;;  %v39517_v34 = vld [vmem:[#allocation47_spill] sm:$0xff]  ;;  %v39519_v54 = vld [vmem:[#allocation60_spill] sm:$0xff] }
 0x50e   :  { %v39518_v14 = vld [vmem:[#allocation81_spill] sm:$0xff] }
 0x50f   :  { %v36485_v19 = vand.u32 4294901760, %v25830_v35  ;;  %v25831_v50 = vadd.f32 %v24898_v36, %v24407_v53  ;;  %v39520_v61 = vld [vmem:[#allocation85_spill] sm:$0xff]  ;;  %v39521_v53 = vld [vmem:[#allocation63_spill] sm:$0xff] }
 0x510   :  { %v39523_v36 = vld [vmem:[#allocation65_spill] sm:$0xff] }
 0x511   :  { %v36488_v27 = vsub.f32 %v25830_v35, %v36485_v19  ;;  %v36490_v48 = vand.u32 4294901760, %v25831_v50  ;;  %v39522_v35 = vld [vmem:[#allocation90_spill] sm:$0xff] }
 0x513   :  { %v38801_v5 = vand.u32 4294901760, %v36488_v27  ;;  %v26029_v51 = vsub.f32 %v25831_v50, %v36490_v48  ;;  %26269 = vmatprep.mubr.f32.mxu1 %v36490_v48  ;;  %v36536_v50 = vpop.f32.mrf.mxu0 }
 0x514   :  { %26271 = vmatmul.mubr.f32.vlgmr.msra.gmra.mxu1 %v36485_v19 }
 0x515   :  { %31718 = vmatpush3.msra.mxu1 %v35886_v57  ;;  %v26030_v13 = vand.u32 4294901760, %v26029_v51  ;;  %v26037_v8 = vsub.f32 %v36488_v27, %v38801_v5  ;;  %v39530_v5 = vld [vmem:[#allocation105_spill] sm:$0xff] }
 0x516   :  { %31719 = vmatprep.subr.mxu1 %v35893_v37 }
 0x517   :  { %31720 = vmatpush3.msra.mxu1 %v35899_v24  ;;  %26513 = vmatprep.mubr.f32.mxu1 %v26030_v13  ;;  %v26031_v4 = vsub.f32 %v26029_v51, %v26030_v13  ;;  %v26038_v28 = vand.u32 4294901760, %v26037_v8  ;;  %v39525_v13 = vld [vmem:[#allocation70_spill] sm:$0xff]  ;;  %v39526_v8 = vld [vmem:[#allocation101_spill] sm:$0xff] }
 0x518   :  { %31721 = vmatprep.subr.mxu1 %v35919_v41 }
 0x519   :  { %31722 = vmatpush3.msra.mxu1 %v35921_v3  ;;  %v26032_v46 = vand.u32 4294901760, %v26031_v4  ;;  %v39527_v4 = vld [vmem:[#allocation71_spill] sm:$0xff] }
 0x51a   :  { %31723 = vmatprep.subr.mxu1 %v35969_v20 }
 0x51b   :  { %31724 = vmatpush3.msra.mxu1 %v35978_v25  ;;  %26033 = vmatprep.mubr.f32.mxu0 %v26032_v46  ;;  %v39528_v46 = vld [vmem:[#allocation103_spill] sm:$0xff] }
 0x51c   :  { %31725 = vmatprep.subr.mxu1 %v35985_v7  ;;  %26039 = vmatmul.mubr.f32.vlgmr.msra.gmra.mxu0 %v26038_v28  ;;  %v39529_v28 = vld [vmem:[#allocation80_spill] sm:$0xff] }
 0x51d   :  { %31683 = vmatpush3.msra.mxu0 %v35897_v42  ;;  %31726 = vmatpush3.msra.mxu1 %v39496_v49  ;;  %v39554_v42 = vld [vmem:[#allocation35_spill] sm:$0xff] }
 0x51e   :  { %31684 = vmatprep.subr.mxu0 %v39497_v38  ;;  %26406 = vmatprep.mubr.f32.mxu0 %v26029_v51  ;;  %v39524_v51 = vld [vmem:[#allocation91_spill] sm:$0xff] }
 0x51f   :  { %31727 = vmatprep.subr.mxu1 %v39498_v21  ;;  %31685 = vmatpush3.msra.mxu0 %v39499_v33  ;;  %v25897_v33 = vld [vmem:[#allocation2 + $0x1e8] sm:$0xff] }
 0x520   :  { %31728 = vmatpush3.msra.mxu1 %v39500_v44  ;;  %31686 = vmatprep.subr.mxu0 %v39501_v58 }
 0x521   :  { %31729 = vmatprep.subr.mxu1 %v39502_v52  ;;  %31687 = vmatpush3.msra.mxu0 %v39503_v31 }
 0x522   :  { %31730 = vmatpush3.msra.mxu1 %v39504_v11  ;;  %31688 = vmatprep.subr.mxu0 %v39505_v26 }
 0x523   :  { %31731 = vmatprep.subr.mxu1 %v39506_v40  ;;  %31689 = vmatpush3.msra.mxu0 %v39507_v29 }
 0x524   :  { %31732 = vmatpush3.msra.mxu1 %v39508_v30  ;;  %31690 = vmatprep.subr.mxu0 %v39509_v45  ;;  %v25899_v45 = vld [vmem:[#allocation2 + $0x1f8] sm:$0xff] }
 0x525   :  { %31733 = vmatprep.subr.mxu1 %v39510_v1  ;;  %31691 = vmatpush3.msra.mxu0 %v39511_v0  ;;  %v39537_v0 = vld [vmem:[#allocation104_spill] sm:$0xff] }
 0x526   :  { %31734 = vmatpush3.msra.mxu1 %v39512_v10  ;;  %31692 = vmatprep.subr.mxu0 %v39513_v9 }
 0x527   :  { %31735 = vmatprep.subr.mxu1 %v39514_v15  ;;  %31693 = vmatpush3.msra.mxu0 %v39515_v22  ;;  %v39533_v22 = vld [vmem:[#allocation87_spill] sm:$0xff] }
 0x528   :  { %31736 = vmatpush3.msra.mxu1 %v39516_v17  ;;  %31694 = vmatprep.subr.mxu0 %v39517_v34  ;;  %v39532_v34 = vld [vmem:[#allocation109_spill] sm:$0xff] }
 0x529   :  { %31737 = vmatprep.subr.mxu1 %v39518_v14  ;;  %31695 = vmatpush3.msra.mxu0 %v39519_v54  ;;  %v24975_v54 = vpop.f32.mrf.mxu0 }
 0x52a   :  { %31738 = vmatpush3.msra.mxu1 %v39520_v61  ;;  %31696 = vmatprep.subr.mxu0 %v39521_v53  ;;  %v39531_v53 = vld [vmem:[#allocation84_spill] sm:$0xff] }
 0x52b   :  { %31739 = vmatprep.subr.mxu1 %v39522_v35  ;;  %31697 = vmatpush3.msra.mxu0 %v39523_v36  ;;  %v36546_v36 = vpop.f32.mrf.mxu1  ;;  %v36556_v9 = vpop.f32.mrf.mxu0 }
 0x52c   :  { %31740 = vmatpush3.msra.mxu1 %v39524_v51  ;;  %31698 = vmatprep.subr.mxu0 %v39525_v13  ;;  %v39534_v13 = vld [vmem:[#allocation89_spill] sm:$0xff] }
 0x52d   :  { %31741 = vmatprep.subr.mxu1 %v39526_v8  ;;  %31699 = vmatpush3.msra.mxu0 %v39527_v4  ;;  %v39535_v4 = vld [vmem:[#allocation94_spill] sm:$0xff]  ;;  %v25134_v29 = vpop.f32.mrf.mxu0 }
 0x52e   :  { %31742 = vmatpush3.msra.mxu1 %v39528_v46  ;;  %31700 = vmatprep.subr.mxu0 %v39529_v28  ;;  %v39536_v28 = vld [vmem:[#allocation95_spill] sm:$0xff] }
 0x52f   :  { %31743 = vmatprep.subr.mxu1 %v39530_v5  ;;  %31701 = vmatpush3.msra.mxu0 %v39531_v53  ;;  %v25057_v53 = vpop.f32.mrf.mxu1 }
 0x530   :  { %31744 = vmatpush3.msra.mxu1 %v39532_v34  ;;  %31702 = vmatprep.subr.mxu0 %v39533_v22  ;;  %v39538_v22 = vand.u32 4294901760, %v36488_v27 }
 0x531   :  { %31745 = vmatprep.subr.mxu1 %v36324_v59  ;;  %31703 = vmatpush3.msra.mxu0 %v39534_v13  ;;  %v39539_v13 = vld [vmem:[#allocation108_spill] sm:$0xff]  ;;  %v36567_v26 = vpop.f32.mrf.mxu1 }
 0x532   :  { %31746 = vmatpush3.msra.mxu1 %v36326_v47  ;;  %31704 = vmatprep.subr.mxu0 %v39535_v4  ;;  %v25058_v4 = vadd.f32 %v25057_v53, %v24975_v54  ;;  %v36575_v54 = vand.u32 4294901760, %v25899_v45 }
 0x533   :  { %31747 = vmatprep.subr.mxu1 %v36365_v32  ;;  %31705 = vmatpush3.msra.mxu0 %v39536_v28  ;;  %v39540_v28 = vld [vmem:[#allocation111_spill] sm:$0xff] }
 0x534   :  { %31748 = vmatpush3.msra.mxu1 %v36374_v60  ;;  %31706 = vmatprep.subr.mxu0 %v39537_v0  ;;  %v39541_v0 = vld [vmem:[#allocation113_spill] sm:$0xff]  ;;  %39542 = vst [vmem:[#allocation138_spill] sm:$0xff] %v36575_v54  ;;  %v25135_v53 = vadd.f32 %v25134_v29, %v25058_v4  ;;  %v36590_v29 = vsub.f32 %v25899_v45, %v36575_v54  ;;  %v39549_v45 = vld [vmem:[#allocation23_spill] sm:$0xff] }
 0x535   :  { %26517 = vmatmul.mubr.f32.vlgmr.msra.gmra.mxu1 %v39538_v22  ;;  %31787 = vmatprep.subr.mxu1 %v35882_v43  ;;  %v25883_v22 = vld [vmem:[#allocation2 + $0x178] sm:$0xff]  ;;  %v25898_v4 = vld [vmem:[#allocation2 + $0x1f0] sm:$0xff] }
 0x536   :  { %31707 = vmatpush3.msra.mxu0 %v39539_v13  ;;  %31788 = vmatpush3.msra.mxu1 %v35886_v57  ;;  %v36579_v13 = vpop.f32.mrf.mxu0  ;;  %39545 = vst [vmem:[#allocation140_spill] sm:$0xff] %v36590_v29 }
 0x537   :  { %26787 = vmatprep.mubr.f32.mxu1 %v36490_v48  ;;  %31708 = vmatprep.subr.mxu0 %v39540_v28  ;;  %v25210_v28 = vpop.f32.mrf.mxu1 }
 0x538   :  { %31789 = vmatprep.subr.mxu1 %v35893_v37  ;;  %31709 = vmatpush3.msra.mxu0 %v39541_v0  ;;  %v39546_v0 = vld [vmem:[#allocation37_spill] sm:$0xff]  ;;  %v25288_v31 = vpop.f32.mrf.mxu0 }
 0x539   :  { %31790 = vmatpush3.msra.mxu1 %v35899_v24  ;;  %31710 = vmatprep.subr.mxu0 %v36341_v56  ;;  %v36583_v56 = vand.u32 4294901760, %v25883_v22  ;;  %v36594_v58 = vpop.f32.mrf.mxu1  ;;  %v39568_v24 = vld [vmem:[#allocation59_spill] sm:$0xff] }
 0x53a   :  { %31791 = vmatprep.subr.mxu1 %v35919_v41  ;;  %31711 = vmatpush3.msra.mxu0 %v36344_v2  ;;  %v39544_v2 = vld [vmem:[#allocation30_spill] sm:$0xff] }
 0x53b   :  { %31792 = vmatpush3.msra.mxu1 %v35921_v3  ;;  %31712 = vmatprep.subr.mxu0 %v36378_v16  ;;  %39543 = vst [vmem:[#allocation139_spill] sm:$0xff] %v36583_v56  ;;  %v25211_v16 = vadd.f32 %v25210_v28, %v25135_v53  ;;  %v36603_v28 = vand.u32 4294901760, %v25898_v4  ;;  %v25881_v53 = vld [vmem:[#allocation2 + $0x168] sm:$0xff] }
 0x53c   :  { %31793 = vmatprep.subr.mxu1 %v35969_v20  ;;  %31713 = vmatpush3.msra.mxu0 %v36388_v55  ;;  %v25882_v55 = vld [vmem:[#allocation2 + $0x170] sm:$0xff] }
 0x53d   :  { %31794 = vmatpush3.msra.mxu1 %v35978_v25  ;;  %26409 = vmatmul.mubr.f32.vlgmr.msra.gmra.mxu0 %v36488_v27  ;;  %v39547_v27 = vld [vmem:[#allocation16_spill] sm:$0xff]  ;;  %39550 = vst [vmem:[#allocation142_spill] sm:$0xff] %v36603_v28  ;;  %v36610_v38 = vand.u32 4294901760, %v25882_v55  ;;  %v25895_v25 = vld [vmem:[#allocation2 + $0x1d8] sm:$0xff] }
 0x53e   :  { %31752 = vmatprep.subr.mxu0 %v39544_v2  ;;  %31795 = vmatprep.subr.mxu1 %v35985_v7  ;;  %v36599_v2 = vsub.f32 %v25883_v22, %v36583_v56  ;;  %v25289_v22 = vadd.f32 %v25288_v31, %v25211_v16  ;;  %v36621_v7 = vand.u32 4294901760, %v25881_v53  ;;  %v39559_v16 = vld [vmem:[#allocation43_spill] sm:$0xff]  ;;  %v36626_v31 = vsub.f32 %v25898_v4, %v36603_v28  ;;  %v39565_v4 = vld [vmem:[#allocation9_spill] sm:$0xff] }
 0x53f   :  { %31753 = vmatpush3.msra.mxu0 %v39546_v0  ;;  %26683 = vmatprep.mubr.f32.mxu0 %v36490_v48  ;;  %v39551_v48 = vld [vmem:[#allocation20_spill] sm:$0xff]  ;;  %v36608_v0 = vand.u32 4294901760, %v36590_v29  ;;  %39553 = vst [vmem:[#allocation144_spill] sm:$0xff] %v36610_v38  ;;  %v36635_v20 = vsub.f32 %v25882_v55, %v36610_v38 }
 0x540   :  { %31796 = vmatpush3.msra.mxu1 %v39496_v49  ;;  %31754 = vmatprep.subr.mxu0 %v39547_v27  ;;  %39548 = vst [vmem:[#allocation141_spill] sm:$0xff] %v36599_v2  ;;  %v25896_v27 = vld [vmem:[#allocation2 + $0x1e0] sm:$0xff]  ;;  %v25362_v49 = vpop.f32.mrf.mxu1  ;;  %39558 = vst [vmem:[#allocation147_spill] sm:$0xff] %v36621_v7  ;;  %v36651_v37 = vsub.f32 %v25881_v53, %v36621_v7  ;;  %v39575_v53 = vld [vmem:[#allocation62_spill] sm:$0xff] }
 0x541   :  { %31797 = vmatprep.subr.mxu1 %v39498_v21  ;;  %31755 = vmatpush3.msra.mxu0 %v39549_v45  ;;  %39552 = vst [vmem:[#allocation143_spill] sm:$0xff] %v36608_v0  ;;  %v36614_v21 = vand.u32 4294901760, %v25897_v33  ;;  %v25880_v45 = vld [vmem:[#allocation2 + $0x160] sm:$0xff]  ;;  %39560 = vst [vmem:[#allocation148_spill] sm:$0xff] %v36626_v31  ;;  %v36670_v43 = vand.u32 4294901760, %v36635_v20 }
 0x542   :  { %31798 = vmatpush3.msra.mxu1 %v39500_v44  ;;  %31756 = vmatprep.subr.mxu0 %v39551_v48  ;;  %v39556_v44 = vld [vmem:[#allocation39_spill] sm:$0xff]  ;;  %v36619_v48 = vand.u32 4294901760, %v36599_v2  ;;  %39563 = vst [vmem:[#allocation150_spill] sm:$0xff] %v36635_v20  ;;  %v36637_v3 = vand.u32 4294901760, %v25880_v45  ;;  %39569 = vst [vmem:[#allocation154_spill] sm:$0xff] %v36651_v37 }
 0x543   :  { %31799 = vmatprep.subr.mxu1 %v39502_v52  ;;  %31757 = vmatpush3.msra.mxu0 %v39554_v42  ;;  %39555 = vst [vmem:[#allocation145_spill] sm:$0xff] %v36614_v21  ;;  %v36628_v42 = vand.u32 4294901760, %v25896_v27  ;;  %v25879_v52 = vld [vmem:[#allocation2 + $0x158] sm:$0xff]  ;;  %v36642_v41 = vsub.f32 %v25897_v33, %v36614_v21  ;;  %39577 = vst [vmem:[#allocation160_spill] sm:$0xff] %v36670_v43 }
 0x544   :  { %31800 = vmatpush3.msra.mxu1 %v39504_v11  ;;  %31758 = vmatprep.subr.mxu0 %v39556_v44  ;;  %39557 = vst [vmem:[#allocation146_spill] sm:$0xff] %v36619_v48  ;;  %v39562_v11 = vld [vmem:[#allocation54_spill] sm:$0xff]  ;;  %v27022_v44 = vsub.f32 %v36590_v29, %v36608_v0  ;;  %39564 = vst [vmem:[#allocation151_spill] sm:$0xff] %v36637_v3  ;;  %v26910_v55 = vsub.f32 %v36599_v2, %v36619_v48  ;;  %v39580_v48 = vld [vmem:[#allocation64_spill] sm:$0xff] }
 0x545   :  { %31801 = vmatprep.subr.mxu1 %v39506_v40  ;;  %31759 = vmatpush3.msra.mxu0 %v39559_v16  ;;  %39561 = vst [vmem:[#allocation149_spill] sm:$0xff] %v36628_v42  ;;  %v25894_v40 = vld [vmem:[#allocation2 + $0x1d0] sm:$0xff]  ;;  %v25363_v16 = vadd.f32 %v25362_v49, %v25289_v22  ;;  %39566 = vst [vmem:[#allocation152_spill] sm:$0xff] %v36642_v41  ;;  %v36653_v49 = vand.u32 4294901760, %v25879_v52  ;;  %v25893_v22 = vld [vmem:[#allocation2 + $0x1c8] sm:$0xff] }
 0x546   :  { %31802 = vmatpush3.msra.mxu1 %v39508_v30  ;;  %31760 = vmatprep.subr.mxu0 %v39562_v11  ;;  %v36644_v30 = vand.u32 4294901760, %v25895_v25  ;;  %v25878_v11 = vld [vmem:[#allocation2 + $0x150] sm:$0xff]  ;;  %v39571_v33 = vld [vmem:[#allocation10_spill] sm:$0xff]  ;;  %v36667_v57 = vand.u32 4294901760, %v27022_v44  ;;  %v25876_v0 = vld [vmem:[#allocation2 + $0x140] sm:$0xff]  ;;  %v36690_v63 = vand.u32 4294901760, %v26910_v55 }
 0x547   :  { %31803 = vmatprep.subr.mxu1 %v39510_v1  ;;  %31761 = vmatpush3.msra.mxu0 %v39565_v4  ;;  %39570 = vst [vmem:[#allocation155_spill] sm:$0xff] %v36653_v49  ;;  %v36658_v4 = vand.u32 4294901760, %v36626_v31  ;;  %v25877_v1 = vld [vmem:[#allocation2 + $0x148] sm:$0xff]  ;;  %v25891_v2 = vld [vmem:[#allocation2 + $0x1b8] sm:$0xff]  ;;  %v39598_v29 = vld [vmem:[#allocation75_spill] sm:$0xff] }
 0x548   :  { %39567 = vst [vmem:[#allocation153_spill] sm:$0xff] %v36644_v30  ;;  %31804 = vmatpush3.msra.mxu1 %v39512_v10  ;;  %31762 = vmatprep.subr.mxu0 %v39568_v24  ;;  %v36661_v10 = vsub.f32 %v25896_v27, %v36628_v42  ;;  %v36663_v24 = vand.u32 4294901760, %v25894_v40  ;;  %39576 = vst [vmem:[#allocation159_spill] sm:$0xff] %v36667_v57  ;;  %v25833_v27 = vadd.f32 %v25363_v16, %v36471_v23 }
 0x549   :  { %31805 = vmatprep.subr.mxu1 %v39514_v15  ;;  %31763 = vmatpush3.msra.mxu0 %v39571_v33  ;;  %39572 = vst [vmem:[#allocation156_spill] sm:$0xff] %v36658_v4  ;;  %v36673_v33 = vsub.f32 %v25880_v45, %v36637_v3  ;;  %v36675_v15 = vand.u32 4294901760, %v25878_v11  ;;  %v36684_v44 = vsub.f32 %v25895_v25, %v36644_v30  ;;  %v39584_v45 = vld [vmem:[#allocation68_spill] sm:$0xff]  ;;  %39585 = vst [vmem:[#allocation166_spill] sm:$0xff] %v36690_v63  ;;  %v39589_v25 = vld [vmem:[#allocation69_spill] sm:$0xff] }
 0x54a   :  { %39573 = vst [vmem:[#allocation157_spill] sm:$0xff] %v36661_v10  ;;  %39574 = vst [vmem:[#allocation158_spill] sm:$0xff] %v36663_v24  ;;  %31806 = vmatpush3.msra.mxu1 %v39516_v17  ;;  %31764 = vmatprep.subr.mxu0 %v39575_v53  ;;  %v36681_v17 = vand.u32 4294901760, %v36642_v41  ;;  %v36686_v53 = vand.u32 4294901760, %v25893_v22  ;;  %v36693_v23 = vand.u32 4294901760, %v36651_v37  ;;  %v36696_v16 = vsub.f32 %v25879_v52, %v36653_v49  ;;  %v39593_v52 = vld [vmem:[#allocation74_spill] sm:$0xff] }
 0x54b   :  { %39578 = vst [vmem:[#allocation161_spill] sm:$0xff] %v36673_v33  ;;  %39579 = vst [vmem:[#allocation162_spill] sm:$0xff] %v36675_v15  ;;  %31807 = vmatprep.subr.mxu1 %v39518_v14  ;;  %31765 = vmatpush3.msra.mxu0 %v39580_v48  ;;  %v36698_v48 = vand.u32 4294901760, %v25877_v1  ;;  %v27029_v14 = vsub.f32 %v36626_v31, %v36658_v4  ;;  %v36708_v55 = vsub.f32 %v25894_v40, %v36663_v24 }
 0x54c   :  { %39581 = vst [vmem:[#allocation163_spill] sm:$0xff] %v36681_v17  ;;  %39582 = vst [vmem:[#allocation164_spill] sm:$0xff] %v36684_v44  ;;  %31808 = vmatpush3.msra.mxu1 %v39520_v61  ;;  %31766 = vmatprep.subr.mxu0 %v39584_v45  ;;  %v36705_v61 = vand.u32 4294901760, %v36661_v10  ;;  %v36710_v45 = vand.u32 4294901760, %v25892_v6  ;;  %v36720_v4 = vsub.f32 %v25878_v11, %v36675_v15  ;;  %v36722_v31 = vand.u32 4294901760, %v25876_v0  ;;  %v39601_v11 = vld [vmem:[#allocation86_spill] sm:$0xff] }
 0x54d   :  { %39583 = vst [vmem:[#allocation165_spill] sm:$0xff] %v36686_v53  ;;  %39586 = vst [vmem:[#allocation167_spill] sm:$0xff] %v36693_v23  ;;  %31809 = vmatprep.subr.mxu1 %v39522_v35  ;;  %31767 = vmatpush3.msra.mxu0 %v39589_v25  ;;  %v26917_v35 = vsub.f32 %v36635_v20, %v36670_v43  ;;  %v36717_v25 = vand.u32 4294901760, %v36673_v33  ;;  %v36724_v40 = vand.u32 4294901760, %v25833_v27 }
 0x54e   :  { %39587 = vst [vmem:[#allocation168_spill] sm:$0xff] %v36696_v16  ;;  %39588 = vst [vmem:[#allocation169_spill] sm:$0xff] %v36698_v48  ;;  %31810 = vmatpush3.msra.mxu1 %v39524_v51  ;;  %31768 = vmatprep.subr.mxu0 %v39593_v52  ;;  %v27036_v52 = vsub.f32 %v36642_v41, %v36681_v17  ;;  %v36731_v51 = vand.u32 4294901760, %v36684_v44  ;;  %v36734_v43 = vsub.f32 %v25893_v22, %v36686_v53  ;;  %v39605_v41 = vld [vmem:[#allocation88_spill] sm:$0xff] }
 0x54f   :  { %39590 = vst [vmem:[#allocation170_spill] sm:$0xff] %v36705_v61  ;;  %39591 = vst [vmem:[#allocation171_spill] sm:$0xff] %v36708_v55  ;;  %31811 = vmatprep.subr.mxu1 %v39526_v8  ;;  %31769 = vmatpush3.msra.mxu0 %v39598_v29  ;;  %v26924_v20 = vsub.f32 %v36651_v37, %v36693_v23  ;;  %v36741_v8 = vand.u32 4294901760, %v36696_v16  ;;  %v36744_v29 = vsub.f32 %v25877_v1, %v36698_v48  ;;  %v39609_v1 = vld [vmem:[#allocation92_spill] sm:$0xff] }
 0x550   :  { %39592 = vst [vmem:[#allocation172_spill] sm:$0xff] %v36710_v45  ;;  %39594 = vst [vmem:[#allocation173_spill] sm:$0xff] %v36717_v25  ;;  %31812 = vmatpush3.msra.mxu1 %v39528_v46  ;;  %31770 = vmatprep.subr.mxu0 %v39601_v11  ;;  %v36746_v17 = vand.u32 4294901760, %v25891_v2  ;;  %v36750_v22 = vand.u32 4294901760, %v27029_v14  ;;  %v27043_v11 = vsub.f32 %v36661_v10, %v36705_v61  ;;  %v36755_v46 = vand.u32 4294901760, %v36708_v55  ;;  %v25875_v61 = vld [vmem:[#allocation2 + $0x138] sm:$0xff] }
 0x551   :  { %39595 = vst [vmem:[#allocation174_spill] sm:$0xff] %v36720_v4  ;;  %39596 = vst [vmem:[#allocation175_spill] sm:$0xff] %v36722_v31  ;;  %31813 = vmatprep.subr.mxu1 %v39530_v5  ;;  %31771 = vmatpush3.msra.mxu0 %v39605_v41  ;;  %v36758_v23 = vsub.f32 %v25892_v6, %v36710_v45  ;;  %v36762_v37 = vand.u32 4294901760, %v26917_v35  ;;  %v26931_v41 = vsub.f32 %v36673_v33, %v36717_v25  ;;  %v39614_v6 = vld [vmem:[#allocation93_spill] sm:$0xff] }
 0x552   :  { %39597 = vst [vmem:[#allocation176_spill] sm:$0xff] %v36724_v40  ;;  %39599 = vst [vmem:[#allocation177_spill] sm:$0xff] %v36731_v51  ;;  %31814 = vmatpush3.msra.mxu1 %v39532_v34  ;;  %31772 = vmatprep.subr.mxu0 %v39609_v1  ;;  %v36767_v14 = vand.u32 4294901760, %v36720_v4  ;;  %v36770_v5 = vsub.f32 %v25876_v0, %v36722_v31  ;;  %v36773_v10 = vsub.f32 %v25833_v27, %v36724_v40  ;;  %v25890_v25 = vld [vmem:[#allocation2 + $0x1b0] sm:$0xff]  ;;  %v39617_v0 = vld [vmem:[#allocation98_spill] sm:$0xff] }
 0x553   :  { %39600 = vst [vmem:[#allocation178_spill] sm:$0xff] %v36734_v43  ;;  %39602 = vst [vmem:[#allocation179_spill] sm:$0xff] %v36741_v8  ;;  %31815 = vmatprep.subr.mxu1 %v36324_v59  ;;  %31773 = vmatpush3.msra.mxu0 %v39614_v6  ;;  %v36777_v1 = vand.u32 4294901760, %v27036_v52  ;;  %v27050_v35 = vsub.f32 %v36684_v44, %v36731_v51  ;;  %v36782_v34 = vand.u32 4294901760, %v36734_v43  ;;  %v36786_v33 = vand.u32 4294901760, %v26924_v20  ;;  %v39621_v59 = vld [vmem:[#allocation99_spill] sm:$0xff] }
 0x554   :  { %39603 = vst [vmem:[#allocation180_spill] sm:$0xff] %v36744_v29  ;;  %39604 = vst [vmem:[#allocation181_spill] sm:$0xff] %v36746_v17  ;;  %31816 = vmatpush3.msra.mxu1 %v36326_v47  ;;  %31774 = vmatprep.subr.mxu0 %v39617_v0  ;;  %v26938_v27 = vsub.f32 %v36696_v16, %v36741_v8  ;;  %v36791_v6 = vand.u32 4294901760, %v36744_v29  ;;  %v36794_v52 = vsub.f32 %v25891_v2, %v36746_v17  ;;  %v25874_v8 = vld [vmem:[#allocation2 + $0x130] sm:$0xff]  ;;  %v39625_v16 = vld [vmem:[#allocation110_spill] sm:$0xff] }
 0x555   :  { %39606 = vst [vmem:[#allocation182_spill] sm:$0xff] %v36750_v22  ;;  %39607 = vst [vmem:[#allocation183_spill] sm:$0xff] %v36755_v46  ;;  %31817 = vmatprep.subr.mxu1 %v36365_v32  ;;  %31775 = vmatpush3.msra.mxu0 %v39621_v59  ;;  %v36798_v51 = vand.u32 4294901760, %v27043_v11  ;;  %v27057_v0 = vsub.f32 %v36708_v55, %v36755_v46  ;;  %v36803_v20 = vand.u32 4294901760, %v36758_v23  ;;  %v36805_v47 = vand.u32 4294901760, %v25875_v61  ;;  %v25889_v46 = vld [vmem:[#allocation2 + $0x1a8] sm:$0xff] }
 0x556   :  { %39608 = vst [vmem:[#allocation184_spill] sm:$0xff] %v36758_v23  ;;  %39610 = vst [vmem:[#allocation185_spill] sm:$0xff] %v36762_v37  ;;  %31818 = vmatpush3.msra.mxu1 %v36374_v60  ;;  %31776 = vmatprep.subr.mxu0 %v39625_v16  ;;  %v36809_v2 = vand.u32 4294901760, %v26931_v41  ;;  %v26945_v59 = vsub.f32 %v36720_v4, %v36767_v14  ;;  %v36814_v11 = vand.u32 4294901760, %v36770_v5  ;;  %v36816_v32 = vand.u32 4294901760, %v25890_v25  ;;  %v39630_v4 = vld [vmem:[#allocation112_spill] sm:$0xff] }
 0x557   :  { %39611 = vst [vmem:[#allocation186_spill] sm:$0xff] %v36767_v14  ;;  %39612 = vst [vmem:[#allocation187_spill] sm:$0xff] %v36770_v5  ;;  %v25056_v55 = vadd.f32 %v36546_v36, %v36536_v50  ;;  %26789 = vmatmul.mubr.f32.vlgmr.msra.gmra.mxu1 %v36485_v19  ;;  %31857 = vmatprep.subr.mxu1 %v36667_v57  ;;  %v36822_v60 = vand.u32 4294901760, %v27050_v35  ;;  %v27064_v16 = vsub.f32 %v36734_v43, %v36782_v34  ;;  %v25873_v14 = vld [vmem:[#allocation2 + $0x128] sm:$0xff]  ;;  %v25888_v57 = vld [vmem:[#allocation2 + $0x1a0] sm:$0xff] }
 0x558   :  { %39613 = vst [vmem:[#allocation188_spill] sm:$0xff] %v36773_v10  ;;  %39615 = vst [vmem:[#allocation189_spill] sm:$0xff] %v36777_v1  ;;  %31777 = vmatpush3.msra.mxu0 %v39630_v4  ;;  %31858 = vmatpush3.msra.mxu1 %v36690_v63  ;;  %v36829_v44 = vand.u32 4294901760, %v26938_v27  ;;  %v26952_v36 = vsub.f32 %v36744_v29, %v36791_v6  ;;  %v36834_v50 = vand.u32 4294901760, %v36794_v52  ;;  %v36836_v35 = vand.u32 4294901760, %v25874_v8  ;;  %v39634_v41 = vld [vmem:[#allocation116_spill] sm:$0xff] }
 0x559   :  { %39616 = vst [vmem:[#allocation190_spill] sm:$0xff] %v36782_v34  ;;  %39618 = vst [vmem:[#allocation191_spill] sm:$0xff] %v36786_v33  ;;  %27131 = vmatprep.mubr.f32.mxu1 %v36724_v40  ;;  %31778 = vmatprep.subr.mxu0 %v39634_v41  ;;  %v36840_v34 = vand.u32 4294901760, %v27057_v0  ;;  %v27071_v63 = vsub.f32 %v36758_v23, %v36803_v20  ;;  %v36845_v27 = vsub.f32 %v25875_v61, %v36805_v47  ;;  %v39638_v29 = vld [vmem:[#allocation117_spill] sm:$0xff] }
 0x55a   :  { %39619 = vst [vmem:[#allocation192_spill] sm:$0xff] %v36791_v6  ;;  %39620 = vst [vmem:[#allocation193_spill] sm:$0xff] %v36794_v52  ;;  %v36847_v4 = vand.u32 4294901760, %v25889_v46  ;;  %v25872_v6 = vld [vmem:[#allocation2 + $0x120] sm:$0xff]  ;;  %31859 = vmatprep.subr.mxu1 %v36750_v22  ;;  %31779 = vmatpush3.msra.mxu0 %v39638_v29  ;;  %v36851_v43 = vand.u32 4294901760, %v26945_v59  ;;  %v26959_v41 = vsub.f32 %v36770_v5, %v36814_v11  ;;  %v36858_v40 = vand.u32 4294901760, %v25873_v14 }
 0x55b   :  { %39622 = vst [vmem:[#allocation194_spill] sm:$0xff] %v36798_v51  ;;  %39623 = vst [vmem:[#allocation195_spill] sm:$0xff] %v36803_v20  ;;  %v36856_v0 = vsub.f32 %v25890_v25, %v36816_v32  ;;  %v25887_v20 = vld [vmem:[#allocation2 + $0x198] sm:$0xff]  ;;  %v25133_v61 = vadd.f32 %v36556_v9, %v25056_v55  ;;  %31860 = vmatpush3.msra.mxu1 %v36762_v37  ;;  %31780 = vmatprep.subr.mxu0 %v36357_v62  ;;  %v39642_v22 = vand.u32 4294901760, %v36773_v10  ;;  %v39645_v25 = vld [vmem:[#allocation123_spill] sm:$0xff] }
 0x55c   :  { %39624 = vst [vmem:[#allocation196_spill] sm:$0xff] %v36805_v47  ;;  %39626 = vst [vmem:[#allocation197_spill] sm:$0xff] %v36809_v2  ;;  %v36866_v29 = vand.u32 4294901760, %v27064_v16  ;;  %v36868_v23 = vand.u32 4294901760, %v25888_v57  ;;  %31861 = vmatprep.subr.mxu1 %v36777_v1  ;;  %31781 = vmatpush3.msra.mxu0 %v39645_v25  ;;  %v36872_v5 = vand.u32 4294901760, %v26952_v36  ;;  %v27078_v9 = vsub.f32 %v36794_v52, %v36834_v50  ;;  %v25870_v62 = vld [vmem:[#allocation2 + $0x110] sm:$0xff] }
 0x55d   :  { %39627 = vst [vmem:[#allocation198_spill] sm:$0xff] %v36814_v11  ;;  %39628 = vst [vmem:[#allocation199_spill] sm:$0xff] %v36816_v32  ;;  %v26893_v59 = vsub.f32 %v36773_v10, %v39642_v22  ;;  %v25871_v11 = vld [vmem:[#allocation2 + $0x118] sm:$0xff]  ;;  %v36877_v55 = vsub.f32 %v25874_v8, %v36836_v35  ;;  %v36879_v37 = vand.u32 4294901760, %v25872_v6  ;;  %v25886_v22 = vld [vmem:[#allocation2 + $0x190] sm:$0xff]  ;;  %31862 = vmatpush3.msra.mxu1 %v36786_v33  ;;  %31782 = vmatprep.subr.mxu0 %v36397_v39 }
 0x55e   :  { %39629 = vst [vmem:[#allocation200_spill] sm:$0xff] %v36822_v60  ;;  %39631 = vst [vmem:[#allocation201_spill] sm:$0xff] %v36829_v44  ;;  %v36883_v16 = vand.u32 4294901760, %v27071_v63  ;;  %v36886_v1 = vand.u32 4294901760, %v36845_v27  ;;  %v36889_v36 = vsub.f32 %v25889_v46, %v36847_v4  ;;  %v36891_v25 = vand.u32 4294901760, %v25887_v20  ;;  %31863 = vmatprep.subr.mxu1 %v36798_v51  ;;  %31783 = vmatpush3.msra.mxu0 %v36404_v18  ;;  %v25869_v52 = vld [vmem:[#allocation2 + $0x108] sm:$0xff] }
 0x55f   :  { %39632 = vst [vmem:[#allocation202_spill] sm:$0xff] %v36834_v50  ;;  %39633 = vst [vmem:[#allocation203_spill] sm:$0xff] %v36836_v35  ;;  %v36895_v8 = vand.u32 4294901760, %v26959_v41  ;;  %v36898_v33 = vand.u32 4294901760, %v36856_v0  ;;  %v36901_v63 = vsub.f32 %v25873_v14, %v36858_v40  ;;  %v36903_v39 = vand.u32 4294901760, %v25871_v11  ;;  %v25885_v50 = vld [vmem:[#allocation2 + $0x188] sm:$0xff]  ;;  %31864 = vmatpush3.msra.mxu1 %v36809_v2  ;;  %26685 = vmatmul.mubr.f32.vlgmr.msra.gmra.mxu0 %v36485_v19 }
 0x560   :  { %39635 = vst [vmem:[#allocation204_spill] sm:$0xff] %v36840_v34  ;;  %39636 = vst [vmem:[#allocation205_spill] sm:$0xff] %v36845_v27  ;;  %v25209_v46 = vadd.f32 %v36567_v26, %v25133_v61  ;;  %v26894_v51 = vand.u32 4294901760, %v26893_v59  ;;  %v36909_v18 = vsub.f32 %v25888_v57, %v36868_v23  ;;  %v36911_v41 = vand.u32 4294901760, %v25886_v22  ;;  %31822 = vmatprep.subr.mxu0 %v36575_v54  ;;  %v25884_v61 = vld [vmem:[#allocation2 + $0x180] sm:$0xff] }
 0x561   :  { %39637 = vst [vmem:[#allocation206_spill] sm:$0xff] %v36847_v4  ;;  %39639 = vst [vmem:[#allocation207_spill] sm:$0xff] %v36851_v43  ;;  %31865 = vmatprep.subr.mxu1 %v36822_v60  ;;  %v36915_v14 = vand.u32 4294901760, %v27078_v9  ;;  %v36918_v10 = vand.u32 4294901760, %v36877_v55  ;;  %v36921_v26 = vsub.f32 %v25872_v6, %v36879_v37  ;;  %v36923_v19 = vand.u32 4294901760, %v25870_v62  ;;  %31823 = vmatpush3.msra.mxu0 %v36583_v56  ;;  %v25868_v2 = vld [vmem:[#allocation2 + $0x100] sm:$0xff] }
 0x562   :  { %39640 = vst [vmem:[#allocation208_spill] sm:$0xff] %v36856_v0  ;;  %39641 = vst [vmem:[#allocation209_spill] sm:$0xff] %v36858_v40  ;;  %26895 = vmatprep.mubr.f32.mxu0 %v26894_v51  ;;  %v26966_v57 = vsub.f32 %v36845_v27, %v36886_v1  ;;  %v36929_v59 = vand.u32 4294901760, %v36889_v36  ;;  %v36932_v9 = vsub.f32 %v25887_v20, %v36891_v25  ;;  %v36934_v60 = vand.u32 4294901760, %v25885_v50 }
 0x563   :  { %39643 = vst [vmem:[#allocation210_spill] sm:$0xff] %v36866_v29  ;;  %39644 = vst [vmem:[#allocation211_spill] sm:$0xff] %v36868_v23  ;;  %31866 = vmatpush3.msra.mxu1 %v36829_v44  ;;  %31824 = vmatprep.subr.mxu0 %v36603_v28  ;;  %v27085_v6 = vsub.f32 %v36856_v0, %v36898_v33  ;;  %v36941_v51 = vand.u32 4294901760, %v36901_v63  ;;  %v36946_v27 = vand.u32 4294901760, %v25869_v52  ;;  %v36952_v44 = vand.u32 4294901760, %v36909_v18 }
 0x564   :  { %39646 = vst [vmem:[#allocation212_spill] sm:$0xff] %v36872_v5  ;;  %39647 = vst [vmem:[#allocation213_spill] sm:$0xff] %v36877_v55  ;;  %v25287_v20 = vadd.f32 %v36579_v13, %v25209_v46  ;;  %31867 = vmatprep.subr.mxu1 %v36840_v34  ;;  %31825 = vmatpush3.msra.mxu0 %v36610_v38  ;;  %v36955_v28 = vsub.f32 %v25886_v22, %v36911_v41  ;;  %v36964_v13 = vand.u32 4294901760, %v36921_v26 }
 0x565   :  { %39648 = vst [vmem:[#allocation214_spill] sm:$0xff] %v36879_v37  ;;  %39649 = vst [vmem:[#allocation215_spill] sm:$0xff] %v36883_v16  ;;  %31868 = vmatpush3.msra.mxu1 %v36851_v43  ;;  %31826 = vmatprep.subr.mxu0 %v36614_v21  ;;  %v36967_v46 = vsub.f32 %v25870_v62, %v36923_v19  ;;  %v36969_v34 = vand.u32 4294901760, %v25868_v2  ;;  %v36973_v22 = vand.u32 4294901760, %v26966_v57  ;;  %v36978_v0 = vand.u32 4294901760, %v36932_v9 }
 0x566   :  { %39650 = vst [vmem:[#allocation216_spill] sm:$0xff] %v36886_v1  ;;  %39651 = vst [vmem:[#allocation217_spill] sm:$0xff] %v36889_v36  ;;  %v36944_v1 = vsub.f32 %v25871_v11, %v36903_v39  ;;  %v26973_v11 = vsub.f32 %v36877_v55, %v36918_v10  ;;  %31869 = vmatprep.subr.mxu1 %v36866_v29  ;;  %31827 = vmatpush3.msra.mxu0 %v36621_v7  ;;  %v36985_v62 = vand.u32 4294901760, %v27085_v6 }
 0x567   :  { %39652 = vst [vmem:[#allocation218_spill] sm:$0xff] %v36891_v25  ;;  %39653 = vst [vmem:[#allocation219_spill] sm:$0xff] %v36895_v8  ;;  %v27092_v43 = vsub.f32 %v36889_v36, %v36929_v59  ;;  %31870 = vmatpush3.msra.mxu1 %v36872_v5  ;;  %31828 = vmatprep.subr.mxu0 %v36628_v42  ;;  %v26980_v29 = vsub.f32 %v36901_v63, %v36941_v51  ;;  %v37001_v6 = vand.u32 4294901760, %v36955_v28 }
 0x568   :  { %39654 = vst [vmem:[#allocation220_spill] sm:$0xff] %v36898_v33  ;;  %39655 = vst [vmem:[#allocation221_spill] sm:$0xff] %v36901_v63  ;;  %v36957_v33 = vand.u32 4294901760, %v25884_v61  ;;  %v36990_v57 = vand.u32 4294901760, %v36944_v1  ;;  %v25361_v36 = vadd.f32 %v36594_v58, %v25287_v20  ;;  %31871 = vmatprep.subr.mxu1 %v36883_v16  ;;  %31829 = vmatpush3.msra.mxu0 %v36637_v3  ;;  %v37013_v20 = vand.u32 4294901760, %v36967_v46 }
 0x569   :  { %39656 = vst [vmem:[#allocation222_spill] sm:$0xff] %v36903_v39  ;;  %39657 = vst [vmem:[#allocation223_spill] sm:$0xff] %v36909_v18  ;;  %31872 = vmatpush3.msra.mxu1 %v36895_v8  ;;  %31830 = vmatprep.subr.mxu0 %v36644_v30  ;;  %v26987_v58 = vsub.f32 %v36921_v26, %v36964_v13  ;;  %v37016_v16 = vsub.f32 %v25868_v2, %v36969_v34 }
 0x56a   :  { %39658 = vst [vmem:[#allocation224_spill] sm:$0xff] %v36911_v41  ;;  %39659 = vst [vmem:[#allocation225_spill] sm:$0xff] %v36915_v14  ;;  %v37004_v5 = vsub.f32 %v25884_v61, %v36957_v33  ;;  %31873 = vmatprep.subr.mxu1 %v36915_v14  ;;  %31831 = vmatpush3.msra.mxu0 %v36653_v49  ;;  %v37020_v61 = vand.u32 4294901760, %v27092_v43  ;;  %v27106_v8 = vsub.f32 %v36932_v9, %v36978_v0 }
 0x56b   :  { %39660 = vst [vmem:[#allocation226_spill] sm:$0xff] %v36918_v10  ;;  %39661 = vst [vmem:[#allocation227_spill] sm:$0xff] %v36921_v26  ;;  %v36981_v10 = vsub.f32 %v25885_v50, %v36934_v60  ;;  %v27099_v50 = vsub.f32 %v36909_v18, %v36952_v44  ;;  %31874 = vmatpush3.msra.mxu1 %v36973_v22  ;;  %31832 = vmatprep.subr.mxu0 %v36663_v24 }
 0x56c   :  { %39662 = vst [vmem:[#allocation228_spill] sm:$0xff] %v36923_v19  ;;  %39663 = vst [vmem:[#allocation229_spill] sm:$0xff] %v36929_v59  ;;  %v36993_v59 = vsub.f32 %v25869_v52, %v36946_v27  ;;  %v37008_v52 = vand.u32 4294901760, %v26973_v11  ;;  %v26994_v2 = vsub.f32 %v36944_v1, %v36990_v57  ;;  %v25832_v43 = vadd.f32 %v25361_v36, %v36469_v12 }
 0x56d   :  { %39664 = vst [vmem:[#allocation230_spill] sm:$0xff] %v36932_v9  ;;  %39665 = vst [vmem:[#allocation231_spill] sm:$0xff] %v36934_v60  ;;  %v37025_v11 = vand.u32 4294901760, %v36981_v10  ;;  %31875 = vmatprep.subr.mxu1 %v36985_v62  ;;  %31833 = vmatpush3.msra.mxu0 %v36675_v15  ;;  %v27001_v12 = vsub.f32 %v36967_v46, %v37013_v20  ;;  %v37053_v36 = vand.u32 4294901760, %v37016_v16 }
 0x56e   :  { %39666 = vst [vmem:[#allocation232_spill] sm:$0xff] %v36941_v51  ;;  %39667 = vst [vmem:[#allocation233_spill] sm:$0xff] %v36944_v1  ;;  %v37034_v14 = vand.u32 4294901760, %v36993_v59  ;;  %31876 = vmatpush3.msra.mxu1 %v37008_v52  ;;  %31834 = vmatprep.subr.mxu0 %v36686_v53 }
 0x56f   :  { %39668 = vst [vmem:[#allocation234_spill] sm:$0xff] %v36946_v27  ;;  %39669 = vst [vmem:[#allocation235_spill] sm:$0xff] %v36952_v44  ;;  %31877 = vmatprep.subr.mxu1 %v37020_v61  ;;  %31835 = vmatpush3.msra.mxu0 %v36698_v48 }
 0x570   :  { %39670 = vst [vmem:[#allocation236_spill] sm:$0xff] %v36955_v28  ;;  %39671 = vst [vmem:[#allocation237_spill] sm:$0xff] %v36957_v33  ;;  %31836 = vmatprep.subr.mxu0 %v36710_v45 }
 0x571   :  { %39672 = vst [vmem:[#allocation238_spill] sm:$0xff] %v36964_v13  ;;  %39673 = vst [vmem:[#allocation239_spill] sm:$0xff] %v36967_v46  ;;  %v37029_v13 = vand.u32 4294901760, %v26980_v29  ;;  %v37044_v29 = vand.u32 4294901760, %v37004_v5  ;;  %31837 = vmatpush3.msra.mxu0 %v36722_v31 }
 0x572   :  { %39674 = vst [vmem:[#allocation240_spill] sm:$0xff] %v36969_v34  ;;  %39675 = vst [vmem:[#allocation241_spill] sm:$0xff] %v36973_v22  ;;  %v27113_v22 = vsub.f32 %v36955_v28, %v37001_v6  ;;  %31838 = vmatprep.subr.mxu0 %v36746_v17 }
 0x573   :  { %39676 = vst [vmem:[#allocation242_spill] sm:$0xff] %v36978_v0  ;;  %39677 = vst [vmem:[#allocation243_spill] sm:$0xff] %v36981_v10  ;;  %v37039_v0 = vand.u32 4294901760, %v27099_v50  ;;  %v37057_v50 = vand.u32 4294901760, %v27106_v8  ;;  %31878 = vmatpush3.msra.mxu1 %v37029_v13  ;;  %31839 = vmatpush3.msra.mxu0 %v36805_v47 }
 0x574   :  { %39678 = vst [vmem:[#allocation244_spill] sm:$0xff] %v36985_v62  ;;  %39679 = vst [vmem:[#allocation245_spill] sm:$0xff] %v36990_v57  ;;  %v37048_v57 = vand.u32 4294901760, %v26987_v58  ;;  %v27120_v62 = vsub.f32 %v36981_v10, %v37025_v11  ;;  %v37063_v58 = vand.u32 4294901760, %v26994_v2  ;;  %v37071_v8 = vand.u32 4294901760, %v27113_v22  ;;  %31840 = vmatprep.subr.mxu0 %v36816_v32 }
 0x575   :  { %39680 = vst [vmem:[#allocation246_spill] sm:$0xff] %v36993_v59  ;;  %39681 = vst [vmem:[#allocation247_spill] sm:$0xff] %v37001_v6  ;;  %31879 = vmatprep.subr.mxu1 %v37039_v0  ;;  %v37077_v2 = vand.u32 4294901760, %v27001_v12  ;;  %31841 = vmatpush3.msra.mxu0 %v36836_v35 }
 0x576   :  { %39682 = vst [vmem:[#allocation248_spill] sm:$0xff] %v37004_v5  ;;  %39683 = vst [vmem:[#allocation249_spill] sm:$0xff] %v37008_v52  ;;  %v27008_v52 = vsub.f32 %v36993_v59, %v37034_v14  ;;  %31880 = vmatpush3.msra.mxu1 %v37048_v57  ;;  %31842 = vmatprep.subr.mxu0 %v36847_v4 }
 0x577   :  { %39684 = vst [vmem:[#allocation250_spill] sm:$0xff] %v37013_v20  ;;  %39685 = vst [vmem:[#allocation251_spill] sm:$0xff] %v37016_v16  ;;  %v37067_v20 = vand.u32 4294901760, %v25832_v43  ;;  %31881 = vmatprep.subr.mxu1 %v37057_v50  ;;  %31843 = vmatpush3.msra.mxu0 %v36858_v40 }
 0x578   :  { %39686 = vst [vmem:[#allocation252_spill] sm:$0xff] %v37020_v61  ;;  %39687 = vst [vmem:[#allocation253_spill] sm:$0xff] %v37025_v11  ;;  %v27127_v61 = vsub.f32 %v37004_v5, %v37044_v29  ;;  %31882 = vmatpush3.msra.mxu1 %v37063_v58  ;;  %v37087_v22 = vand.u32 4294901760, %v27008_v52  ;;  %31844 = vmatprep.subr.mxu0 %v36868_v23  ;;  %v39722_v11 = vld [vmem:[#allocation205_spill] sm:$0xff] }
 0x579   :  { %39688 = vst [vmem:[#allocation254_spill] sm:$0xff] %v37029_v13  ;;  %39689 = vst [vmem:[#allocation255_spill] sm:$0xff] %v37034_v14  ;;  %v27015_v13 = vsub.f32 %v37016_v16, %v37053_v36  ;;  %31883 = vmatprep.subr.mxu1 %v37071_v8  ;;  %31845 = vmatpush3.msra.mxu0 %v36879_v37  ;;  %v39718_v14 = vld [vmem:[#allocation180_spill] sm:$0xff] }
 0x57a   :  { %39690 = vst [vmem:[#allocation256_spill] sm:$0xff] %v37039_v0  ;;  %39691 = vst [vmem:[#allocation257_spill] sm:$0xff] %v37044_v29  ;;  %v37083_v0 = vand.u32 4294901760, %v27120_v62  ;;  %v37094_v12 = vand.u32 4294901760, %v27127_v61  ;;  %31884 = vmatpush3.msra.mxu1 %v37077_v2  ;;  %31846 = vmatprep.subr.mxu0 %v36891_v25  ;;  %v39702_v61 = vld [vmem:[#allocation188_spill] sm:$0xff] }
 0x57b   :  { %39692 = vst [vmem:[#allocation258_spill] sm:$0xff] %v37048_v57  ;;  %39693 = vst [vmem:[#allocation259_spill] sm:$0xff] %v37053_v36  ;;  %v37090_v57 = vsub.f32 %v25832_v43, %v37067_v20  ;;  %v37098_v62 = vand.u32 4294901760, %v27015_v13  ;;  %31847 = vmatpush3.msra.mxu0 %v36903_v39  ;;  %v39703_v43 = vand.u32 4294901760, %v39702_v61  ;;  %v39714_v29 = vld [vmem:[#allocation168_spill] sm:$0xff] }
 0x57c   :  { %39694 = vst [vmem:[#allocation260_spill] sm:$0xff] %v37057_v50  ;;  %39695 = vst [vmem:[#allocation261_spill] sm:$0xff] %v37063_v58  ;;  %31885 = vmatprep.subr.mxu1 %v37083_v0  ;;  %31848 = vmatprep.subr.mxu0 %v36911_v41  ;;  %v39713_v50 = vld [vmem:[#allocation164_spill] sm:$0xff] }
 0x57d   :  { %39696 = vst [vmem:[#allocation262_spill] sm:$0xff] %v37071_v8  ;;  %39697 = vst [vmem:[#allocation263_spill] sm:$0xff] %v37077_v2  ;;  %31886 = vmatpush3.msra.mxu1 %v37087_v22  ;;  %v38978_v52 = vand.u32 4294901760, %v37090_v57  ;;  %31849 = vmatpush3.msra.mxu0 %v36923_v19  ;;  %v39707_v2 = vld [vmem:[#allocation148_spill] sm:$0xff]  ;;  %v39708_v8 = vld [vmem:[#allocation150_spill] sm:$0xff] }
 0x57e   :  { %39698 = vst [vmem:[#allocation264_spill] sm:$0xff] %v37083_v0  ;;  %39699 = vst [vmem:[#allocation265_spill] sm:$0xff] %v37087_v22  ;;  %31887 = vmatprep.subr.mxu1 %v37094_v12  ;;  %31850 = vmatprep.subr.mxu0 %v36934_v60  ;;  %v37125_v22 = vpop.f32.mrf.mxu0  ;;  %v37134_v0 = vpop.f32.mrf.mxu1 }
 0x57f   :  { %39700 = vst [vmem:[#allocation266_spill] sm:$0xff] %v37094_v12  ;;  %39701 = vst [vmem:[#allocation267_spill] sm:$0xff] %v37098_v62  ;;  %31888 = vmatpush3.msra.mxu1 %v37098_v62  ;;  %v26899_v13 = vsub.f32 %v37090_v57, %v38978_v52  ;;  %v39704_v62 = vld [vmem:[#allocation142_spill] sm:$0xff]  ;;  %31851 = vmatpush3.msra.mxu0 %v36946_v27 }
 0x580   :  { %27133 = vmatmul.mubr.f32.vlgmr.msra.gmra.mxu1 %v37067_v20  ;;  %31927 = vmatprep.subr.mxu1 %v36575_v54  ;;  %v25440_v52 = vpop.f32.mrf.mxu0 }
 0x581   :  { %31928 = vmatpush3.msra.mxu1 %v36583_v56  ;;  %27375 = vmatprep.mubr.f32.mxu1 %v39703_v43  ;;  %v26900_v12 = vand.u32 4294901760, %v26899_v13  ;;  %v39705_v43 = vld [vmem:[#allocation140_spill] sm:$0xff]  ;;  %v39706_v13 = vld [vmem:[#allocation141_spill] sm:$0xff] }
 0x582   :  { %31929 = vmatprep.subr.mxu1 %v39704_v62  ;;  %31852 = vmatprep.subr.mxu0 %v36957_v33  ;;  %v37144_v58 = vpop.f32.mrf.mxu0 }
 0x583   :  { %31930 = vmatpush3.msra.mxu1 %v36610_v38  ;;  %31853 = vmatpush3.msra.mxu0 %v36969_v34 }
 0x584   :  { %31931 = vmatprep.subr.mxu1 %v36614_v21  ;;  %26901 = vmatmul.mubr.f32.vlgmr.msra.gmra.mxu0 %v26900_v12  ;;  %v39709_v12 = vld [vmem:[#allocation152_spill] sm:$0xff] }
 0x585   :  { %31932 = vmatpush3.msra.mxu1 %v36621_v7  ;;  %31892 = vmatprep.subr.mxu0 %v39705_v43  ;;  %v25522_v43 = vpop.f32.mrf.mxu1 }
 0x586   :  { %31933 = vmatprep.subr.mxu1 %v36628_v42  ;;  %31893 = vmatpush3.msra.mxu0 %v39706_v13  ;;  %v39710_v13 = vld [vmem:[#allocation154_spill] sm:$0xff] }
 0x587   :  { %31934 = vmatpush3.msra.mxu1 %v36637_v3  ;;  %27268 = vmatprep.mubr.f32.mxu0 %v39702_v61  ;;  %v39711_v61 = vld [vmem:[#allocation157_spill] sm:$0xff]  ;;  %v37154_v36 = vpop.f32.mrf.mxu1 }
 0x588   :  { %31935 = vmatprep.subr.mxu1 %v36644_v30  ;;  %31894 = vmatprep.subr.mxu0 %v39707_v2  ;;  %v39712_v2 = vld [vmem:[#allocation161_spill] sm:$0xff] }
 0x589   :  { %31936 = vmatpush3.msra.mxu1 %v36653_v49  ;;  %31895 = vmatpush3.msra.mxu0 %v39708_v8  ;;  %v25523_v8 = vadd.f32 %v25522_v43, %v25440_v52  ;;  %v39717_v43 = vld [vmem:[#allocation178_spill] sm:$0xff] }
 0x58a   :  { %31937 = vmatprep.subr.mxu1 %v36663_v24  ;;  %31896 = vmatprep.subr.mxu0 %v39709_v12  ;;  %v25599_v12 = vpop.f32.mrf.mxu0 }
 0x58b   :  { %31938 = vmatpush3.msra.mxu1 %v36675_v15  ;;  %31897 = vmatpush3.msra.mxu0 %v39710_v13  ;;  %v39715_v13 = vld [vmem:[#allocation171_spill] sm:$0xff]  ;;  %v25600_v52 = vadd.f32 %v25599_v12, %v25523_v8  ;;  %v39721_v12 = vld [vmem:[#allocation193_spill] sm:$0xff] }
 0x58c   :  { %31939 = vmatprep.subr.mxu1 %v36686_v53  ;;  %31898 = vmatprep.subr.mxu0 %v39711_v61  ;;  %v39716_v61 = vld [vmem:[#allocation174_spill] sm:$0xff] }
 0x58d   :  { %31940 = vmatpush3.msra.mxu1 %v36698_v48  ;;  %31899 = vmatpush3.msra.mxu0 %v39712_v2  ;;  %v37164_v2 = vpop.f32.mrf.mxu0 }
 0x58e   :  { %31941 = vmatprep.subr.mxu1 %v36710_v45  ;;  %31900 = vmatprep.subr.mxu0 %v39713_v50  ;;  %v25675_v50 = vpop.f32.mrf.mxu1 }
 0x58f   :  { %31942 = vmatpush3.msra.mxu1 %v36722_v31  ;;  %31901 = vmatpush3.msra.mxu0 %v39714_v29  ;;  %v39719_v29 = vld [vmem:[#allocation184_spill] sm:$0xff]  ;;  %v25676_v8 = vadd.f32 %v25675_v50, %v25600_v52  ;;  %v39724_v52 = vld [vmem:[#allocation217_spill] sm:$0xff] }
 0x590   :  { %31943 = vmatprep.subr.mxu1 %v36746_v17  ;;  %31902 = vmatprep.subr.mxu0 %v39715_v13  ;;  %v39720_v13 = vld [vmem:[#allocation187_spill] sm:$0xff] }
 0x591   :  { %31944 = vmatpush3.msra.mxu1 %v36805_v47  ;;  %31903 = vmatpush3.msra.mxu0 %v39716_v61  ;;  %v37174_v61 = vpop.f32.mrf.mxu1 }
 0x592   :  { %31945 = vmatprep.subr.mxu1 %v36816_v32  ;;  %31904 = vmatprep.subr.mxu0 %v39717_v43  ;;  %v25753_v43 = vpop.f32.mrf.mxu0 }
 0x593   :  { %31946 = vmatpush3.msra.mxu1 %v36836_v35  ;;  %31905 = vmatpush3.msra.mxu0 %v39718_v14  ;;  %v39723_v14 = vld [vmem:[#allocation208_spill] sm:$0xff]  ;;  %v25754_v50 = vadd.f32 %v25753_v43, %v25676_v8  ;;  %v39725_v43 = vand.u32 4294901760, %v37090_v57 }
 0x594   :  { %31947 = vmatprep.subr.mxu1 %v36847_v4  ;;  %31906 = vmatprep.subr.mxu0 %v39719_v29  ;;  %v39726_v8 = vld [vmem:[#allocation176_spill] sm:$0xff] }
 0x595   :  { %31948 = vmatpush3.msra.mxu1 %v36858_v40  ;;  %31907 = vmatpush3.msra.mxu0 %v39720_v13  ;;  %v25911_v13 = vld [vmem:[#allocation2 + $0x258] sm:$0xff] }
 0x596   :  { %31949 = vmatprep.subr.mxu1 %v36868_v23  ;;  %31908 = vmatprep.subr.mxu0 %v39721_v12  ;;  %v25827_v12 = vpop.f32.mrf.mxu1 }
 0x597   :  { %31950 = vmatpush3.msra.mxu1 %v36879_v37  ;;  %31909 = vmatpush3.msra.mxu0 %v39722_v11 }
 0x598   :  { %31951 = vmatprep.subr.mxu1 %v36891_v25  ;;  %31910 = vmatprep.subr.mxu0 %v39723_v14  ;;  %v25828_v14 = vadd.f32 %v25827_v12, %v25754_v50  ;;  %v25521_v12 = vadd.f32 %v37134_v0, %v37125_v22  ;;  %v25931_v50 = vld [vmem:[#allocation2 + $0x2f8] sm:$0xff] }
 0x599   :  { %31952 = vmatpush3.msra.mxu1 %v36903_v39  ;;  %31911 = vmatpush3.msra.mxu0 %v36877_v55  ;;  %v39730_v22 = vld [vmem:[#allocation146_spill] sm:$0xff] }
 0x59a   :  { %31953 = vmatprep.subr.mxu1 %v36911_v41  ;;  %31912 = vmatprep.subr.mxu0 %v39724_v52  ;;  %v25598_v0 = vadd.f32 %v37144_v58, %v25521_v12  ;;  %v25914_v58 = vld [vmem:[#allocation2 + $0x270] sm:$0xff]  ;;  %v39733_v12 = vld [vmem:[#allocation163_spill] sm:$0xff] }
 0x59b   :  { %31954 = vmatpush3.msra.mxu1 %v36923_v19  ;;  %31913 = vmatpush3.msra.mxu0 %v36901_v63  ;;  %v39738_v63 = vld [vmem:[#allocation177_spill] sm:$0xff] }
 0x59c   :  { %31955 = vmatprep.subr.mxu1 %v36934_v60  ;;  %31914 = vmatprep.subr.mxu0 %v36909_v18  ;;  %v39727_v18 = vld [vmem:[#allocation137_spill] sm:$0xff] }
 0x59d   :  { %31956 = vmatpush3.msra.mxu1 %v36946_v27  ;;  %31915 = vmatpush3.msra.mxu0 %v36921_v26  ;;  %v25835_v26 = vadd.f32 %v25828_v14, %v39727_v18  ;;  %v39729_v14 = vld [vmem:[#allocation143_spill] sm:$0xff] }
 0x59e   :  { %31957 = vmatprep.subr.mxu1 %v36957_v33  ;;  %31916 = vmatprep.subr.mxu0 %v36932_v9  ;;  %v39736_v9 = vld [vmem:[#allocation173_spill] sm:$0xff] }
 0x59f   :  { %31958 = vmatpush3.msra.mxu1 %v36969_v34  ;;  %31917 = vmatpush3.msra.mxu0 %v36944_v1  ;;  %v37210_v18 = vand.u32 4294901760, %v25835_v26  ;;  %v25928_v1 = vld [vmem:[#allocation2 + $0x2e0] sm:$0xff] }
 0x5a0   :  { %27379 = vmatmul.mubr.f32.vlgmr.msra.gmra.mxu1 %v39725_v43  ;;  %31997 = vmatprep.subr.mxu1 %v36575_v54  ;;  %v25915_v43 = vld [vmem:[#allocation2 + $0x278] sm:$0xff]  ;;  %v37264_v11 = vand.u32 4294901760, %v25928_v1 }
 0x5a1   :  { %31998 = vmatpush3.msra.mxu1 %v36583_v56  ;;  %27649 = vmatprep.mubr.f32.mxu1 %v39726_v8  ;;  %39728 = vst [vmem:[#allocation188_spill] sm:$0xff] %v37210_v18 }
 0x5a2   :  { %31918 = vmatprep.subr.mxu0 %v36955_v28  ;;  %31999 = vmatprep.subr.mxu1 %v39704_v62  ;;  %v37241_v28 = vand.u32 4294901760, %v25914_v58 }
 0x5a3   :  { %31919 = vmatpush3.msra.mxu0 %v36967_v46  ;;  %32000 = vmatpush3.msra.mxu1 %v36610_v38  ;;  %v25913_v46 = vld [vmem:[#allocation2 + $0x268] sm:$0xff] }
 0x5a4   :  { %31920 = vmatprep.subr.mxu0 %v36981_v10  ;;  %32001 = vmatprep.subr.mxu1 %v36614_v21  ;;  %v37256_v52 = vand.u32 4294901760, %v25913_v46 }
 0x5a5   :  { %31921 = vmatpush3.msra.mxu0 %v36993_v59  ;;  %32002 = vmatpush3.msra.mxu1 %v36621_v7  ;;  %v37228_v59 = vand.u32 4294901760, %v25931_v50 }
 0x5a6   :  { %31922 = vmatprep.subr.mxu0 %v37004_v5  ;;  %32003 = vmatprep.subr.mxu1 %v36628_v42  ;;  %v37222_v5 = vsub.f32 %v25835_v26, %v37210_v18  ;;  %v25929_v26 = vld [vmem:[#allocation2 + $0x2e8] sm:$0xff] }
 0x5a7   :  { %31923 = vmatpush3.msra.mxu0 %v37016_v16  ;;  %32004 = vmatpush3.msra.mxu1 %v36637_v3  ;;  %v39731_v16 = vld [vmem:[#allocation156_spill] sm:$0xff] }
 0x5a8   :  { %27271 = vmatmul.mubr.f32.vlgmr.msra.gmra.mxu0 %v37090_v57  ;;  %31962 = vmatprep.subr.mxu0 %v39729_v14  ;;  %v25930_v57 = vld [vmem:[#allocation2 + $0x2f0] sm:$0xff]  ;;  %v39732_v14 = vld [vmem:[#allocation160_spill] sm:$0xff] }
 0x5a9   :  { %32005 = vmatprep.subr.mxu1 %v36644_v30  ;;  %31963 = vmatpush3.msra.mxu0 %v39730_v22  ;;  %v25674_v22 = vadd.f32 %v37154_v36, %v25598_v0  ;;  %v37237_v10 = vand.u32 4294901760, %v25930_v57  ;;  %v37247_v36 = vsub.f32 %v25931_v50, %v37228_v59  ;;  %v37249_v0 = vand.u32 4294901760, %v25929_v26  ;;  %v25908_v30 = vld [vmem:[#allocation2 + $0x240] sm:$0xff] }
 0x5aa   :  { %27545 = vmatprep.mubr.f32.mxu0 %v39726_v8  ;;  %32006 = vmatpush3.msra.mxu1 %v36653_v49  ;;  %v37232_v8 = vand.u32 4294901760, %v25915_v43  ;;  %v37368_v62 = vand.u32 4294901760, %v25908_v30 }
 0x5ab   :  { %31964 = vmatprep.subr.mxu0 %v39731_v16  ;;  %32007 = vmatprep.subr.mxu1 %v36663_v24  ;;  %v39734_v16 = vld [vmem:[#allocation167_spill] sm:$0xff]  ;;  %39737 = vst [vmem:[#allocation176_spill] sm:$0xff] %v37247_v36  ;;  %v25752_v55 = vadd.f32 %v37164_v2, %v25674_v22  ;;  %v37262_v50 = vsub.f32 %v25930_v57, %v37237_v10  ;;  %v39744_v2 = vand.u32 4294901760, %v37222_v5  ;;  %v39745_v57 = vld [vmem:[#allocation186_spill] sm:$0xff] }
 0x5ac   :  { %31965 = vmatpush3.msra.mxu0 %v39732_v14  ;;  %32008 = vmatpush3.msra.mxu1 %v36675_v15  ;;  %v39735_v14 = vld [vmem:[#allocation170_spill] sm:$0xff]  ;;  %v39754_v15 = vld [vmem:[#allocation195_spill] sm:$0xff]  ;;  %39772 = vst [vmem:[#allocation289_spill] sm:$0xff] %v37368_v62 }
 0x5ad   :  { %31966 = vmatprep.subr.mxu0 %v39733_v12  ;;  %32009 = vmatprep.subr.mxu1 %v36686_v53  ;;  %v25927_v12 = vld [vmem:[#allocation2 + $0x2d8] sm:$0xff]  ;;  %39741 = vst [vmem:[#allocation268_spill] sm:$0xff] %v37262_v50  ;;  %v37276_v22 = vsub.f32 %v37222_v5, %v39744_v2  ;;  %v25924_v24 = vld [vmem:[#allocation2 + $0x2c0] sm:$0xff] }
 0x5ae   :  { %31967 = vmatpush3.msra.mxu0 %v39734_v16  ;;  %32010 = vmatpush3.msra.mxu1 %v36698_v48  ;;  %v25912_v16 = vld [vmem:[#allocation2 + $0x260] sm:$0xff]  ;;  %v37299_v48 = vadd.f32 %v37174_v61, %v25752_v55  ;;  %v37356_v21 = vand.u32 4294901760, %v25924_v24 }
 0x5af   :  { %31968 = vmatprep.subr.mxu0 %v39735_v14  ;;  %32011 = vmatprep.subr.mxu1 %v36710_v45  ;;  %v37254_v14 = vsub.f32 %v25915_v43, %v37232_v8  ;;  %v37269_v43 = vsub.f32 %v25914_v58, %v37241_v28  ;;  %v37271_v29 = vand.u32 4294901760, %v25912_v16  ;;  %v37286_v58 = vand.u32 4294901760, %v25927_v12  ;;  %v25925_v45 = vld [vmem:[#allocation2 + $0x2c8] sm:$0xff] }
 0x5b0   :  { %31969 = vmatpush3.msra.mxu0 %v39736_v9  ;;  %32012 = vmatpush3.msra.mxu1 %v36722_v31  ;;  %v39740_v9 = vld [vmem:[#allocation179_spill] sm:$0xff]  ;;  %v39748_v31 = vld [vmem:[#allocation190_spill] sm:$0xff]  ;;  %39768 = vst [vmem:[#allocation286_spill] sm:$0xff] %v37356_v21 }
 0x5b1   :  { %31970 = vmatprep.subr.mxu0 %v39738_v63  ;;  %39739 = vst [vmem:[#allocation137_spill] sm:$0xff] %v37254_v14  ;;  %32013 = vmatprep.subr.mxu1 %v36746_v17  ;;  %v39742_v63 = vld [vmem:[#allocation183_spill] sm:$0xff]  ;;  %39743 = vst [vmem:[#allocation269_spill] sm:$0xff] %v37269_v43  ;;  %v37281_v17 = vand.u32 4294901760, %v37247_v36  ;;  %v37291_v2 = vand.u32 4294901760, %v37254_v14  ;;  %v37314_v55 = vand.u32 4294901760, %v37269_v43  ;;  %v37317_v61 = vsub.f32 %v25912_v16, %v37271_v29 }
 0x5b2   :  { %31971 = vmatpush3.msra.mxu0 %v39740_v9  ;;  %32014 = vmatpush3.msra.mxu1 %v36805_v47  ;;  %v25926_v9 = vld [vmem:[#allocation2 + $0x2d0] sm:$0xff]  ;;  %v37330_v49 = vsub.f32 %v25927_v12, %v37286_v58  ;;  %v37332_v16 = vand.u32 4294901760, %v25925_v45  ;;  %v39765_v12 = vld [vmem:[#allocation216_spill] sm:$0xff] }
 0x5b3   :  { %31972 = vmatprep.subr.mxu0 %v39742_v63  ;;  %32015 = vmatprep.subr.mxu1 %v36816_v32  ;;  %39746 = vst [vmem:[#allocation270_spill] sm:$0xff] %v37281_v17  ;;  %v37284_v63 = vsub.f32 %v25929_v26, %v37249_v0  ;;  %v25910_v47 = vld [vmem:[#allocation2 + $0x250] sm:$0xff]  ;;  %39749 = vst [vmem:[#allocation272_spill] sm:$0xff] %v37291_v2  ;;  %v37294_v32 = vsub.f32 %v25913_v46, %v37256_v52  ;;  %v39751_v26 = vld [vmem:[#allocation192_spill] sm:$0xff]  ;;  %v37309_v53 = vand.u32 4294901760, %v25926_v9 }
 0x5b4   :  { %31973 = vmatpush3.msra.mxu0 %v39745_v57  ;;  %32016 = vmatpush3.msra.mxu1 %v36836_v35  ;;  %v37296_v57 = vand.u32 4294901760, %v25911_v13  ;;  %v37304_v35 = vand.u32 4294901760, %v37262_v50  ;;  %v25909_v46 = vld [vmem:[#allocation2 + $0x248] sm:$0xff]  ;;  %39755 = vst [vmem:[#allocation276_spill] sm:$0xff] %v37314_v55  ;;  %39756 = vst [vmem:[#allocation277_spill] sm:$0xff] %v37317_v61  ;;  %v37380_v54 = vsub.f32 %v25925_v45, %v37332_v16 }
 0x5b5   :  { %39747 = vst [vmem:[#allocation271_spill] sm:$0xff] %v37284_v63  ;;  %31974 = vmatprep.subr.mxu0 %v39748_v31  ;;  %39750 = vst [vmem:[#allocation273_spill] sm:$0xff] %v37294_v32  ;;  %32017 = vmatprep.subr.mxu1 %v36847_v4  ;;  %v37307_v31 = vsub.f32 %v25928_v1, %v37264_v11  ;;  %v37320_v4 = vand.u32 4294901760, %v25910_v47  ;;  %v39757_v1 = vld [vmem:[#allocation198_spill] sm:$0xff]  ;;  %v37344_v42 = vand.u32 4294901760, %v25909_v46 }
 0x5b6   :  { %31975 = vmatpush3.msra.mxu0 %v39751_v26  ;;  %39752 = vst [vmem:[#allocation274_spill] sm:$0xff] %v37304_v35  ;;  %32018 = vmatpush3.msra.mxu1 %v36858_v40  ;;  %v27884_v40 = vsub.f32 %v37247_v36, %v37281_v17  ;;  %39759 = vst [vmem:[#allocation279_spill] sm:$0xff] %v37330_v49  ;;  %v39761_v26 = vld [vmem:[#allocation202_spill] sm:$0xff]  ;;  %v37342_v3 = vsub.f32 %v25911_v13, %v37296_v57  ;;  %v39769_v13 = vld [vmem:[#allocation220_spill] sm:$0xff] }
 0x5b7   :  { %39753 = vst [vmem:[#allocation275_spill] sm:$0xff] %v37307_v31  ;;  %31976 = vmatprep.subr.mxu0 %v39754_v15  ;;  %32019 = vmatprep.subr.mxu1 %v36868_v23  ;;  %v37327_v15 = vand.u32 4294901760, %v37284_v63  ;;  %39760 = vst [vmem:[#allocation280_spill] sm:$0xff] %v37332_v16  ;;  %v27772_v23 = vsub.f32 %v37254_v14, %v37291_v2  ;;  %v37354_v7 = vsub.f32 %v25926_v9, %v37309_v53  ;;  %v39773_v9 = vld [vmem:[#allocation226_spill] sm:$0xff] }
 0x5b8   :  { %31977 = vmatpush3.msra.mxu0 %v39757_v1  ;;  %32020 = vmatpush3.msra.mxu1 %v36879_v37  ;;  %v37339_v1 = vand.u32 4294901760, %v37294_v32  ;;  %39763 = vst [vmem:[#allocation282_spill] sm:$0xff] %v37342_v3  ;;  %39764 = vst [vmem:[#allocation283_spill] sm:$0xff] %v37344_v42  ;;  %v27891_v37 = vsub.f32 %v37262_v50, %v37304_v35  ;;  %v37366_v38 = vsub.f32 %v25910_v47, %v37320_v4  ;;  %v39777_v47 = vld [vmem:[#allocation229_spill] sm:$0xff] }
 0x5b9   :  { %39758 = vst [vmem:[#allocation278_spill] sm:$0xff] %v37327_v15  ;;  %31978 = vmatprep.subr.mxu0 %v39761_v26  ;;  %32021 = vmatprep.subr.mxu1 %v36891_v25  ;;  %v37351_v26 = vand.u32 4294901760, %v37307_v31  ;;  %39767 = vst [vmem:[#allocation285_spill] sm:$0xff] %v37354_v7  ;;  %v27779_v25 = vsub.f32 %v37269_v43, %v37314_v55  ;;  %v37372_v56 = vand.u32 4294901760, %v27884_v40  ;;  %v37384_v55 = vand.u32 4294901760, %v27772_v23  ;;  %v25916_v43 = vld [vmem:[#allocation2 + $0x280] sm:$0xff] }
 0x5ba   :  { %39762 = vst [vmem:[#allocation281_spill] sm:$0xff] %v37339_v1  ;;  %31979 = vmatpush3.msra.mxu0 %v39765_v12  ;;  %32022 = vmatpush3.msra.mxu1 %v36903_v39  ;;  %v37363_v12 = vand.u32 4294901760, %v37317_v61  ;;  %39771 = vst [vmem:[#allocation288_spill] sm:$0xff] %v37366_v38  ;;  %v37377_v39 = vand.u32 4294901760, %v37330_v49  ;;  %v37389_v40 = vand.u32 4294901760, %v37342_v3  ;;  %v37396_v45 = vand.u32 4294901760, %v27891_v37 }
 0x5bb   :  { %39766 = vst [vmem:[#allocation284_spill] sm:$0xff] %v37351_v26  ;;  %31980 = vmatprep.subr.mxu0 %v39769_v13  ;;  %32023 = vmatprep.subr.mxu1 %v36911_v41  ;;  %39774 = vst [vmem:[#allocation290_spill] sm:$0xff] %v37372_v56  ;;  %v27898_v13 = vsub.f32 %v37284_v63, %v37327_v15  ;;  %v37392_v41 = vsub.f32 %v25909_v46, %v37344_v42  ;;  %v25923_v15 = vld [vmem:[#allocation2 + $0x2b8] sm:$0xff]  ;;  %v37408_v46 = vand.u32 4294901760, %v27779_v25  ;;  %v25901_v63 = vld [vmem:[#allocation2 + $0x208] sm:$0xff] }
 0x5bc   :  { %39770 = vst [vmem:[#allocation287_spill] sm:$0xff] %v37363_v12  ;;  %31981 = vmatpush3.msra.mxu0 %v39773_v9  ;;  %39775 = vst [vmem:[#allocation291_spill] sm:$0xff] %v37377_v39  ;;  %32024 = vmatpush3.msra.mxu1 %v36923_v19  ;;  %v27786_v9 = vsub.f32 %v37294_v32, %v37339_v1  ;;  %v27905_v23 = vsub.f32 %v37307_v31, %v37351_v26  ;;  %v25907_v1 = vld [vmem:[#allocation2 + $0x238] sm:$0xff]  ;;  %v25922_v26 = vld [vmem:[#allocation2 + $0x2b0] sm:$0xff] }
 0x5bd   :  { %39776 = vst [vmem:[#allocation292_spill] sm:$0xff] %v37380_v54  ;;  %31982 = vmatprep.subr.mxu0 %v39777_v47  ;;  %39778 = vst [vmem:[#allocation293_spill] sm:$0xff] %v37384_v55  ;;  %32025 = vmatprep.subr.mxu1 %v36934_v60  ;;  %v37401_v47 = vand.u32 4294901760, %v37354_v7  ;;  %v37404_v19 = vsub.f32 %v25924_v24, %v37356_v21  ;;  %v27793_v37 = vsub.f32 %v37317_v61, %v37363_v12  ;;  %v39787_v24 = vld [vmem:[#allocation238_spill] sm:$0xff]  ;;  %v25906_v12 = vld [vmem:[#allocation2 + $0x230] sm:$0xff] }
 0x5be   :  { %39779 = vst [vmem:[#allocation294_spill] sm:$0xff] %v37389_v40  ;;  %39780 = vst [vmem:[#allocation295_spill] sm:$0xff] %v37392_v41  ;;  %31983 = vmatpush3.msra.mxu0 %v36941_v51  ;;  %32026 = vmatpush3.msra.mxu1 %v36946_v27  ;;  %v37413_v51 = vand.u32 4294901760, %v37366_v38  ;;  %v37416_v60 = vsub.f32 %v25908_v30, %v37368_v62  ;;  %v37420_v35 = vand.u32 4294901760, %v27898_v13  ;;  %v37427_v27 = vand.u32 4294901760, %v25923_v15  ;;  %v39791_v30 = vld [vmem:[#allocation242_spill] sm:$0xff] }
 0x5bf   :  { %39781 = vst [vmem:[#allocation296_spill] sm:$0xff] %v37396_v45  ;;  %39782 = vst [vmem:[#allocation297_spill] sm:$0xff] %v37401_v47  ;;  %31984 = vmatprep.subr.mxu0 %v36952_v44  ;;  %32027 = vmatprep.subr.mxu1 %v36957_v33  ;;  %v27912_v25 = vsub.f32 %v37330_v49, %v37377_v39  ;;  %v37425_v44 = vand.u32 4294901760, %v37380_v54  ;;  %v37431_v2 = vand.u32 4294901760, %v27786_v9  ;;  %v37436_v13 = vand.u32 4294901760, %v37392_v41  ;;  %v25921_v39 = vld [vmem:[#allocation2 + $0x2a8] sm:$0xff] }
 0x5c0   :  { %39783 = vst [vmem:[#allocation298_spill] sm:$0xff] %v37404_v19  ;;  %39784 = vst [vmem:[#allocation299_spill] sm:$0xff] %v37408_v46  ;;  %31985 = vmatpush3.msra.mxu0 %v39787_v24  ;;  %32028 = vmatpush3.msra.mxu1 %v36969_v34  ;;  %v27800_v24 = vsub.f32 %v37342_v3, %v37389_v40  ;;  %v37438_v33 = vand.u32 4294901760, %v25907_v1  ;;  %v37442_v17 = vand.u32 4294901760, %v27905_v23  ;;  %v37447_v9 = vand.u32 4294901760, %v37404_v19  ;;  %v25905_v40 = vld [vmem:[#allocation2 + $0x228] sm:$0xff] }
 0x5c1   :  { %39785 = vst [vmem:[#allocation300_spill] sm:$0xff] %v37413_v51  ;;  %39786 = vst [vmem:[#allocation301_spill] sm:$0xff] %v37416_v60  ;;  %31986 = vmatprep.subr.mxu0 %v39791_v30  ;;  %27651 = vmatmul.mubr.f32.vlgmr.msra.gmra.mxu1 %v37067_v20  ;;  %v27919_v30 = vsub.f32 %v37354_v7, %v37401_v47  ;;  %v37449_v34 = vand.u32 4294901760, %v25922_v26  ;;  %v39798_v3 = vld [vmem:[#allocation245_spill] sm:$0xff]  ;;  %v37453_v49 = vand.u32 4294901760, %v27793_v37  ;;  %v37458_v23 = vand.u32 4294901760, %v37416_v60 }
 0x5c2   :  { %39788 = vst [vmem:[#allocation302_spill] sm:$0xff] %v37420_v35  ;;  %39789 = vst [vmem:[#allocation303_spill] sm:$0xff] %v37425_v44  ;;  %32067 = vmatprep.subr.mxu1 %v37372_v56  ;;  %31987 = vmatpush3.msra.mxu0 %v39798_v3  ;;  %v27807_v56 = vsub.f32 %v37366_v38, %v37413_v51  ;;  %v37460_v61 = vand.u32 4294901760, %v25906_v12  ;;  %v25920_v47 = vld [vmem:[#allocation2 + $0x2a0] sm:$0xff]  ;;  %v37464_v7 = vand.u32 4294901760, %v27912_v25  ;;  %v37471_v3 = vand.u32 4294901760, %v25921_v39 }
 0x5c3   :  { %39790 = vst [vmem:[#allocation304_spill] sm:$0xff] %v37427_v27  ;;  %39792 = vst [vmem:[#allocation305_spill] sm:$0xff] %v37431_v2  ;;  %32068 = vmatpush3.msra.mxu1 %v37384_v55  ;;  %27993 = vmatprep.mubr.f32.mxu1 %v37210_v18  ;;  %v27926_v55 = vsub.f32 %v37380_v54, %v37425_v44  ;;  %v37469_v37 = vsub.f32 %v25923_v15, %v37427_v27  ;;  %v25904_v51 = vld [vmem:[#allocation2 + $0x220] sm:$0xff]  ;;  %v39805_v38 = vld [vmem:[#allocation250_spill] sm:$0xff]  ;;  %v37475_v31 = vand.u32 4294901760, %v27800_v24 }
 0x5c4   :  { %39793 = vst [vmem:[#allocation306_spill] sm:$0xff] %v37436_v13  ;;  %39794 = vst [vmem:[#allocation307_spill] sm:$0xff] %v37438_v33  ;;  %31988 = vmatprep.subr.mxu0 %v37001_v6  ;;  %32069 = vmatprep.subr.mxu1 %v37396_v45  ;;  %v27814_v6 = vsub.f32 %v37392_v41, %v37436_v13  ;;  %v37480_v25 = vsub.f32 %v25907_v1, %v37438_v33  ;;  %v37482_v18 = vand.u32 4294901760, %v25905_v40  ;;  %v25919_v44 = vld [vmem:[#allocation2 + $0x298] sm:$0xff]  ;;  %v39809_v15 = vld [vmem:[#allocation253_spill] sm:$0xff] }
 0x5c5   :  { %39795 = vst [vmem:[#allocation308_spill] sm:$0xff] %v37442_v17  ;;  %39796 = vst [vmem:[#allocation309_spill] sm:$0xff] %v37447_v9  ;;  %31989 = vmatpush3.msra.mxu0 %v39805_v38  ;;  %32070 = vmatpush3.msra.mxu1 %v37408_v46  ;;  %v37486_v54 = vand.u32 4294901760, %v27919_v30  ;;  %v27933_v45 = vsub.f32 %v37404_v19, %v37447_v9  ;;  %v37491_v24 = vsub.f32 %v25922_v26, %v37449_v34  ;;  %v25903_v13 = vld [vmem:[#allocation2 + $0x218] sm:$0xff]  ;;  %v39813_v1 = vld [vmem:[#allocation255_spill] sm:$0xff] }
 0x5c6   :  { %39797 = vst [vmem:[#allocation310_spill] sm:$0xff] %v37449_v34  ;;  %39799 = vst [vmem:[#allocation311_spill] sm:$0xff] %v37453_v49  ;;  %31990 = vmatprep.subr.mxu0 %v39809_v15  ;;  %v37493_v38 = vand.u32 4294901760, %v25920_v47  ;;  %32071 = vmatprep.subr.mxu1 %v37420_v35  ;;  %v37497_v41 = vand.u32 4294901760, %v27807_v56  ;;  %v27821_v46 = vsub.f32 %v37416_v60, %v37458_v23  ;;  %v37504_v15 = vand.u32 4294901760, %v25904_v51  ;;  %v25918_v9 = vld [vmem:[#allocation2 + $0x290] sm:$0xff] }
 0x5c7   :  { %39800 = vst [vmem:[#allocation312_spill] sm:$0xff] %v37458_v23  ;;  %39801 = vst [vmem:[#allocation313_spill] sm:$0xff] %v37460_v61  ;;  %31991 = vmatpush3.msra.mxu0 %v39813_v1  ;;  %v37502_v30 = vsub.f32 %v25906_v12, %v37460_v61  ;;  %32072 = vmatpush3.msra.mxu1 %v37431_v2  ;;  %v39817_v26 = vld [vmem:[#allocation257_spill] sm:$0xff]  ;;  %v37508_v19 = vand.u32 4294901760, %v27926_v55  ;;  %v37511_v35 = vand.u32 4294901760, %v37469_v37  ;;  %v37516_v1 = vand.u32 4294901760, %v25919_v44 }
 0x5c8   :  { %39802 = vst [vmem:[#allocation314_spill] sm:$0xff] %v37464_v7  ;;  %39803 = vst [vmem:[#allocation315_spill] sm:$0xff] %v37469_v37  ;;  %31992 = vmatprep.subr.mxu0 %v39817_v26  ;;  %v37514_v56 = vsub.f32 %v25921_v39, %v37471_v3  ;;  %v25902_v23 = vld [vmem:[#allocation2 + $0x210] sm:$0xff]  ;;  %32073 = vmatprep.subr.mxu1 %v37442_v17  ;;  %v39822_v12 = vld [vmem:[#allocation259_spill] sm:$0xff]  ;;  %v37520_v60 = vand.u32 4294901760, %v27814_v6  ;;  %v37523_v2 = vand.u32 4294901760, %v37480_v25 }
 0x5c9   :  { %39804 = vst [vmem:[#allocation316_spill] sm:$0xff] %v37471_v3  ;;  %39806 = vst [vmem:[#allocation317_spill] sm:$0xff] %v37475_v31  ;;  %31993 = vmatpush3.msra.mxu0 %v39822_v12  ;;  %v37526_v55 = vsub.f32 %v25905_v40, %v37482_v18  ;;  %v37528_v26 = vand.u32 4294901760, %v25903_v13  ;;  %v25917_v32 = vld [vmem:[#allocation2 + $0x288] sm:$0xff]  ;;  %32074 = vmatpush3.msra.mxu1 %v37453_v49  ;;  %v37532_v39 = vand.u32 4294901760, %v27933_v45  ;;  %v37535_v17 = vand.u32 4294901760, %v37491_v24 }
 0x5ca   :  { %39807 = vst [vmem:[#allocation318_spill] sm:$0xff] %v37480_v25  ;;  %39808 = vst [vmem:[#allocation319_spill] sm:$0xff] %v37482_v18  ;;  %27547 = vmatmul.mubr.f32.vlgmr.msra.gmra.mxu0 %v37067_v20  ;;  %v37538_v6 = vsub.f32 %v25920_v47, %v37493_v38  ;;  %v37540_v12 = vand.u32 4294901760, %v25918_v9  ;;  %32032 = vmatprep.subr.mxu0 %v37228_v59  ;;  %v37544_v40 = vand.u32 4294901760, %v27821_v46  ;;  %v37547_v49 = vand.u32 4294901760, %v37502_v30 }
 0x5cb   :  { %39810 = vst [vmem:[#allocation320_spill] sm:$0xff] %v37486_v54  ;;  %39811 = vst [vmem:[#allocation321_spill] sm:$0xff] %v37491_v24  ;;  %32075 = vmatprep.subr.mxu1 %v37464_v7  ;;  %v37550_v20 = vsub.f32 %v25904_v51, %v37504_v15  ;;  %v37552_v45 = vand.u32 4294901760, %v25902_v23  ;;  %32033 = vmatpush3.msra.mxu0 %v37232_v8  ;;  %v39835_v47 = vand.u32 4294901760, %v37276_v22  ;;  %v37560_v46 = vand.u32 4294901760, %v37514_v56  ;;  %v25900_v51 = vld [vmem:[#allocation2 + $0x200] sm:$0xff] }
 0x5cc   :  { %39812 = vst [vmem:[#allocation322_spill] sm:$0xff] %v37493_v38  ;;  %39814 = vst [vmem:[#allocation323_spill] sm:$0xff] %v37497_v41  ;;  %v27940_v50 = vsub.f32 %v37469_v37, %v37511_v35  ;;  %v37563_v7 = vsub.f32 %v25919_v44, %v37516_v1  ;;  %v37565_v14 = vand.u32 4294901760, %v25917_v32  ;;  %32076 = vmatpush3.msra.mxu1 %v37475_v31  ;;  %32034 = vmatprep.subr.mxu0 %v37237_v10 }
 0x5cd   :  { %39815 = vst [vmem:[#allocation324_spill] sm:$0xff] %v37502_v30  ;;  %39816 = vst [vmem:[#allocation325_spill] sm:$0xff] %v37504_v15  ;;  %27757 = vmatprep.mubr.f32.mxu0 %v39835_v47  ;;  %v27828_v22 = vsub.f32 %v37480_v25, %v37523_v2  ;;  %v37572_v47 = vand.u32 4294901760, %v37526_v55  ;;  %v37577_v37 = vand.u32 4294901760, %v25901_v63  ;;  %32077 = vmatprep.subr.mxu1 %v37486_v54  ;;  %v37584_v31 = vand.u32 4294901760, %v37538_v6 }
 0x5ce   :  { %39818 = vst [vmem:[#allocation326_spill] sm:$0xff] %v37508_v19  ;;  %39819 = vst [vmem:[#allocation327_spill] sm:$0xff] %v37511_v35  ;;  %v37575_v35 = vsub.f32 %v25903_v13, %v37528_v26  ;;  %32035 = vmatpush3.msra.mxu0 %v37241_v28  ;;  %v27947_v44 = vsub.f32 %v37491_v24, %v37535_v17  ;;  %v37589_v25 = vand.u32 4294901760, %v25916_v43  ;;  %32078 = vmatpush3.msra.mxu1 %v37497_v41 }
 0x5cf   :  { %39820 = vst [vmem:[#allocation328_spill] sm:$0xff] %v37514_v56  ;;  %39821 = vst [vmem:[#allocation329_spill] sm:$0xff] %v37516_v1  ;;  %32036 = vmatprep.subr.mxu0 %v37249_v0  ;;  %v27835_v13 = vsub.f32 %v37502_v30, %v37547_v49  ;;  %v37596_v54 = vand.u32 4294901760, %v37550_v20  ;;  %v37601_v24 = vand.u32 4294901760, %v25900_v51  ;;  %32079 = vmatprep.subr.mxu1 %v37508_v19  ;;  %v37610_v36 = vand.u32 4294901760, %v37563_v7 }
 0x5d0   :  { %39823 = vst [vmem:[#allocation330_spill] sm:$0xff] %v37520_v60  ;;  %39824 = vst [vmem:[#allocation331_spill] sm:$0xff] %v37523_v2  ;;  %v37587_v2 = vsub.f32 %v25918_v9, %v37540_v12  ;;  %32037 = vmatpush3.msra.mxu0 %v37256_v52  ;;  %v37605_v9 = vand.u32 4294901760, %v27940_v50  ;;  %v27954_v41 = vsub.f32 %v37514_v56, %v37560_v46  ;;  %32080 = vmatpush3.msra.mxu1 %v37520_v60 }
 0x5d1   :  { %39825 = vst [vmem:[#allocation332_spill] sm:$0xff] %v37526_v55  ;;  %39826 = vst [vmem:[#allocation333_spill] sm:$0xff] %v37528_v26  ;;  %32038 = vmatprep.subr.mxu0 %v37264_v11  ;;  %v27842_v19 = vsub.f32 %v37526_v55, %v37572_v47  ;;  %v37622_v50 = vand.u32 4294901760, %v37575_v35  ;;  %32081 = vmatprep.subr.mxu1 %v37532_v39  ;;  %v27961_v60 = vsub.f32 %v37538_v6, %v37584_v31 }
 0x5d2   :  { %39827 = vst [vmem:[#allocation334_spill] sm:$0xff] %v37532_v39  ;;  %39828 = vst [vmem:[#allocation335_spill] sm:$0xff] %v37535_v17  ;;  %v37599_v17 = vsub.f32 %v25902_v23, %v37552_v45  ;;  %v37617_v23 = vand.u32 4294901760, %v27828_v22  ;;  %32039 = vmatpush3.msra.mxu0 %v37271_v29  ;;  %v37634_v22 = vand.u32 4294901760, %v37587_v2  ;;  %32082 = vmatpush3.msra.mxu1 %v37544_v40 }
 0x5d3   :  { %39829 = vst [vmem:[#allocation336_spill] sm:$0xff] %v37538_v6  ;;  %39830 = vst [vmem:[#allocation337_spill] sm:$0xff] %v37540_v12  ;;  %32040 = vmatprep.subr.mxu0 %v37286_v58  ;;  %v27849_v39 = vsub.f32 %v37550_v20, %v37596_v54  ;;  %32083 = vmatprep.subr.mxu1 %v37605_v9 }
 0x5d4   :  { %39831 = vst [vmem:[#allocation338_spill] sm:$0xff] %v37544_v40  ;;  %39832 = vst [vmem:[#allocation339_spill] sm:$0xff] %v37547_v49  ;;  %v37613_v49 = vsub.f32 %v25917_v32, %v37565_v14  ;;  %v37629_v32 = vand.u32 4294901760, %v27947_v44  ;;  %v37646_v44 = vand.u32 4294901760, %v37599_v17  ;;  %32041 = vmatpush3.msra.mxu0 %v37296_v57  ;;  %v27968_v40 = vsub.f32 %v37563_v7, %v37610_v36 }
 0x5d5   :  { %39833 = vst [vmem:[#allocation340_spill] sm:$0xff] %v37550_v20  ;;  %39834 = vst [vmem:[#allocation341_spill] sm:$0xff] %v37552_v45  ;;  %32084 = vmatpush3.msra.mxu1 %v37617_v23  ;;  %32042 = vmatprep.subr.mxu0 %v37309_v53 }
 0x5d6   :  { %39836 = vst [vmem:[#allocation342_spill] sm:$0xff] %v37560_v46  ;;  %39837 = vst [vmem:[#allocation343_spill] sm:$0xff] %v37563_v7  ;;  %v37625_v46 = vsub.f32 %v25901_v63, %v37577_v37  ;;  %v37641_v63 = vand.u32 4294901760, %v27835_v13  ;;  %v37658_v13 = vand.u32 4294901760, %v37613_v49  ;;  %32085 = vmatprep.subr.mxu1 %v37629_v32  ;;  %32043 = vmatpush3.msra.mxu0 %v37320_v4 }
 0x5d7   :  { %39838 = vst [vmem:[#allocation344_spill] sm:$0xff] %v37565_v14  ;;  %39839 = vst [vmem:[#allocation345_spill] sm:$0xff] %v37572_v47  ;;  %v37637_v47 = vsub.f32 %v25916_v43, %v37589_v25  ;;  %v37653_v43 = vand.u32 4294901760, %v27954_v41  ;;  %v39864_v41 = vld [vmem:[#allocation136_spill] sm:$0xff]  ;;  %32044 = vmatprep.subr.mxu0 %v37332_v16 }
 0x5d8   :  { %39840 = vst [vmem:[#allocation346_spill] sm:$0xff] %v37575_v35  ;;  %39841 = vst [vmem:[#allocation347_spill] sm:$0xff] %v37577_v37  ;;  %v25834_v20 = vadd.f32 %v37299_v48, %v39864_v41  ;;  %32086 = vmatpush3.msra.mxu1 %v37641_v63  ;;  %v27863_v48 = vsub.f32 %v37599_v17, %v37646_v44  ;;  %32045 = vmatpush3.msra.mxu0 %v37344_v42 }
 0x5d9   :  { %39842 = vst [vmem:[#allocation348_spill] sm:$0xff] %v37584_v31  ;;  %39843 = vst [vmem:[#allocation349_spill] sm:$0xff] %v37587_v2  ;;  %v37649_v31 = vsub.f32 %v25900_v51, %v37601_v24  ;;  %v27856_v51 = vsub.f32 %v37575_v35, %v37622_v50  ;;  %32087 = vmatprep.subr.mxu1 %v37653_v43  ;;  %32046 = vmatprep.subr.mxu0 %v37356_v21 }
 0x5da   :  { %39844 = vst [vmem:[#allocation350_spill] sm:$0xff] %v37589_v25  ;;  %39845 = vst [vmem:[#allocation351_spill] sm:$0xff] %v37596_v54  ;;  %v37662_v54 = vand.u32 4294901760, %v27842_v19  ;;  %v37678_v19 = vand.u32 4294901760, %v37637_v47  ;;  %32047 = vmatpush3.msra.mxu0 %v37368_v62 }
 0x5db   :  { %39846 = vst [vmem:[#allocation352_spill] sm:$0xff] %v37599_v17  ;;  %39847 = vst [vmem:[#allocation353_spill] sm:$0xff] %v37601_v24  ;;  %v37687_v41 = vand.u32 4294901760, %v37649_v31  ;;  %32048 = vmatprep.subr.mxu0 %v37427_v27 }
 0x5dc   :  { %39848 = vst [vmem:[#allocation354_spill] sm:$0xff] %v37605_v9  ;;  %39849 = vst [vmem:[#allocation355_spill] sm:$0xff] %v37610_v36  ;;  %v37667_v9 = vand.u32 4294901760, %v37625_v46  ;;  %v37673_v36 = vand.u32 4294901760, %v27961_v60  ;;  %v37691_v60 = vand.u32 4294901760, %v27968_v40  ;;  %32088 = vmatpush3.msra.mxu1 %v37662_v54  ;;  %32049 = vmatpush3.msra.mxu0 %v37438_v33 }
 0x5dd   :  { %39850 = vst [vmem:[#allocation356_spill] sm:$0xff] %v37613_v49  ;;  %39851 = vst [vmem:[#allocation357_spill] sm:$0xff] %v37617_v23  ;;  %v27975_v23 = vsub.f32 %v37587_v2, %v37634_v22  ;;  %32050 = vmatprep.subr.mxu0 %v37449_v34 }
 0x5de   :  { %39852 = vst [vmem:[#allocation358_spill] sm:$0xff] %v37622_v50  ;;  %39853 = vst [vmem:[#allocation359_spill] sm:$0xff] %v37625_v46  ;;  %v37682_v50 = vand.u32 4294901760, %v27849_v39  ;;  %v37697_v39 = vand.u32 4294901760, %v27856_v51  ;;  %32089 = vmatprep.subr.mxu1 %v37673_v36  ;;  %v37711_v51 = vand.u32 4294901760, %v27863_v48  ;;  %32051 = vmatpush3.msra.mxu0 %v37460_v61 }
 0x5df   :  { %39854 = vst [vmem:[#allocation360_spill] sm:$0xff] %v37629_v32  ;;  %39855 = vst [vmem:[#allocation361_spill] sm:$0xff] %v37634_v22  ;;  %v27982_v32 = vsub.f32 %v37613_v49, %v37658_v13  ;;  %v37705_v40 = vand.u32 4294901760, %v27975_v23  ;;  %32052 = vmatprep.subr.mxu0 %v37471_v3 }
 0x5e0   :  { %39856 = vst [vmem:[#allocation362_spill] sm:$0xff] %v37637_v47  ;;  %39857 = vst [vmem:[#allocation363_spill] sm:$0xff] %v37641_v63  ;;  %v27870_v63 = vsub.f32 %v37625_v46, %v37667_v9  ;;  %32090 = vmatpush3.msra.mxu1 %v37682_v50  ;;  %32053 = vmatpush3.msra.mxu0 %v37482_v18 }
 0x5e1   :  { %39858 = vst [vmem:[#allocation364_spill] sm:$0xff] %v37646_v44  ;;  %39859 = vst [vmem:[#allocation365_spill] sm:$0xff] %v37649_v31  ;;  %v37701_v44 = vand.u32 4294901760, %v25834_v20  ;;  %32091 = vmatprep.subr.mxu1 %v37691_v60  ;;  %32054 = vmatprep.subr.mxu0 %v37493_v38 }
 0x5e2   :  { %39860 = vst [vmem:[#allocation366_spill] sm:$0xff] %v37653_v43  ;;  %39861 = vst [vmem:[#allocation367_spill] sm:$0xff] %v37658_v13  ;;  %v27989_v43 = vsub.f32 %v37637_v47, %v37678_v19  ;;  %32092 = vmatpush3.msra.mxu1 %v37697_v39  ;;  %v37721_v23 = vand.u32 4294901760, %v27870_v63  ;;  %32055 = vmatpush3.msra.mxu0 %v37504_v15  ;;  %v39877_v63 = vand.u32 4294901760, %v37222_v5 }
 0x5e3   :  { %39862 = vst [vmem:[#allocation368_spill] sm:$0xff] %v37662_v54  ;;  %39863 = vst [vmem:[#allocation369_spill] sm:$0xff] %v37667_v9  ;;  %v27877_v54 = vsub.f32 %v37649_v31, %v37687_v41  ;;  %32093 = vmatprep.subr.mxu1 %v37705_v40  ;;  %32056 = vmatprep.subr.mxu0 %v37516_v1 }
 0x5e4   :  { %39865 = vst [vmem:[#allocation136_spill] sm:$0xff] %v37673_v36  ;;  %39866 = vst [vmem:[#allocation370_spill] sm:$0xff] %v37678_v19  ;;  %v37717_v36 = vand.u32 4294901760, %v27982_v32  ;;  %v37728_v48 = vand.u32 4294901760, %v27989_v43  ;;  %32094 = vmatpush3.msra.mxu1 %v37711_v51  ;;  %32057 = vmatpush3.msra.mxu0 %v37528_v26 }
 0x5e5   :  { %39867 = vst [vmem:[#allocation371_spill] sm:$0xff] %v37682_v50  ;;  %39868 = vst [vmem:[#allocation372_spill] sm:$0xff] %v37687_v41  ;;  %v37724_v50 = vsub.f32 %v25834_v20, %v37701_v44  ;;  %v37732_v32 = vand.u32 4294901760, %v27877_v54  ;;  %32058 = vmatprep.subr.mxu0 %v37540_v12 }
 0x5e6   :  { %39869 = vst [vmem:[#allocation373_spill] sm:$0xff] %v37691_v60  ;;  %39870 = vst [vmem:[#allocation374_spill] sm:$0xff] %v37697_v39  ;;  %32095 = vmatprep.subr.mxu1 %v37717_v36  ;;  %32059 = vmatpush3.msra.mxu0 %v37552_v45  ;;  %v39981_v39 = vld [vmem:[#allocation130_spill] sm:$0xff]  ;;  %v39984_v60 = vld [vmem:[#allocation105_spill] sm:$0xff] }
 0x5e7   :  { %39871 = vst [vmem:[#allocation375_spill] sm:$0xff] %v37705_v40  ;;  %39872 = vst [vmem:[#allocation376_spill] sm:$0xff] %v37711_v51  ;;  %32096 = vmatpush3.msra.mxu1 %v37721_v23  ;;  %v39190_v20 = vand.u32 4294901760, %v37724_v50  ;;  %32060 = vmatprep.subr.mxu0 %v37565_v14  ;;  %v39974_v51 = vld [vmem:[#allocation85_spill] sm:$0xff] }
 0x5e8   :  { %39873 = vst [vmem:[#allocation377_spill] sm:$0xff] %v37717_v36  ;;  %39874 = vst [vmem:[#allocation378_spill] sm:$0xff] %v37721_v23  ;;  %32097 = vmatprep.subr.mxu1 %v37728_v48  ;;  %32061 = vmatpush3.msra.mxu0 %v37577_v37  ;;  %v39968_v23 = vld [vmem:[#allocation77_spill] sm:$0xff]  ;;  %v39971_v36 = vld [vmem:[#allocation120_spill] sm:$0xff] }
 0x5e9   :  { %39875 = vst [vmem:[#allocation379_spill] sm:$0xff] %v37728_v48  ;;  %39876 = vst [vmem:[#allocation380_spill] sm:$0xff] %v37732_v32  ;;  %32098 = vmatpush3.msra.mxu1 %v37732_v32  ;;  %v27761_v54 = vsub.f32 %v37724_v50, %v39190_v20  ;;  %32062 = vmatprep.subr.mxu0 %v37589_v25  ;;  %v39879_v20 = vld [vmem:[#allocation137_spill] sm:$0xff]  ;;  %v39882_v48 = vld [vmem:[#allocation271_spill] sm:$0xff] }
 0x5ea   :  { %27995 = vmatmul.mubr.f32.vlgmr.msra.gmra.mxu1 %v37701_v44  ;;  %32137 = vmatprep.subr.mxu1 %v37228_v59  ;;  %v39881_v32 = vld [vmem:[#allocation269_spill] sm:$0xff] }
 0x5eb   :  { %32138 = vmatpush3.msra.mxu1 %v37232_v8  ;;  %28237 = vmatprep.mubr.f32.mxu1 %v39877_v63  ;;  %v27762_v43 = vand.u32 4294901760, %v27761_v54  ;;  %v39878_v63 = vld [vmem:[#allocation176_spill] sm:$0xff] }
 0x5ec   :  { %32139 = vmatprep.subr.mxu1 %v37237_v10  ;;  %32063 = vmatpush3.msra.mxu0 %v37601_v24  ;;  %v39880_v54 = vld [vmem:[#allocation268_spill] sm:$0xff] }
 0x5ed   :  { %32140 = vmatpush3.msra.mxu1 %v37241_v28  ;;  %27763 = vmatmul.mubr.f32.vlgmr.msra.gmra.mxu0 %v27762_v43  ;;  %v39883_v43 = vld [vmem:[#allocation273_spill] sm:$0xff] }
 0x5ee   :  { %32141 = vmatprep.subr.mxu1 %v37249_v0  ;;  %32102 = vmatprep.subr.mxu0 %v39878_v63  ;;  %v39963_v63 = vld [vmem:[#allocation100_spill] sm:$0xff] }
 0x5ef   :  { %32142 = vmatpush3.msra.mxu1 %v37256_v52  ;;  %32103 = vmatpush3.msra.mxu0 %v39879_v20  ;;  %v39884_v20 = vld [vmem:[#allocation275_spill] sm:$0xff] }
 0x5f0   :  { %32143 = vmatprep.subr.mxu1 %v37264_v11  ;;  %28130 = vmatprep.mubr.f32.mxu0 %v37222_v5  ;;  %v39885_v5 = vld [vmem:[#allocation277_spill] sm:$0xff] }
 0x5f1   :  { %32144 = vmatpush3.msra.mxu1 %v37271_v29  ;;  %32104 = vmatprep.subr.mxu0 %v39880_v54  ;;  %v39886_v54 = vld [vmem:[#allocation279_spill] sm:$0xff] }
 0x5f2   :  { %32145 = vmatprep.subr.mxu1 %v37286_v58  ;;  %32105 = vmatpush3.msra.mxu0 %v39881_v32  ;;  %v39887_v32 = vld [vmem:[#allocation282_spill] sm:$0xff] }
 0x5f3   :  { %32146 = vmatpush3.msra.mxu1 %v37296_v57  ;;  %32106 = vmatprep.subr.mxu0 %v39882_v48  ;;  %v39888_v48 = vld [vmem:[#allocation285_spill] sm:$0xff] }
 0x5f4   :  { %32147 = vmatprep.subr.mxu1 %v37309_v53  ;;  %32107 = vmatpush3.msra.mxu0 %v39883_v43  ;;  %v39889_v43 = vld [vmem:[#allocation288_spill] sm:$0xff] }
 0x5f5   :  { %32148 = vmatpush3.msra.mxu1 %v37320_v4  ;;  %32108 = vmatprep.subr.mxu0 %v39884_v20  ;;  %v39890_v20 = vld [vmem:[#allocation292_spill] sm:$0xff] }
 0x5f6   :  { %32149 = vmatprep.subr.mxu1 %v37332_v16  ;;  %32109 = vmatpush3.msra.mxu0 %v39885_v5  ;;  %v39891_v5 = vld [vmem:[#allocation295_spill] sm:$0xff] }
 0x5f7   :  { %32150 = vmatpush3.msra.mxu1 %v37344_v42  ;;  %32110 = vmatprep.subr.mxu0 %v39886_v54  ;;  %v39892_v54 = vld [vmem:[#allocation298_spill] sm:$0xff] }
 0x5f8   :  { %32151 = vmatprep.subr.mxu1 %v37356_v21  ;;  %32111 = vmatpush3.msra.mxu0 %v39887_v32  ;;  %v39893_v32 = vld [vmem:[#allocation301_spill] sm:$0xff] }
 0x5f9   :  { %32152 = vmatpush3.msra.mxu1 %v37368_v62  ;;  %32112 = vmatprep.subr.mxu0 %v39888_v48  ;;  %v39894_v48 = vld [vmem:[#allocation315_spill] sm:$0xff] }
 0x5fa   :  { %32153 = vmatprep.subr.mxu1 %v37427_v27  ;;  %32113 = vmatpush3.msra.mxu0 %v39889_v43  ;;  %v39895_v43 = vld [vmem:[#allocation318_spill] sm:$0xff] }
 0x5fb   :  { %32154 = vmatpush3.msra.mxu1 %v37438_v33  ;;  %32114 = vmatprep.subr.mxu0 %v39890_v20  ;;  %v39896_v20 = vld [vmem:[#allocation321_spill] sm:$0xff] }
 0x5fc   :  { %32155 = vmatprep.subr.mxu1 %v37449_v34  ;;  %32115 = vmatpush3.msra.mxu0 %v39891_v5  ;;  %v39962_v5 = vld [vmem:[#allocation61_spill] sm:$0xff] }
 0x5fd   :  { %32156 = vmatpush3.msra.mxu1 %v37460_v61  ;;  %32116 = vmatprep.subr.mxu0 %v39892_v54  ;;  %v39960_v54 = vld [vmem:[#allocation57_spill] sm:$0xff] }
 0x5fe   :  { %32157 = vmatprep.subr.mxu1 %v37471_v3  ;;  %32117 = vmatpush3.msra.mxu0 %v39893_v32  ;;  %v39958_v32 = vld [vmem:[#allocation41_spill] sm:$0xff] }
 0x5ff   :  { %32158 = vmatpush3.msra.mxu1 %v37482_v18  ;;  %32118 = vmatprep.subr.mxu0 %v39894_v48  ;;  %v39957_v48 = vld [vmem:[#allocation83_spill] sm:$0xff] }
 0x600   :  { %32159 = vmatprep.subr.mxu1 %v37493_v38  ;;  %32119 = vmatpush3.msra.mxu0 %v39895_v43  ;;  %v39897_v43 = vld [vmem:[#allocation340_spill] sm:$0xff] }
 0x601   :  { %32160 = vmatpush3.msra.mxu1 %v37504_v15  ;;  %32120 = vmatprep.subr.mxu0 %v39896_v20  ;;  %v39955_v20 = vld [vmem:[#allocation82_spill] sm:$0xff] }
 0x602   :  { %32161 = vmatprep.subr.mxu1 %v37516_v1  ;;  %32121 = vmatpush3.msra.mxu0 %v37502_v30  ;;  %v39898_v30 = vand.u32 4294901760, %v37724_v50 }
 0x603   :  { %32162 = vmatpush3.msra.mxu1 %v37528_v26  ;;  %32122 = vmatprep.subr.mxu0 %v37514_v56  ;;  %v39954_v56 = vld [vmem:[#allocation31_spill] sm:$0xff] }
 0x604   :  { %32163 = vmatprep.subr.mxu1 %v37540_v12  ;;  %32123 = vmatpush3.msra.mxu0 %v37526_v55  ;;  %v39899_v55 = vld [vmem:[#allocation188_spill] sm:$0xff] }
 0x605   :  { %32164 = vmatpush3.msra.mxu1 %v37552_v45  ;;  %32124 = vmatprep.subr.mxu0 %v37538_v6  ;;  %v39952_v6 = vld [vmem:[#allocation25_spill] sm:$0xff] }
 0x606   :  { %32165 = vmatprep.subr.mxu1 %v37565_v14  ;;  %32125 = vmatpush3.msra.mxu0 %v39897_v43  ;;  %v39950_v43 = vld [vmem:[#allocation19_spill] sm:$0xff] }
 0x607   :  { %32166 = vmatpush3.msra.mxu1 %v37577_v37  ;;  %32126 = vmatprep.subr.mxu0 %v37563_v7  ;;  %v39948_v7 = vld [vmem:[#allocation50_spill] sm:$0xff] }
 0x608   :  { %32167 = vmatprep.subr.mxu1 %v37589_v25  ;;  %32127 = vmatpush3.msra.mxu0 %v37575_v35  ;;  %v39947_v35 = vld [vmem:[#allocation72_spill] sm:$0xff] }
 0x609   :  { %32168 = vmatpush3.msra.mxu1 %v37601_v24  ;;  %32128 = vmatprep.subr.mxu0 %v37587_v2  ;;  %v39946_v2 = vld [vmem:[#allocation26_spill] sm:$0xff] }
 0x60a   :  { %28241 = vmatmul.mubr.f32.vlgmr.msra.gmra.mxu1 %v39898_v30  ;;  %32207 = vmatprep.subr.mxu1 %v37228_v59  ;;  %v39900_v30 = vld [vmem:[#allocation270_spill] sm:$0xff] }
 0x60b   :  { %32208 = vmatpush3.msra.mxu1 %v37232_v8  ;;  %28511 = vmatprep.mubr.f32.mxu1 %v39899_v55 }
 0x60c   :  { %32209 = vmatprep.subr.mxu1 %v37237_v10  ;;  %32129 = vmatpush3.msra.mxu0 %v37599_v17 }
 0x60d   :  { %32210 = vmatpush3.msra.mxu1 %v37241_v28  ;;  %32130 = vmatprep.subr.mxu0 %v37613_v49  ;;  %v39901_v49 = vld [vmem:[#allocation272_spill] sm:$0xff] }
 0x60e   :  { %32211 = vmatprep.subr.mxu1 %v37249_v0  ;;  %32131 = vmatpush3.msra.mxu0 %v37625_v46  ;;  %v39902_v46 = vld [vmem:[#allocation274_spill] sm:$0xff] }
 0x60f   :  { %32212 = vmatpush3.msra.mxu1 %v37256_v52  ;;  %32132 = vmatprep.subr.mxu0 %v37637_v47  ;;  %v39903_v47 = vld [vmem:[#allocation276_spill] sm:$0xff] }
 0x610   :  { %32213 = vmatprep.subr.mxu1 %v37264_v11  ;;  %32133 = vmatpush3.msra.mxu0 %v37649_v31  ;;  %v39904_v31 = vld [vmem:[#allocation278_spill] sm:$0xff] }
 0x611   :  { %32214 = vmatpush3.msra.mxu1 %v37271_v29  ;;  %28133 = vmatmul.mubr.f32.vlgmr.msra.gmra.mxu0 %v37724_v50  ;;  %v39905_v50 = vld [vmem:[#allocation281_spill] sm:$0xff] }
 0x612   :  { %32172 = vmatprep.subr.mxu0 %v39900_v30  ;;  %32215 = vmatprep.subr.mxu1 %v37286_v58  ;;  %v39928_v30 = vld [vmem:[#allocation55_spill] sm:$0xff] }
 0x613   :  { %32173 = vmatpush3.msra.mxu0 %v39901_v49  ;;  %28407 = vmatprep.mubr.f32.mxu0 %v39899_v55  ;;  %v39906_v49 = vld [vmem:[#allocation284_spill] sm:$0xff]  ;;  %v39907_v55 = vld [vmem:[#allocation287_spill] sm:$0xff] }
 0x614   :  { %32216 = vmatpush3.msra.mxu1 %v37296_v57  ;;  %32174 = vmatprep.subr.mxu0 %v39902_v46  ;;  %v39908_v46 = vld [vmem:[#allocation291_spill] sm:$0xff] }
 0x615   :  { %32217 = vmatprep.subr.mxu1 %v37309_v53  ;;  %32175 = vmatpush3.msra.mxu0 %v39903_v47  ;;  %v39909_v47 = vld [vmem:[#allocation294_spill] sm:$0xff] }
 0x616   :  { %32218 = vmatpush3.msra.mxu1 %v37320_v4  ;;  %32176 = vmatprep.subr.mxu0 %v39904_v31  ;;  %v39910_v31 = vld [vmem:[#allocation297_spill] sm:$0xff] }
 0x617   :  { %32219 = vmatprep.subr.mxu1 %v37332_v16  ;;  %32177 = vmatpush3.msra.mxu0 %v39905_v50  ;;  %v39911_v50 = vld [vmem:[#allocation300_spill] sm:$0xff] }
 0x618   :  { %32220 = vmatpush3.msra.mxu1 %v37344_v42  ;;  %32178 = vmatprep.subr.mxu0 %v39906_v49  ;;  %v39912_v49 = vld [vmem:[#allocation303_spill] sm:$0xff] }
 0x619   :  { %32221 = vmatprep.subr.mxu1 %v37356_v21  ;;  %32179 = vmatpush3.msra.mxu0 %v39907_v55  ;;  %v39913_v55 = vld [vmem:[#allocation306_spill] sm:$0xff] }
 0x61a   :  { %32222 = vmatpush3.msra.mxu1 %v37368_v62  ;;  %32180 = vmatprep.subr.mxu0 %v39908_v46  ;;  %v39914_v46 = vld [vmem:[#allocation309_spill] sm:$0xff] }
 0x61b   :  { %32223 = vmatprep.subr.mxu1 %v37427_v27  ;;  %32181 = vmatpush3.msra.mxu0 %v39909_v47  ;;  %v39915_v47 = vld [vmem:[#allocation312_spill] sm:$0xff] }
 0x61c   :  { %32224 = vmatpush3.msra.mxu1 %v37438_v33  ;;  %32182 = vmatprep.subr.mxu0 %v39910_v31  ;;  %v39916_v31 = vld [vmem:[#allocation327_spill] sm:$0xff]  ;;  %v40142_v33 = vld [vmem:[#allocation221_spill] sm:$0xff] }
 0x61d   :  { %32225 = vmatprep.subr.mxu1 %v37449_v34  ;;  %32183 = vmatpush3.msra.mxu0 %v39911_v50  ;;  %v39917_v50 = vld [vmem:[#allocation331_spill] sm:$0xff] }
 0x61e   :  { %32226 = vmatpush3.msra.mxu1 %v37460_v61  ;;  %32184 = vmatprep.subr.mxu0 %v39912_v49  ;;  %v39918_v49 = vld [vmem:[#allocation335_spill] sm:$0xff]  ;;  %v40119_v61 = vld [vmem:[#allocation240_spill] sm:$0xff] }
 0x61f   :  { %32227 = vmatprep.subr.mxu1 %v37471_v3  ;;  %32185 = vmatpush3.msra.mxu0 %v39913_v55  ;;  %v39919_v55 = vld [vmem:[#allocation339_spill] sm:$0xff]  ;;  %v40116_v3 = vld [vmem:[#allocation265_spill] sm:$0xff] }
 0x620   :  { %32228 = vmatpush3.msra.mxu1 %v37482_v18  ;;  %32186 = vmatprep.subr.mxu0 %v39914_v46  ;;  %v39920_v46 = vld [vmem:[#allocation342_spill] sm:$0xff]  ;;  %v39996_v18 = vld [vmem:[#allocation49_spill] sm:$0xff] }
 0x621   :  { %32229 = vmatprep.subr.mxu1 %v37493_v38  ;;  %32187 = vmatpush3.msra.mxu0 %v39915_v47  ;;  %v39921_v47 = vld [vmem:[#allocation345_spill] sm:$0xff] }
 0x622   :  { %32230 = vmatpush3.msra.mxu1 %v37504_v15  ;;  %32188 = vmatprep.subr.mxu0 %v39916_v31  ;;  %v39922_v31 = vld [vmem:[#allocation348_spill] sm:$0xff]  ;;  %v39995_v38 = vld [vmem:[#allocation29_spill] sm:$0xff] }
 0x623   :  { %32231 = vmatprep.subr.mxu1 %v37516_v1  ;;  %32189 = vmatpush3.msra.mxu0 %v39917_v50  ;;  %v39923_v50 = vld [vmem:[#allocation351_spill] sm:$0xff]  ;;  %v39994_v15 = vld [vmem:[#allocation40_spill] sm:$0xff] }
 0x624   :  { %32232 = vmatpush3.msra.mxu1 %v37528_v26  ;;  %32190 = vmatprep.subr.mxu0 %v39918_v49  ;;  %v39924_v49 = vld [vmem:[#allocation355_spill] sm:$0xff] }
 0x625   :  { %32233 = vmatprep.subr.mxu1 %v37540_v12  ;;  %32191 = vmatpush3.msra.mxu0 %v39919_v55  ;;  %v39925_v55 = vld [vmem:[#allocation358_spill] sm:$0xff]  ;;  %v39979_v12 = vld [vmem:[#allocation129_spill] sm:$0xff]  ;;  %v39982_v26 = vld [vmem:[#allocation103_spill] sm:$0xff] }
 0x626   :  { %32234 = vmatpush3.msra.mxu1 %v37552_v45  ;;  %32192 = vmatprep.subr.mxu0 %v39920_v46  ;;  %v39926_v46 = vld [vmem:[#allocation52_spill] sm:$0xff]  ;;  %v39976_v45 = vld [vmem:[#allocation90_spill] sm:$0xff]  ;;  %v39988_v1 = vld [vmem:[#allocation115_spill] sm:$0xff] }
 0x627   :  { %32235 = vmatprep.subr.mxu1 %v37565_v14  ;;  %32193 = vmatpush3.msra.mxu0 %v39921_v47  ;;  %v39927_v47 = vld [vmem:[#allocation364_spill] sm:$0xff] }
 0x628   :  { %32236 = vmatpush3.msra.mxu1 %v37577_v37  ;;  %32194 = vmatprep.subr.mxu0 %v39922_v31  ;;  %v39929_v31 = vld [vmem:[#allocation42_spill] sm:$0xff] }
 0x629   :  { %32237 = vmatprep.subr.mxu1 %v37589_v25  ;;  %32195 = vmatpush3.msra.mxu0 %v39923_v50  ;;  %v39930_v50 = vld [vmem:[#allocation12_spill] sm:$0xff]  ;;  %v39966_v25 = vld [vmem:[#allocation67_spill] sm:$0xff] }
 0x62a   :  { %32238 = vmatpush3.msra.mxu1 %v37601_v24  ;;  %32196 = vmatprep.subr.mxu0 %v39924_v49  ;;  %v39931_v49 = vld [vmem:[#allocation11_spill] sm:$0xff]  ;;  %v39965_v24 = vld [vmem:[#allocation102_spill] sm:$0xff] }
 0x62b   :  { %28513 = vmatmul.mubr.f32.vlgmr.msra.gmra.mxu1 %v37701_v44  ;;  %32197 = vmatpush3.msra.mxu0 %v39925_v55  ;;  %v39944_v55 = vld [vmem:[#allocation56_spill] sm:$0xff] }
 0x62c   :  { %32198 = vmatprep.subr.mxu0 %v37634_v22  ;;  %32277 = vmatprep.subr.mxu1 %v39926_v46  ;;  %v39932_v22 = vld [vmem:[#allocation58_spill] sm:$0xff]  ;;  %v39933_v46 = vld [vmem:[#allocation36_spill] sm:$0xff] }
 0x62d   :  { %32199 = vmatpush3.msra.mxu0 %v39927_v47  ;;  %32278 = vmatpush3.msra.mxu1 %v39928_v30  ;;  %v39934_v30 = vld [vmem:[#allocation14_spill] sm:$0xff]  ;;  %v39942_v47 = vld [vmem:[#allocation51_spill] sm:$0xff] }
 0x62e   :  { %32200 = vmatprep.subr.mxu0 %v37658_v13  ;;  %32279 = vmatprep.subr.mxu1 %v39929_v31  ;;  %v39935_v13 = vld [vmem:[#allocation38_spill] sm:$0xff] }
 0x62f   :  { %32201 = vmatpush3.msra.mxu0 %v37667_v9  ;;  %32280 = vmatpush3.msra.mxu1 %v39930_v50  ;;  %v39936_v31 = vld [vmem:[#allocation22_spill] sm:$0xff]  ;;  %v39937_v9 = vld [vmem:[#allocation45_spill] sm:$0xff] }
 0x630   :  { %32202 = vmatprep.subr.mxu0 %v37678_v19  ;;  %32281 = vmatprep.subr.mxu1 %v39931_v49  ;;  %v32933_v49 = vld [vmem:[%s38607_s0] sm:$0xff]  ;;  %v39941_v19 = vld [vmem:[#allocation53_spill] sm:$0xff] }
 0x631   :  { %32203 = vmatpush3.msra.mxu0 %v37687_v41  ;;  %32282 = vmatpush3.msra.mxu1 %v39932_v22  ;;  %v28535_v50 = vcombine.high %v32933_v49, %v32933_v49  ;;  %v39938_v41 = vld [vmem:[#allocation27_spill] sm:$0xff]  ;;  %v39939_v22 = vld [vmem:[#allocation28_spill] sm:$0xff] }
 0x632   :  { %28409 = vmatmul.mubr.f32.vlgmr.msra.gmra.mxu0 %v37701_v44  ;;  %32242 = vmatprep.subr.mxu0 %v39933_v46  ;;  %v39940_v44 = vld [vmem:[#allocation44_spill] sm:$0xff] }
 0x633   :  { %32243 = vmatpush3.msra.mxu0 %v39934_v30  ;;  %32283 = vmatprep.subr.mxu1 %v39935_v13  ;;  %v39943_v13 = vld [vmem:[#allocation48_spill] sm:$0xff]  ;;  %v37914_v17 = vand.u32 4294901760, %v28535_v50 }
 0x634   :  { %32244 = vmatprep.subr.mxu0 %v39936_v31  ;;  %32284 = vmatpush3.msra.mxu1 %v39937_v9  ;;  %v39945_v9 = vld [vmem:[#allocation8_spill] sm:$0xff] }
 0x635   :  { %32245 = vmatpush3.msra.mxu0 %v39938_v41  ;;  %32285 = vmatprep.subr.mxu1 %v39939_v22  ;;  %v39949_v22 = vld [vmem:[#allocation73_spill] sm:$0xff] }
 0x636   :  { %32246 = vmatprep.subr.mxu0 %v39940_v44  ;;  %32286 = vmatpush3.msra.mxu1 %v39941_v19  ;;  %v39951_v19 = vld [vmem:[#allocation76_spill] sm:$0xff] }
 0x637   :  { %32247 = vmatpush3.msra.mxu0 %v39942_v47  ;;  %32287 = vmatprep.subr.mxu1 %v39943_v13  ;;  %v39953_v13 = vld [vmem:[#allocation78_spill] sm:$0xff] }
 0x638   :  { %32248 = vmatprep.subr.mxu0 %v39944_v55  ;;  %32288 = vmatpush3.msra.mxu1 %v39945_v9  ;;  %v37925_v9 = vsub.f32 %v28535_v50, %v37914_v17 }
 0x639   :  { %32249 = vmatpush3.msra.mxu0 %v39946_v2  ;;  %32289 = vmatprep.subr.mxu1 %v39947_v35  ;;  %v39956_v35 = vld [vmem:[#allocation33_spill] sm:$0xff] }
 0x63a   :  { %32250 = vmatprep.subr.mxu0 %v39948_v7  ;;  %32290 = vmatpush3.msra.mxu1 %v39949_v22  ;;  %v37931_v22 = vand.u32 4294901760, %v32933_v49  ;;  %v39224_v50 = vand.u32 4294901760, %v37925_v9 }
 0x63b   :  { %32251 = vmatpush3.msra.mxu0 %v39950_v43  ;;  %32291 = vmatprep.subr.mxu1 %v39951_v19  ;;  %v39959_v19 = vld [vmem:[#allocation96_spill] sm:$0xff] }
 0x63c   :  { %32252 = vmatprep.subr.mxu0 %v39952_v6  ;;  %32292 = vmatpush3.msra.mxu1 %v39953_v13  ;;  %v39961_v13 = vld [vmem:[#allocation97_spill] sm:$0xff]  ;;  %v28640_v37 = vsub.f32 %v37925_v9, %v39224_v50  ;;  %v39978_v50 = vld [vmem:[#allocation91_spill] sm:$0xff] }
 0x63d   :  { %32253 = vmatpush3.msra.mxu0 %v39954_v56  ;;  %32293 = vmatprep.subr.mxu1 %v39955_v20  ;;  %v39964_v20 = vld [vmem:[#allocation66_spill] sm:$0xff] }
 0x63e   :  { %32254 = vmatprep.subr.mxu0 %v39956_v35  ;;  %32294 = vmatpush3.msra.mxu1 %v39957_v48  ;;  %v37943_v48 = vsub.f32 %v32933_v49, %v37931_v22  ;;  %v39973_v49 = vld [vmem:[#allocation121_spill] sm:$0xff]  ;;  %v28641_v40 = vand.u32 4294901760, %v28640_v37 }
 0x63f   :  { %32255 = vmatpush3.msra.mxu0 %v39958_v32  ;;  %32295 = vmatprep.subr.mxu1 %v39959_v19  ;;  %v39967_v19 = vld [vmem:[#allocation106_spill] sm:$0xff]  ;;  %v39985_v37 = vld [vmem:[#allocation109_spill] sm:$0xff] }
 0x640   :  { %32256 = vmatprep.subr.mxu0 %v39960_v54  ;;  %32296 = vmatpush3.msra.mxu1 %v39961_v13  ;;  %v39969_v13 = vld [vmem:[#allocation107_spill] sm:$0xff]  ;;  %v39233_v14 = vand.u32 4294901760, %v37943_v48 }
 0x641   :  { %32257 = vmatpush3.msra.mxu0 %v39962_v5  ;;  %32297 = vmatprep.subr.mxu1 %v39963_v63  ;;  %v39970_v63 = vld [vmem:[#allocation79_spill] sm:$0xff] }
 0x642   :  { %32258 = vmatprep.subr.mxu0 %v39964_v20  ;;  %32298 = vmatpush3.msra.mxu1 %v39965_v24  ;;  %v39972_v24 = vld [vmem:[#allocation81_spill] sm:$0xff] }
 0x643   :  { %32259 = vmatpush3.msra.mxu0 %v39966_v25  ;;  %32299 = vmatprep.subr.mxu1 %v39967_v19  ;;  %v39975_v19 = vld [vmem:[#allocation124_spill] sm:$0xff] }
 0x644   :  { %32260 = vmatprep.subr.mxu0 %v39968_v23  ;;  %32300 = vmatpush3.msra.mxu1 %v39969_v13  ;;  %v39977_v13 = vld [vmem:[#allocation126_spill] sm:$0xff] }
 0x645   :  { %32261 = vmatpush3.msra.mxu0 %v39970_v63  ;;  %32301 = vmatprep.subr.mxu1 %v39971_v36  ;;  %v39980_v36 = vld [vmem:[#allocation101_spill] sm:$0xff] }
 0x646   :  { %32262 = vmatprep.subr.mxu0 %v39972_v24  ;;  %32302 = vmatpush3.msra.mxu1 %v39973_v49  ;;  %v28646_v49 = vsub.f32 %v37943_v48, %v39233_v14  ;;  %v39989_v14 = vld [vmem:[#allocation125_spill] sm:$0xff] }
 0x647   :  { %32263 = vmatpush3.msra.mxu0 %v39974_v51  ;;  %32303 = vmatprep.subr.mxu1 %v39975_v19  ;;  %v39983_v19 = vld [vmem:[#allocation134_spill] sm:$0xff] }
 0x648   :  { %32264 = vmatprep.subr.mxu0 %v39976_v45  ;;  %32304 = vmatpush3.msra.mxu1 %v39977_v13  ;;  %v39986_v13 = vld [vmem:[#allocation135_spill] sm:$0xff] }
 0x649   :  { %32265 = vmatpush3.msra.mxu0 %v39978_v50  ;;  %32305 = vmatprep.subr.mxu1 %v39979_v12  ;;  %v39987_v12 = vld [vmem:[#allocation114_spill] sm:$0xff] }
 0x64a   :  { %32266 = vmatprep.subr.mxu0 %v39980_v36  ;;  %32306 = vmatpush3.msra.mxu1 %v39981_v39  ;;  %v28647_v39 = vand.u32 4294901760, %v28646_v49  ;;  %v39993_v49 = vld [vmem:[#allocation34_spill] sm:$0xff] }
 0x64b   :  { %32267 = vmatpush3.msra.mxu0 %v39982_v26  ;;  %32307 = vmatprep.subr.mxu1 %v39983_v19  ;;  %v39990_v19 = vld [vmem:[#allocation127_spill] sm:$0xff] }
 0x64c   :  { %32268 = vmatprep.subr.mxu0 %v39984_v60  ;;  %28642 = vmatprep.mubr.f32.mxu0 %v28641_v40  ;;  %v39991_v40 = vld [vmem:[#allocation18_spill] sm:$0xff] }
 0x64d   :  { %32269 = vmatpush3.msra.mxu0 %v39985_v37  ;;  %32308 = vmatpush3.msra.mxu1 %v39986_v13  ;;  %v39992_v13 = vld [vmem:[#allocation24_spill] sm:$0xff] }
 0x64e   :  { %32270 = vmatprep.subr.mxu0 %v39987_v12  ;;  %28878 = vmatprep.mubr.f32.mxu1 %v37914_v17 }
 0x64f   :  { %32271 = vmatpush3.msra.mxu0 %v39988_v1  ;;  %28880 = vmatmul.mubr.f32.vlgmr.msra.gmra.mxu1 %v37931_v22 }
 0x650   :  { %32272 = vmatprep.subr.mxu0 %v39989_v14  ;;  %32347 = vmatprep.subr.mxu1 %v39933_v46 }
 0x651   :  { %32273 = vmatpush3.msra.mxu0 %v39990_v19  ;;  %32348 = vmatpush3.msra.mxu1 %v39934_v30 }
 0x652   :  { %28648 = vmatmul.mubr.f32.vlgmr.msra.gmra.mxu0 %v28647_v39  ;;  %32312 = vmatprep.subr.mxu0 %v39991_v40  ;;  %v39997_v39 = vld [vmem:[#allocation32_spill] sm:$0xff]  ;;  %v39998_v40 = vld [vmem:[#allocation15_spill] sm:$0xff] }
 0x653   :  { %32313 = vmatpush3.msra.mxu0 %v39992_v13  ;;  %32349 = vmatprep.subr.mxu1 %v39936_v31  ;;  %v39999_v13 = vld [vmem:[#allocation46_spill] sm:$0xff] }
 0x654   :  { %32314 = vmatprep.subr.mxu0 %v39993_v49  ;;  %32350 = vmatpush3.msra.mxu1 %v39938_v41  ;;  %v40003_v49 = vld [vmem:[#allocation47_spill] sm:$0xff] }
 0x655   :  { %32315 = vmatpush3.msra.mxu0 %v39994_v15  ;;  %32351 = vmatprep.subr.mxu1 %v39940_v44  ;;  %v40000_v15 = vld [vmem:[#allocation13_spill] sm:$0xff] }
 0x656   :  { %32316 = vmatprep.subr.mxu0 %v39995_v38  ;;  %32352 = vmatpush3.msra.mxu1 %v39942_v47  ;;  %v40001_v38 = vld [vmem:[#allocation17_spill] sm:$0xff] }
 0x657   :  { %32317 = vmatpush3.msra.mxu0 %v39996_v18  ;;  %32353 = vmatprep.subr.mxu1 %v39944_v55  ;;  %v40002_v18 = vld [vmem:[#allocation21_spill] sm:$0xff] }
 0x658   :  { %32318 = vmatprep.subr.mxu0 %v39997_v39  ;;  %32354 = vmatpush3.msra.mxu1 %v39946_v2  ;;  %v40004_v39 = vld [vmem:[#allocation60_spill] sm:$0xff] }
 0x659   :  { %32319 = vmatpush3.msra.mxu0 %v39998_v40  ;;  %32355 = vmatprep.subr.mxu1 %v39948_v7  ;;  %v40005_v40 = vld [vmem:[#allocation63_spill] sm:$0xff] }
 0x65a   :  { %32320 = vmatprep.subr.mxu0 %v39999_v13  ;;  %32356 = vmatpush3.msra.mxu1 %v39950_v43  ;;  %v40006_v13 = vld [vmem:[#allocation65_spill] sm:$0xff] }
 0x65b   :  { %32321 = vmatpush3.msra.mxu0 %v40000_v15  ;;  %32357 = vmatprep.subr.mxu1 %v39952_v6  ;;  %v40007_v15 = vld [vmem:[#allocation70_spill] sm:$0xff] }
 0x65c   :  { %32322 = vmatprep.subr.mxu0 %v40001_v38  ;;  %32358 = vmatpush3.msra.mxu1 %v39954_v56  ;;  %v40008_v38 = vld [vmem:[#allocation71_spill] sm:$0xff] }
 0x65d   :  { %32323 = vmatpush3.msra.mxu0 %v40002_v18  ;;  %32359 = vmatprep.subr.mxu1 %v39956_v35  ;;  %v40009_v18 = vld [vmem:[#allocation80_spill] sm:$0xff] }
 0x65e   :  { %32324 = vmatprep.subr.mxu0 %v40003_v49  ;;  %32360 = vmatpush3.msra.mxu1 %v39958_v32  ;;  %v40010_v49 = vld [vmem:[#allocation84_spill] sm:$0xff] }
 0x65f   :  { %32325 = vmatpush3.msra.mxu0 %v40004_v39  ;;  %32361 = vmatprep.subr.mxu1 %v39960_v54  ;;  %v40011_v39 = vld [vmem:[#allocation87_spill] sm:$0xff] }
 0x660   :  { %32326 = vmatprep.subr.mxu0 %v40005_v40  ;;  %32362 = vmatpush3.msra.mxu1 %v39962_v5  ;;  %v40012_v40 = vld [vmem:[#allocation89_spill] sm:$0xff] }
 0x661   :  { %32327 = vmatpush3.msra.mxu0 %v40006_v13  ;;  %32363 = vmatprep.subr.mxu1 %v39964_v20  ;;  %v40013_v13 = vld [vmem:[#allocation94_spill] sm:$0xff] }
 0x662   :  { %32328 = vmatprep.subr.mxu0 %v40007_v15  ;;  %32364 = vmatpush3.msra.mxu1 %v39966_v25  ;;  %v40014_v15 = vld [vmem:[#allocation95_spill] sm:$0xff] }
 0x663   :  { %32329 = vmatpush3.msra.mxu0 %v40008_v38  ;;  %32365 = vmatprep.subr.mxu1 %v39968_v23  ;;  %v40015_v38 = vld [vmem:[#allocation104_spill] sm:$0xff] }
 0x664   :  { %32330 = vmatprep.subr.mxu0 %v40009_v18  ;;  %32366 = vmatpush3.msra.mxu1 %v39970_v63  ;;  %v40016_v18 = vld [vmem:[#allocation108_spill] sm:$0xff] }
 0x665   :  { %32331 = vmatpush3.msra.mxu0 %v40010_v49  ;;  %32367 = vmatprep.subr.mxu1 %v39972_v24  ;;  %v40017_v49 = vld [vmem:[#allocation111_spill] sm:$0xff] }
 0x666   :  { %32332 = vmatprep.subr.mxu0 %v40011_v39  ;;  %32368 = vmatpush3.msra.mxu1 %v39974_v51  ;;  %v40018_v39 = vld [vmem:[#allocation113_spill] sm:$0xff] }
 0x667   :  { %32333 = vmatpush3.msra.mxu0 %v40012_v40  ;;  %32369 = vmatprep.subr.mxu1 %v39976_v45  ;;  %v40019_v40 = vld [vmem:[#allocation118_spill] sm:$0xff] }
 0x668   :  { %32334 = vmatprep.subr.mxu0 %v40013_v13  ;;  %32370 = vmatpush3.msra.mxu1 %v39978_v50  ;;  %v40020_v13 = vld [vmem:[#allocation119_spill] sm:$0xff] }
 0x669   :  { %32335 = vmatpush3.msra.mxu0 %v40014_v15  ;;  %32371 = vmatprep.subr.mxu1 %v39980_v36  ;;  %v40021_v15 = vld [vmem:[#allocation128_spill] sm:$0xff] }
 0x66a   :  { %32336 = vmatprep.subr.mxu0 %v40015_v38  ;;  %32372 = vmatpush3.msra.mxu1 %v39982_v26  ;;  %v40022_v38 = vld [vmem:[#allocation131_spill] sm:$0xff] }
 0x66b   :  { %32337 = vmatpush3.msra.mxu0 %v40016_v18  ;;  %32373 = vmatprep.subr.mxu1 %v39984_v60  ;;  %v40023_v18 = vand.u32 4294901760, %v37925_v9 }
 0x66c   :  { %32338 = vmatprep.subr.mxu0 %v40017_v49  ;;  %32374 = vmatpush3.msra.mxu1 %v39985_v37  ;;  %v40024_v49 = vld [vmem:[#allocation30_spill] sm:$0xff] }
 0x66d   :  { %32339 = vmatpush3.msra.mxu0 %v40018_v39  ;;  %32375 = vmatprep.subr.mxu1 %v39987_v12  ;;  %v40025_v39 = vand.u32 4294901760, %v37943_v48 }
 0x66e   :  { %32340 = vmatprep.subr.mxu0 %v40019_v40  ;;  %32376 = vmatpush3.msra.mxu1 %v39988_v1  ;;  %v40026_v40 = vld [vmem:[#allocation37_spill] sm:$0xff] }
 0x66f   :  { %32341 = vmatpush3.msra.mxu0 %v40020_v13  ;;  %32377 = vmatprep.subr.mxu1 %v39989_v14  ;;  %v40027_v13 = vld [vmem:[#allocation16_spill] sm:$0xff] }
 0x670   :  { %32342 = vmatprep.subr.mxu0 %v40021_v15  ;;  %29015 = vmatprep.mubr.f32.mxu0 %v37925_v9  ;;  %v40028_v15 = vld [vmem:[#allocation23_spill] sm:$0xff]  ;;  %v40029_v9 = vld [vmem:[#allocation20_spill] sm:$0xff] }
 0x671   :  { %32343 = vmatpush3.msra.mxu0 %v40022_v38  ;;  %32378 = vmatpush3.msra.mxu1 %v39990_v19  ;;  %v40062_v38 = vld [vmem:[#allocation182_spill] sm:$0xff] }
 0x672   :  { %29018 = vmatmul.mubr.f32.vlgmr.msra.gmra.mxu0 %v37943_v48  ;;  %29122 = vmatprep.mubr.f32.mxu1 %v40023_v18  ;;  %v40031_v48 = vld [vmem:[#allocation39_spill] sm:$0xff]  ;;  %v40063_v18 = vld [vmem:[#allocation144_spill] sm:$0xff] }
 0x673   :  { %32382 = vmatprep.subr.mxu0 %v40024_v49  ;;  %32417 = vmatprep.subr.mxu1 %v39933_v46  ;;  %v40030_v46 = vld [vmem:[#allocation35_spill] sm:$0xff]  ;;  %v40065_v49 = vld [vmem:[#allocation145_spill] sm:$0xff] }
 0x674   :  { %29126 = vmatmul.mubr.f32.vlgmr.msra.gmra.mxu1 %v40025_v39  ;;  %32383 = vmatpush3.msra.mxu0 %v40026_v40  ;;  %v40067_v39 = vld [vmem:[#allocation147_spill] sm:$0xff] }
 0x675   :  { %32418 = vmatpush3.msra.mxu1 %v39934_v30  ;;  %32384 = vmatprep.subr.mxu0 %v40027_v13  ;;  %v40032_v30 = vld [vmem:[#allocation43_spill] sm:$0xff]  ;;  %v40070_v13 = vld [vmem:[#allocation194_spill] sm:$0xff] }
 0x676   :  { %32419 = vmatprep.subr.mxu1 %v39936_v31  ;;  %32385 = vmatpush3.msra.mxu0 %v40028_v15  ;;  %v40033_v31 = vld [vmem:[#allocation54_spill] sm:$0xff]  ;;  %v40068_v40 = vld [vmem:[#allocation191_spill] sm:$0xff] }
 0x677   :  { %32420 = vmatpush3.msra.mxu1 %v39938_v41  ;;  %32386 = vmatprep.subr.mxu0 %v40029_v9  ;;  %v40034_v41 = vld [vmem:[#allocation9_spill] sm:$0xff]  ;;  %v40071_v15 = vld [vmem:[#allocation151_spill] sm:$0xff] }
 0x678   :  { %32421 = vmatprep.subr.mxu1 %v39940_v44  ;;  %32387 = vmatpush3.msra.mxu0 %v40030_v46  ;;  %v40035_v44 = vld [vmem:[#allocation59_spill] sm:$0xff]  ;;  %v40072_v9 = vld [vmem:[#allocation197_spill] sm:$0xff] }
 0x679   :  { %32422 = vmatpush3.msra.mxu1 %v39942_v47  ;;  %32388 = vmatprep.subr.mxu0 %v40031_v48  ;;  %v40036_v47 = vld [vmem:[#allocation10_spill] sm:$0xff]  ;;  %v40073_v46 = vld [vmem:[#allocation153_spill] sm:$0xff]  ;;  %v32934_v48 = vld [vmem:[%s38607_s0 + $0x8] sm:$0xff] }
 0x67a   :  { %32423 = vmatprep.subr.mxu1 %v39944_v55  ;;  %32389 = vmatpush3.msra.mxu0 %v40032_v30  ;;  %v40037_v55 = vld [vmem:[#allocation62_spill] sm:$0xff]  ;;  %v28536_v30 = vcombine.high %v32934_v48, %v32934_v48 }
 0x67b   :  { %32424 = vmatpush3.msra.mxu1 %v39946_v2  ;;  %32390 = vmatprep.subr.mxu0 %v40033_v31  ;;  %v40038_v2 = vld [vmem:[#allocation64_spill] sm:$0xff] }
 0x67c   :  { %32425 = vmatprep.subr.mxu1 %v39948_v7  ;;  %32391 = vmatpush3.msra.mxu0 %v40034_v41  ;;  %v40039_v7 = vld [vmem:[#allocation68_spill] sm:$0xff]  ;;  %v40075_v41 = vld [vmem:[#allocation155_spill] sm:$0xff] }
 0x67d   :  { %32426 = vmatpush3.msra.mxu1 %v39950_v43  ;;  %32392 = vmatprep.subr.mxu0 %v40035_v44  ;;  %v40040_v43 = vld [vmem:[#allocation69_spill] sm:$0xff]  ;;  %v40074_v31 = vld [vmem:[#allocation200_spill] sm:$0xff] }
 0x67e   :  { %32427 = vmatprep.subr.mxu1 %v39952_v6  ;;  %32393 = vmatpush3.msra.mxu0 %v40036_v47  ;;  %v40041_v6 = vld [vmem:[#allocation74_spill] sm:$0xff]  ;;  %v40076_v44 = vld [vmem:[#allocation201_spill] sm:$0xff] }
 0x67f   :  { %32428 = vmatpush3.msra.mxu1 %v39954_v56  ;;  %32394 = vmatprep.subr.mxu0 %v40037_v55  ;;  %v40042_v56 = vld [vmem:[#allocation75_spill] sm:$0xff]  ;;  %v40077_v47 = vld [vmem:[#allocation158_spill] sm:$0xff]  ;;  %v40078_v55 = vld [vmem:[#allocation204_spill] sm:$0xff] }
 0x680   :  { %32429 = vmatprep.subr.mxu1 %v39956_v35  ;;  %32395 = vmatpush3.msra.mxu0 %v40038_v2  ;;  %v40043_v35 = vld [vmem:[#allocation86_spill] sm:$0xff] }
 0x681   :  { %32430 = vmatpush3.msra.mxu1 %v39958_v32  ;;  %32396 = vmatprep.subr.mxu0 %v40039_v7  ;;  %v40044_v32 = vld [vmem:[#allocation88_spill] sm:$0xff]  ;;  %v40079_v2 = vld [vmem:[#allocation162_spill] sm:$0xff]  ;;  %v40080_v7 = vld [vmem:[#allocation207_spill] sm:$0xff] }
 0x682   :  { %32431 = vmatprep.subr.mxu1 %v39960_v54  ;;  %32397 = vmatpush3.msra.mxu0 %v40040_v43  ;;  %v40045_v54 = vld [vmem:[#allocation92_spill] sm:$0xff]  ;;  %v40081_v43 = vld [vmem:[#allocation165_spill] sm:$0xff] }
 0x683   :  { %32432 = vmatpush3.msra.mxu1 %v39962_v5  ;;  %32398 = vmatprep.subr.mxu0 %v40041_v6  ;;  %v40046_v5 = vld [vmem:[#allocation93_spill] sm:$0xff]  ;;  %v38145_v6 = vand.u32 4294901760, %v28536_v30 }
 0x684   :  { %32433 = vmatprep.subr.mxu1 %v39964_v20  ;;  %32399 = vmatpush3.msra.mxu0 %v40042_v56  ;;  %v40047_v20 = vld [vmem:[#allocation98_spill] sm:$0xff] }
 0x685   :  { %32434 = vmatpush3.msra.mxu1 %v39966_v25  ;;  %32400 = vmatprep.subr.mxu0 %v40043_v35  ;;  %v40048_v25 = vld [vmem:[#allocation99_spill] sm:$0xff]  ;;  %v40082_v56 = vld [vmem:[#allocation210_spill] sm:$0xff]  ;;  %v40083_v35 = vld [vmem:[#allocation169_spill] sm:$0xff] }
 0x686   :  { %32435 = vmatprep.subr.mxu1 %v39968_v23  ;;  %32401 = vmatpush3.msra.mxu0 %v40044_v32  ;;  %v40049_v23 = vld [vmem:[#allocation110_spill] sm:$0xff]  ;;  %v38149_v32 = vand.u32 4294901760, %v32934_v48 }
 0x687   :  { %32436 = vmatpush3.msra.mxu1 %v39970_v63  ;;  %32402 = vmatprep.subr.mxu0 %v40045_v54  ;;  %v40050_v63 = vld [vmem:[#allocation112_spill] sm:$0xff] }
 0x688   :  { %32437 = vmatprep.subr.mxu1 %v39972_v24  ;;  %32403 = vmatpush3.msra.mxu0 %v40046_v5  ;;  %v40051_v24 = vld [vmem:[#allocation116_spill] sm:$0xff] }
 0x689   :  { %32438 = vmatpush3.msra.mxu1 %v39974_v51  ;;  %32404 = vmatprep.subr.mxu0 %v40047_v20  ;;  %v40052_v51 = vld [vmem:[#allocation117_spill] sm:$0xff]  ;;  %v40084_v54 = vld [vmem:[#allocation212_spill] sm:$0xff]  ;;  %v40086_v20 = vld [vmem:[#allocation215_spill] sm:$0xff] }
 0x68a   :  { %32439 = vmatprep.subr.mxu1 %v39976_v45  ;;  %32405 = vmatpush3.msra.mxu0 %v40048_v25  ;;  %v40053_v45 = vld [vmem:[#allocation122_spill] sm:$0xff]  ;;  %v40085_v5 = vld [vmem:[#allocation172_spill] sm:$0xff]  ;;  %v40087_v25 = vld [vmem:[#allocation175_spill] sm:$0xff] }
 0x68b   :  { %32440 = vmatpush3.msra.mxu1 %v39978_v50  ;;  %32406 = vmatprep.subr.mxu0 %v40049_v23  ;;  %v40054_v50 = vld [vmem:[#allocation123_spill] sm:$0xff] }
 0x68c   :  { %32441 = vmatprep.subr.mxu1 %v39980_v36  ;;  %32407 = vmatpush3.msra.mxu0 %v40050_v63  ;;  %v40055_v36 = vld [vmem:[#allocation132_spill] sm:$0xff]  ;;  %v40088_v23 = vld [vmem:[#allocation219_spill] sm:$0xff]  ;;  %v40089_v63 = vld [vmem:[#allocation181_spill] sm:$0xff] }
 0x68d   :  { %32442 = vmatpush3.msra.mxu1 %v39982_v26  ;;  %32408 = vmatprep.subr.mxu0 %v40051_v24  ;;  %v40056_v26 = vld [vmem:[#allocation133_spill] sm:$0xff]  ;;  %v38158_v24 = vsub.f32 %v28536_v30, %v38145_v6  ;;  %v40101_v30 = vld [vmem:[#allocation211_spill] sm:$0xff] }
 0x68e   :  { %32443 = vmatprep.subr.mxu1 %v39984_v60  ;;  %32409 = vmatpush3.msra.mxu0 %v40052_v51  ;;  %v40057_v60 = vld [vmem:[#allocation138_spill] sm:$0xff]  ;;  %v40090_v51 = vld [vmem:[#allocation225_spill] sm:$0xff] }
 0x68f   :  { %32444 = vmatpush3.msra.mxu1 %v39985_v37  ;;  %32410 = vmatprep.subr.mxu0 %v40053_v45  ;;  %v40058_v37 = vld [vmem:[#allocation159_spill] sm:$0xff]  ;;  %v40091_v45 = vld [vmem:[#allocation196_spill] sm:$0xff] }
 0x690   :  { %32445 = vmatprep.subr.mxu1 %v39987_v12  ;;  %32411 = vmatpush3.msra.mxu0 %v40054_v50  ;;  %v40060_v12 = vld [vmem:[#allocation166_spill] sm:$0xff]  ;;  %v38163_v50 = vsub.f32 %v32934_v48, %v38149_v32 }
 0x691   :  { %32446 = vmatpush3.msra.mxu1 %v39988_v1  ;;  %32412 = vmatprep.subr.mxu0 %v40055_v36  ;;  %v40059_v1 = vld [vmem:[#allocation139_spill] sm:$0xff]  ;;  %v40092_v36 = vld [vmem:[#allocation241_spill] sm:$0xff]  ;;  %v40100_v48 = vld [vmem:[#allocation254_spill] sm:$0xff] }
 0x692   :  { %32447 = vmatprep.subr.mxu1 %v39989_v14  ;;  %32413 = vmatpush3.msra.mxu0 %v40056_v26  ;;  %v40061_v14 = vld [vmem:[#allocation142_spill] sm:$0xff]  ;;  %v40093_v26 = vld [vmem:[#allocation199_spill] sm:$0xff] }
 0x693   :  { %29292 = vmatprep.mubr.f32.mxu0 %v37914_v17  ;;  %32448 = vmatpush3.msra.mxu1 %v39990_v19  ;;  %v40064_v19 = vld [vmem:[#allocation185_spill] sm:$0xff] }
 0x694   :  { %29294 = vmatmul.mubr.f32.vlgmr.msra.gmra.mxu0 %v37931_v22  ;;  %29396 = vmatprep.mubr.f32.mxu1 %v37914_v17  ;;  %v40066_v17 = vld [vmem:[#allocation189_spill] sm:$0xff] }
 0x695   :  { %32452 = vmatprep.subr.mxu0 %v40057_v60  ;;  %32487 = vmatprep.subr.mxu1 %v40058_v37  ;;  %v40094_v37 = vld [vmem:[#allocation244_spill] sm:$0xff] }
 0x696   :  { %29398 = vmatmul.mubr.f32.vlgmr.msra.gmra.mxu1 %v37931_v22  ;;  %32453 = vmatpush3.msra.mxu0 %v40059_v1  ;;  %v40069_v22 = vld [vmem:[#allocation149_spill] sm:$0xff] }
 0x697   :  { %32488 = vmatpush3.msra.mxu1 %v40060_v12  ;;  %32454 = vmatprep.subr.mxu0 %v40061_v14  ;;  %v40095_v12 = vld [vmem:[#allocation203_spill] sm:$0xff] }
 0x698   :  { %32489 = vmatprep.subr.mxu1 %v40062_v38  ;;  %32455 = vmatpush3.msra.mxu0 %v40063_v18  ;;  %v40096_v38 = vld [vmem:[#allocation249_spill] sm:$0xff] }
 0x699   :  { %32490 = vmatpush3.msra.mxu1 %v40064_v19  ;;  %32456 = vmatprep.subr.mxu0 %v40065_v49  ;;  %v40097_v19 = vld [vmem:[#allocation206_spill] sm:$0xff] }
 0x69a   :  { %32491 = vmatprep.subr.mxu1 %v40066_v17  ;;  %32457 = vmatpush3.msra.mxu0 %v40067_v39  ;;  %v39240_v17 = vand.u32 4294901760, %v38158_v24 }
 0x69b   :  { %32492 = vmatpush3.msra.mxu1 %v40068_v40  ;;  %32458 = vmatprep.subr.mxu0 %v40069_v22  ;;  %v40098_v40 = vld [vmem:[#allocation252_spill] sm:$0xff] }
 0x69c   :  { %32493 = vmatprep.subr.mxu1 %v40070_v13  ;;  %32459 = vmatpush3.msra.mxu0 %v40071_v15  ;;  %v40099_v13 = vld [vmem:[#allocation209_spill] sm:$0xff] }
 0x69d   :  { %32494 = vmatpush3.msra.mxu1 %v40072_v9  ;;  %32460 = vmatprep.subr.mxu0 %v40073_v46  ;;  %v39243_v9 = vand.u32 4294901760, %v38163_v50 }
 0x69e   :  { %32495 = vmatprep.subr.mxu1 %v40074_v31  ;;  %32461 = vmatpush3.msra.mxu0 %v40075_v41  ;;  %v40102_v31 = vld [vmem:[#allocation256_spill] sm:$0xff] }
 0x69f   :  { %32496 = vmatpush3.msra.mxu1 %v40076_v44  ;;  %32462 = vmatprep.subr.mxu0 %v40077_v47  ;;  %v40103_v44 = vld [vmem:[#allocation214_spill] sm:$0xff] }
 0x6a0   :  { %32497 = vmatprep.subr.mxu1 %v40078_v55  ;;  %32463 = vmatpush3.msra.mxu0 %v40079_v2  ;;  %v40104_v55 = vld [vmem:[#allocation258_spill] sm:$0xff] }
 0x6a1   :  { %32498 = vmatpush3.msra.mxu1 %v40080_v7  ;;  %32464 = vmatprep.subr.mxu0 %v40081_v43  ;;  %v40105_v7 = vld [vmem:[#allocation218_spill] sm:$0xff] }
 0x6a2   :  { %32499 = vmatprep.subr.mxu1 %v40082_v56  ;;  %32465 = vmatpush3.msra.mxu0 %v40083_v35  ;;  %v29502_v56 = vsub.f32 %v38158_v24, %v39240_v17 }
 0x6a3   :  { %32500 = vmatpush3.msra.mxu1 %v40084_v54  ;;  %32466 = vmatprep.subr.mxu0 %v40085_v5  ;;  %v40106_v54 = vld [vmem:[#allocation260_spill] sm:$0xff] }
 0x6a4   :  { %32501 = vmatprep.subr.mxu1 %v40086_v20  ;;  %32467 = vmatpush3.msra.mxu0 %v40087_v25  ;;  %v40107_v20 = vld [vmem:[#allocation222_spill] sm:$0xff] }
 0x6a5   :  { %32502 = vmatpush3.msra.mxu1 %v40088_v23  ;;  %32468 = vmatprep.subr.mxu0 %v40089_v63  ;;  %v29508_v23 = vsub.f32 %v38163_v50, %v39243_v9  ;;  %v40117_v9 = vld [vmem:[#allocation237_spill] sm:$0xff] }
 0x6a6   :  { %32503 = vmatprep.subr.mxu1 %v40090_v51  ;;  %32469 = vmatpush3.msra.mxu0 %v40091_v45  ;;  %v40108_v51 = vld [vmem:[#allocation261_spill] sm:$0xff] }
 0x6a7   :  { %32504 = vmatpush3.msra.mxu1 %v40092_v36  ;;  %32470 = vmatprep.subr.mxu0 %v40093_v26  ;;  %v40109_v36 = vld [vmem:[#allocation224_spill] sm:$0xff]  ;;  %v29509_v17 = vand.u32 4294901760, %v29508_v23  ;;  %v40122_v23 = vld [vmem:[#allocation141_spill] sm:$0xff] }
 0x6a8   :  { %32505 = vmatprep.subr.mxu1 %v40094_v37  ;;  %32471 = vmatpush3.msra.mxu0 %v40095_v12  ;;  %v40110_v37 = vld [vmem:[#allocation262_spill] sm:$0xff] }
 0x6a9   :  { %32506 = vmatpush3.msra.mxu1 %v40096_v38  ;;  %32472 = vmatprep.subr.mxu0 %v40097_v19  ;;  %v40111_v38 = vld [vmem:[#allocation228_spill] sm:$0xff] }
 0x6aa   :  { %32507 = vmatprep.subr.mxu1 %v40098_v40  ;;  %32473 = vmatpush3.msra.mxu0 %v40099_v13  ;;  %v40112_v40 = vld [vmem:[#allocation263_spill] sm:$0xff] }
 0x6ab   :  { %32508 = vmatpush3.msra.mxu1 %v40100_v48  ;;  %32474 = vmatprep.subr.mxu0 %v40101_v30  ;;  %v40113_v48 = vld [vmem:[#allocation231_spill] sm:$0xff] }
 0x6ac   :  { %32509 = vmatprep.subr.mxu1 %v40102_v31  ;;  %32475 = vmatpush3.msra.mxu0 %v40103_v44  ;;  %v29503_v31 = vand.u32 4294901760, %v29502_v56  ;;  %v40121_v56 = vld [vmem:[#allocation140_spill] sm:$0xff] }
 0x6ad   :  { %32510 = vmatpush3.msra.mxu1 %v40104_v55  ;;  %32476 = vmatprep.subr.mxu0 %v40105_v7  ;;  %v40114_v55 = vld [vmem:[#allocation264_spill] sm:$0xff] }
 0x6ae   :  { %32511 = vmatprep.subr.mxu1 %v40106_v54  ;;  %32477 = vmatpush3.msra.mxu0 %v40107_v20  ;;  %v40115_v54 = vld [vmem:[#allocation234_spill] sm:$0xff] }
 0x6af   :  { %32512 = vmatpush3.msra.mxu1 %v40108_v51  ;;  %32478 = vmatprep.subr.mxu0 %v40109_v36  ;;  %v40118_v51 = vld [vmem:[#allocation266_spill] sm:$0xff] }
 0x6b0   :  { %32513 = vmatprep.subr.mxu1 %v40110_v37  ;;  %32479 = vmatpush3.msra.mxu0 %v40111_v38  ;;  %v40120_v37 = vld [vmem:[#allocation267_spill] sm:$0xff] }
 0x6b1   :  { %32514 = vmatpush3.msra.mxu1 %v40112_v40  ;;  %32480 = vmatprep.subr.mxu0 %v40113_v48  ;;  %v40124_v40 = vld [vmem:[#allocation150_spill] sm:$0xff] }
 0x6b2   :  { %32515 = vmatprep.subr.mxu1 %v40114_v55  ;;  %32481 = vmatpush3.msra.mxu0 %v40115_v54  ;;  %v40127_v55 = vld [vmem:[#allocation157_spill] sm:$0xff] }
 0x6b3   :  { %32516 = vmatpush3.msra.mxu1 %v40116_v3  ;;  %32482 = vmatprep.subr.mxu0 %v40117_v9  ;;  %v40123_v3 = vld [vmem:[#allocation148_spill] sm:$0xff] }
 0x6b4   :  { %32517 = vmatprep.subr.mxu1 %v40118_v51  ;;  %32483 = vmatpush3.msra.mxu0 %v40119_v61  ;;  %v40128_v51 = vld [vmem:[#allocation161_spill] sm:$0xff] }
 0x6b5   :  { %29504 = vmatprep.mubr.f32.mxu0 %v29503_v31  ;;  %32518 = vmatpush3.msra.mxu1 %v40120_v37  ;;  %v40126_v31 = vld [vmem:[#allocation154_spill] sm:$0xff]  ;;  %v40129_v37 = vld [vmem:[#allocation164_spill] sm:$0xff] }
 0x6b6   :  { %29510 = vmatmul.mubr.f32.vlgmr.msra.gmra.mxu0 %v29509_v17  ;;  %29740 = vmatprep.mubr.f32.mxu1 %v38145_v6  ;;  %v40125_v17 = vld [vmem:[#allocation152_spill] sm:$0xff] }
 0x6b7   :  { %32522 = vmatprep.subr.mxu0 %v40121_v56  ;;  %32557 = vmatprep.subr.mxu1 %v40057_v60  ;;  %v40130_v56 = vld [vmem:[#allocation168_spill] sm:$0xff] }
 0x6b8   :  { %29742 = vmatmul.mubr.f32.vlgmr.msra.gmra.mxu1 %v38149_v32  ;;  %32523 = vmatpush3.msra.mxu0 %v40122_v23  ;;  %v40131_v23 = vld [vmem:[#allocation171_spill] sm:$0xff] }
 0x6b9   :  { %32558 = vmatpush3.msra.mxu1 %v40059_v1  ;;  %32524 = vmatprep.subr.mxu0 %v40123_v3  ;;  %v31644_v3 = vpop.f32.mrf.mxu0 }
 0x6ba   :  { %32559 = vmatprep.subr.mxu1 %v40061_v14  ;;  %32525 = vmatpush3.msra.mxu0 %v40124_v40  ;;  %v40132_v40 = vld [vmem:[#allocation174_spill] sm:$0xff] }
 0x6bb   :  { %32560 = vmatpush3.msra.mxu1 %v40063_v18  ;;  %32526 = vmatprep.subr.mxu0 %v40125_v17  ;;  %v40133_v17 = vld [vmem:[#allocation178_spill] sm:$0xff] }
 0x6bc   :  { %32561 = vmatprep.subr.mxu1 %v40065_v49  ;;  %32527 = vmatpush3.msra.mxu0 %v40126_v31  ;;  %v40134_v31 = vld [vmem:[#allocation180_spill] sm:$0xff] }
 0x6bd   :  { %32562 = vmatpush3.msra.mxu1 %v40067_v39  ;;  %32528 = vmatprep.subr.mxu0 %v40127_v55  ;;  %v40135_v55 = vld [vmem:[#allocation184_spill] sm:$0xff] }
 0x6be   :  { %32563 = vmatprep.subr.mxu1 %v40069_v22  ;;  %32529 = vmatpush3.msra.mxu0 %v40128_v51  ;;  %v31645_v51 = vpop.f32.mrf.mxu0 }
 0x6bf   :  { %32564 = vmatpush3.msra.mxu1 %v40071_v15  ;;  %32530 = vmatprep.subr.mxu0 %v40129_v37  ;;  %v40136_v37 = vld [vmem:[#allocation187_spill] sm:$0xff]  ;;  %v31646_v27 = vadd.f32 %v31645_v51, %v31644_v3  ;;  %v40147_v51 = vld [vmem:[#allocation236_spill] sm:$0xff] }
 0x6c0   :  { %32565 = vmatprep.subr.mxu1 %v40073_v46  ;;  %32531 = vmatpush3.msra.mxu0 %v40130_v56  ;;  %v40137_v56 = vld [vmem:[#allocation193_spill] sm:$0xff] }
 0x6c1   :  { %32566 = vmatpush3.msra.mxu1 %v40075_v41  ;;  %32532 = vmatprep.subr.mxu0 %v40131_v23  ;;  %v31679_v23 = vpop.f32.mrf.mxu1 }
 0x6c2   :  { %32567 = vmatprep.subr.mxu1 %v40077_v47  ;;  %32533 = vmatpush3.msra.mxu0 %v40132_v40  ;;  %v31714_v40 = vpop.f32.mrf.mxu0 }
 0x6c3   :  { %32568 = vmatpush3.msra.mxu1 %v40079_v2  ;;  %32534 = vmatprep.subr.mxu0 %v40133_v17  ;;  %v40138_v17 = vld [vmem:[#allocation205_spill] sm:$0xff]  ;;  %v31680_v34 = vpop.f32.mrf.mxu1 }
 0x6c4   :  { %32569 = vmatprep.subr.mxu1 %v40081_v43  ;;  %32535 = vmatpush3.msra.mxu0 %v40134_v31  ;;  %v40139_v31 = vld [vmem:[#allocation208_spill] sm:$0xff]  ;;  %v31681_v21 = vadd.f32 %v31680_v34, %v31679_v23  ;;  %v40149_v23 = vld [vmem:[#allocation243_spill] sm:$0xff] }
 0x6c5   :  { %32570 = vmatpush3.msra.mxu1 %v40083_v35  ;;  %32536 = vmatprep.subr.mxu0 %v40135_v55  ;;  %v40140_v55 = vld [vmem:[#allocation213_spill] sm:$0xff] }
 0x6c6   :  { %32571 = vmatprep.subr.mxu1 %v40085_v5  ;;  %32537 = vmatpush3.msra.mxu0 %v40136_v37  ;;  %v40141_v37 = vld [vmem:[#allocation217_spill] sm:$0xff]  ;;  %v26273_v3 = vadd.f32 %v31681_v21, %v31646_v27  ;;  %v40150_v21 = vld [vmem:[#allocation246_spill] sm:$0xff] }
 0x6c7   :  { %32572 = vmatpush3.msra.mxu1 %v40087_v25  ;;  %32538 = vmatprep.subr.mxu0 %v40137_v56  ;;  %v31715_v56 = vpop.f32.mrf.mxu0 }
 0x6c8   :  { %32573 = vmatprep.subr.mxu1 %v40089_v63  ;;  %32539 = vmatpush3.msra.mxu0 %v40138_v17  ;;  %v40143_v17 = vld [vmem:[#allocation223_spill] sm:$0xff]  ;;  %v31716_v42 = vadd.f32 %v31715_v56, %v31714_v40 }
 0x6c9   :  { %32574 = vmatpush3.msra.mxu1 %v40091_v45  ;;  %32540 = vmatprep.subr.mxu0 %v40139_v31  ;;  %v31749_v31 = vpop.f32.mrf.mxu1  ;;  %v31784_v62 = vpop.f32.mrf.mxu0 }
 0x6ca   :  { %32575 = vmatprep.subr.mxu1 %v40093_v26  ;;  %32541 = vmatpush3.msra.mxu0 %v40140_v55  ;;  %v40144_v55 = vld [vmem:[#allocation227_spill] sm:$0xff]  ;;  %v26411_v34 = vadd.f32 %v31716_v42, %v26273_v3 }
 0x6cb   :  { %32576 = vmatpush3.msra.mxu1 %v40095_v12  ;;  %32542 = vmatprep.subr.mxu0 %v40141_v37  ;;  %v40145_v37 = vld [vmem:[#allocation230_spill] sm:$0xff]  ;;  %v31785_v16 = vpop.f32.mrf.mxu0 }
 0x6cc   :  { %32577 = vmatprep.subr.mxu1 %v40097_v19  ;;  %32543 = vmatpush3.msra.mxu0 %v40142_v33  ;;  %v40146_v33 = vld [vmem:[#allocation233_spill] sm:$0xff] }
 0x6cd   :  { %32578 = vmatpush3.msra.mxu1 %v40099_v13  ;;  %32544 = vmatprep.subr.mxu0 %v40143_v17  ;;  %v31750_v17 = vpop.f32.mrf.mxu1  ;;  %v31854_v56 = vpop.f32.mrf.mxu0 }
 0x6ce   :  { %32579 = vmatprep.subr.mxu1 %v40101_v30  ;;  %32545 = vmatpush3.msra.mxu0 %v40144_v55  ;;  %v40148_v55 = vld [vmem:[#allocation239_spill] sm:$0xff]  ;;  %v31751_v27 = vadd.f32 %v31750_v17, %v31749_v31  ;;  %v40153_v31 = vand.u32 4294901760, %v38158_v24 }
 0x6cf   :  { %32580 = vmatpush3.msra.mxu1 %v40103_v44  ;;  %32546 = vmatprep.subr.mxu0 %v40145_v37  ;;  %v31819_v40 = vpop.f32.mrf.mxu1  ;;  %v31786_v37 = vadd.f32 %v31785_v16, %v31784_v62  ;;  %v40154_v16 = vld [vmem:[#allocation143_spill] sm:$0xff] }
 0x6d0   :  { %32581 = vmatprep.subr.mxu1 %v40105_v7  ;;  %32547 = vmatpush3.msra.mxu0 %v40146_v33  ;;  %v40151_v33 = vld [vmem:[#allocation248_spill] sm:$0xff]  ;;  %v26519_v42 = vadd.f32 %v31751_v27, %v26411_v34  ;;  %v40155_v34 = vand.u32 4294901760, %v38163_v50 }
 0x6d1   :  { %32582 = vmatpush3.msra.mxu1 %v40107_v20  ;;  %32548 = vmatprep.subr.mxu0 %v40147_v51  ;;  %v40152_v51 = vld [vmem:[#allocation251_spill] sm:$0xff]  ;;  %v31820_v3 = vpop.f32.mrf.mxu1 }
 0x6d2   :  { %32583 = vmatprep.subr.mxu1 %v40109_v36  ;;  %32549 = vmatpush3.msra.mxu0 %v40148_v55  ;;  %v31855_v55 = vpop.f32.mrf.mxu0  ;;  %v26687_v62 = vadd.f32 %v31786_v37, %v26519_v42  ;;  %v31821_v27 = vadd.f32 %v31820_v3, %v31819_v40  ;;  %v40162_v3 = vld [vmem:[#allocation173_spill] sm:$0xff] }
 0x6d3   :  { %32584 = vmatpush3.msra.mxu1 %v40111_v38  ;;  %32550 = vmatprep.subr.mxu0 %v40149_v23  ;;  %v31889_v17 = vpop.f32.mrf.mxu1 }
 0x6d4   :  { %32585 = vmatprep.subr.mxu1 %v40113_v48  ;;  %32551 = vmatpush3.msra.mxu0 %v40150_v21  ;;  %v31924_v23 = vpop.f32.mrf.mxu0  ;;  %v40156_v21 = vld [vmem:[#allocation146_spill] sm:$0xff]  ;;  %v26791_v37 = vadd.f32 %v31821_v27, %v26687_v62  ;;  %v40163_v62 = vld [vmem:[#allocation177_spill] sm:$0xff]  ;;  %v40168_v27 = vld [vmem:[#allocation192_spill] sm:$0xff] }
 0x6d5   :  { %32586 = vmatpush3.msra.mxu1 %v40115_v54  ;;  %32552 = vmatprep.subr.mxu0 %v40151_v33  ;;  %v31856_v33 = vadd.f32 %v31855_v55, %v31854_v56  ;;  %v31890_v42 = vpop.f32.mrf.mxu1 }
 0x6d6   :  { %32587 = vmatprep.subr.mxu1 %v40117_v9  ;;  %32553 = vmatpush3.msra.mxu0 %v40152_v51  ;;  %v40157_v51 = vld [vmem:[#allocation156_spill] sm:$0xff] }
 0x6d7   :  { %29877 = vmatprep.mubr.f32.mxu0 %v38158_v24  ;;  %32588 = vmatpush3.msra.mxu1 %v40119_v61  ;;  %v40158_v24 = vld [vmem:[#allocation160_spill] sm:$0xff]  ;;  %v26903_v40 = vadd.f32 %v31856_v33, %v26791_v37  ;;  %v31959_v56 = vpop.f32.mrf.mxu1 }
 0x6d8   :  { %29880 = vmatmul.mubr.f32.vlgmr.msra.gmra.mxu0 %v38163_v50  ;;  %29984 = vmatprep.mubr.f32.mxu1 %v40153_v31  ;;  %v31925_v50 = vpop.f32.mrf.mxu0  ;;  %v40160_v31 = vld [vmem:[#allocation167_spill] sm:$0xff] }
 0x6d9   :  { %32592 = vmatprep.subr.mxu0 %v40154_v16  ;;  %32627 = vmatprep.subr.mxu1 %v40057_v60  ;;  %v40159_v60 = vld [vmem:[#allocation163_spill] sm:$0xff]  ;;  %v31926_v55 = vadd.f32 %v31925_v50, %v31924_v23 }
 0x6da   :  { %29988 = vmatmul.mubr.f32.vlgmr.msra.gmra.mxu1 %v40155_v34  ;;  %32593 = vmatpush3.msra.mxu0 %v40156_v21  ;;  %v31960_v34 = vpop.f32.mrf.mxu1 }
 0x6db   :  { %32628 = vmatpush3.msra.mxu1 %v40059_v1  ;;  %32594 = vmatprep.subr.mxu0 %v40157_v51  ;;  %v40161_v1 = vld [vmem:[#allocation170_spill] sm:$0xff]  ;;  %v40169_v51 = vld [vmem:[#allocation195_spill] sm:$0xff] }
 0x6dc   :  { %32629 = vmatprep.subr.mxu1 %v40061_v14  ;;  %32595 = vmatpush3.msra.mxu0 %v40158_v24  ;;  %v31994_v14 = vpop.f32.mrf.mxu0  ;;  %v32029_v23 = vpop.f32.mrf.mxu1 }
 0x6dd   :  { %32630 = vmatpush3.msra.mxu1 %v40063_v18  ;;  %32596 = vmatprep.subr.mxu0 %v40159_v60  ;;  %v31891_v18 = vadd.f32 %v31890_v42, %v31889_v17 }
 0x6de   :  { %32631 = vmatprep.subr.mxu1 %v40065_v49  ;;  %32597 = vmatpush3.msra.mxu0 %v40160_v31  ;;  %v40164_v49 = vld [vmem:[#allocation179_spill] sm:$0xff]  ;;  %v31995_v21 = vpop.f32.mrf.mxu0  ;;  %v32030_v37 = vpop.f32.mrf.mxu1  ;;  %v40174_v31 = vld [vmem:[#allocation226_spill] sm:$0xff] }
 0x6df   :  { %32632 = vmatpush3.msra.mxu1 %v40067_v39  ;;  %32598 = vmatprep.subr.mxu0 %v40161_v1  ;;  %v27135_v16 = vadd.f32 %v31891_v18, %v26903_v40  ;;  %v40165_v39 = vld [vmem:[#allocation183_spill] sm:$0xff]  ;;  %v31996_v33 = vadd.f32 %v31995_v21, %v31994_v14  ;;  %v40175_v1 = vld [vmem:[#allocation229_spill] sm:$0xff] }
 0x6e0   :  { %32633 = vmatprep.subr.mxu1 %v40069_v22  ;;  %32599 = vmatpush3.msra.mxu0 %v40162_v3  ;;  %v40166_v22 = vld [vmem:[#allocation186_spill] sm:$0xff]  ;;  %v32099_v50 = vpop.f32.mrf.mxu1 }
 0x6e1   :  { %32634 = vmatpush3.msra.mxu1 %v40071_v15  ;;  %32600 = vmatprep.subr.mxu0 %v40163_v62  ;;  %v27273_v17 = vadd.f32 %v31926_v55, %v27135_v16  ;;  %v40167_v15 = vld [vmem:[#allocation190_spill] sm:$0xff]  ;;  %v40181_v16 = vld [vmem:[#allocation247_spill] sm:$0xff] }
 0x6e2   :  { %32635 = vmatprep.subr.mxu1 %v40073_v46  ;;  %32601 = vmatpush3.msra.mxu0 %v40164_v49  ;;  %v32064_v46 = vpop.f32.mrf.mxu0  ;;  %v32100_v14 = vpop.f32.mrf.mxu1 }
 0x6e3   :  { %32636 = vmatpush3.msra.mxu1 %v40075_v41  ;;  %32602 = vmatprep.subr.mxu0 %v40165_v39  ;;  %v31961_v41 = vadd.f32 %v31960_v34, %v31959_v56 }
 0x6e4   :  { %32637 = vmatprep.subr.mxu1 %v40077_v47  ;;  %32603 = vmatpush3.msra.mxu0 %v40166_v22  ;;  %v40170_v47 = vld [vmem:[#allocation198_spill] sm:$0xff]  ;;  %v32065_v60 = vpop.f32.mrf.mxu0  ;;  %v32169_v55 = vpop.f32.mrf.mxu1 }
 0x6e5   :  { %32638 = vmatpush3.msra.mxu1 %v40079_v2  ;;  %32604 = vmatprep.subr.mxu0 %v40167_v15  ;;  %v27381_v24 = vadd.f32 %v31961_v41, %v27273_v17  ;;  %v40171_v2 = vld [vmem:[#allocation202_spill] sm:$0xff]  ;;  %v32066_v40 = vadd.f32 %v32065_v60, %v32064_v46  ;;  %v40196_v60 = vld [vmem:[#allocation317_spill] sm:$0xff] }
 0x6e6   :  { %32639 = vmatprep.subr.mxu1 %v40081_v43  ;;  %32605 = vmatpush3.msra.mxu0 %v40168_v27  ;;  %v40172_v43 = vld [vmem:[#allocation216_spill] sm:$0xff]  ;;  %v32170_v34 = vpop.f32.mrf.mxu1  ;;  %v40190_v27 = vld [vmem:[#allocation299_spill] sm:$0xff]  ;;  %v40191_v41 = vld [vmem:[#allocation302_spill] sm:$0xff] }
 0x6e7   :  { %32640 = vmatpush3.msra.mxu1 %v40083_v35  ;;  %32606 = vmatprep.subr.mxu0 %v40169_v51  ;;  %v27549_v42 = vadd.f32 %v31996_v33, %v27381_v24  ;;  %v40173_v35 = vld [vmem:[#allocation220_spill] sm:$0xff]  ;;  %v32171_v15 = vadd.f32 %v32170_v34, %v32169_v55  ;;  %v32935_v24 = vld [vmem:[%s38607_s0 + $0x10] sm:$0xff]  ;;  %v40217_v34 = vld [vmem:[#allocation319_spill] sm:$0xff] }
 0x6e8   :  { %32641 = vmatprep.subr.mxu1 %v40085_v5  ;;  %32607 = vmatpush3.msra.mxu0 %v40170_v47  ;;  %v32134_v5 = vpop.f32.mrf.mxu0  ;;  %v40193_v51 = vld [vmem:[#allocation308_spill] sm:$0xff]  ;;  %v40194_v47 = vld [vmem:[#allocation311_spill] sm:$0xff]  ;;  %v40210_v55 = vld [vmem:[#allocation357_spill] sm:$0xff] }
 0x6e9   :  { %32642 = vmatpush3.msra.mxu1 %v40087_v25  ;;  %32608 = vmatprep.subr.mxu0 %v40171_v2  ;;  %v32031_v25 = vadd.f32 %v32030_v37, %v32029_v23  ;;  %v28537_v2 = vcombine.high %v32935_v24, %v32935_v24  ;;  %v40195_v37 = vld [vmem:[#allocation314_spill] sm:$0xff] }
 0x6ea   :  { %32643 = vmatprep.subr.mxu1 %v40089_v63  ;;  %32609 = vmatpush3.msra.mxu0 %v40172_v43  ;;  %v40176_v63 = vld [vmem:[#allocation232_spill] sm:$0xff]  ;;  %v32135_v3 = vpop.f32.mrf.mxu0 }
 0x6eb   :  { %32644 = vmatpush3.msra.mxu1 %v40091_v45  ;;  %32610 = vmatprep.subr.mxu0 %v40173_v35  ;;  %v27653_v56 = vadd.f32 %v32031_v25, %v27549_v42  ;;  %v40177_v45 = vld [vmem:[#allocation235_spill] sm:$0xff]  ;;  %v32136_v49 = vadd.f32 %v32135_v3, %v32134_v5  ;;  %v32239_v17 = vpop.f32.mrf.mxu1  ;;  %v40197_v43 = vld [vmem:[#allocation320_spill] sm:$0xff]  ;;  %v38372_v35 = vand.u32 4294901760, %v28537_v2  ;;  %v40200_v5 = vld [vmem:[#allocation326_spill] sm:$0xff] }
 0x6ec   :  { %32645 = vmatprep.subr.mxu1 %v40093_v26  ;;  %32611 = vmatpush3.msra.mxu0 %v40174_v31  ;;  %v40178_v26 = vld [vmem:[#allocation238_spill] sm:$0xff]  ;;  %v40198_v42 = vld [vmem:[#allocation323_spill] sm:$0xff]  ;;  %v38376_v31 = vand.u32 4294901760, %v32935_v24  ;;  %v40207_v3 = vld [vmem:[#allocation304_spill] sm:$0xff] }
 0x6ed   :  { %32646 = vmatpush3.msra.mxu1 %v40095_v12  ;;  %32612 = vmatprep.subr.mxu0 %v40175_v1  ;;  %v27765_v18 = vadd.f32 %v32066_v40, %v27653_v56  ;;  %v40179_v12 = vld [vmem:[#allocation242_spill] sm:$0xff]  ;;  %v32240_v23 = vpop.f32.mrf.mxu1  ;;  %v40201_v25 = vld [vmem:[#allocation283_spill] sm:$0xff]  ;;  %v40205_v56 = vld [vmem:[#allocation289_spill] sm:$0xff] }
 0x6ee   :  { %32647 = vmatprep.subr.mxu1 %v40097_v19  ;;  %32613 = vmatpush3.msra.mxu0 %v40176_v63  ;;  %v40180_v19 = vld [vmem:[#allocation245_spill] sm:$0xff]  ;;  %v40202_v40 = vld [vmem:[#allocation330_spill] sm:$0xff] }
 0x6ef   :  { %32648 = vmatpush3.msra.mxu1 %v40099_v13  ;;  %32614 = vmatprep.subr.mxu0 %v40177_v45  ;;  %v32101_v13 = vadd.f32 %v32100_v14, %v32099_v50  ;;  %v40199_v50 = vld [vmem:[#allocation280_spill] sm:$0xff]  ;;  %v40203_v1 = vld [vmem:[#allocation286_spill] sm:$0xff]  ;;  %v38385_v14 = vsub.f32 %v28537_v2, %v38372_v35 }
 0x6f0   :  { %32649 = vmatprep.subr.mxu1 %v40101_v30  ;;  %32615 = vmatpush3.msra.mxu0 %v40178_v26  ;;  %v40182_v30 = vld [vmem:[#allocation250_spill] sm:$0xff] }
 0x6f1   :  { %32650 = vmatpush3.msra.mxu1 %v40103_v44  ;;  %32616 = vmatprep.subr.mxu0 %v40179_v12  ;;  %v27997_v39 = vadd.f32 %v32101_v13, %v27765_v18  ;;  %v40183_v44 = vld [vmem:[#allocation253_spill] sm:$0xff]  ;;  %v40204_v63 = vld [vmem:[#allocation334_spill] sm:$0xff]  ;;  %v38390_v18 = vsub.f32 %v32935_v24, %v38376_v31  ;;  %v40209_v12 = vld [vmem:[#allocation307_spill] sm:$0xff] }
 0x6f2   :  { %32651 = vmatprep.subr.mxu1 %v40105_v7  ;;  %32617 = vmatpush3.msra.mxu0 %v40180_v19  ;;  %v32204_v62 = vpop.f32.mrf.mxu0  ;;  %v40184_v7 = vld [vmem:[#allocation255_spill] sm:$0xff]  ;;  %v40206_v45 = vld [vmem:[#allocation338_spill] sm:$0xff]  ;;  %v40213_v13 = vld [vmem:[#allocation313_spill] sm:$0xff] }
 0x6f3   :  { %32652 = vmatpush3.msra.mxu1 %v40107_v20  ;;  %32618 = vmatprep.subr.mxu0 %v40181_v16  ;;  %v28135_v22 = vadd.f32 %v32136_v49, %v27997_v39  ;;  %v40185_v20 = vld [vmem:[#allocation257_spill] sm:$0xff]  ;;  %v40208_v26 = vld [vmem:[#allocation354_spill] sm:$0xff]  ;;  %v40214_v49 = vld [vmem:[#allocation363_spill] sm:$0xff]  ;;  %v30363_v16 = vand.u32 4294901760, %v38385_v14 }
 0x6f4   :  { %32653 = vmatprep.subr.mxu1 %v40109_v36  ;;  %32619 = vmatpush3.msra.mxu0 %v40182_v30  ;;  %v32205_v21 = vpop.f32.mrf.mxu0  ;;  %v40186_v36 = vld [vmem:[#allocation259_spill] sm:$0xff]  ;;  %v40211_v19 = vld [vmem:[#allocation310_spill] sm:$0xff]  ;;  %v40215_v30 = vld [vmem:[#allocation316_spill] sm:$0xff] }
 0x6f5   :  { %32654 = vmatpush3.msra.mxu1 %v40111_v38  ;;  %32620 = vmatprep.subr.mxu0 %v40183_v44  ;;  %v32206_v38 = vadd.f32 %v32205_v21, %v32204_v62  ;;  %v40212_v62 = vld [vmem:[#allocation360_spill] sm:$0xff]  ;;  %v40216_v39 = vld [vmem:[#allocation366_spill] sm:$0xff]  ;;  %v30369_v44 = vand.u32 4294901760, %v38390_v18 }
 0x6f6   :  { %32655 = vmatprep.subr.mxu1 %v40113_v48  ;;  %32621 = vmatpush3.msra.mxu0 %v40184_v7  ;;  %v40187_v48 = vld [vmem:[#allocation290_spill] sm:$0xff]  ;;  %v40218_v7 = vld [vmem:[#allocation368_spill] sm:$0xff] }
 0x6f7   :  { %32656 = vmatpush3.msra.mxu1 %v40115_v54  ;;  %32622 = vmatprep.subr.mxu0 %v40185_v20  ;;  %v28243_v54 = vadd.f32 %v32171_v15, %v28135_v22  ;;  %v40219_v21 = vld [vmem:[#allocation322_spill] sm:$0xff]  ;;  %v40220_v22 = vld [vmem:[#allocation136_spill] sm:$0xff]  ;;  %v40221_v20 = vld [vmem:[#allocation325_spill] sm:$0xff] }
 0x6f8   :  { %32657 = vmatprep.subr.mxu1 %v40117_v9  ;;  %32623 = vmatpush3.msra.mxu0 %v40186_v36  ;;  %v40188_v9 = vld [vmem:[#allocation293_spill] sm:$0xff]  ;;  %v30364_v36 = vsub.f32 %v38385_v14, %v30363_v16  ;;  %v40234_v24 = vld [vmem:[#allocation378_spill] sm:$0xff] }
 0x6f9   :  { %30154 = vmatprep.mubr.f32.mxu0 %v38145_v6  ;;  %32658 = vmatpush3.msra.mxu1 %v40119_v61  ;;  %v28411_v46 = vadd.f32 %v32206_v38, %v28243_v54  ;;  %v40189_v61 = vld [vmem:[#allocation296_spill] sm:$0xff]  ;;  %v40223_v15 = vld [vmem:[#allocation329_spill] sm:$0xff]  ;;  %v40235_v2 = vld [vmem:[#allocation350_spill] sm:$0xff] }
 0x6fa   :  { %30156 = vmatmul.mubr.f32.vlgmr.msra.gmra.mxu0 %v38149_v32  ;;  %30258 = vmatprep.mubr.f32.mxu1 %v38145_v6  ;;  %v32241_v6 = vadd.f32 %v32240_v23, %v32239_v17  ;;  %v40222_v17 = vld [vmem:[#allocation371_spill] sm:$0xff]  ;;  %v40224_v38 = vld [vmem:[#allocation373_spill] sm:$0xff]  ;;  %v40226_v23 = vld [vmem:[#allocation374_spill] sm:$0xff] }
 0x6fb   :  { %32662 = vmatprep.subr.mxu0 %v37228_v59  ;;  %32697 = vmatprep.subr.mxu1 %v40187_v48  ;;  %v30370_v48 = vsub.f32 %v38390_v18, %v30369_v44  ;;  %v40225_v54 = vld [vmem:[#allocation333_spill] sm:$0xff] }
 0x6fc   :  { %30260 = vmatmul.mubr.f32.vlgmr.msra.gmra.mxu1 %v38149_v32  ;;  %32663 = vmatpush3.msra.mxu0 %v37232_v8  ;;  %v40192_v32 = vld [vmem:[#allocation305_spill] sm:$0xff]  ;;  %v38355_v33 = vadd.f32 %v32241_v6, %v28411_v46  ;;  %v40228_v46 = vld [vmem:[#allocation375_spill] sm:$0xff]  ;;  %v40230_v6 = vld [vmem:[#allocation376_spill] sm:$0xff] }
 0x6fd   :  { %32698 = vmatpush3.msra.mxu1 %v40188_v9  ;;  %32664 = vmatprep.subr.mxu0 %v37237_v10  ;;  %v40227_v9 = vld [vmem:[#allocation337_spill] sm:$0xff] }
 0x6fe   :  { %32699 = vmatprep.subr.mxu1 %v40189_v61  ;;  %32665 = vmatpush3.msra.mxu0 %v37241_v28  ;;  %v40229_v61 = vld [vmem:[#allocation341_spill] sm:$0xff] }
 0x6ff   :  { %32700 = vmatpush3.msra.mxu1 %v40190_v27  ;;  %32666 = vmatprep.subr.mxu0 %v37249_v0  ;;  %v30365_v27 = vand.u32 4294901760, %v30364_v36  ;;  %v40252_v36 = vld [vmem:[#allocation295_spill] sm:$0xff] }
 0x700   :  { %32701 = vmatprep.subr.mxu1 %v40191_v41  ;;  %32667 = vmatpush3.msra.mxu0 %v37256_v52  ;;  %v40231_v41 = vld [vmem:[#allocation344_spill] sm:$0xff] }
 0x701   :  { %32702 = vmatpush3.msra.mxu1 %v40192_v32  ;;  %32668 = vmatprep.subr.mxu0 %v37264_v11  ;;  %v40232_v32 = vld [vmem:[#allocation377_spill] sm:$0xff] }
 0x702   :  { %32703 = vmatprep.subr.mxu1 %v40193_v51  ;;  %32669 = vmatpush3.msra.mxu0 %v37271_v29  ;;  %v30371_v51 = vand.u32 4294901760, %v30370_v48  ;;  %v40254_v48 = vld [vmem:[#allocation301_spill] sm:$0xff] }
 0x703   :  { %32704 = vmatpush3.msra.mxu1 %v40194_v47  ;;  %32670 = vmatprep.subr.mxu0 %v37286_v58  ;;  %v40233_v47 = vld [vmem:[#allocation347_spill] sm:$0xff] }
 0x704   :  { %32705 = vmatprep.subr.mxu1 %v40195_v37  ;;  %32671 = vmatpush3.msra.mxu0 %v37296_v57  ;;  %v40236_v37 = vld [vmem:[#allocation379_spill] sm:$0xff] }
 0x705   :  { %32706 = vmatpush3.msra.mxu1 %v40196_v60  ;;  %28518 = vadd.xlane.f32.xlu0 %v38355_v33  ;;  %v40237_v60 = vld [vmem:[#allocation353_spill] sm:$0xff] }
 0x706   :  { %32672 = vmatprep.subr.mxu0 %v37309_v53  ;;  %32707 = vmatprep.subr.mxu1 %v40197_v43  ;;  %v40238_v43 = vld [vmem:[#allocation380_spill] sm:$0xff] }
 0x707   :  { %32673 = vmatpush3.msra.mxu0 %v37320_v4  ;;  %32708 = vmatpush3.msra.mxu1 %v40198_v42  ;;  %v40239_v42 = vld [vmem:[#allocation176_spill] sm:$0xff] }
 0x708   :  { %32674 = vmatprep.subr.mxu0 %v40199_v50  ;;  %32709 = vmatprep.subr.mxu1 %v40200_v5  ;;  %v40240_v5 = vld [vmem:[#allocation137_spill] sm:$0xff] }
 0x709   :  { %32675 = vmatpush3.msra.mxu0 %v40201_v25  ;;  %32710 = vmatpush3.msra.mxu1 %v40202_v40  ;;  %v40241_v40 = vld [vmem:[#allocation268_spill] sm:$0xff] }
 0x70a   :  { %32676 = vmatprep.subr.mxu0 %v40203_v1  ;;  %32711 = vmatprep.subr.mxu1 %v40204_v63  ;;  %v40242_v63 = vld [vmem:[#allocation269_spill] sm:$0xff] }
 0x70b   :  { %32677 = vmatpush3.msra.mxu0 %v40205_v56  ;;  %32712 = vmatpush3.msra.mxu1 %v40206_v45  ;;  %v40243_v45 = vld [vmem:[#allocation271_spill] sm:$0xff] }
 0x70c   :  { %32678 = vmatprep.subr.mxu0 %v40207_v3  ;;  %32713 = vmatprep.subr.mxu1 %v40208_v26  ;;  %v40244_v26 = vld [vmem:[#allocation273_spill] sm:$0xff] }
 0x70d   :  { %32679 = vmatpush3.msra.mxu0 %v40209_v12  ;;  %32714 = vmatpush3.msra.mxu1 %v40210_v55  ;;  %v40245_v55 = vld [vmem:[#allocation275_spill] sm:$0xff] }
 0x70e   :  { %32680 = vmatprep.subr.mxu0 %v40211_v19  ;;  %32715 = vmatprep.subr.mxu1 %v40212_v62  ;;  %v40246_v62 = vld [vmem:[#allocation277_spill] sm:$0xff] }
 0x70f   :  { %32681 = vmatpush3.msra.mxu0 %v40213_v13  ;;  %32716 = vmatpush3.msra.mxu1 %v40214_v49  ;;  %v40247_v49 = vld [vmem:[#allocation279_spill] sm:$0xff] }
 0x710   :  { %32682 = vmatprep.subr.mxu0 %v40215_v30  ;;  %32717 = vmatprep.subr.mxu1 %v40216_v39  ;;  %v40248_v39 = vld [vmem:[#allocation282_spill] sm:$0xff] }
 0x711   :  { %32683 = vmatpush3.msra.mxu0 %v40217_v34  ;;  %32718 = vmatpush3.msra.mxu1 %v40218_v7  ;;  %v40249_v7 = vld [vmem:[#allocation285_spill] sm:$0xff] }
 0x712   :  { %32684 = vmatprep.subr.mxu0 %v40219_v21  ;;  %32719 = vmatprep.subr.mxu1 %v40220_v22  ;;  %v40250_v22 = vld [vmem:[#allocation288_spill] sm:$0xff] }
 0x713   :  { %32685 = vmatpush3.msra.mxu0 %v40221_v20  ;;  %32720 = vmatpush3.msra.mxu1 %v40222_v17  ;;  %v40251_v17 = vld [vmem:[#allocation292_spill] sm:$0xff] }
 0x714   :  { %32686 = vmatprep.subr.mxu0 %v40223_v15  ;;  %32721 = vmatprep.subr.mxu1 %v40224_v38  ;;  %v40253_v38 = vld [vmem:[#allocation298_spill] sm:$0xff] }
 0x715   :  { %32687 = vmatpush3.msra.mxu0 %v40225_v54  ;;  %32722 = vmatpush3.msra.mxu1 %v40226_v23  ;;  %v40255_v23 = vld [vmem:[#allocation315_spill] sm:$0xff] }
 0x716   :  { %32688 = vmatprep.subr.mxu0 %v40227_v9  ;;  %32723 = vmatprep.subr.mxu1 %v40228_v46  ;;  %v40256_v46 = vld [vmem:[#allocation318_spill] sm:$0xff] }
 0x717   :  { %32689 = vmatpush3.msra.mxu0 %v40229_v61  ;;  %32724 = vmatpush3.msra.mxu1 %v40230_v6  ;;  %v40257_v6 = vld [vmem:[#allocation321_spill] sm:$0xff] }
 0x718   :  { %32690 = vmatprep.subr.mxu0 %v40231_v41  ;;  %32725 = vmatprep.subr.mxu1 %v40232_v32  ;;  %v40259_v32 = vld [vmem:[#allocation328_spill] sm:$0xff] }
 0x719   :  { %32691 = vmatpush3.msra.mxu0 %v40233_v47  ;;  %32726 = vmatpush3.msra.mxu1 %v40234_v24  ;;  %v40261_v24 = vld [vmem:[#allocation336_spill] sm:$0xff] }
 0x71a   :  { %32692 = vmatprep.subr.mxu0 %v40235_v2  ;;  %32727 = vmatprep.subr.mxu1 %v40236_v37  ;;  %v40262_v37 = vld [vmem:[#allocation340_spill] sm:$0xff] }
 0x71b   :  { %32693 = vmatpush3.msra.mxu0 %v40237_v60  ;;  %30366 = vmatprep.mubr.f32.mxu0 %v30365_v27  ;;  %v40258_v27 = vld [vmem:[#allocation324_spill] sm:$0xff] }
 0x71c   :  { %32728 = vmatpush3.msra.mxu1 %v40238_v43  ;;  %30372 = vmatmul.mubr.f32.vlgmr.msra.gmra.mxu0 %v30371_v51  ;;  %v40260_v51 = vld [vmem:[#allocation332_spill] sm:$0xff]  ;;  %v40263_v43 = vld [vmem:[#allocation343_spill] sm:$0xff] }
 0x71d   :  { %30602 = vmatprep.mubr.f32.mxu1 %v38372_v35  ;;  %32732 = vmatprep.subr.mxu0 %v40239_v42  ;;  %v40264_v42 = vld [vmem:[#allocation346_spill] sm:$0xff] }
 0x71e   :  { %32767 = vmatprep.subr.mxu1 %v37228_v59  ;;  %30604 = vmatmul.mubr.f32.vlgmr.msra.gmra.mxu1 %v38376_v31 }
 0x71f   :  { %32733 = vmatpush3.msra.mxu0 %v40240_v5  ;;  %32768 = vmatpush3.msra.mxu1 %v37232_v8  ;;  %v40265_v5 = vld [vmem:[#allocation349_spill] sm:$0xff] }
 0x720   :  { %32734 = vmatprep.subr.mxu0 %v40241_v40  ;;  %32769 = vmatprep.subr.mxu1 %v37237_v10  ;;  %v40266_v40 = vld [vmem:[#allocation352_spill] sm:$0xff] }
 0x721   :  { %32735 = vmatpush3.msra.mxu0 %v40242_v63  ;;  %32770 = vmatpush3.msra.mxu1 %v37241_v28  ;;  %v40267_v63 = vld [vmem:[#allocation356_spill] sm:$0xff] }
 0x722   :  { %32736 = vmatprep.subr.mxu0 %v40243_v45  ;;  %32771 = vmatprep.subr.mxu1 %v37249_v0  ;;  %v40268_v45 = vld [vmem:[#allocation359_spill] sm:$0xff] }
 0x723   :  { %32737 = vmatpush3.msra.mxu0 %v40244_v26  ;;  %32772 = vmatpush3.msra.mxu1 %v37256_v52  ;;  %v40269_v26 = vld [vmem:[#allocation362_spill] sm:$0xff] }
 0x724   :  { %32738 = vmatprep.subr.mxu0 %v40245_v55  ;;  %32773 = vmatprep.subr.mxu1 %v37264_v11  ;;  %v40270_v55 = vld [vmem:[#allocation365_spill] sm:$0xff] }
 0x725   :  { %32739 = vmatpush3.msra.mxu0 %v40246_v62  ;;  %32774 = vmatpush3.msra.mxu1 %v37271_v29  ;;  %v40271_v62 = vld [vmem:[#allocation270_spill] sm:$0xff] }
 0x726   :  { %32740 = vmatprep.subr.mxu0 %v40247_v49  ;;  %32775 = vmatprep.subr.mxu1 %v37286_v58  ;;  %v40272_v49 = vld [vmem:[#allocation272_spill] sm:$0xff] }
 0x727   :  { %32741 = vmatpush3.msra.mxu0 %v40248_v39  ;;  %32776 = vmatpush3.msra.mxu1 %v37296_v57  ;;  %v40273_v39 = vld [vmem:[#allocation274_spill] sm:$0xff] }
 0x728   :  { %32742 = vmatprep.subr.mxu0 %v40249_v7  ;;  %32777 = vmatprep.subr.mxu1 %v37309_v53  ;;  %v40274_v7 = vld [vmem:[#allocation276_spill] sm:$0xff] }
 0x729   :  { %32743 = vmatpush3.msra.mxu0 %v40250_v22  ;;  %32778 = vmatpush3.msra.mxu1 %v37320_v4 }
 0x72a   :  { %32744 = vmatprep.subr.mxu0 %v40251_v17  ;;  %32779 = vmatprep.subr.mxu1 %v40199_v50 }
 0x72b   :  { %32745 = vmatpush3.msra.mxu0 %v40252_v36  ;;  %32780 = vmatpush3.msra.mxu1 %v40201_v25 }
 0x72c   :  { %32746 = vmatprep.subr.mxu0 %v40253_v38  ;;  %32781 = vmatprep.subr.mxu1 %v40203_v1 }
 0x72d   :  { %32747 = vmatpush3.msra.mxu0 %v40254_v48  ;;  %32782 = vmatpush3.msra.mxu1 %v40205_v56 }
 0x72e   :  { %32748 = vmatprep.subr.mxu0 %v40255_v23  ;;  %32783 = vmatprep.subr.mxu1 %v40207_v3 }
 0x72f   :  { %32749 = vmatpush3.msra.mxu0 %v40256_v46  ;;  %32784 = vmatpush3.msra.mxu1 %v40209_v12 }
 0x730   :  { %32750 = vmatprep.subr.mxu0 %v40257_v6  ;;  %32785 = vmatprep.subr.mxu1 %v40211_v19 }
 0x731   :  { %32751 = vmatpush3.msra.mxu0 %v40258_v27  ;;  %32786 = vmatpush3.msra.mxu1 %v40213_v13 }
 0x732   :  { %32752 = vmatprep.subr.mxu0 %v40259_v32  ;;  %32787 = vmatprep.subr.mxu1 %v40215_v30 }
 0x733   :  { %32753 = vmatpush3.msra.mxu0 %v40260_v51  ;;  %32788 = vmatpush3.msra.mxu1 %v40217_v34 }
 0x734   :  { %32754 = vmatprep.subr.mxu0 %v40261_v24  ;;  %32789 = vmatprep.subr.mxu1 %v40219_v21 }
 0x735   :  { %32755 = vmatpush3.msra.mxu0 %v40262_v37  ;;  %32790 = vmatpush3.msra.mxu1 %v40221_v20 }
 0x736   :  { %32756 = vmatprep.subr.mxu0 %v40263_v43  ;;  %32791 = vmatprep.subr.mxu1 %v40223_v15 }
 0x737   :  { %32757 = vmatpush3.msra.mxu0 %v40264_v42  ;;  %32792 = vmatpush3.msra.mxu1 %v40225_v54 }
 0x738   :  { %32758 = vmatprep.subr.mxu0 %v40265_v5  ;;  %32793 = vmatprep.subr.mxu1 %v40227_v9 }
 0x739   :  { %32759 = vmatpush3.msra.mxu0 %v40266_v40  ;;  %32794 = vmatpush3.msra.mxu1 %v40229_v61 }
 0x73a   :  { %32760 = vmatprep.subr.mxu0 %v40267_v63  ;;  %32795 = vmatprep.subr.mxu1 %v40231_v41 }
 0x73b   :  { %32761 = vmatpush3.msra.mxu0 %v40268_v45  ;;  %32796 = vmatpush3.msra.mxu1 %v40233_v47 }
 0x73c   :  { %32762 = vmatprep.subr.mxu0 %v40269_v26  ;;  %32797 = vmatprep.subr.mxu1 %v40235_v2 }
 0x73d   :  { %32763 = vmatpush3.msra.mxu0 %v40270_v55  ;;  %30739 = vmatprep.mubr.f32.mxu0 %v38385_v14  ;;  %v40275_v14 = vld [vmem:[#allocation278_spill] sm:$0xff] }
 0x73e   :  { %32798 = vmatpush3.msra.mxu1 %v40237_v60  ;;  %30742 = vmatmul.mubr.f32.vlgmr.msra.gmra.mxu0 %v38390_v18  ;;  %v40277_v18 = vld [vmem:[#allocation284_spill] sm:$0xff] }
 0x73f   :  { %30846 = vmatprep.mubr.f32.mxu1 %v30363_v16  ;;  %32802 = vmatprep.subr.mxu0 %v40271_v62  ;;  %v40297_v16 = vld [vmem:[#allocation361_spill] sm:$0xff] }
 0x740   :  { %32837 = vmatprep.subr.mxu1 %v37228_v59  ;;  %30850 = vmatmul.mubr.f32.vlgmr.msra.gmra.mxu1 %v30369_v44  ;;  %v40276_v59 = vld [vmem:[#allocation281_spill] sm:$0xff]  ;;  %v40299_v44 = vld [vmem:[#allocation367_spill] sm:$0xff] }
 0x741   :  { %32803 = vmatpush3.msra.mxu0 %v40272_v49  ;;  %32838 = vmatpush3.msra.mxu1 %v37232_v8  ;;  %v40278_v8 = vld [vmem:[#allocation287_spill] sm:$0xff] }
 0x742   :  { %32804 = vmatprep.subr.mxu0 %v40273_v39  ;;  %32839 = vmatprep.subr.mxu1 %v37237_v10  ;;  %v40279_v10 = vld [vmem:[#allocation291_spill] sm:$0xff] }
 0x743   :  { %32805 = vmatpush3.msra.mxu0 %v40274_v7  ;;  %32840 = vmatpush3.msra.mxu1 %v37241_v28  ;;  %v40280_v28 = vld [vmem:[#allocation294_spill] sm:$0xff] }
 0x744   :  { %32806 = vmatprep.subr.mxu0 %v40275_v14  ;;  %32841 = vmatprep.subr.mxu1 %v37249_v0  ;;  %v40281_v0 = vld [vmem:[#allocation297_spill] sm:$0xff] }
 0x745   :  { %32807 = vmatpush3.msra.mxu0 %v40276_v59  ;;  %32842 = vmatpush3.msra.mxu1 %v37256_v52  ;;  %v40282_v52 = vld [vmem:[#allocation300_spill] sm:$0xff] }
 0x746   :  { %32808 = vmatprep.subr.mxu0 %v40277_v18  ;;  %32843 = vmatprep.subr.mxu1 %v37264_v11  ;;  %v40283_v11 = vld [vmem:[#allocation303_spill] sm:$0xff] }
 0x747   :  { %32809 = vmatpush3.msra.mxu0 %v40278_v8  ;;  %32844 = vmatpush3.msra.mxu1 %v37271_v29  ;;  %v40284_v29 = vld [vmem:[#allocation306_spill] sm:$0xff] }
 0x748   :  { %32810 = vmatprep.subr.mxu0 %v40279_v10  ;;  %32845 = vmatprep.subr.mxu1 %v37286_v58  ;;  %v40285_v58 = vld [vmem:[#allocation309_spill] sm:$0xff] }
 0x749   :  { %32811 = vmatpush3.msra.mxu0 %v40280_v28  ;;  %32846 = vmatpush3.msra.mxu1 %v37296_v57  ;;  %v40286_v57 = vld [vmem:[#allocation312_spill] sm:$0xff] }
 0x74a   :  { %32812 = vmatprep.subr.mxu0 %v40281_v0  ;;  %32847 = vmatprep.subr.mxu1 %v37309_v53  ;;  %v40287_v53 = vld [vmem:[#allocation327_spill] sm:$0xff] }
 0x74b   :  { %32813 = vmatpush3.msra.mxu0 %v40282_v52  ;;  %32848 = vmatpush3.msra.mxu1 %v37320_v4  ;;  %v40288_v4 = vld [vmem:[#allocation331_spill] sm:$0xff] }
 0x74c   :  { %32814 = vmatprep.subr.mxu0 %v40283_v11  ;;  %32849 = vmatprep.subr.mxu1 %v40199_v50  ;;  %v40289_v50 = vld [vmem:[#allocation335_spill] sm:$0xff] }
 0x74d   :  { %32815 = vmatpush3.msra.mxu0 %v40284_v29  ;;  %32850 = vmatpush3.msra.mxu1 %v40201_v25  ;;  %v40290_v25 = vld [vmem:[#allocation339_spill] sm:$0xff] }
 0x74e   :  { %32816 = vmatprep.subr.mxu0 %v40285_v58  ;;  %32851 = vmatprep.subr.mxu1 %v40203_v1  ;;  %v40291_v1 = vld [vmem:[#allocation342_spill] sm:$0xff] }
 0x74f   :  { %32817 = vmatpush3.msra.mxu0 %v40286_v57  ;;  %32852 = vmatpush3.msra.mxu1 %v40205_v56  ;;  %v40292_v56 = vld [vmem:[#allocation345_spill] sm:$0xff] }
 0x750   :  { %32818 = vmatprep.subr.mxu0 %v40287_v53  ;;  %32853 = vmatprep.subr.mxu1 %v40207_v3  ;;  %v40293_v3 = vld [vmem:[#allocation348_spill] sm:$0xff] }
 0x751   :  { %32819 = vmatpush3.msra.mxu0 %v40288_v4  ;;  %32854 = vmatpush3.msra.mxu1 %v40209_v12  ;;  %v40294_v12 = vld [vmem:[#allocation351_spill] sm:$0xff] }
 0x752   :  { %32820 = vmatprep.subr.mxu0 %v40289_v50  ;;  %32855 = vmatprep.subr.mxu1 %v40211_v19  ;;  %v40295_v19 = vld [vmem:[#allocation355_spill] sm:$0xff] }
 0x753   :  { %32821 = vmatpush3.msra.mxu0 %v40290_v25  ;;  %32856 = vmatpush3.msra.mxu1 %v40213_v13  ;;  %v40296_v13 = vld [vmem:[#allocation358_spill] sm:$0xff] }
 0x754   :  { %32822 = vmatprep.subr.mxu0 %v40291_v1  ;;  %32857 = vmatprep.subr.mxu1 %v40215_v30  ;;  %v40298_v30 = vld [vmem:[#allocation364_spill] sm:$0xff] }
 0x755   :  { %32823 = vmatpush3.msra.mxu0 %v40292_v56  ;;  %32858 = vmatpush3.msra.mxu1 %v40217_v34  ;;  %v40300_v34 = vld [vmem:[#allocation369_spill] sm:$0xff] }
 0x756   :  { %32824 = vmatprep.subr.mxu0 %v40293_v3  ;;  %32859 = vmatprep.subr.mxu1 %v40219_v21  ;;  %v40301_v21 = vld [vmem:[#allocation370_spill] sm:$0xff]  ;;  %v31127_v3 = vld [vmem:[%s38612_s5] sm:$0xff]  ;;  %s32993_s5 = smov [#allocation5]  }
 0x757   :  { %32825 = vmatpush3.msra.mxu0 %v40294_v12  ;;  %32860 = vmatpush3.msra.mxu1 %v40221_v20  ;;  %v40302_v20 = vld [vmem:[#allocation372_spill] sm:$0xff]  ;;  %s31587_s15 = sshll.u32 %s32993_s5, 4  ;;  %s31588_s15 = int_to_ptr.vmem [resolvable:$true] %s31587_s15 }
 0x758   :  { %32826 = vmatprep.subr.mxu0 %v40295_v19  ;;  %32861 = vmatprep.subr.mxu1 %v40223_v15  ;;  %v40303_v15 = vmov 0.0   ;;  %s32956_s3 = scalar_lea.vmem %s31588_s15, 128  ;;  %p32961_p6 = scmp.lt.s32.totalorder %s31588_s15, %s31588_s15 }
 0x759   :  { %32827 = vmatpush3.msra.mxu0 %v40296_v13  ;;  %32862 = vmatpush3.msra.mxu1 %v40225_v54  ;;  %p32957_p5 = scmp.ne.s32.totalorder %s31588_s15, %s32956_s3  ;;  %p32962_p7 = scmp.lt.s32.totalorder %s32956_s3, %s32956_s3 }
 0x75a   :  { %32828 = vmatprep.subr.mxu0 %v40297_v16  ;;  %32863 = vmatprep.subr.mxu1 %v40227_v9  ;;  %v31129_v16 = vsel %vm96_vm0, %v31127_v3, 0 }
 0x75b   :  { %32829 = vmatpush3.msra.mxu0 %v40298_v30  ;;  %32864 = vmatpush3.msra.mxu1 %v40229_v61  ;;  %p32963_p8 = por %p32962_p7, %p32961_p6 }
 0x75c   :  { %32830 = vmatprep.subr.mxu0 %v40299_v44  ;;  %32865 = vmatprep.subr.mxu1 %v40231_v41 }
 0x75d   :  { %32831 = vmatpush3.msra.mxu0 %v40300_v34  ;;  %32866 = vmatpush3.msra.mxu1 %v40233_v47  ;;  %p32964_p9 = pnand %p32963_p8, %p32957_p5 }
 0x75e   :  { %32832 = vmatprep.subr.mxu0 %v40301_v21  ;;  %32867 = vmatprep.subr.mxu1 %v40235_v2 }
 0x75f   :  { %32833 = vmatpush3.msra.mxu0 %v40302_v20  ;;  %31016 = vmatprep.mubr.f32.mxu0 %v38372_v35 }
 0x760   :  { %32868 = vmatpush3.msra.mxu1 %v40237_v60  ;;  %31120 = vmatprep.mubr.f32.mxu1 %v38372_v35  ;;  %v32274_v35 = vpop.f32.mrf.mxu0 }
 0x761   :  { %31018 = vmatmul.mubr.f32.vlgmr.msra.gmra.mxu0 %v38376_v31  ;;  %31122 = vmatmul.mubr.f32.vlgmr.msra.gmra.mxu1 %v38376_v31  ;;  %v32309_v31 = vpop.f32.mrf.mxu1 }
 0x762   :  { %32884 = vmatprep.subr.mxu0 %v40303_v15  ;;  %32889 = vmatprep.subr.mxu1 %v40303_v15  ;;  %v32275_v47 = vpop.f32.mrf.mxu0 }
 0x763   :  { %32886 = vmatprep.mubr.msk.f32.mxu0 %vm32992_vm11, %v40303_v15  ;;  %32891 = vmatprep.mubr.msk.f32.mxu1 %vm32992_vm11, %v40303_v15  ;;  %v32310_v60 = vpop.f32.mrf.mxu1 }
 0x764   :  { %v32344_v2 = vpop.f32.mrf.mxu0  ;;  %v32311_v36 = vadd.f32 %v32310_v60, %v32309_v31 }
 0x765   :  { %v32379_v22 = vpop.f32.mrf.mxu1 }
 0x766   :  { %v32345_v17 = vpop.f32.mrf.mxu0 }
 0x767   :  { %v32346_v48 = vadd.f32 %v32345_v17, %v32344_v2  ;;  %v32380_v23 = vpop.f32.mrf.mxu1 }
 0x768   :  { %v32414_v38 = vpop.f32.mrf.mxu0  ;;  %v32381_v51 = vadd.f32 %v32380_v23, %v32379_v22 }
 0x769   :  { %v32449_v6 = vpop.f32.mrf.mxu1 }
 0x76a   :  { %v32415_v27 = vpop.f32.mrf.mxu0 }
 0x76b   :  { %v32416_v37 = vadd.f32 %v32415_v27, %v32414_v38  ;;  %v32450_v43 = vpop.f32.mrf.mxu1 }
 0x76c   :  { %v32451_v45 = vadd.f32 %v32450_v43, %v32449_v6 }
 0x776   :  { %v32484_v24 = vpop.f32.mrf.mxu0 }
 0x778   :  { %v32519_v5 = vpop.f32.mrf.mxu1  ;;  %v32485_v40 = vpop.f32.mrf.mxu0 }
 0x779   :  { %v32486_v55 = vadd.f32 %v32485_v40, %v32484_v24 }
 0x77a   :  { %v32520_v62 = vpop.f32.mrf.mxu1 }
 0x77b   :  { %v32521_v59 = vadd.f32 %v32520_v62, %v32519_v5 }
 0x78e   :  { %v28519_v54 = vpop.xlane.xlu0 %28518 }
 0x78f   :  { %v38572_v9 = vmul.f32 0.0078125, %v28519_v54  ;;  %v31200_v54 = vand.u32 4294901760, %v31129_v16 }
 0x791   :  { %v38576_v61 = vsub.f32 %v38355_v33, %v38572_v9  ;;  %v32276_v33 = vadd.f32 %v32275_v47, %v32274_v35  ;;  %v31201_v47 = vsub.f32 %v31129_v16, %v31200_v54 }
 0x793   :  { %v28522_v41 = vmul.f32 %v38576_v61, %v38576_v61  ;;  %v28882_v46 = vadd.f32 %v32311_v36, %v32276_v33  ;;  %v31202_v33 = vand.u32 4294901760, %v31201_v47 }
 0x795   :  { %28523 = vadd.xlane.f32.xlu1 %v28522_v41  ;;  %v29020_v32 = vadd.f32 %v32346_v48, %v28882_v46  ;;  %v31203_v27 = vsub.f32 %v31201_v47, %v31202_v33 }
 0x797   :  { %v29128_v42 = vadd.f32 %v32381_v51, %v29020_v32  ;;  %v31204_v24 = vand.u32 4294901760, %v31203_v27 }
 0x798   :  { %v32554_v26 = vpop.f32.mrf.mxu0 }
 0x799   :  { %v29296_v63 = vadd.f32 %v32416_v37, %v29128_v42 }
 0x79a   :  { %v32589_v39 = vpop.f32.mrf.mxu1  ;;  %v32555_v7 = vpop.f32.mrf.mxu0 }
 0x79b   :  { %v29400_v49 = vadd.f32 %v32451_v45, %v29296_v63  ;;  %v32556_v8 = vadd.f32 %v32555_v7, %v32554_v26  ;;  %v28525_v63 = vmul.f32 0.0, %v38572_v9 }
 0x79c   :  { %v32590_v10 = vpop.f32.mrf.mxu1 }
 0x79d   :  { %v29512_v14 = vadd.f32 %v32486_v55, %v29400_v49  ;;  %v32591_v29 = vadd.f32 %v32590_v10, %v32589_v39  ;;  %v28526_v26 = vmul.f32 %v28525_v63, %v38572_v9 }
 0x79f   :  { %v29744_v28 = vadd.f32 %v32521_v59, %v29512_v14 }
 0x7a1   :  { %v29882_v11 = vadd.f32 %v32556_v8, %v29744_v28 }
 0x7a3   :  { %v29990_v4 = vadd.f32 %v32591_v29, %v29882_v11 }
 0x7ba   :  { %v32624_v18 = vpop.f32.mrf.mxu0 }
 0x7bc   :  { %v32659_v0 = vpop.f32.mrf.mxu1  ;;  %v32625_v52 = vpop.f32.mrf.mxu0 }
 0x7bd   :  { %v32626_v57 = vadd.f32 %v32625_v52, %v32624_v18 }
 0x7be   :  { %v32660_v53 = vpop.f32.mrf.mxu1 }
 0x7bf   :  { %v30158_v1 = vadd.f32 %v32626_v57, %v29990_v4  ;;  %v32661_v56 = vadd.f32 %v32660_v53, %v32659_v0 }
 0x7c1   :  { %v30262_v30 = vadd.f32 %v32661_v56, %v30158_v1 }
 0x7dc   :  { %v32694_v58 = vpop.f32.mrf.mxu0 }
 0x7de   :  { %v32729_v50 = vpop.f32.mrf.mxu1  ;;  %v32695_v25 = vpop.f32.mrf.mxu0 }
 0x7df   :  { %v32696_v19 = vadd.f32 %v32695_v25, %v32694_v58 }
 0x7e0   :  { %v32730_v13 = vpop.f32.mrf.mxu1 }
 0x7e1   :  { %v30374_v21 = vadd.f32 %v32696_v19, %v30262_v30  ;;  %v32731_v20 = vadd.f32 %v32730_v13, %v32729_v50 }
 0x7e3   :  { %v30606_v31 = vadd.f32 %v32731_v20, %v30374_v21 }
 0x7fe   :  { %v32764_v12 = vpop.f32.mrf.mxu0 }
 0x800   :  { %v32799_v44 = vpop.f32.mrf.mxu1  ;;  %v32765_v34 = vpop.f32.mrf.mxu0 }
 0x801   :  { %v32766_v41 = vadd.f32 %v32765_v34, %v32764_v12 }
 0x802   :  { %v32800_v35 = vpop.f32.mrf.mxu1 }
 0x803   :  { %v30744_v2 = vadd.f32 %v32766_v41, %v30606_v31  ;;  %v32801_v60 = vadd.f32 %v32800_v35, %v32799_v44 }
 0x805   :  { %v30852_v48 = vadd.f32 %v32801_v60, %v30744_v2 }
 0x81e   :  { %v28524_v45 = vpop.xlane.xlu1 %28523 }
 0x81f   :  { %v28527_v55 = vsub.f32 %v28524_v45, %v28526_v26 }
 0x821   :  { %v32834_v22 = vpop.f32.mrf.mxu0  ;;  %v32869_v17 = vpop.f32.mrf.mxu1  ;;  %v28528_v62 = vmul.f32 0.0078125, %v28527_v55 }
 0x823   :  { %v32835_v36 = vpop.f32.mrf.mxu0  ;;  %v32870_v38 = vpop.f32.mrf.mxu1  ;;  %v28529_v49 = vadd.f32 1e-05, %v28528_v62 }
 0x824   :  { %v32836_v23 = vadd.f32 %v32835_v36, %v32834_v22  ;;  %v32871_v6 = vadd.f32 %v32870_v38, %v32869_v17 }
 0x825   :  { %32931 = vrsqrt.f32 %v28529_v49 }
 0x826   :  { %v31020_v46 = vadd.f32 %v32836_v23, %v30852_v48 }
 0x828   :  { %v31124_v32 = vadd.f32 %v32871_v6, %v31020_v46 }
 0x82a   :  { %v31132_v51 = vsel %vm100_vm2, %v31124_v32, 0 }
 0x82b   :  { %v31165_v37 = vand.u32 4294901760, %v31132_v51 }
 0x82d   :  { %v31242_v43 = vsub.f32 %v31132_v51, %v31165_v37  ;;  %32885 = vmatpush3.msra.mxu0 %v31165_v37 }
 0x82e   :  { %32887 = vmatmul.mubr.f32.vlgmr.msra.gmra.mxu0 %v31204_v24  ;;  %32894 = vmatprep.subr.mxu0 %v40303_v15 }
 0x82f   :  { %32895 = vmatpush3.msra.mxu0 %v31242_v43  ;;  %32896 = vmatprep.mubr.msk.f32.mxu0 %vm32992_vm11, %v40303_v15  ;;  %v31243_v42 = vand.u32 4294901760, %v31242_v43 }
 0x830   :  { %32904 = vmatprep.subr.mxu0 %v40303_v15 }
 0x831   :  { %v31244_v5 = vsub.f32 %v31242_v43, %v31243_v42 }
 0x832   :  { %32897 = vmatmul.mubr.f32.vlgmr.msra.gmra.mxu0 %v31201_v47  ;;  %v32932_v7 = vpop.eup %32931 }
 0x833   :  { %32905 = vmatpush3.msra.mxu0 %v31243_v42  ;;  %v31245_v40 = vand.u32 4294901760, %v31244_v5  ;;  %32906 = vmatprep.mubr.msk.f32.mxu0 %vm32992_vm11, %v40303_v15  ;;  %v28531_v18 = vmul.f32 %v32932_v7, %v38576_v61 }
 0x835   :  { %32890 = vmatpush3.msra.mxu1 %v31245_v40 }
 0x836   :  { %32892 = vmatmul.mubr.f32.vlgmr.msra.gmra.mxu1 %v31200_v54  ;;  %32899 = vmatprep.subr.mxu1 %v40303_v15 }
 0x837   :  { %32900 = vmatpush3.msra.mxu1 %v31165_v37  ;;  %32901 = vmatprep.mubr.msk.f32.mxu1 %vm32992_vm11, %v40303_v15 }
 0x838   :  { %32909 = vmatprep.subr.mxu1 %v40303_v15  ;;  %32907 = vmatmul.mubr.f32.vlgmr.msra.gmra.mxu0 %v31200_v54 }
 0x83a   :  { %32902 = vmatmul.mubr.f32.vlgmr.msra.gmra.mxu1 %v31202_v33 }
 0x83b   :  { %32910 = vmatpush3.msra.mxu1 %v31165_v37  ;;  %32911 = vmatprep.mubr.msk.f32.mxu1 %vm32992_vm11, %v40303_v15 }
 0x83e   :  { %32912 = vmatmul.mubr.f32.vlgmr.msra.gmra.mxu1 %v31200_v54 }
 0x8ee   :  { %v31206_v39 = vpop.f32.mrf.mxu0 }
 0x8ef   :  { %v31207_v10 = vadd.f32 %v31206_v39, %v28531_v18 }
 0x8f0   :  { %v32888_v14 = vpop.f32.mrf.mxu0 }
 0x8f2   :  { %v31356_v59 = vpop.f32.mrf.mxu0 }
 0x8f4   :  { %v32898_v8 = vpop.f32.mrf.mxu0 }
 0x8f6   :  { %v31282_v28 = vpop.f32.mrf.mxu1 }
 0x8f7   :  { %v31283_v15 = vadd.f32 %v31282_v28, %v31207_v10 }
 0x8f8   :  { %v32893_v0 = vpop.f32.mrf.mxu1  ;;  %v31504_v52 = vpop.f32.mrf.mxu0 }
 0x8f9   :  { %v31357_v11 = vadd.f32 %v31356_v59, %v31283_v15 }
 0x8fa   :  { %v31430_v29 = vpop.f32.mrf.mxu1  ;;  %v32908_v58 = vpop.f32.mrf.mxu0 }
 0x8fb   :  { %v31431_v9 = vadd.f32 %v31430_v29, %v31357_v11 }
 0x8fc   :  { %v32903_v57 = vpop.f32.mrf.mxu1 }
 0x8fd   :  { %v31505_v53 = vadd.f32 %v31504_v52, %v31431_v9 }
 0x8fe   :  { %v31576_v4 = vpop.f32.mrf.mxu1 }
 0x8ff   :  { %v31577_v50 = vadd.f32 %v31576_v4, %v31505_v53 }
 0x900   :  { %v32913_v25 = vpop.f32.mrf.mxu1 }
 0x901   :  { %31580 = vst [vmem:[#allocation5] sm:$0xff] %v31577_v50 }
 0x902   :  { %32967 = shalt.err (!%p32964_p9)
}
 0x903   :  { %31590 = dma.vmem_to_hbm [thread:$0]  %s31588_s15, 128, %s38613_s6, [#allocation4]  }
 0x904   :  { %32978 = dma.done.wait [#allocation4], 128  }
 0x905   :  { %32979 = vsyncadd [#allocation4], 4294967168 }
 0x906   :  { %31594 = vsyncpa [#allocation3], 1 }
 0x907   :  { %31595 = vsyncpa [#allocation4], 1 }

</bundles_post_ra>
